<compile_context>
chip_gen: v6e
topology: v6e:2x2x1
jax: 0.10.0
libtpu: 0.0.40
codegen_flags: <defaults>
</compile_context>

<pallas_src>
import numpy as np
import jax
import jax.numpy as jnp
from jax import lax
from jax.experimental import pallas as pl
from jax.experimental.pallas import tpu as pltpu

# Scaled VGG16 "features" configuration (original /8 channels, 'M' = maxpool2x2).
CFG = [8, 8, "M", 16, 16, "M", 32, 32, 32, "M", 64, 64, 64, "M", 64, 64, 64, "M"]
FC_DIMS = [64, 64, 32, 10]          # scaled from 25088 -> 512 -> 256 -> 10
IMG = 32                            # input spatial size
IN_CH = 3
ROW_PAD = 40                        # per-image rows of the packed input slab (8-aligned >= IMG+2)
OUT_PAD = 8                         # per-image rows of the packed output slab (8-aligned)


def _stages():
    """[(hw, [cin, cout1, cout2, ...]), ...] per conv-conv[-conv]-pool stage."""
    stages, hw, cin, cur = [], IMG, IN_CH, []
    for c in CFG:
        if c == "M":
            stages.append((hw, [cin] + cur))
            cin, cur, hw = cur[-1], [], hw // 2
        else:
            cur.append(c)
    return stages


STAGES = _stages()
assert ROW_PAD % 8 == 0 and ROW_PAD >= IMG + 2
assert STAGES[-1][0] == 2 and STAGES[-1][1][-1] == FC_DIMS[0]  # 1x1x64 features -> flatten is trivial


# ----------------------------------------------------------------------------
# Host-side constant construction (runs once, outside jit)
# ----------------------------------------------------------------------------
def _toeplitz_weight(k, hw):
    """(3,3,cin,cout) conv kernel -> (3, hw*cin, hw*cout) banded matrices.

    The horizontal (kx) taps and the horizontal zero padding are folded into the
    matrix; the vertical tap index (ky) stays explicit as the leading axis, so a
    "same" 3x3 conv becomes 3 matmuls on row-shifted views of the activation.
    """
    k = np.asarray(k, np.float32)
    cin, cout = k.shape[2], k.shape[3]
    wt = np.zeros((3, hw * cin, hw * cout), np.float32)
    for ky in range(3):
        for wo in range(hw):
            for kx in range(3):
                wi = wo + kx - 1
                if 0 <= wi < hw:
                    wt[ky, wi * cin:(wi + 1) * cin, wo * cout:(wo + 1) * cout] = k[ky, kx]
    return wt


def _row_pad_matrix(hw):
    """(hw+2, hw) 0/1 matrix: re-inserts the zero rows (vertical padding) around
    a conv output via a tiny MXU matmul (avoids unaligned sublane stores)."""
    m = np.zeros((hw + 2, hw), np.float32)
    for i in range(hw):
        m[i + 1, i] = 1.0
    return m


def _col_select(hw, ch):
    """((hw-1)*ch, (hw//2)*ch) 0/1 matrix: picks the even (w, w+1) pair maxes,
    i.e. the horizontal half of the 2x2 pool."""
    sel = np.zeros(((hw - 1) * ch, (hw // 2) * ch), np.float32)
    for wo in range(hw // 2):
        sel[2 * wo * ch:(2 * wo + 1) * ch, wo * ch:(wo + 1) * ch] = np.eye(ch, dtype=np.float32)
    return sel


def _row_select(hw, last):
    """Row selection for the vertical half of the 2x2 pool.  For inner stages it
    also rebuilds the zero-padded row structure expected by the next stage; for
    the last stage it emits the flattened (1, C) feature row directly."""
    hp = hw + 2
    rows = (hw // 2) if last else (hw // 2 + 2)
    sel = np.zeros((rows, hp - 1), np.float32)
    for ho in range(hw // 2):
        sel[(ho if last else ho + 1), 2 * ho + 1] = 1.0
    return sel


def init_params(key):
    """Deterministic synthetic weights (standard small conv / fc form)."""
    params = {"convs": [], "fcs": []}
    cin = IN_CH
    for c in CFG:
        if c == "M":
            continue
        key, kw, kb = jax.random.split(key, 3)
        w = jax.random.normal(kw, (3, 3, cin, c), jnp.float32) * (2.0 / (9 * cin)) ** 0.5
        b = jax.random.normal(kb, (c,), jnp.float32) * 0.01
        params["convs"].append((w, b))
        cin = c
    for i in range(3):
        key, kw, kb = jax.random.split(key, 3)
        w = jax.random.normal(kw, (FC_DIMS[i], FC_DIMS[i + 1]), jnp.float32) * (2.0 / FC_DIMS[i]) ** 0.5
        b = jax.random.normal(kb, (1, FC_DIMS[i + 1]), jnp.float32) * 0.01
        params["fcs"].append((w, b))
    return params


def pack_params(params):
    """Flatten params into the kernel operand list (order must match the kernel)."""
    packed = []
    ci = 0
    for si, (hw, chans) in enumerate(STAGES):
        packed.append(jnp.asarray(_row_pad_matrix(hw)))                         # f32
        for li in range(len(chans) - 1):
            w, b = params["convs"][ci]
            ci += 1
            packed.append(jnp.asarray(_toeplitz_weight(w, hw), jnp.bfloat16))   # bf16 conv weight
            packed.append(jnp.asarray(np.tile(np.asarray(b, np.float32), hw)[None, :]))  # (1, hw*cout) f32
        packed.append(jnp.asarray(_col_select(hw, chans[-1])))                  # f32
        packed.append(jnp.asarray(_row_select(hw, si == len(STAGES) - 1)))      # f32
    for w, b in params["fcs"]:
        packed.append(jnp.asarray(w, jnp.float32))
        packed.append(jnp.asarray(b, jnp.float32))
    return tuple(packed)


# ----------------------------------------------------------------------------
# The single fused kernel: full scaled-VGG16 forward for ONE image per grid step
# ----------------------------------------------------------------------------
def _vgg16_kernel(*refs):
    out_ref = refs[-1]
    ins = refs[:-1]
    a_ref = ins[0]
    cur = 1

    hw0 = STAGES[0][0]
    # Padded per-image slab: row 0 / row hw0+1 are zero (vertical conv padding),
    # rows 1..hw0 hold the image, trailing alignment rows are dropped here.
    A = a_ref[...][: hw0 + 2, :]                       # (hw0+2, hw0*IN_CH) f32

    for (hw, chans) in STAGES:
        hp = hw + 2
        rpad = ins[cur][...]                           # (hp, hw) f32
        cur += 1
        # --- 3x3 "same" convs, fused bias + ReLU -----------------------------
        for li in range(len(chans) - 1):
            cout = chans[li + 1]
            wt_ref = ins[cur]                          # (3, hw*cin, hw*cout) bf16
            b_ref = ins[cur + 1]                       # (1, hw*cout) f32
            cur += 2
            acc = None
            for t in range(3):                         # vertical taps; horizontal taps folded into wt
                lhs = A[t:t + hw, :].astype(jnp.bfloat16)
                part = jnp.dot(lhs, wt_ref[t], preferred_element_type=jnp.float32)
                acc = part if acc is None else acc + part
            z = jnp.maximum(acc + b_ref[...], 0.0)     # (hw, hw*cout) f32
            A = jnp.dot(rpad, z, preferred_element_type=jnp.float32)   # re-insert zero padding rows
        # --- fused 2x2 / stride-2 max pool ------------------------------------
        csel_ref = ins[cur]                            # ((hw-1)*C, (hw//2)*C)
        rsel_ref = ins[cur + 1]
        cur += 2
        C = chans[-1]
        Bc = jnp.maximum(A[:, :(hw - 1) * C], A[:, C:])               # horizontal pair max
        Bh = jnp.dot(Bc, csel_ref[...], preferred_element_type=jnp.float32)   # pick even pairs
        Bv = jnp.maximum(Bh[:hp - 1, :], Bh[1:, :])                   # vertical pair max
        A = jnp.dot(rsel_ref[...], Bv, preferred_element_type=jnp.float32)    # row select (+ re-pad)

    # --- classifier: Flatten -> Linear/ReLU/Dropout x2 -> Linear -> Softmax ---
    x = A                                              # (1, 64) f32 (1x1 spatial -> flatten is identity)
    w1, b1, w2, b2, w3, b3 = tuple(ins[cur + i][...] for i in range(6))
    h = jnp.maximum(jnp.dot(x, w1, preferred_element_type=jnp.float32) + b1, 0.0)
    # TODO(synk): torch.nn.Dropout(0.5) is identity here (eval semantics); the
    # torch training-mode RNG mask is not reproducible in Pallas.
    h = jnp.maximum(jnp.dot(h, w2, preferred_element_type=jnp.float32) + b2, 0.0)
    logits = jnp.dot(h, w3, preferred_element_type=jnp.float32) + b3
    m = jnp.max(logits, axis=1, keepdims=True)
    e = jnp.exp(logits - m)
    denom = jnp.sum(e, axis=1, keepdims=True)
    probs = e * pl.reciprocal(denom, approx=True)      # (1, 10)
    out_ref[...] = jnp.broadcast_to(probs, (OUT_PAD, FC_DIMS[-1]))


def _const_spec(a):
    zeros = (0,) * a.ndim
    return pl.BlockSpec(a.shape, lambda i: zeros)


def my_vgg16_forward(x_nchw, packed):
    """MyVgg16.forward equivalent. x_nchw: (N, 3, 32, 32)."""
    n = x_nchw.shape[0]
    hw0 = STAGES[0][0]
    # NCHW -> per-image lane-dense (rows=H, cols=W*C) slabs with one zero row of
    # vertical padding on top and (ROW_PAD - H - 1) below (8-aligned blocks).
    xr = jnp.transpose(x_nchw.astype(jnp.float32), (0, 2, 3, 1)).reshape(n, hw0, hw0 * IN_CH)
    xr = jnp.pad(xr, ((0, 0), (1, ROW_PAD - hw0 - 1), (0, 0)))
    a0 = xr.reshape(n * ROW_PAD, hw0 * IN_CH)

    in_specs = [pl.BlockSpec((ROW_PAD, hw0 * IN_CH), lambda i: (i, 0))]
    in_specs += [_const_spec(a) for a in packed]

    out = pl.pallas_call(
        _vgg16_kernel,
        out_shape=jax.ShapeDtypeStruct((n * OUT_PAD, FC_DIMS[-1]), jnp.float32),
        grid=(n,),
        in_specs=in_specs,
        out_specs=pl.BlockSpec((OUT_PAD, FC_DIMS[-1]), lambda i: (i, 0)),
        compiler_params=pltpu.CompilerParams(
            dimension_semantics=("parallel",),
            vmem_limit_bytes=40 * 1024 * 1024,
        ),
    )(a0, *packed)
    return out.reshape(n, OUT_PAD, FC_DIMS[-1])[:, 0, :]


# ----------------------------------------------------------------------------
# Pure-JAX reference (same bf16 weight / conv-LHS rounding as the kernel)
# ----------------------------------------------------------------------------
def reference_forward(x_nchw, params):
    x = jnp.transpose(x_nchw.astype(jnp.float32), (0, 2, 3, 1))  # NHWC
    ci = 0
    for c in CFG:
        if c == "M":
            nb, hh, ww, ch = x.shape
            x = jnp.max(x.reshape(nb, hh // 2, 2, ww // 2, 2, ch), axis=(2, 4))
        else:
            wk, b = params["convs"][ci]
            ci += 1
            y = lax.conv_general_dilated(
                x.astype(jnp.bfloat16), wk.astype(jnp.bfloat16),
                window_strides=(1, 1), padding="SAME",
                dimension_numbers=("NHWC", "HWIO", "NHWC"),
                preferred_element_type=jnp.float32)
            x = jnp.maximum(y + b.reshape(1, 1, 1, -1), 0.0)
    nb = x.shape[0]
    feats = jnp.transpose(x, (0, 3, 1, 2)).reshape(nb, -1)       # NCHW flatten (1x1 spatial)
    (w1, b1), (w2, b2), (wf3, b3) = params["fcs"]
    h = jnp.maximum(feats @ w1 + b1, 0.0)
    h = jnp.maximum(h @ w2 + b2, 0.0)
    logits = h @ wf3 + b3
    return jax.nn.softmax(logits, axis=1)


if __name__ == "__main__":
    key = jax.random.PRNGKey(0)
    kx, kp = jax.random.split(key)
    x = jax.random.normal(kx, (2, IN_CH, IMG, IMG), jnp.float32)   # NCHW, small shapes
    params = init_params(kp)
    packed = pack_params(params)

    fwd = jax.jit(my_vgg16_forward)
    out = jax.block_until_ready(fwd(x, packed))

    assert out.shape == (2, FC_DIMS[-1]), out.shape
    assert out.dtype == jnp.float32
    # Softmax rows sum to ~1 (approx reciprocal used in-kernel).
    assert bool(jnp.allclose(jnp.sum(out, axis=1), 1.0, atol=5e-3)), jnp.sum(out, axis=1)
    # Cross-check against a pure-JAX reference with matching precision choices.
    ref = reference_forward(x, params)
    assert bool(jnp.allclose(out, ref, atol=5e-3)), float(jnp.max(jnp.abs(out - ref)))
    print("KERNEL_OK")
</pallas_src>

<mosaic_0001>
module attributes {stable_mosaic.version = 11 : i64} {
  func.func @_vgg16_kernel(%arg0: i32, %arg1: memref<40x96xf32, #tpu.memory_space<vmem>>, %arg2: memref<34x32xf32, #tpu.memory_space<vmem>>, %arg3: memref<3x96x256xbf16, #tpu.memory_space<vmem>>, %arg4: memref<1x256xf32, #tpu.memory_space<vmem>>, %arg5: memref<3x256x256xbf16, #tpu.memory_space<vmem>>, %arg6: memref<1x256xf32, #tpu.memory_space<vmem>>, %arg7: memref<248x128xf32, #tpu.memory_space<vmem>>, %arg8: memref<18x33xf32, #tpu.memory_space<vmem>>, %arg9: memref<18x16xf32, #tpu.memory_space<vmem>>, %arg10: memref<3x128x256xbf16, #tpu.memory_space<vmem>>, %arg11: memref<1x256xf32, #tpu.memory_space<vmem>>, %arg12: memref<3x256x256xbf16, #tpu.memory_space<vmem>>, %arg13: memref<1x256xf32, #tpu.memory_space<vmem>>, %arg14: memref<240x128xf32, #tpu.memory_space<vmem>>, %arg15: memref<10x17xf32, #tpu.memory_space<vmem>>, %arg16: memref<10x8xf32, #tpu.memory_space<vmem>>, %arg17: memref<3x128x256xbf16, #tpu.memory_space<vmem>>, %arg18: memref<1x256xf32, #tpu.memory_space<vmem>>, %arg19: memref<3x256x256xbf16, #tpu.memory_space<vmem>>, %arg20: memref<1x256xf32, #tpu.memory_space<vmem>>, %arg21: memref<3x256x256xbf16, #tpu.memory_space<vmem>>, %arg22: memref<1x256xf32, #tpu.memory_space<vmem>>, %arg23: memref<224x128xf32, #tpu.memory_space<vmem>>, %arg24: memref<6x9xf32, #tpu.memory_space<vmem>>, %arg25: memref<6x4xf32, #tpu.memory_space<vmem>>, %arg26: memref<3x128x256xbf16, #tpu.memory_space<vmem>>, %arg27: memref<1x256xf32, #tpu.memory_space<vmem>>, %arg28: memref<3x256x256xbf16, #tpu.memory_space<vmem>>, %arg29: memref<1x256xf32, #tpu.memory_space<vmem>>, %arg30: memref<3x256x256xbf16, #tpu.memory_space<vmem>>, %arg31: memref<1x256xf32, #tpu.memory_space<vmem>>, %arg32: memref<192x128xf32, #tpu.memory_space<vmem>>, %arg33: memref<4x5xf32, #tpu.memory_space<vmem>>, %arg34: memref<4x2xf32, #tpu.memory_space<vmem>>, %arg35: memref<3x128x128xbf16, #tpu.memory_space<vmem>>, %arg36: memref<1x128xf32, #tpu.memory_space<vmem>>, %arg37: memref<3x128x128xbf16, #tpu.memory_space<vmem>>, %arg38: memref<1x128xf32, #tpu.memory_space<vmem>>, %arg39: memref<3x128x128xbf16, #tpu.memory_space<vmem>>, %arg40: memref<1x128xf32, #tpu.memory_space<vmem>>, %arg41: memref<64x64xf32, #tpu.memory_space<vmem>>, %arg42: memref<1x3xf32, #tpu.memory_space<vmem>>, %arg43: memref<64x64xf32, #tpu.memory_space<vmem>>, %arg44: memref<1x64xf32, #tpu.memory_space<vmem>>, %arg45: memref<64x32xf32, #tpu.memory_space<vmem>>, %arg46: memref<1x32xf32, #tpu.memory_space<vmem>>, %arg47: memref<32x10xf32, #tpu.memory_space<vmem>>, %arg48: memref<1x10xf32, #tpu.memory_space<vmem>>, %arg49: memref<8x10xf32, #tpu.memory_space<vmem>>) attributes {dimension_semantics = [#tpu.dimension_semantics<parallel>], iteration_bounds = array<i64: 2>, scalar_prefetch = 0 : i64, scratch_operands = 0 : i64, tpu.core_type = #tpu.core_type<tc>, window_params = [{transform_indices = @transform_0, window_bounds = array<i64: 40, 96>}, {pipeline_mode = #tpu.pipeline_mode<synchronous>, transform_indices = @transform_1, window_bounds = array<i64: 34, 32>}, {pipeline_mode = #tpu.pipeline_mode<synchronous>, transform_indices = @transform_2, window_bounds = array<i64: 3, 96, 256>}, {pipeline_mode = #tpu.pipeline_mode<synchronous>, transform_indices = @transform_3, window_bounds = array<i64: 1, 256>}, {pipeline_mode = #tpu.pipeline_mode<synchronous>, transform_indices = @transform_4, window_bounds = array<i64: 3, 256, 256>}, {pipeline_mode = #tpu.pipeline_mode<synchronous>, transform_indices = @transform_5, window_bounds = array<i64: 1, 256>}, {pipeline_mode = #tpu.pipeline_mode<synchronous>, transform_indices = @transform_6, window_bounds = array<i64: 248, 128>}, {pipeline_mode = #tpu.pipeline_mode<synchronous>, transform_indices = @transform_7, window_bounds = array<i64: 18, 33>}, {pipeline_mode = #tpu.pipeline_mode<synchronous>, transform_indices = @transform_8, window_bounds = array<i64: 18, 16>}, {pipeline_mode = #tpu.pipeline_mode<synchronous>, transform_indices = @transform_9, window_bounds = array<i64: 3, 128, 256>}, {pipeline_mode = #tpu.pipeline_mode<synchronous>, transform_indices = @transform_10, window_bounds = array<i64: 1, 256>}, {pipeline_mode = #tpu.pipeline_mode<synchronous>, transform_indices = @transform_11, window_bounds = array<i64: 3, 256, 256>}, {pipeline_mode = #tpu.pipeline_mode<synchronous>, transform_indices = @transform_12, window_bounds = array<i64: 1, 256>}, {pipeline_mode = #tpu.pipeline_mode<synchronous>, transform_indices = @transform_13, window_bounds = array<i64: 240, 128>}, {pipeline_mode = #tpu.pipeline_mode<synchronous>, transform_indices = @transform_14, window_bounds = array<i64: 10, 17>}, {pipeline_mode = #tpu.pipeline_mode<synchronous>, transform_indices = @transform_15, window_bounds = array<i64: 10, 8>}, {pipeline_mode = #tpu.pipeline_mode<synchronous>, transform_indices = @transform_16, window_bounds = array<i64: 3, 128, 256>}, {pipeline_mode = #tpu.pipeline_mode<synchronous>, transform_indices = @transform_17, window_bounds = array<i64: 1, 256>}, {pipeline_mode = #tpu.pipeline_mode<synchronous>, transform_indices = @transform_18, window_bounds = array<i64: 3, 256, 256>}, {pipeline_mode = #tpu.pipeline_mode<synchronous>, transform_indices = @transform_19, window_bounds = array<i64: 1, 256>}, {pipeline_mode = #tpu.pipeline_mode<synchronous>, transform_indices = @transform_20, window_bounds = array<i64: 3, 256, 256>}, {pipeline_mode = #tpu.pipeline_mode<synchronous>, transform_indices = @transform_21, window_bounds = array<i64: 1, 256>}, {pipeline_mode = #tpu.pipeline_mode<synchronous>, transform_indices = @transform_22, window_bounds = array<i64: 224, 128>}, {pipeline_mode = #tpu.pipeline_mode<synchronous>, transform_indices = @transform_23, window_bounds = array<i64: 6, 9>}, {pipeline_mode = #tpu.pipeline_mode<synchronous>, transform_indices = @transform_24, window_bounds = array<i64: 6, 4>}, {pipeline_mode = #tpu.pipeline_mode<synchronous>, transform_indices = @transform_25, window_bounds = array<i64: 3, 128, 256>}, {pipeline_mode = #tpu.pipeline_mode<synchronous>, transform_indices = @transform_26, window_bounds = array<i64: 1, 256>}, {pipeline_mode = #tpu.pipeline_mode<synchronous>, transform_indices = @transform_27, window_bounds = array<i64: 3, 256, 256>}, {pipeline_mode = #tpu.pipeline_mode<synchronous>, transform_indices = @transform_28, window_bounds = array<i64: 1, 256>}, {pipeline_mode = #tpu.pipeline_mode<synchronous>, transform_indices = @transform_29, window_bounds = array<i64: 3, 256, 256>}, {pipeline_mode = #tpu.pipeline_mode<synchronous>, transform_indices = @transform_30, window_bounds = array<i64: 1, 256>}, {pipeline_mode = #tpu.pipeline_mode<synchronous>, transform_indices = @transform_31, window_bounds = array<i64: 192, 128>}, {pipeline_mode = #tpu.pipeline_mode<synchronous>, transform_indices = @transform_32, window_bounds = array<i64: 4, 5>}, {pipeline_mode = #tpu.pipeline_mode<synchronous>, transform_indices = @transform_33, window_bounds = array<i64: 4, 2>}, {pipeline_mode = #tpu.pipeline_mode<synchronous>, transform_indices = @transform_34, window_bounds = array<i64: 3, 128, 128>}, {pipeline_mode = #tpu.pipeline_mode<synchronous>, transform_indices = @transform_35, window_bounds = array<i64: 1, 128>}, {pipeline_mode = #tpu.pipeline_mode<synchronous>, transform_indices = @transform_36, window_bounds = array<i64: 3, 128, 128>}, {pipeline_mode = #tpu.pipeline_mode<synchronous>, transform_indices = @transform_37, window_bounds = array<i64: 1, 128>}, {pipeline_mode = #tpu.pipeline_mode<synchronous>, transform_indices = @transform_38, window_bounds = array<i64: 3, 128, 128>}, {pipeline_mode = #tpu.pipeline_mode<synchronous>, transform_indices = @transform_39, window_bounds = array<i64: 1, 128>}, {pipeline_mode = #tpu.pipeline_mode<synchronous>, transform_indices = @transform_40, window_bounds = array<i64: 64, 64>}, {pipeline_mode = #tpu.pipeline_mode<synchronous>, transform_indices = @transform_41, window_bounds = array<i64: 1, 3>}, {pipeline_mode = #tpu.pipeline_mode<synchronous>, transform_indices = @transform_42, window_bounds = array<i64: 64, 64>}, {pipeline_mode = #tpu.pipeline_mode<synchronous>, transform_indices = @transform_43, window_bounds = array<i64: 1, 64>}, {pipeline_mode = #tpu.pipeline_mode<synchronous>, transform_indices = @transform_44, window_bounds = array<i64: 64, 32>}, {pipeline_mode = #tpu.pipeline_mode<synchronous>, transform_indices = @transform_45, window_bounds = array<i64: 1, 32>}, {pipeline_mode = #tpu.pipeline_mode<synchronous>, transform_indices = @transform_46, window_bounds = array<i64: 32, 10>}, {pipeline_mode = #tpu.pipeline_mode<synchronous>, transform_indices = @transform_47, window_bounds = array<i64: 1, 10>}, {transform_indices = @transform_48, window_bounds = array<i64: 8, 10>}]} {
    %c0 = arith.constant 0 : index
    %c0_0 = arith.constant 0 : index
    %0 = vector.load %arg1[%c0, %c0_0] : memref<40x96xf32, #tpu.memory_space<vmem>>, vector<40x96xf32>
    %1 = vector.extract_strided_slice %0 {offsets = [0, 0], sizes = [34, 96], strides = [1, 1]} : vector<40x96xf32> to vector<34x96xf32>
    %c0_1 = arith.constant 0 : index
    %c0_2 = arith.constant 0 : index
    %2 = vector.load %arg2[%c0_1, %c0_2] : memref<34x32xf32, #tpu.memory_space<vmem>>, vector<34x32xf32>
    %3 = vector.extract_strided_slice %1 {offsets = [0, 0], sizes = [32, 96], strides = [1, 1]} : vector<34x96xf32> to vector<32x96xf32>
    %4 = arith.truncf %3 : vector<32x96xf32> to vector<32x96xbf16>
    %c0_3 = arith.constant 0 : index
    %c0_4 = arith.constant 0 : index
    %c0_5 = arith.constant 0 : index
    %5 = vector.load %arg3[%c0_3, %c0_4, %c0_5] : memref<3x96x256xbf16, #tpu.memory_space<vmem>>, vector<1x96x256xbf16>
    %6 = vector.shape_cast %5 : vector<1x96x256xbf16> to vector<96x256xbf16>
    %cst = arith.constant dense<0.000000e+00> : vector<32x256xf32>
    %7 = tpu.matmul %4, %6, %cst {dimension_numbers = #tpu.dot_dimension_numbers<[1], [0], [0], [1], [0, 0, 1, 1], [], []>} : vector<32x96xbf16>, vector<96x256xbf16>, vector<32x256xf32> -> vector<32x256xf32>
    %8 = vector.extract_strided_slice %1 {offsets = [1, 0], sizes = [32, 96], strides = [1, 1]} : vector<34x96xf32> to vector<32x96xf32>
    %9 = arith.truncf %8 : vector<32x96xf32> to vector<32x96xbf16>
    %c1 = arith.constant 1 : index
    %c0_6 = arith.constant 0 : index
    %c0_7 = arith.constant 0 : index
    %10 = vector.load %arg3[%c1, %c0_6, %c0_7] : memref<3x96x256xbf16, #tpu.memory_space<vmem>>, vector<1x96x256xbf16>
    %11 = vector.shape_cast %10 : vector<1x96x256xbf16> to vector<96x256xbf16>
    %cst_8 = arith.constant dense<0.000000e+00> : vector<32x256xf32>
    %12 = tpu.matmul %9, %11, %cst_8 {dimension_numbers = #tpu.dot_dimension_numbers<[1], [0], [0], [1], [0, 0, 1, 1], [], []>} : vector<32x96xbf16>, vector<96x256xbf16>, vector<32x256xf32> -> vector<32x256xf32>
    %13 = arith.addf %7, %12 : vector<32x256xf32>
    %14 = vector.extract_strided_slice %1 {offsets = [2, 0], sizes = [32, 96], strides = [1, 1]} : vector<34x96xf32> to vector<32x96xf32>
    %15 = arith.truncf %14 : vector<32x96xf32> to vector<32x96xbf16>
    %c2 = arith.constant 2 : index
    %c0_9 = arith.constant 0 : index
    %c0_10 = arith.constant 0 : index
    %16 = vector.load %arg3[%c2, %c0_9, %c0_10] : memref<3x96x256xbf16, #tpu.memory_space<vmem>>, vector<1x96x256xbf16>
    %17 = vector.shape_cast %16 : vector<1x96x256xbf16> to vector<96x256xbf16>
    %cst_11 = arith.constant dense<0.000000e+00> : vector<32x256xf32>
    %18 = tpu.matmul %15, %17, %cst_11 {dimension_numbers = #tpu.dot_dimension_numbers<[1], [0], [0], [1], [0, 0, 1, 1], [], []>} : vector<32x96xbf16>, vector<96x256xbf16>, vector<32x256xf32> -> vector<32x256xf32>
    %19 = arith.addf %13, %18 : vector<32x256xf32>
    %c0_12 = arith.constant 0 : index
    %c0_13 = arith.constant 0 : index
    %20 = vector.load %arg4[%c0_12, %c0_13] : memref<1x256xf32, #tpu.memory_space<vmem>>, vector<1x256xf32>
    %21 = vector.broadcast %20 : vector<1x256xf32> to vector<32x256xf32>
    %22 = arith.addf %19, %21 : vector<32x256xf32>
    %cst_14 = arith.constant 0.000000e+00 : f32
    %23 = vector.broadcast %cst_14 : f32 to vector<32x256xf32>
    %24 = arith.maximumf %22, %23 : vector<32x256xf32>
    %cst_15 = arith.constant dense<0.000000e+00> : vector<34x256xf32>
    %25 = tpu.matmul %2, %24, %cst_15 {dimension_numbers = #tpu.dot_dimension_numbers<[1], [0], [0], [1], [0, 0, 1, 1], [], []>} : vector<34x32xf32>, vector<32x256xf32>, vector<34x256xf32> -> vector<34x256xf32>
    %26 = vector.extract_strided_slice %25 {offsets = [0, 0], sizes = [32, 256], strides = [1, 1]} : vector<34x256xf32> to vector<32x256xf32>
    %27 = arith.truncf %26 : vector<32x256xf32> to vector<32x256xbf16>
    %c0_16 = arith.constant 0 : index
    %c0_17 = arith.constant 0 : index
    %c0_18 = arith.constant 0 : index
    %28 = vector.load %arg5[%c0_16, %c0_17, %c0_18] : memref<3x256x256xbf16, #tpu.memory_space<vmem>>, vector<1x256x256xbf16>
    %29 = vector.shape_cast %28 : vector<1x256x256xbf16> to vector<256x256xbf16>
    %cst_19 = arith.constant dense<0.000000e+00> : vector<32x256xf32>
    %30 = tpu.matmul %27, %29, %cst_19 {dimension_numbers = #tpu.dot_dimension_numbers<[1], [0], [0], [1], [0, 0, 1, 1], [], []>} : vector<32x256xbf16>, vector<256x256xbf16>, vector<32x256xf32> -> vector<32x256xf32>
    %31 = vector.extract_strided_slice %25 {offsets = [1, 0], sizes = [32, 256], strides = [1, 1]} : vector<34x256xf32> to vector<32x256xf32>
    %32 = arith.truncf %31 : vector<32x256xf32> to vector<32x256xbf16>
    %c1_20 = arith.constant 1 : index
    %c0_21 = arith.constant 0 : index
    %c0_22 = arith.constant 0 : index
    %33 = vector.load %arg5[%c1_20, %c0_21, %c0_22] : memref<3x256x256xbf16, #tpu.memory_space<vmem>>, vector<1x256x256xbf16>
    %34 = vector.shape_cast %33 : vector<1x256x256xbf16> to vector<256x256xbf16>
    %cst_23 = arith.constant dense<0.000000e+00> : vector<32x256xf32>
    %35 = tpu.matmul %32, %34, %cst_23 {dimension_numbers = #tpu.dot_dimension_numbers<[1], [0], [0], [1], [0, 0, 1, 1], [], []>} : vector<32x256xbf16>, vector<256x256xbf16>, vector<32x256xf32> -> vector<32x256xf32>
    %36 = arith.addf %30, %35 : vector<32x256xf32>
    %37 = vector.extract_strided_slice %25 {offsets = [2, 0], sizes = [32, 256], strides = [1, 1]} : vector<34x256xf32> to vector<32x256xf32>
    %38 = arith.truncf %37 : vector<32x256xf32> to vector<32x256xbf16>
    %c2_24 = arith.constant 2 : index
    %c0_25 = arith.constant 0 : index
    %c0_26 = arith.constant 0 : index
    %39 = vector.load %arg5[%c2_24, %c0_25, %c0_26] : memref<3x256x256xbf16, #tpu.memory_space<vmem>>, vector<1x256x256xbf16>
    %40 = vector.shape_cast %39 : vector<1x256x256xbf16> to vector<256x256xbf16>
    %cst_27 = arith.constant dense<0.000000e+00> : vector<32x256xf32>
    %41 = tpu.matmul %38, %40, %cst_27 {dimension_numbers = #tpu.dot_dimension_numbers<[1], [0], [0], [1], [0, 0, 1, 1], [], []>} : vector<32x256xbf16>, vector<256x256xbf16>, vector<32x256xf32> -> vector<32x256xf32>
    %42 = arith.addf %36, %41 : vector<32x256xf32>
    %c0_28 = arith.constant 0 : index
    %c0_29 = arith.constant 0 : index
    %43 = vector.load %arg6[%c0_28, %c0_29] : memref<1x256xf32, #tpu.memory_space<vmem>>, vector<1x256xf32>
    %44 = vector.broadcast %43 : vector<1x256xf32> to vector<32x256xf32>
    %45 = arith.addf %42, %44 : vector<32x256xf32>
    %cst_30 = arith.constant 0.000000e+00 : f32
    %46 = vector.broadcast %cst_30 : f32 to vector<32x256xf32>
    %47 = arith.maximumf %45, %46 : vector<32x256xf32>
    %cst_31 = arith.constant dense<0.000000e+00> : vector<34x256xf32>
    %48 = tpu.matmul %2, %47, %cst_31 {dimension_numbers = #tpu.dot_dimension_numbers<[1], [0], [0], [1], [0, 0, 1, 1], [], []>} : vector<34x32xf32>, vector<32x256xf32>, vector<34x256xf32> -> vector<34x256xf32>
    %49 = vector.extract_strided_slice %48 {offsets = [0, 0], sizes = [34, 248], strides = [1, 1]} : vector<34x256xf32> to vector<34x248xf32>
    %50 = vector.extract_strided_slice %48 {offsets = [0, 8], sizes = [34, 248], strides = [1, 1]} : vector<34x256xf32> to vector<34x248xf32>
    %51 = arith.maximumf %49, %50 : vector<34x248xf32>
    %c0_32 = arith.constant 0 : index
    %c0_33 = arith.constant 0 : index
    %52 = vector.load %arg7[%c0_32, %c0_33] : memref<248x128xf32, #tpu.memory_space<vmem>>, vector<248x128xf32>
    %cst_34 = arith.constant dense<0.000000e+00> : vector<34x128xf32>
    %53 = tpu.matmul %51, %52, %cst_34 {dimension_numbers = #tpu.dot_dimension_numbers<[1], [0], [0], [1], [0, 0, 1, 1], [], []>} : vector<34x248xf32>, vector<248x128xf32>, vector<34x128xf32> -> vector<34x128xf32>
    %54 = vector.extract_strided_slice %53 {offsets = [0, 0], sizes = [33, 128], strides = [1, 1]} : vector<34x128xf32> to vector<33x128xf32>
    %55 = vector.extract_strided_slice %53 {offsets = [1, 0], sizes = [33, 128], strides = [1, 1]} : vector<34x128xf32> to vector<33x128xf32>
    %56 = arith.maximumf %54, %55 : vector<33x128xf32>
    %c0_35 = arith.constant 0 : index
    %c0_36 = arith.constant 0 : index
    %57 = vector.load %arg8[%c0_35, %c0_36] : memref<18x33xf32, #tpu.memory_space<vmem>>, vector<18x33xf32>
    %cst_37 = arith.constant dense<0.000000e+00> : vector<18x128xf32>
    %58 = tpu.matmul %57, %56, %cst_37 {dimension_numbers = #tpu.dot_dimension_numbers<[1], [0], [0], [1], [0, 0, 1, 1], [], []>} : vector<18x33xf32>, vector<33x128xf32>, vector<18x128xf32> -> vector<18x128xf32>
    %c0_38 = arith.constant 0 : index
    %c0_39 = arith.constant 0 : index
    %59 = vector.load %arg9[%c0_38, %c0_39] : memref<18x16xf32, #tpu.memory_space<vmem>>, vector<18x16xf32>
    %60 = vector.extract_strided_slice %58 {offsets = [0, 0], sizes = [16, 128], strides = [1, 1]} : vector<18x128xf32> to vector<16x128xf32>
    %61 = arith.truncf %60 : vector<16x128xf32> to vector<16x128xbf16>
    %c0_40 = arith.constant 0 : index
    %c0_41 = arith.constant 0 : index
    %c0_42 = arith.constant 0 : index
    %62 = vector.load %arg10[%c0_40, %c0_41, %c0_42] : memref<3x128x256xbf16, #tpu.memory_space<vmem>>, vector<1x128x256xbf16>
    %63 = vector.shape_cast %62 : vector<1x128x256xbf16> to vector<128x256xbf16>
    %cst_43 = arith.constant dense<0.000000e+00> : vector<16x256xf32>
    %64 = tpu.matmul %61, %63, %cst_43 {dimension_numbers = #tpu.dot_dimension_numbers<[1], [0], [0], [1], [0, 0, 1, 1], [], []>} : vector<16x128xbf16>, vector<128x256xbf16>, vector<16x256xf32> -> vector<16x256xf32>
    %65 = vector.extract_strided_slice %58 {offsets = [1, 0], sizes = [16, 128], strides = [1, 1]} : vector<18x128xf32> to vector<16x128xf32>
    %66 = arith.truncf %65 : vector<16x128xf32> to vector<16x128xbf16>
    %c1_44 = arith.constant 1 : index
    %c0_45 = arith.constant 0 : index
    %c0_46 = arith.constant 0 : index
    %67 = vector.load %arg10[%c1_44, %c0_45, %c0_46] : memref<3x128x256xbf16, #tpu.memory_space<vmem>>, vector<1x128x256xbf16>
    %68 = vector.shape_cast %67 : vector<1x128x256xbf16> to vector<128x256xbf16>
    %cst_47 = arith.constant dense<0.000000e+00> : vector<16x256xf32>
    %69 = tpu.matmul %66, %68, %cst_47 {dimension_numbers = #tpu.dot_dimension_numbers<[1], [0], [0], [1], [0, 0, 1, 1], [], []>} : vector<16x128xbf16>, vector<128x256xbf16>, vector<16x256xf32> -> vector<16x256xf32>
    %70 = arith.addf %64, %69 : vector<16x256xf32>
    %71 = vector.extract_strided_slice %58 {offsets = [2, 0], sizes = [16, 128], strides = [1, 1]} : vector<18x128xf32> to vector<16x128xf32>
    %72 = arith.truncf %71 : vector<16x128xf32> to vector<16x128xbf16>
    %c2_48 = arith.constant 2 : index
    %c0_49 = arith.constant 0 : index
    %c0_50 = arith.constant 0 : index
    %73 = vector.load %arg10[%c2_48, %c0_49, %c0_50] : memref<3x128x256xbf16, #tpu.memory_space<vmem>>, vector<1x128x256xbf16>
    %74 = vector.shape_cast %73 : vector<1x128x256xbf16> to vector<128x256xbf16>
    %cst_51 = arith.constant dense<0.000000e+00> : vector<16x256xf32>
    %75 = tpu.matmul %72, %74, %cst_51 {dimension_numbers = #tpu.dot_dimension_numbers<[1], [0], [0], [1], [0, 0, 1, 1], [], []>} : vector<16x128xbf16>, vector<128x256xbf16>, vector<16x256xf32> -> vector<16x256xf32>
    %76 = arith.addf %70, %75 : vector<16x256xf32>
    %c0_52 = arith.constant 0 : index
    %c0_53 = arith.constant 0 : index
    %77 = vector.load %arg11[%c0_52, %c0_53] : memref<1x256xf32, #tpu.memory_space<vmem>>, vector<1x256xf32>
    %78 = vector.broadcast %77 : vector<1x256xf32> to vector<16x256xf32>
    %79 = arith.addf %76, %78 : vector<16x256xf32>
    %cst_54 = arith.constant 0.000000e+00 : f32
    %80 = vector.broadcast %cst_54 : f32 to vector<16x256xf32>
    %81 = arith.maximumf %79, %80 : vector<16x256xf32>
    %cst_55 = arith.constant dense<0.000000e+00> : vector<18x256xf32>
    %82 = tpu.matmul %59, %81, %cst_55 {dimension_numbers = #tpu.dot_dimension_numbers<[1], [0], [0], [1], [0, 0, 1, 1], [], []>} : vector<18x16xf32>, vector<16x256xf32>, vector<18x256xf32> -> vector<18x256xf32>
    %83 = vector.extract_strided_slice %82 {offsets = [0, 0], sizes = [16, 256], strides = [1, 1]} : vector<18x256xf32> to vector<16x256xf32>
    %84 = arith.truncf %83 : vector<16x256xf32> to vector<16x256xbf16>
    %c0_56 = arith.constant 0 : index
    %c0_57 = arith.constant 0 : index
    %c0_58 = arith.constant 0 : index
    %85 = vector.load %arg12[%c0_56, %c0_57, %c0_58] : memref<3x256x256xbf16, #tpu.memory_space<vmem>>, vector<1x256x256xbf16>
    %86 = vector.shape_cast %85 : vector<1x256x256xbf16> to vector<256x256xbf16>
    %cst_59 = arith.constant dense<0.000000e+00> : vector<16x256xf32>
    %87 = tpu.matmul %84, %86, %cst_59 {dimension_numbers = #tpu.dot_dimension_numbers<[1], [0], [0], [1], [0, 0, 1, 1], [], []>} : vector<16x256xbf16>, vector<256x256xbf16>, vector<16x256xf32> -> vector<16x256xf32>
    %88 = vector.extract_strided_slice %82 {offsets = [1, 0], sizes = [16, 256], strides = [1, 1]} : vector<18x256xf32> to vector<16x256xf32>
    %89 = arith.truncf %88 : vector<16x256xf32> to vector<16x256xbf16>
    %c1_60 = arith.constant 1 : index
    %c0_61 = arith.constant 0 : index
    %c0_62 = arith.constant 0 : index
    %90 = vector.load %arg12[%c1_60, %c0_61, %c0_62] : memref<3x256x256xbf16, #tpu.memory_space<vmem>>, vector<1x256x256xbf16>
    %91 = vector.shape_cast %90 : vector<1x256x256xbf16> to vector<256x256xbf16>
    %cst_63 = arith.constant dense<0.000000e+00> : vector<16x256xf32>
    %92 = tpu.matmul %89, %91, %cst_63 {dimension_numbers = #tpu.dot_dimension_numbers<[1], [0], [0], [1], [0, 0, 1, 1], [], []>} : vector<16x256xbf16>, vector<256x256xbf16>, vector<16x256xf32> -> vector<16x256xf32>
    %93 = arith.addf %87, %92 : vector<16x256xf32>
    %94 = vector.extract_strided_slice %82 {offsets = [2, 0], sizes = [16, 256], strides = [1, 1]} : vector<18x256xf32> to vector<16x256xf32>
    %95 = arith.truncf %94 : vector<16x256xf32> to vector<16x256xbf16>
    %c2_64 = arith.constant 2 : index
    %c0_65 = arith.constant 0 : index
    %c0_66 = arith.constant 0 : index
    %96 = vector.load %arg12[%c2_64, %c0_65, %c0_66] : memref<3x256x256xbf16, #tpu.memory_space<vmem>>, vector<1x256x256xbf16>
    %97 = vector.shape_cast %96 : vector<1x256x256xbf16> to vector<256x256xbf16>
    %cst_67 = arith.constant dense<0.000000e+00> : vector<16x256xf32>
    %98 = tpu.matmul %95, %97, %cst_67 {dimension_numbers = #tpu.dot_dimension_numbers<[1], [0], [0], [1], [0, 0, 1, 1], [], []>} : vector<16x256xbf16>, vector<256x256xbf16>, vector<16x256xf32> -> vector<16x256xf32>
    %99 = arith.addf %93, %98 : vector<16x256xf32>
    %c0_68 = arith.constant 0 : index
    %c0_69 = arith.constant 0 : index
    %100 = vector.load %arg13[%c0_68, %c0_69] : memref<1x256xf32, #tpu.memory_space<vmem>>, vector<1x256xf32>
    %101 = vector.broadcast %100 : vector<1x256xf32> to vector<16x256xf32>
    %102 = arith.addf %99, %101 : vector<16x256xf32>
    %cst_70 = arith.constant 0.000000e+00 : f32
    %103 = vector.broadcast %cst_70 : f32 to vector<16x256xf32>
    %104 = arith.maximumf %102, %103 : vector<16x256xf32>
    %cst_71 = arith.constant dense<0.000000e+00> : vector<18x256xf32>
    %105 = tpu.matmul %59, %104, %cst_71 {dimension_numbers = #tpu.dot_dimension_numbers<[1], [0], [0], [1], [0, 0, 1, 1], [], []>} : vector<18x16xf32>, vector<16x256xf32>, vector<18x256xf32> -> vector<18x256xf32>
    %106 = vector.extract_strided_slice %105 {offsets = [0, 0], sizes = [18, 240], strides = [1, 1]} : vector<18x256xf32> to vector<18x240xf32>
    %107 = vector.extract_strided_slice %105 {offsets = [0, 16], sizes = [18, 240], strides = [1, 1]} : vector<18x256xf32> to vector<18x240xf32>
    %108 = arith.maximumf %106, %107 : vector<18x240xf32>
    %c0_72 = arith.constant 0 : index
    %c0_73 = arith.constant 0 : index
    %109 = vector.load %arg14[%c0_72, %c0_73] : memref<240x128xf32, #tpu.memory_space<vmem>>, vector<240x128xf32>
    %cst_74 = arith.constant dense<0.000000e+00> : vector<18x128xf32>
    %110 = tpu.matmul %108, %109, %cst_74 {dimension_numbers = #tpu.dot_dimension_numbers<[1], [0], [0], [1], [0, 0, 1, 1], [], []>} : vector<18x240xf32>, vector<240x128xf32>, vector<18x128xf32> -> vector<18x128xf32>
    %111 = vector.extract_strided_slice %110 {offsets = [0, 0], sizes = [17, 128], strides = [1, 1]} : vector<18x128xf32> to vector<17x128xf32>
    %112 = vector.extract_strided_slice %110 {offsets = [1, 0], sizes = [17, 128], strides = [1, 1]} : vector<18x128xf32> to vector<17x128xf32>
    %113 = arith.maximumf %111, %112 : vector<17x128xf32>
    %c0_75 = arith.constant 0 : index
    %c0_76 = arith.constant 0 : index
    %114 = vector.load %arg15[%c0_75, %c0_76] : memref<10x17xf32, #tpu.memory_space<vmem>>, vector<10x17xf32>
    %cst_77 = arith.constant dense<0.000000e+00> : vector<10x128xf32>
    %115 = tpu.matmul %114, %113, %cst_77 {dimension_numbers = #tpu.dot_dimension_numbers<[1], [0], [0], [1], [0, 0, 1, 1], [], []>} : vector<10x17xf32>, vector<17x128xf32>, vector<10x128xf32> -> vector<10x128xf32>
    %c0_78 = arith.constant 0 : index
    %c0_79 = arith.constant 0 : index
    %116 = vector.load %arg16[%c0_78, %c0_79] : memref<10x8xf32, #tpu.memory_space<vmem>>, vector<10x8xf32>
    %117 = vector.extract_strided_slice %115 {offsets = [0, 0], sizes = [8, 128], strides = [1, 1]} : vector<10x128xf32> to vector<8x128xf32>
    %118 = arith.truncf %117 : vector<8x128xf32> to vector<8x128xbf16>
    %c0_80 = arith.constant 0 : index
    %c0_81 = arith.constant 0 : index
    %c0_82 = arith.constant 0 : index
    %119 = vector.load %arg17[%c0_80, %c0_81, %c0_82] : memref<3x128x256xbf16, #tpu.memory_space<vmem>>, vector<1x128x256xbf16>
    %120 = vector.shape_cast %119 : vector<1x128x256xbf16> to vector<128x256xbf16>
    %cst_83 = arith.constant dense<0.000000e+00> : vector<8x256xf32>
    %121 = tpu.matmul %118, %120, %cst_83 {dimension_numbers = #tpu.dot_dimension_numbers<[1], [0], [0], [1], [0, 0, 1, 1], [], []>} : vector<8x128xbf16>, vector<128x256xbf16>, vector<8x256xf32> -> vector<8x256xf32>
    %122 = vector.extract_strided_slice %115 {offsets = [1, 0], sizes = [8, 128], strides = [1, 1]} : vector<10x128xf32> to vector<8x128xf32>
    %123 = arith.truncf %122 : vector<8x128xf32> to vector<8x128xbf16>
    %c1_84 = arith.constant 1 : index
    %c0_85 = arith.constant 0 : index
    %c0_86 = arith.constant 0 : index
    %124 = vector.load %arg17[%c1_84, %c0_85, %c0_86] : memref<3x128x256xbf16, #tpu.memory_space<vmem>>, vector<1x128x256xbf16>
    %125 = vector.shape_cast %124 : vector<1x128x256xbf16> to vector<128x256xbf16>
    %cst_87 = arith.constant dense<0.000000e+00> : vector<8x256xf32>
    %126 = tpu.matmul %123, %125, %cst_87 {dimension_numbers = #tpu.dot_dimension_numbers<[1], [0], [0], [1], [0, 0, 1, 1], [], []>} : vector<8x128xbf16>, vector<128x256xbf16>, vector<8x256xf32> -> vector<8x256xf32>
    %127 = arith.addf %121, %126 : vector<8x256xf32>
    %128 = vector.extract_strided_slice %115 {offsets = [2, 0], sizes = [8, 128], strides = [1, 1]} : vector<10x128xf32> to vector<8x128xf32>
    %129 = arith.truncf %128 : vector<8x128xf32> to vector<8x128xbf16>
    %c2_88 = arith.constant 2 : index
    %c0_89 = arith.constant 0 : index
    %c0_90 = arith.constant 0 : index
    %130 = vector.load %arg17[%c2_88, %c0_89, %c0_90] : memref<3x128x256xbf16, #tpu.memory_space<vmem>>, vector<1x128x256xbf16>
    %131 = vector.shape_cast %130 : vector<1x128x256xbf16> to vector<128x256xbf16>
    %cst_91 = arith.constant dense<0.000000e+00> : vector<8x256xf32>
    %132 = tpu.matmul %129, %131, %cst_91 {dimension_numbers = #tpu.dot_dimension_numbers<[1], [0], [0], [1], [0, 0, 1, 1], [], []>} : vector<8x128xbf16>, vector<128x256xbf16>, vector<8x256xf32> -> vector<8x256xf32>
    %133 = arith.addf %127, %132 : vector<8x256xf32>
    %c0_92 = arith.constant 0 : index
    %c0_93 = arith.constant 0 : index
    %134 = vector.load %arg18[%c0_92, %c0_93] : memref<1x256xf32, #tpu.memory_space<vmem>>, vector<1x256xf32>
    %135 = vector.broadcast %134 : vector<1x256xf32> to vector<8x256xf32>
    %136 = arith.addf %133, %135 : vector<8x256xf32>
    %cst_94 = arith.constant 0.000000e+00 : f32
    %137 = vector.broadcast %cst_94 : f32 to vector<8x256xf32>
    %138 = arith.maximumf %136, %137 : vector<8x256xf32>
    %cst_95 = arith.constant dense<0.000000e+00> : vector<10x256xf32>
    %139 = tpu.matmul %116, %138, %cst_95 {dimension_numbers = #tpu.dot_dimension_numbers<[1], [0], [0], [1], [0, 0, 1, 1], [], []>} : vector<10x8xf32>, vector<8x256xf32>, vector<10x256xf32> -> vector<10x256xf32>
    %140 = vector.extract_strided_slice %139 {offsets = [0, 0], sizes = [8, 256], strides = [1, 1]} : vector<10x256xf32> to vector<8x256xf32>
    %141 = arith.truncf %140 : vector<8x256xf32> to vector<8x256xbf16>
    %c0_96 = arith.constant 0 : index
    %c0_97 = arith.constant 0 : index
    %c0_98 = arith.constant 0 : index
    %142 = vector.load %arg19[%c0_96, %c0_97, %c0_98] : memref<3x256x256xbf16, #tpu.memory_space<vmem>>, vector<1x256x256xbf16>
    %143 = vector.shape_cast %142 : vector<1x256x256xbf16> to vector<256x256xbf16>
    %cst_99 = arith.constant dense<0.000000e+00> : vector<8x256xf32>
    %144 = tpu.matmul %141, %143, %cst_99 {dimension_numbers = #tpu.dot_dimension_numbers<[1], [0], [0], [1], [0, 0, 1, 1], [], []>} : vector<8x256xbf16>, vector<256x256xbf16>, vector<8x256xf32> -> vector<8x256xf32>
    %145 = vector.extract_strided_slice %139 {offsets = [1, 0], sizes = [8, 256], strides = [1, 1]} : vector<10x256xf32> to vector<8x256xf32>
    %146 = arith.truncf %145 : vector<8x256xf32> to vector<8x256xbf16>
    %c1_100 = arith.constant 1 : index
    %c0_101 = arith.constant 0 : index
    %c0_102 = arith.constant 0 : index
    %147 = vector.load %arg19[%c1_100, %c0_101, %c0_102] : memref<3x256x256xbf16, #tpu.memory_space<vmem>>, vector<1x256x256xbf16>
    %148 = vector.shape_cast %147 : vector<1x256x256xbf16> to vector<256x256xbf16>
    %cst_103 = arith.constant dense<0.000000e+00> : vector<8x256xf32>
    %149 = tpu.matmul %146, %148, %cst_103 {dimension_numbers = #tpu.dot_dimension_numbers<[1], [0], [0], [1], [0, 0, 1, 1], [], []>} : vector<8x256xbf16>, vector<256x256xbf16>, vector<8x256xf32> -> vector<8x256xf32>
    %150 = arith.addf %144, %149 : vector<8x256xf32>
    %151 = vector.extract_strided_slice %139 {offsets = [2, 0], sizes = [8, 256], strides = [1, 1]} : vector<10x256xf32> to vector<8x256xf32>
    %152 = arith.truncf %151 : vector<8x256xf32> to vector<8x256xbf16>
    %c2_104 = arith.constant 2 : index
    %c0_105 = arith.constant 0 : index
    %c0_106 = arith.constant 0 : index
    %153 = vector.load %arg19[%c2_104, %c0_105, %c0_106] : memref<3x256x256xbf16, #tpu.memory_space<vmem>>, vector<1x256x256xbf16>
    %154 = vector.shape_cast %153 : vector<1x256x256xbf16> to vector<256x256xbf16>
    %cst_107 = arith.constant dense<0.000000e+00> : vector<8x256xf32>
    %155 = tpu.matmul %152, %154, %cst_107 {dimension_numbers = #tpu.dot_dimension_numbers<[1], [0], [0], [1], [0, 0, 1, 1], [], []>} : vector<8x256xbf16>, vector<256x256xbf16>, vector<8x256xf32> -> vector<8x256xf32>
    %156 = arith.addf %150, %155 : vector<8x256xf32>
    %c0_108 = arith.constant 0 : index
    %c0_109 = arith.constant 0 : index
    %157 = vector.load %arg20[%c0_108, %c0_109] : memref<1x256xf32, #tpu.memory_space<vmem>>, vector<1x256xf32>
    %158 = vector.broadcast %157 : vector<1x256xf32> to vector<8x256xf32>
    %159 = arith.addf %156, %158 : vector<8x256xf32>
    %cst_110 = arith.constant 0.000000e+00 : f32
    %160 = vector.broadcast %cst_110 : f32 to vector<8x256xf32>
    %161 = arith.maximumf %159, %160 : vector<8x256xf32>
    %cst_111 = arith.constant dense<0.000000e+00> : vector<10x256xf32>
    %162 = tpu.matmul %116, %161, %cst_111 {dimension_numbers = #tpu.dot_dimension_numbers<[1], [0], [0], [1], [0, 0, 1, 1], [], []>} : vector<10x8xf32>, vector<8x256xf32>, vector<10x256xf32> -> vector<10x256xf32>
    %163 = vector.extract_strided_slice %162 {offsets = [0, 0], sizes = [8, 256], strides = [1, 1]} : vector<10x256xf32> to vector<8x256xf32>
    %164 = arith.truncf %163 : vector<8x256xf32> to vector<8x256xbf16>
    %c0_112 = arith.constant 0 : index
    %c0_113 = arith.constant 0 : index
    %c0_114 = arith.constant 0 : index
    %165 = vector.load %arg21[%c0_112, %c0_113, %c0_114] : memref<3x256x256xbf16, #tpu.memory_space<vmem>>, vector<1x256x256xbf16>
    %166 = vector.shape_cast %165 : vector<1x256x256xbf16> to vector<256x256xbf16>
    %cst_115 = arith.constant dense<0.000000e+00> : vector<8x256xf32>
    %167 = tpu.matmul %164, %166, %cst_115 {dimension_numbers = #tpu.dot_dimension_numbers<[1], [0], [0], [1], [0, 0, 1, 1], [], []>} : vector<8x256xbf16>, vector<256x256xbf16>, vector<8x256xf32> -> vector<8x256xf32>
    %168 = vector.extract_strided_slice %162 {offsets = [1, 0], sizes = [8, 256], strides = [1, 1]} : vector<10x256xf32> to vector<8x256xf32>
    %169 = arith.truncf %168 : vector<8x256xf32> to vector<8x256xbf16>
    %c1_116 = arith.constant 1 : index
    %c0_117 = arith.constant 0 : index
    %c0_118 = arith.constant 0 : index
    %170 = vector.load %arg21[%c1_116, %c0_117, %c0_118] : memref<3x256x256xbf16, #tpu.memory_space<vmem>>, vector<1x256x256xbf16>
    %171 = vector.shape_cast %170 : vector<1x256x256xbf16> to vector<256x256xbf16>
    %cst_119 = arith.constant dense<0.000000e+00> : vector<8x256xf32>
    %172 = tpu.matmul %169, %171, %cst_119 {dimension_numbers = #tpu.dot_dimension_numbers<[1], [0], [0], [1], [0, 0, 1, 1], [], []>} : vector<8x256xbf16>, vector<256x256xbf16>, vector<8x256xf32> -> vector<8x256xf32>
    %173 = arith.addf %167, %172 : vector<8x256xf32>
    %174 = vector.extract_strided_slice %162 {offsets = [2, 0], sizes = [8, 256], strides = [1, 1]} : vector<10x256xf32> to vector<8x256xf32>
    %175 = arith.truncf %174 : vector<8x256xf32> to vector<8x256xbf16>
    %c2_120 = arith.constant 2 : index
    %c0_121 = arith.constant 0 : index
    %c0_122 = arith.constant 0 : index
    %176 = vector.load %arg21[%c2_120, %c0_121, %c0_122] : memref<3x256x256xbf16, #tpu.memory_space<vmem>>, vector<1x256x256xbf16>
    %177 = vector.shape_cast %176 : vector<1x256x256xbf16> to vector<256x256xbf16>
    %cst_123 = arith.constant dense<0.000000e+00> : vector<8x256xf32>
    %178 = tpu.matmul %175, %177, %cst_123 {dimension_numbers = #tpu.dot_dimension_numbers<[1], [0], [0], [1], [0, 0, 1, 1], [], []>} : vector<8x256xbf16>, vector<256x256xbf16>, vector<8x256xf32> -> vector<8x256xf32>
    %179 = arith.addf %173, %178 : vector<8x256xf32>
    %c0_124 = arith.constant 0 : index
    %c0_125 = arith.constant 0 : index
    %180 = vector.load %arg22[%c0_124, %c0_125] : memref<1x256xf32, #tpu.memory_space<vmem>>, vector<1x256xf32>
    %181 = vector.broadcast %180 : vector<1x256xf32> to vector<8x256xf32>
    %182 = arith.addf %179, %181 : vector<8x256xf32>
    %cst_126 = arith.constant 0.000000e+00 : f32
    %183 = vector.broadcast %cst_126 : f32 to vector<8x256xf32>
    %184 = arith.maximumf %182, %183 : vector<8x256xf32>
    %cst_127 = arith.constant dense<0.000000e+00> : vector<10x256xf32>
    %185 = tpu.matmul %116, %184, %cst_127 {dimension_numbers = #tpu.dot_dimension_numbers<[1], [0], [0], [1], [0, 0, 1, 1], [], []>} : vector<10x8xf32>, vector<8x256xf32>, vector<10x256xf32> -> vector<10x256xf32>
    %186 = vector.extract_strided_slice %185 {offsets = [0, 0], sizes = [10, 224], strides = [1, 1]} : vector<10x256xf32> to vector<10x224xf32>
    %187 = vector.extract_strided_slice %185 {offsets = [0, 32], sizes = [10, 224], strides = [1, 1]} : vector<10x256xf32> to vector<10x224xf32>
    %188 = arith.maximumf %186, %187 : vector<10x224xf32>
    %c0_128 = arith.constant 0 : index
    %c0_129 = arith.constant 0 : index
    %189 = vector.load %arg23[%c0_128, %c0_129] : memref<224x128xf32, #tpu.memory_space<vmem>>, vector<224x128xf32>
    %cst_130 = arith.constant dense<0.000000e+00> : vector<10x128xf32>
    %190 = tpu.matmul %188, %189, %cst_130 {dimension_numbers = #tpu.dot_dimension_numbers<[1], [0], [0], [1], [0, 0, 1, 1], [], []>} : vector<10x224xf32>, vector<224x128xf32>, vector<10x128xf32> -> vector<10x128xf32>
    %191 = vector.extract_strided_slice %190 {offsets = [0, 0], sizes = [9, 128], strides = [1, 1]} : vector<10x128xf32> to vector<9x128xf32>
    %192 = vector.extract_strided_slice %190 {offsets = [1, 0], sizes = [9, 128], strides = [1, 1]} : vector<10x128xf32> to vector<9x128xf32>
    %193 = arith.maximumf %191, %192 : vector<9x128xf32>
    %c0_131 = arith.constant 0 : index
    %c0_132 = arith.constant 0 : index
    %194 = vector.load %arg24[%c0_131, %c0_132] : memref<6x9xf32, #tpu.memory_space<vmem>>, vector<6x9xf32>
    %cst_133 = arith.constant dense<0.000000e+00> : vector<6x128xf32>
    %195 = tpu.matmul %194, %193, %cst_133 {dimension_numbers = #tpu.dot_dimension_numbers<[1], [0], [0], [1], [0, 0, 1, 1], [], []>} : vector<6x9xf32>, vector<9x128xf32>, vector<6x128xf32> -> vector<6x128xf32>
    %c0_134 = arith.constant 0 : index
    %c0_135 = arith.constant 0 : index
    %196 = vector.load %arg25[%c0_134, %c0_135] : memref<6x4xf32, #tpu.memory_space<vmem>>, vector<6x4xf32>
    %197 = vector.extract_strided_slice %195 {offsets = [0, 0], sizes = [4, 128], strides = [1, 1]} : vector<6x128xf32> to vector<4x128xf32>
    %198 = arith.truncf %197 : vector<4x128xf32> to vector<4x128xbf16>
    %c0_136 = arith.constant 0 : index
    %c0_137 = arith.constant 0 : index
    %c0_138 = arith.constant 0 : index
    %199 = vector.load %arg26[%c0_136, %c0_137, %c0_138] : memref<3x128x256xbf16, #tpu.memory_space<vmem>>, vector<1x128x256xbf16>
    %200 = vector.shape_cast %199 : vector<1x128x256xbf16> to vector<128x256xbf16>
    %cst_139 = arith.constant dense<0.000000e+00> : vector<4x256xf32>
    %201 = tpu.matmul %198, %200, %cst_139 {dimension_numbers = #tpu.dot_dimension_numbers<[1], [0], [0], [1], [0, 0, 1, 1], [], []>} : vector<4x128xbf16>, vector<128x256xbf16>, vector<4x256xf32> -> vector<4x256xf32>
    %202 = vector.extract_strided_slice %195 {offsets = [1, 0], sizes = [4, 128], strides = [1, 1]} : vector<6x128xf32> to vector<4x128xf32>
    %203 = arith.truncf %202 : vector<4x128xf32> to vector<4x128xbf16>
    %c1_140 = arith.constant 1 : index
    %c0_141 = arith.constant 0 : index
    %c0_142 = arith.constant 0 : index
    %204 = vector.load %arg26[%c1_140, %c0_141, %c0_142] : memref<3x128x256xbf16, #tpu.memory_space<vmem>>, vector<1x128x256xbf16>
    %205 = vector.shape_cast %204 : vector<1x128x256xbf16> to vector<128x256xbf16>
    %cst_143 = arith.constant dense<0.000000e+00> : vector<4x256xf32>
    %206 = tpu.matmul %203, %205, %cst_143 {dimension_numbers = #tpu.dot_dimension_numbers<[1], [0], [0], [1], [0, 0, 1, 1], [], []>} : vector<4x128xbf16>, vector<128x256xbf16>, vector<4x256xf32> -> vector<4x256xf32>
    %207 = arith.addf %201, %206 : vector<4x256xf32>
    %208 = vector.extract_strided_slice %195 {offsets = [2, 0], sizes = [4, 128], strides = [1, 1]} : vector<6x128xf32> to vector<4x128xf32>
    %209 = arith.truncf %208 : vector<4x128xf32> to vector<4x128xbf16>
    %c2_144 = arith.constant 2 : index
    %c0_145 = arith.constant 0 : index
    %c0_146 = arith.constant 0 : index
    %210 = vector.load %arg26[%c2_144, %c0_145, %c0_146] : memref<3x128x256xbf16, #tpu.memory_space<vmem>>, vector<1x128x256xbf16>
    %211 = vector.shape_cast %210 : vector<1x128x256xbf16> to vector<128x256xbf16>
    %cst_147 = arith.constant dense<0.000000e+00> : vector<4x256xf32>
    %212 = tpu.matmul %209, %211, %cst_147 {dimension_numbers = #tpu.dot_dimension_numbers<[1], [0], [0], [1], [0, 0, 1, 1], [], []>} : vector<4x128xbf16>, vector<128x256xbf16>, vector<4x256xf32> -> vector<4x256xf32>
    %213 = arith.addf %207, %212 : vector<4x256xf32>
    %c0_148 = arith.constant 0 : index
    %c0_149 = arith.constant 0 : index
    %214 = vector.load %arg27[%c0_148, %c0_149] : memref<1x256xf32, #tpu.memory_space<vmem>>, vector<1x256xf32>
    %215 = vector.broadcast %214 : vector<1x256xf32> to vector<4x256xf32>
    %216 = arith.addf %213, %215 : vector<4x256xf32>
    %cst_150 = arith.constant 0.000000e+00 : f32
    %217 = vector.broadcast %cst_150 : f32 to vector<4x256xf32>
    %218 = arith.maximumf %216, %217 : vector<4x256xf32>
    %cst_151 = arith.constant dense<0.000000e+00> : vector<6x256xf32>
    %219 = tpu.matmul %196, %218, %cst_151 {dimension_numbers = #tpu.dot_dimension_numbers<[1], [0], [0], [1], [0, 0, 1, 1], [], []>} : vector<6x4xf32>, vector<4x256xf32>, vector<6x256xf32> -> vector<6x256xf32>
    %220 = vector.extract_strided_slice %219 {offsets = [0, 0], sizes = [4, 256], strides = [1, 1]} : vector<6x256xf32> to vector<4x256xf32>
    %221 = arith.truncf %220 : vector<4x256xf32> to vector<4x256xbf16>
    %c0_152 = arith.constant 0 : index
    %c0_153 = arith.constant 0 : index
    %c0_154 = arith.constant 0 : index
    %222 = vector.load %arg28[%c0_152, %c0_153, %c0_154] : memref<3x256x256xbf16, #tpu.memory_space<vmem>>, vector<1x256x256xbf16>
    %223 = vector.shape_cast %222 : vector<1x256x256xbf16> to vector<256x256xbf16>
    %cst_155 = arith.constant dense<0.000000e+00> : vector<4x256xf32>
    %224 = tpu.matmul %221, %223, %cst_155 {dimension_numbers = #tpu.dot_dimension_numbers<[1], [0], [0], [1], [0, 0, 1, 1], [], []>} : vector<4x256xbf16>, vector<256x256xbf16>, vector<4x256xf32> -> vector<4x256xf32>
    %225 = vector.extract_strided_slice %219 {offsets = [1, 0], sizes = [4, 256], strides = [1, 1]} : vector<6x256xf32> to vector<4x256xf32>
    %226 = arith.truncf %225 : vector<4x256xf32> to vector<4x256xbf16>
    %c1_156 = arith.constant 1 : index
    %c0_157 = arith.constant 0 : index
    %c0_158 = arith.constant 0 : index
    %227 = vector.load %arg28[%c1_156, %c0_157, %c0_158] : memref<3x256x256xbf16, #tpu.memory_space<vmem>>, vector<1x256x256xbf16>
    %228 = vector.shape_cast %227 : vector<1x256x256xbf16> to vector<256x256xbf16>
    %cst_159 = arith.constant dense<0.000000e+00> : vector<4x256xf32>
    %229 = tpu.matmul %226, %228, %cst_159 {dimension_numbers = #tpu.dot_dimension_numbers<[1], [0], [0], [1], [0, 0, 1, 1], [], []>} : vector<4x256xbf16>, vector<256x256xbf16>, vector<4x256xf32> -> vector<4x256xf32>
    %230 = arith.addf %224, %229 : vector<4x256xf32>
    %231 = vector.extract_strided_slice %219 {offsets = [2, 0], sizes = [4, 256], strides = [1, 1]} : vector<6x256xf32> to vector<4x256xf32>
    %232 = arith.truncf %231 : vector<4x256xf32> to vector<4x256xbf16>
    %c2_160 = arith.constant 2 : index
    %c0_161 = arith.constant 0 : index
    %c0_162 = arith.constant 0 : index
    %233 = vector.load %arg28[%c2_160, %c0_161, %c0_162] : memref<3x256x256xbf16, #tpu.memory_space<vmem>>, vector<1x256x256xbf16>
    %234 = vector.shape_cast %233 : vector<1x256x256xbf16> to vector<256x256xbf16>
    %cst_163 = arith.constant dense<0.000000e+00> : vector<4x256xf32>
    %235 = tpu.matmul %232, %234, %cst_163 {dimension_numbers = #tpu.dot_dimension_numbers<[1], [0], [0], [1], [0, 0, 1, 1], [], []>} : vector<4x256xbf16>, vector<256x256xbf16>, vector<4x256xf32> -> vector<4x256xf32>
    %236 = arith.addf %230, %235 : vector<4x256xf32>
    %c0_164 = arith.constant 0 : index
    %c0_165 = arith.constant 0 : index
    %237 = vector.load %arg29[%c0_164, %c0_165] : memref<1x256xf32, #tpu.memory_space<vmem>>, vector<1x256xf32>
    %238 = vector.broadcast %237 : vector<1x256xf32> to vector<4x256xf32>
    %239 = arith.addf %236, %238 : vector<4x256xf32>
    %cst_166 = arith.constant 0.000000e+00 : f32
    %240 = vector.broadcast %cst_166 : f32 to vector<4x256xf32>
    %241 = arith.maximumf %239, %240 : vector<4x256xf32>
    %cst_167 = arith.constant dense<0.000000e+00> : vector<6x256xf32>
    %242 = tpu.matmul %196, %241, %cst_167 {dimension_numbers = #tpu.dot_dimension_numbers<[1], [0], [0], [1], [0, 0, 1, 1], [], []>} : vector<6x4xf32>, vector<4x256xf32>, vector<6x256xf32> -> vector<6x256xf32>
    %243 = vector.extract_strided_slice %242 {offsets = [0, 0], sizes = [4, 256], strides = [1, 1]} : vector<6x256xf32> to vector<4x256xf32>
    %244 = arith.truncf %243 : vector<4x256xf32> to vector<4x256xbf16>
    %c0_168 = arith.constant 0 : index
    %c0_169 = arith.constant 0 : index
    %c0_170 = arith.constant 0 : index
    %245 = vector.load %arg30[%c0_168, %c0_169, %c0_170] : memref<3x256x256xbf16, #tpu.memory_space<vmem>>, vector<1x256x256xbf16>
    %246 = vector.shape_cast %245 : vector<1x256x256xbf16> to vector<256x256xbf16>
    %cst_171 = arith.constant dense<0.000000e+00> : vector<4x256xf32>
    %247 = tpu.matmul %244, %246, %cst_171 {dimension_numbers = #tpu.dot_dimension_numbers<[1], [0], [0], [1], [0, 0, 1, 1], [], []>} : vector<4x256xbf16>, vector<256x256xbf16>, vector<4x256xf32> -> vector<4x256xf32>
    %248 = vector.extract_strided_slice %242 {offsets = [1, 0], sizes = [4, 256], strides = [1, 1]} : vector<6x256xf32> to vector<4x256xf32>
    %249 = arith.truncf %248 : vector<4x256xf32> to vector<4x256xbf16>
    %c1_172 = arith.constant 1 : index
    %c0_173 = arith.constant 0 : index
    %c0_174 = arith.constant 0 : index
    %250 = vector.load %arg30[%c1_172, %c0_173, %c0_174] : memref<3x256x256xbf16, #tpu.memory_space<vmem>>, vector<1x256x256xbf16>
    %251 = vector.shape_cast %250 : vector<1x256x256xbf16> to vector<256x256xbf16>
    %cst_175 = arith.constant dense<0.000000e+00> : vector<4x256xf32>
    %252 = tpu.matmul %249, %251, %cst_175 {dimension_numbers = #tpu.dot_dimension_numbers<[1], [0], [0], [1], [0, 0, 1, 1], [], []>} : vector<4x256xbf16>, vector<256x256xbf16>, vector<4x256xf32> -> vector<4x256xf32>
    %253 = arith.addf %247, %252 : vector<4x256xf32>
    %254 = vector.extract_strided_slice %242 {offsets = [2, 0], sizes = [4, 256], strides = [1, 1]} : vector<6x256xf32> to vector<4x256xf32>
    %255 = arith.truncf %254 : vector<4x256xf32> to vector<4x256xbf16>
    %c2_176 = arith.constant 2 : index
    %c0_177 = arith.constant 0 : index
    %c0_178 = arith.constant 0 : index
    %256 = vector.load %arg30[%c2_176, %c0_177, %c0_178] : memref<3x256x256xbf16, #tpu.memory_space<vmem>>, vector<1x256x256xbf16>
    %257 = vector.shape_cast %256 : vector<1x256x256xbf16> to vector<256x256xbf16>
    %cst_179 = arith.constant dense<0.000000e+00> : vector<4x256xf32>
    %258 = tpu.matmul %255, %257, %cst_179 {dimension_numbers = #tpu.dot_dimension_numbers<[1], [0], [0], [1], [0, 0, 1, 1], [], []>} : vector<4x256xbf16>, vector<256x256xbf16>, vector<4x256xf32> -> vector<4x256xf32>
    %259 = arith.addf %253, %258 : vector<4x256xf32>
    %c0_180 = arith.constant 0 : index
    %c0_181 = arith.constant 0 : index
    %260 = vector.load %arg31[%c0_180, %c0_181] : memref<1x256xf32, #tpu.memory_space<vmem>>, vector<1x256xf32>
    %261 = vector.broadcast %260 : vector<1x256xf32> to vector<4x256xf32>
    %262 = arith.addf %259, %261 : vector<4x256xf32>
    %cst_182 = arith.constant 0.000000e+00 : f32
    %263 = vector.broadcast %cst_182 : f32 to vector<4x256xf32>
    %264 = arith.maximumf %262, %263 : vector<4x256xf32>
    %cst_183 = arith.constant dense<0.000000e+00> : vector<6x256xf32>
    %265 = tpu.matmul %196, %264, %cst_183 {dimension_numbers = #tpu.dot_dimension_numbers<[1], [0], [0], [1], [0, 0, 1, 1], [], []>} : vector<6x4xf32>, vector<4x256xf32>, vector<6x256xf32> -> vector<6x256xf32>
    %266 = vector.extract_strided_slice %265 {offsets = [0, 0], sizes = [6, 192], strides = [1, 1]} : vector<6x256xf32> to vector<6x192xf32>
    %267 = vector.extract_strided_slice %265 {offsets = [0, 64], sizes = [6, 192], strides = [1, 1]} : vector<6x256xf32> to vector<6x192xf32>
    %268 = arith.maximumf %266, %267 : vector<6x192xf32>
    %c0_184 = arith.constant 0 : index
    %c0_185 = arith.constant 0 : index
    %269 = vector.load %arg32[%c0_184, %c0_185] : memref<192x128xf32, #tpu.memory_space<vmem>>, vector<192x128xf32>
    %cst_186 = arith.constant dense<0.000000e+00> : vector<6x128xf32>
    %270 = tpu.matmul %268, %269, %cst_186 {dimension_numbers = #tpu.dot_dimension_numbers<[1], [0], [0], [1], [0, 0, 1, 1], [], []>} : vector<6x192xf32>, vector<192x128xf32>, vector<6x128xf32> -> vector<6x128xf32>
    %271 = vector.extract_strided_slice %270 {offsets = [0, 0], sizes = [5, 128], strides = [1, 1]} : vector<6x128xf32> to vector<5x128xf32>
    %272 = vector.extract_strided_slice %270 {offsets = [1, 0], sizes = [5, 128], strides = [1, 1]} : vector<6x128xf32> to vector<5x128xf32>
    %273 = arith.maximumf %271, %272 : vector<5x128xf32>
    %c0_187 = arith.constant 0 : index
    %c0_188 = arith.constant 0 : index
    %274 = vector.load %arg33[%c0_187, %c0_188] : memref<4x5xf32, #tpu.memory_space<vmem>>, vector<4x5xf32>
    %cst_189 = arith.constant dense<0.000000e+00> : vector<4x128xf32>
    %275 = tpu.matmul %274, %273, %cst_189 {dimension_numbers = #tpu.dot_dimension_numbers<[1], [0], [0], [1], [0, 0, 1, 1], [], []>} : vector<4x5xf32>, vector<5x128xf32>, vector<4x128xf32> -> vector<4x128xf32>
    %c0_190 = arith.constant 0 : index
    %c0_191 = arith.constant 0 : index
    %276 = vector.load %arg34[%c0_190, %c0_191] : memref<4x2xf32, #tpu.memory_space<vmem>>, vector<4x2xf32>
    %277 = vector.extract_strided_slice %275 {offsets = [0, 0], sizes = [2, 128], strides = [1, 1]} : vector<4x128xf32> to vector<2x128xf32>
    %278 = arith.truncf %277 : vector<2x128xf32> to vector<2x128xbf16>
    %c0_192 = arith.constant 0 : index
    %c0_193 = arith.constant 0 : index
    %c0_194 = arith.constant 0 : index
    %279 = vector.load %arg35[%c0_192, %c0_193, %c0_194] : memref<3x128x128xbf16, #tpu.memory_space<vmem>>, vector<1x128x128xbf16>
    %280 = vector.shape_cast %279 : vector<1x128x128xbf16> to vector<128x128xbf16>
    %cst_195 = arith.constant dense<0.000000e+00> : vector<2x128xf32>
    %281 = tpu.matmul %278, %280, %cst_195 {dimension_numbers = #tpu.dot_dimension_numbers<[1], [0], [0], [1], [0, 0, 1, 1], [], []>} : vector<2x128xbf16>, vector<128x128xbf16>, vector<2x128xf32> -> vector<2x128xf32>
    %282 = vector.extract_strided_slice %275 {offsets = [1, 0], sizes = [2, 128], strides = [1, 1]} : vector<4x128xf32> to vector<2x128xf32>
    %283 = arith.truncf %282 : vector<2x128xf32> to vector<2x128xbf16>
    %c1_196 = arith.constant 1 : index
    %c0_197 = arith.constant 0 : index
    %c0_198 = arith.constant 0 : index
    %284 = vector.load %arg35[%c1_196, %c0_197, %c0_198] : memref<3x128x128xbf16, #tpu.memory_space<vmem>>, vector<1x128x128xbf16>
    %285 = vector.shape_cast %284 : vector<1x128x128xbf16> to vector<128x128xbf16>
    %cst_199 = arith.constant dense<0.000000e+00> : vector<2x128xf32>
    %286 = tpu.matmul %283, %285, %cst_199 {dimension_numbers = #tpu.dot_dimension_numbers<[1], [0], [0], [1], [0, 0, 1, 1], [], []>} : vector<2x128xbf16>, vector<128x128xbf16>, vector<2x128xf32> -> vector<2x128xf32>
    %287 = arith.addf %281, %286 : vector<2x128xf32>
    %288 = vector.extract_strided_slice %275 {offsets = [2, 0], sizes = [2, 128], strides = [1, 1]} : vector<4x128xf32> to vector<2x128xf32>
    %289 = arith.truncf %288 : vector<2x128xf32> to vector<2x128xbf16>
    %c2_200 = arith.constant 2 : index
    %c0_201 = arith.constant 0 : index
    %c0_202 = arith.constant 0 : index
    %290 = vector.load %arg35[%c2_200, %c0_201, %c0_202] : memref<3x128x128xbf16, #tpu.memory_space<vmem>>, vector<1x128x128xbf16>
    %291 = vector.shape_cast %290 : vector<1x128x128xbf16> to vector<128x128xbf16>
    %cst_203 = arith.constant dense<0.000000e+00> : vector<2x128xf32>
    %292 = tpu.matmul %289, %291, %cst_203 {dimension_numbers = #tpu.dot_dimension_numbers<[1], [0], [0], [1], [0, 0, 1, 1], [], []>} : vector<2x128xbf16>, vector<128x128xbf16>, vector<2x128xf32> -> vector<2x128xf32>
    %293 = arith.addf %287, %292 : vector<2x128xf32>
    %c0_204 = arith.constant 0 : index
    %c0_205 = arith.constant 0 : index
    %294 = vector.load %arg36[%c0_204, %c0_205] : memref<1x128xf32, #tpu.memory_space<vmem>>, vector<1x128xf32>
    %295 = vector.broadcast %294 : vector<1x128xf32> to vector<2x128xf32>
    %296 = arith.addf %293, %295 : vector<2x128xf32>
    %cst_206 = arith.constant 0.000000e+00 : f32
    %297 = vector.broadcast %cst_206 : f32 to vector<2x128xf32>
    %298 = arith.maximumf %296, %297 : vector<2x128xf32>
    %cst_207 = arith.constant dense<0.000000e+00> : vector<4x128xf32>
    %299 = tpu.matmul %276, %298, %cst_207 {dimension_numbers = #tpu.dot_dimension_numbers<[1], [0], [0], [1], [0, 0, 1, 1], [], []>} : vector<4x2xf32>, vector<2x128xf32>, vector<4x128xf32> -> vector<4x128xf32>
    %300 = vector.extract_strided_slice %299 {offsets = [0, 0], sizes = [2, 128], strides = [1, 1]} : vector<4x128xf32> to vector<2x128xf32>
    %301 = arith.truncf %300 : vector<2x128xf32> to vector<2x128xbf16>
    %c0_208 = arith.constant 0 : index
    %c0_209 = arith.constant 0 : index
    %c0_210 = arith.constant 0 : index
    %302 = vector.load %arg37[%c0_208, %c0_209, %c0_210] : memref<3x128x128xbf16, #tpu.memory_space<vmem>>, vector<1x128x128xbf16>
    %303 = vector.shape_cast %302 : vector<1x128x128xbf16> to vector<128x128xbf16>
    %cst_211 = arith.constant dense<0.000000e+00> : vector<2x128xf32>
    %304 = tpu.matmul %301, %303, %cst_211 {dimension_numbers = #tpu.dot_dimension_numbers<[1], [0], [0], [1], [0, 0, 1, 1], [], []>} : vector<2x128xbf16>, vector<128x128xbf16>, vector<2x128xf32> -> vector<2x128xf32>
    %305 = vector.extract_strided_slice %299 {offsets = [1, 0], sizes = [2, 128], strides = [1, 1]} : vector<4x128xf32> to vector<2x128xf32>
    %306 = arith.truncf %305 : vector<2x128xf32> to vector<2x128xbf16>
    %c1_212 = arith.constant 1 : index
    %c0_213 = arith.constant 0 : index
    %c0_214 = arith.constant 0 : index
    %307 = vector.load %arg37[%c1_212, %c0_213, %c0_214] : memref<3x128x128xbf16, #tpu.memory_space<vmem>>, vector<1x128x128xbf16>
    %308 = vector.shape_cast %307 : vector<1x128x128xbf16> to vector<128x128xbf16>
    %cst_215 = arith.constant dense<0.000000e+00> : vector<2x128xf32>
    %309 = tpu.matmul %306, %308, %cst_215 {dimension_numbers = #tpu.dot_dimension_numbers<[1], [0], [0], [1], [0, 0, 1, 1], [], []>} : vector<2x128xbf16>, vector<128x128xbf16>, vector<2x128xf32> -> vector<2x128xf32>
    %310 = arith.addf %304, %309 : vector<2x128xf32>
    %311 = vector.extract_strided_slice %299 {offsets = [2, 0], sizes = [2, 128], strides = [1, 1]} : vector<4x128xf32> to vector<2x128xf32>
    %312 = arith.truncf %311 : vector<2x128xf32> to vector<2x128xbf16>
    %c2_216 = arith.constant 2 : index
    %c0_217 = arith.constant 0 : index
    %c0_218 = arith.constant 0 : index
    %313 = vector.load %arg37[%c2_216, %c0_217, %c0_218] : memref<3x128x128xbf16, #tpu.memory_space<vmem>>, vector<1x128x128xbf16>
    %314 = vector.shape_cast %313 : vector<1x128x128xbf16> to vector<128x128xbf16>
    %cst_219 = arith.constant dense<0.000000e+00> : vector<2x128xf32>
    %315 = tpu.matmul %312, %314, %cst_219 {dimension_numbers = #tpu.dot_dimension_numbers<[1], [0], [0], [1], [0, 0, 1, 1], [], []>} : vector<2x128xbf16>, vector<128x128xbf16>, vector<2x128xf32> -> vector<2x128xf32>
    %316 = arith.addf %310, %315 : vector<2x128xf32>
    %c0_220 = arith.constant 0 : index
    %c0_221 = arith.constant 0 : index
    %317 = vector.load %arg38[%c0_220, %c0_221] : memref<1x128xf32, #tpu.memory_space<vmem>>, vector<1x128xf32>
    %318 = vector.broadcast %317 : vector<1x128xf32> to vector<2x128xf32>
    %319 = arith.addf %316, %318 : vector<2x128xf32>
    %cst_222 = arith.constant 0.000000e+00 : f32
    %320 = vector.broadcast %cst_222 : f32 to vector<2x128xf32>
    %321 = arith.maximumf %319, %320 : vector<2x128xf32>
    %cst_223 = arith.constant dense<0.000000e+00> : vector<4x128xf32>
    %322 = tpu.matmul %276, %321, %cst_223 {dimension_numbers = #tpu.dot_dimension_numbers<[1], [0], [0], [1], [0, 0, 1, 1], [], []>} : vector<4x2xf32>, vector<2x128xf32>, vector<4x128xf32> -> vector<4x128xf32>
    %323 = vector.extract_strided_slice %322 {offsets = [0, 0], sizes = [2, 128], strides = [1, 1]} : vector<4x128xf32> to vector<2x128xf32>
    %324 = arith.truncf %323 : vector<2x128xf32> to vector<2x128xbf16>
    %c0_224 = arith.constant 0 : index
    %c0_225 = arith.constant 0 : index
    %c0_226 = arith.constant 0 : index
    %325 = vector.load %arg39[%c0_224, %c0_225, %c0_226] : memref<3x128x128xbf16, #tpu.memory_space<vmem>>, vector<1x128x128xbf16>
    %326 = vector.shape_cast %325 : vector<1x128x128xbf16> to vector<128x128xbf16>
    %cst_227 = arith.constant dense<0.000000e+00> : vector<2x128xf32>
    %327 = tpu.matmul %324, %326, %cst_227 {dimension_numbers = #tpu.dot_dimension_numbers<[1], [0], [0], [1], [0, 0, 1, 1], [], []>} : vector<2x128xbf16>, vector<128x128xbf16>, vector<2x128xf32> -> vector<2x128xf32>
    %328 = vector.extract_strided_slice %322 {offsets = [1, 0], sizes = [2, 128], strides = [1, 1]} : vector<4x128xf32> to vector<2x128xf32>
    %329 = arith.truncf %328 : vector<2x128xf32> to vector<2x128xbf16>
    %c1_228 = arith.constant 1 : index
    %c0_229 = arith.constant 0 : index
    %c0_230 = arith.constant 0 : index
    %330 = vector.load %arg39[%c1_228, %c0_229, %c0_230] : memref<3x128x128xbf16, #tpu.memory_space<vmem>>, vector<1x128x128xbf16>
    %331 = vector.shape_cast %330 : vector<1x128x128xbf16> to vector<128x128xbf16>
    %cst_231 = arith.constant dense<0.000000e+00> : vector<2x128xf32>
    %332 = tpu.matmul %329, %331, %cst_231 {dimension_numbers = #tpu.dot_dimension_numbers<[1], [0], [0], [1], [0, 0, 1, 1], [], []>} : vector<2x128xbf16>, vector<128x128xbf16>, vector<2x128xf32> -> vector<2x128xf32>
    %333 = arith.addf %327, %332 : vector<2x128xf32>
    %334 = vector.extract_strided_slice %322 {offsets = [2, 0], sizes = [2, 128], strides = [1, 1]} : vector<4x128xf32> to vector<2x128xf32>
    %335 = arith.truncf %334 : vector<2x128xf32> to vector<2x128xbf16>
    %c2_232 = arith.constant 2 : index
    %c0_233 = arith.constant 0 : index
    %c0_234 = arith.constant 0 : index
    %336 = vector.load %arg39[%c2_232, %c0_233, %c0_234] : memref<3x128x128xbf16, #tpu.memory_space<vmem>>, vector<1x128x128xbf16>
    %337 = vector.shape_cast %336 : vector<1x128x128xbf16> to vector<128x128xbf16>
    %cst_235 = arith.constant dense<0.000000e+00> : vector<2x128xf32>
    %338 = tpu.matmul %335, %337, %cst_235 {dimension_numbers = #tpu.dot_dimension_numbers<[1], [0], [0], [1], [0, 0, 1, 1], [], []>} : vector<2x128xbf16>, vector<128x128xbf16>, vector<2x128xf32> -> vector<2x128xf32>
    %339 = arith.addf %333, %338 : vector<2x128xf32>
    %c0_236 = arith.constant 0 : index
    %c0_237 = arith.constant 0 : index
    %340 = vector.load %arg40[%c0_236, %c0_237] : memref<1x128xf32, #tpu.memory_space<vmem>>, vector<1x128xf32>
    %341 = vector.broadcast %340 : vector<1x128xf32> to vector<2x128xf32>
    %342 = arith.addf %339, %341 : vector<2x128xf32>
    %cst_238 = arith.constant 0.000000e+00 : f32
    %343 = vector.broadcast %cst_238 : f32 to vector<2x128xf32>
    %344 = arith.maximumf %342, %343 : vector<2x128xf32>
    %cst_239 = arith.constant dense<0.000000e+00> : vector<4x128xf32>
    %345 = tpu.matmul %276, %344, %cst_239 {dimension_numbers = #tpu.dot_dimension_numbers<[1], [0], [0], [1], [0, 0, 1, 1], [], []>} : vector<4x2xf32>, vector<2x128xf32>, vector<4x128xf32> -> vector<4x128xf32>
    %346 = vector.extract_strided_slice %345 {offsets = [0, 0], sizes = [4, 64], strides = [1, 1]} : vector<4x128xf32> to vector<4x64xf32>
    %347 = vector.extract_strided_slice %345 {offsets = [0, 64], sizes = [4, 64], strides = [1, 1]} : vector<4x128xf32> to vector<4x64xf32>
    %348 = arith.maximumf %346, %347 : vector<4x64xf32>
    %c0_240 = arith.constant 0 : index
    %c0_241 = arith.constant 0 : index
    %349 = vector.load %arg41[%c0_240, %c0_241] : memref<64x64xf32, #tpu.memory_space<vmem>>, vector<64x64xf32>
    %cst_242 = arith.constant dense<0.000000e+00> : vector<4x64xf32>
    %350 = tpu.matmul %348, %349, %cst_242 {dimension_numbers = #tpu.dot_dimension_numbers<[1], [0], [0], [1], [0, 0, 1, 1], [], []>} : vector<4x64xf32>, vector<64x64xf32>, vector<4x64xf32> -> vector<4x64xf32>
    %351 = vector.extract_strided_slice %350 {offsets = [0, 0], sizes = [3, 64], strides = [1, 1]} : vector<4x64xf32> to vector<3x64xf32>
    %352 = vector.extract_strided_slice %350 {offsets = [1, 0], sizes = [3, 64], strides = [1, 1]} : vector<4x64xf32> to vector<3x64xf32>
    %353 = arith.maximumf %351, %352 : vector<3x64xf32>
    %c0_243 = arith.constant 0 : index
    %c0_244 = arith.constant 0 : index
    %354 = vector.load %arg42[%c0_243, %c0_244] : memref<1x3xf32, #tpu.memory_space<vmem>>, vector<1x3xf32>
    %cst_245 = arith.constant dense<0.000000e+00> : vector<1x64xf32>
    %355 = tpu.matmul %354, %353, %cst_245 {dimension_numbers = #tpu.dot_dimension_numbers<[1], [0], [0], [1], [0, 0, 1, 1], [], []>} : vector<1x3xf32>, vector<3x64xf32>, vector<1x64xf32> -> vector<1x64xf32>
    %c0_246 = arith.constant 0 : index
    %c0_247 = arith.constant 0 : index
    %356 = vector.load %arg43[%c0_246, %c0_247] : memref<64x64xf32, #tpu.memory_space<vmem>>, vector<64x64xf32>
    %c0_248 = arith.constant 0 : index
    %c0_249 = arith.constant 0 : index
    %357 = vector.load %arg44[%c0_248, %c0_249] : memref<1x64xf32, #tpu.memory_space<vmem>>, vector<1x64xf32>
    %c0_250 = arith.constant 0 : index
    %c0_251 = arith.constant 0 : index
    %358 = vector.load %arg45[%c0_250, %c0_251] : memref<64x32xf32, #tpu.memory_space<vmem>>, vector<64x32xf32>
    %c0_252 = arith.constant 0 : index
    %c0_253 = arith.constant 0 : index
    %359 = vector.load %arg46[%c0_252, %c0_253] : memref<1x32xf32, #tpu.memory_space<vmem>>, vector<1x32xf32>
    %c0_254 = arith.constant 0 : index
    %c0_255 = arith.constant 0 : index
    %360 = vector.load %arg47[%c0_254, %c0_255] : memref<32x10xf32, #tpu.memory_space<vmem>>, vector<32x10xf32>
    %c0_256 = arith.constant 0 : index
    %c0_257 = arith.constant 0 : index
    %361 = vector.load %arg48[%c0_256, %c0_257] : memref<1x10xf32, #tpu.memory_space<vmem>>, vector<1x10xf32>
    %cst_258 = arith.constant dense<0.000000e+00> : vector<1x64xf32>
    %362 = tpu.matmul %355, %356, %cst_258 {dimension_numbers = #tpu.dot_dimension_numbers<[1], [0], [0], [1], [0, 0, 1, 1], [], []>} : vector<1x64xf32>, vector<64x64xf32>, vector<1x64xf32> -> vector<1x64xf32>
    %363 = arith.addf %362, %357 : vector<1x64xf32>
    %cst_259 = arith.constant 0.000000e+00 : f32
    %364 = vector.broadcast %cst_259 : f32 to vector<1x64xf32>
    %365 = arith.maximumf %363, %364 : vector<1x64xf32>
    %cst_260 = arith.constant dense<0.000000e+00> : vector<1x32xf32>
    %366 = tpu.matmul %365, %358, %cst_260 {dimension_numbers = #tpu.dot_dimension_numbers<[1], [0], [0], [1], [0, 0, 1, 1], [], []>} : vector<1x64xf32>, vector<64x32xf32>, vector<1x32xf32> -> vector<1x32xf32>
    %367 = arith.addf %366, %359 : vector<1x32xf32>
    %cst_261 = arith.constant 0.000000e+00 : f32
    %368 = vector.broadcast %cst_261 : f32 to vector<1x32xf32>
    %369 = arith.maximumf %367, %368 : vector<1x32xf32>
    %cst_262 = arith.constant dense<0.000000e+00> : vector<1x10xf32>
    %370 = tpu.matmul %369, %360, %cst_262 {dimension_numbers = #tpu.dot_dimension_numbers<[1], [0], [0], [1], [0, 0, 1, 1], [], []>} : vector<1x32xf32>, vector<32x10xf32>, vector<1x10xf32> -> vector<1x10xf32>
    %371 = arith.addf %370, %361 : vector<1x10xf32>
    %cst_263 = arith.constant dense<0xFF800000> : vector<1xf32>
    %372 = vector.multi_reduction <maximumf>, %371, %cst_263 [1] : vector<1x10xf32> to vector<1xf32>
    %373 = vector.shape_cast %372 : vector<1xf32> to vector<1x1xf32>
    %374 = vector.broadcast %373 : vector<1x1xf32> to vector<1x10xf32>
    %375 = arith.subf %371, %374 : vector<1x10xf32>
    %376 = math.exp %375 : vector<1x10xf32>
    %cst_264 = arith.constant dense<0.000000e+00> : vector<1xf32>
    %377 = vector.multi_reduction <add>, %376, %cst_264 [1] : vector<1x10xf32> to vector<1xf32>
    %378 = vector.shape_cast %377 : vector<1xf32> to vector<1x1xf32>
    %379 = tpu.reciprocal %378 {approx = true} : vector<1x1xf32> -> vector<1x1xf32>
    %380 = vector.broadcast %379 : vector<1x1xf32> to vector<1x10xf32>
    %381 = arith.mulf %376, %380 : vector<1x10xf32>
    %382 = vector.shape_cast %381 : vector<1x10xf32> to vector<1x10xf32>
    %383 = vector.broadcast %382 : vector<1x10xf32> to vector<8x10xf32>
    %c0_265 = arith.constant 0 : index
    %c0_266 = arith.constant 0 : index
    %384 = vector.load %arg49[%c0_265, %c0_266] : memref<8x10xf32, #tpu.memory_space<vmem>>, vector<8x10xf32>
    tpu.vector_store %arg49[%c0_265, %c0_266], %383 {strides = array<i32>} : memref<8x10xf32, #tpu.memory_space<vmem>>, vector<8x10xf32>,
    return
  }
  func.func @transform_0(%arg0: i32) -> (i32, i32) {
    %c0_i32 = arith.constant 0 : i32
    %c0_i32_0 = arith.constant 0 : i32
    return %arg0, %c0_i32 : i32, i32
  }
  func.func @transform_1(%arg0: i32) -> (i32, i32) {
    %c0_i32 = arith.constant 0 : i32
    %c0_i32_0 = arith.constant 0 : i32
    %c0_i32_1 = arith.constant 0 : i32
    return %c0_i32, %c0_i32_0 : i32, i32
  }
  func.func @transform_2(%arg0: i32) -> (i32, i32, i32) {
    %c0_i32 = arith.constant 0 : i32
    %c0_i32_0 = arith.constant 0 : i32
    %c0_i32_1 = arith.constant 0 : i32
    %c0_i32_2 = arith.constant 0 : i32
    return %c0_i32, %c0_i32_0, %c0_i32_1 : i32, i32, i32
  }
  func.func @transform_3(%arg0: i32) -> (i32, i32) {
    %c0_i32 = arith.constant 0 : i32
    %c0_i32_0 = arith.constant 0 : i32
    %c0_i32_1 = arith.constant 0 : i32
    return %c0_i32, %c0_i32_0 : i32, i32
  }
  func.func @transform_4(%arg0: i32) -> (i32, i32, i32) {
    %c0_i32 = arith.constant 0 : i32
    %c0_i32_0 = arith.constant 0 : i32
    %c0_i32_1 = arith.constant 0 : i32
    %c0_i32_2 = arith.constant 0 : i32
    return %c0_i32, %c0_i32_0, %c0_i32_1 : i32, i32, i32
  }
  func.func @transform_5(%arg0: i32) -> (i32, i32) {
    %c0_i32 = arith.constant 0 : i32
    %c0_i32_0 = arith.constant 0 : i32
    %c0_i32_1 = arith.constant 0 : i32
    return %c0_i32, %c0_i32_0 : i32, i32
  }
  func.func @transform_6(%arg0: i32) -> (i32, i32) {
    %c0_i32 = arith.constant 0 : i32
    %c0_i32_0 = arith.constant 0 : i32
    %c0_i32_1 = arith.constant 0 : i32
    return %c0_i32, %c0_i32_0 : i32, i32
  }
  func.func @transform_7(%arg0: i32) -> (i32, i32) {
    %c0_i32 = arith.constant 0 : i32
    %c0_i32_0 = arith.constant 0 : i32
    %c0_i32_1 = arith.constant 0 : i32
    return %c0_i32, %c0_i32_0 : i32, i32
  }
  func.func @transform_8(%arg0: i32) -> (i32, i32) {
    %c0_i32 = arith.constant 0 : i32
    %c0_i32_0 = arith.constant 0 : i32
    %c0_i32_1 = arith.constant 0 : i32
    return %c0_i32, %c0_i32_0 : i32, i32
  }
  func.func @transform_9(%arg0: i32) -> (i32, i32, i32) {
    %c0_i32 = arith.constant 0 : i32
    %c0_i32_0 = arith.constant 0 : i32
    %c0_i32_1 = arith.constant 0 : i32
    %c0_i32_2 = arith.constant 0 : i32
    return %c0_i32, %c0_i32_0, %c0_i32_1 : i32, i32, i32
  }
  func.func @transform_10(%arg0: i32) -> (i32, i32) {
    %c0_i32 = arith.constant 0 : i32
    %c0_i32_0 = arith.constant 0 : i32
    %c0_i32_1 = arith.constant 0 : i32
    return %c0_i32, %c0_i32_0 : i32, i32
  }
  func.func @transform_11(%arg0: i32) -> (i32, i32, i32) {
    %c0_i32 = arith.constant 0 : i32
    %c0_i32_0 = arith.constant 0 : i32
    %c0_i32_1 = arith.constant 0 : i32
    %c0_i32_2 = arith.constant 0 : i32
    return %c0_i32, %c0_i32_0, %c0_i32_1 : i32, i32, i32
  }
  func.func @transform_12(%arg0: i32) -> (i32, i32) {
    %c0_i32 = arith.constant 0 : i32
    %c0_i32_0 = arith.constant 0 : i32
    %c0_i32_1 = arith.constant 0 : i32
    return %c0_i32, %c0_i32_0 : i32, i32
  }
  func.func @transform_13(%arg0: i32) -> (i32, i32) {
    %c0_i32 = arith.constant 0 : i32
    %c0_i32_0 = arith.constant 0 : i32
    %c0_i32_1 = arith.constant 0 : i32
    return %c0_i32, %c0_i32_0 : i32, i32
  }
  func.func @transform_14(%arg0: i32) -> (i32, i32) {
    %c0_i32 = arith.constant 0 : i32
    %c0_i32_0 = arith.constant 0 : i32
    %c0_i32_1 = arith.constant 0 : i32
    return %c0_i32, %c0_i32_0 : i32, i32
  }
  func.func @transform_15(%arg0: i32) -> (i32, i32) {
    %c0_i32 = arith.constant 0 : i32
    %c0_i32_0 = arith.constant 0 : i32
    %c0_i32_1 = arith.constant 0 : i32
    return %c0_i32, %c0_i32_0 : i32, i32
  }
  func.func @transform_16(%arg0: i32) -> (i32, i32, i32) {
    %c0_i32 = arith.constant 0 : i32
    %c0_i32_0 = arith.constant 0 : i32
    %c0_i32_1 = arith.constant 0 : i32
    %c0_i32_2 = arith.constant 0 : i32
    return %c0_i32, %c0_i32_0, %c0_i32_1 : i32, i32, i32
  }
  func.func @transform_17(%arg0: i32) -> (i32, i32) {
    %c0_i32 = arith.constant 0 : i32
    %c0_i32_0 = arith.constant 0 : i32
    %c0_i32_1 = arith.constant 0 : i32
    return %c0_i32, %c0_i32_0 : i32, i32
  }
  func.func @transform_18(%arg0: i32) -> (i32, i32, i32) {
    %c0_i32 = arith.constant 0 : i32
    %c0_i32_0 = arith.constant 0 : i32
    %c0_i32_1 = arith.constant 0 : i32
    %c0_i32_2 = arith.constant 0 : i32
    return %c0_i32, %c0_i32_0, %c0_i32_1 : i32, i32, i32
  }
  func.func @transform_19(%arg0: i32) -> (i32, i32) {
    %c0_i32 = arith.constant 0 : i32
    %c0_i32_0 = arith.constant 0 : i32
    %c0_i32_1 = arith.constant 0 : i32
    return %c0_i32, %c0_i32_0 : i32, i32
  }
  func.func @transform_20(%arg0: i32) -> (i32, i32, i32) {
    %c0_i32 = arith.constant 0 : i32
    %c0_i32_0 = arith.constant 0 : i32
    %c0_i32_1 = arith.constant 0 : i32
    %c0_i32_2 = arith.constant 0 : i32
    return %c0_i32, %c0_i32_0, %c0_i32_1 : i32, i32, i32
  }
  func.func @transform_21(%arg0: i32) -> (i32, i32) {
    %c0_i32 = arith.constant 0 : i32
    %c0_i32_0 = arith.constant 0 : i32
    %c0_i32_1 = arith.constant 0 : i32
    return %c0_i32, %c0_i32_0 : i32, i32
  }
  func.func @transform_22(%arg0: i32) -> (i32, i32) {
    %c0_i32 = arith.constant 0 : i32
    %c0_i32_0 = arith.constant 0 : i32
    %c0_i32_1 = arith.constant 0 : i32
    return %c0_i32, %c0_i32_0 : i32, i32
  }
  func.func @transform_23(%arg0: i32) -> (i32, i32) {
    %c0_i32 = arith.constant 0 : i32
    %c0_i32_0 = arith.constant 0 : i32
    %c0_i32_1 = arith.constant 0 : i32
    return %c0_i32, %c0_i32_0 : i32, i32
  }
  func.func @transform_24(%arg0: i32) -> (i32, i32) {
    %c0_i32 = arith.constant 0 : i32
    %c0_i32_0 = arith.constant 0 : i32
    %c0_i32_1 = arith.constant 0 : i32
    return %c0_i32, %c0_i32_0 : i32, i32
  }
  func.func @transform_25(%arg0: i32) -> (i32, i32, i32) {
    %c0_i32 = arith.constant 0 : i32
    %c0_i32_0 = arith.constant 0 : i32
    %c0_i32_1 = arith.constant 0 : i32
    %c0_i32_2 = arith.constant 0 : i32
    return %c0_i32, %c0_i32_0, %c0_i32_1 : i32, i32, i32
  }
  func.func @transform_26(%arg0: i32) -> (i32, i32) {
    %c0_i32 = arith.constant 0 : i32
    %c0_i32_0 = arith.constant 0 : i32
    %c0_i32_1 = arith.constant 0 : i32
    return %c0_i32, %c0_i32_0 : i32, i32
  }
  func.func @transform_27(%arg0: i32) -> (i32, i32, i32) {
    %c0_i32 = arith.constant 0 : i32
    %c0_i32_0 = arith.constant 0 : i32
    %c0_i32_1 = arith.constant 0 : i32
    %c0_i32_2 = arith.constant 0 : i32
    return %c0_i32, %c0_i32_0, %c0_i32_1 : i32, i32, i32
  }
  func.func @transform_28(%arg0: i32) -> (i32, i32) {
    %c0_i32 = arith.constant 0 : i32
    %c0_i32_0 = arith.constant 0 : i32
    %c0_i32_1 = arith.constant 0 : i32
    return %c0_i32, %c0_i32_0 : i32, i32
  }
  func.func @transform_29(%arg0: i32) -> (i32, i32, i32) {
    %c0_i32 = arith.constant 0 : i32
    %c0_i32_0 = arith.constant 0 : i32
    %c0_i32_1 = arith.constant 0 : i32
    %c0_i32_2 = arith.constant 0 : i32
    return %c0_i32, %c0_i32_0, %c0_i32_1 : i32, i32, i32
  }
  func.func @transform_30(%arg0: i32) -> (i32, i32) {
    %c0_i32 = arith.constant 0 : i32
    %c0_i32_0 = arith.constant 0 : i32
    %c0_i32_1 = arith.constant 0 : i32
    return %c0_i32, %c0_i32_0 : i32, i32
  }
  func.func @transform_31(%arg0: i32) -> (i32, i32) {
    %c0_i32 = arith.constant 0 : i32
    %c0_i32_0 = arith.constant 0 : i32
    %c0_i32_1 = arith.constant 0 : i32
    return %c0_i32, %c0_i32_0 : i32, i32
  }
  func.func @transform_32(%arg0: i32) -> (i32, i32) {
    %c0_i32 = arith.constant 0 : i32
    %c0_i32_0 = arith.constant 0 : i32
    %c0_i32_1 = arith.constant 0 : i32
    return %c0_i32, %c0_i32_0 : i32, i32
  }
  func.func @transform_33(%arg0: i32) -> (i32, i32) {
    %c0_i32 = arith.constant 0 : i32
    %c0_i32_0 = arith.constant 0 : i32
    %c0_i32_1 = arith.constant 0 : i32
    return %c0_i32, %c0_i32_0 : i32, i32
  }
  func.func @transform_34(%arg0: i32) -> (i32, i32, i32) {
    %c0_i32 = arith.constant 0 : i32
    %c0_i32_0 = arith.constant 0 : i32
    %c0_i32_1 = arith.constant 0 : i32
    %c0_i32_2 = arith.constant 0 : i32
    return %c0_i32, %c0_i32_0, %c0_i32_1 : i32, i32, i32
  }
  func.func @transform_35(%arg0: i32) -> (i32, i32) {
    %c0_i32 = arith.constant 0 : i32
    %c0_i32_0 = arith.constant 0 : i32
    %c0_i32_1 = arith.constant 0 : i32
    return %c0_i32, %c0_i32_0 : i32, i32
  }
  func.func @transform_36(%arg0: i32) -> (i32, i32, i32) {
    %c0_i32 = arith.constant 0 : i32
    %c0_i32_0 = arith.constant 0 : i32
    %c0_i32_1 = arith.constant 0 : i32
    %c0_i32_2 = arith.constant 0 : i32
    return %c0_i32, %c0_i32_0, %c0_i32_1 : i32, i32, i32
  }
  func.func @transform_37(%arg0: i32) -> (i32, i32) {
    %c0_i32 = arith.constant 0 : i32
    %c0_i32_0 = arith.constant 0 : i32
    %c0_i32_1 = arith.constant 0 : i32
    return %c0_i32, %c0_i32_0 : i32, i32
  }
  func.func @transform_38(%arg0: i32) -> (i32, i32, i32) {
    %c0_i32 = arith.constant 0 : i32
    %c0_i32_0 = arith.constant 0 : i32
    %c0_i32_1 = arith.constant 0 : i32
    %c0_i32_2 = arith.constant 0 : i32
    return %c0_i32, %c0_i32_0, %c0_i32_1 : i32, i32, i32
  }
  func.func @transform_39(%arg0: i32) -> (i32, i32) {
    %c0_i32 = arith.constant 0 : i32
    %c0_i32_0 = arith.constant 0 : i32
    %c0_i32_1 = arith.constant 0 : i32
    return %c0_i32, %c0_i32_0 : i32, i32
  }
  func.func @transform_40(%arg0: i32) -> (i32, i32) {
    %c0_i32 = arith.constant 0 : i32
    %c0_i32_0 = arith.constant 0 : i32
    %c0_i32_1 = arith.constant 0 : i32
    return %c0_i32, %c0_i32_0 : i32, i32
  }
  func.func @transform_41(%arg0: i32) -> (i32, i32) {
    %c0_i32 = arith.constant 0 : i32
    %c0_i32_0 = arith.constant 0 : i32
    %c0_i32_1 = arith.constant 0 : i32
    return %c0_i32, %c0_i32_0 : i32, i32
  }
  func.func @transform_42(%arg0: i32) -> (i32, i32) {
    %c0_i32 = arith.constant 0 : i32
    %c0_i32_0 = arith.constant 0 : i32
    %c0_i32_1 = arith.constant 0 : i32
    return %c0_i32, %c0_i32_0 : i32, i32
  }
  func.func @transform_43(%arg0: i32) -> (i32, i32) {
    %c0_i32 = arith.constant 0 : i32
    %c0_i32_0 = arith.constant 0 : i32
    %c0_i32_1 = arith.constant 0 : i32
    return %c0_i32, %c0_i32_0 : i32, i32
  }
  func.func @transform_44(%arg0: i32) -> (i32, i32) {
    %c0_i32 = arith.constant 0 : i32
    %c0_i32_0 = arith.constant 0 : i32
    %c0_i32_1 = arith.constant 0 : i32
    return %c0_i32, %c0_i32_0 : i32, i32
  }
  func.func @transform_45(%arg0: i32) -> (i32, i32) {
    %c0_i32 = arith.constant 0 : i32
    %c0_i32_0 = arith.constant 0 : i32
    %c0_i32_1 = arith.constant 0 : i32
    return %c0_i32, %c0_i32_0 : i32, i32
  }
  func.func @transform_46(%arg0: i32) -> (i32, i32) {
    %c0_i32 = arith.constant 0 : i32
    %c0_i32_0 = arith.constant 0 : i32
    %c0_i32_1 = arith.constant 0 : i32
    return %c0_i32, %c0_i32_0 : i32, i32
  }
  func.func @transform_47(%arg0: i32) -> (i32, i32) {
    %c0_i32 = arith.constant 0 : i32
    %c0_i32_0 = arith.constant 0 : i32
    %c0_i32_1 = arith.constant 0 : i32
    return %c0_i32, %c0_i32_0 : i32, i32
  }
  func.func @transform_48(%arg0: i32) -> (i32, i32) {
    %c0_i32 = arith.constant 0 : i32
    %c0_i32_0 = arith.constant 0 : i32
    return %arg0, %c0_i32 : i32, i32
  }
}

</mosaic_0001>

<bundles_post_ra>
// kernel: my_vgg16_forward.1
= control target key start
LH: loop header
LB: loop body
LE: loop exit
PB: predicated region body
PF: predicated region fallthrough
CT: control target
= control target key end

     0   :  { %s16338_s6 = smov 1   ;;  %s16339_s10 = smov 2   ;;  %s17734_s0 = inlined_call_operand.smem [shape: u32[49], index: -1, kind: input, shape index: {}] }
   0x1   :  { %s16442_s5 = sld [smem:[%s17734_s0]]   ;;  %s16340_s14 = smov 3  }
   0x2   :  { %s16447_s9 = sld [smem:[%s17734_s0 + %s16338_s6]]   ;;  %s16341_s18 = smov 4  }
   0x3   :  { %s16452_s13 = sld [smem:[%s17734_s0 + %s16339_s10]]   ;;  %s16342_s22 = smov 5  }
   0x4   :  { %s16457_s17 = sld [smem:[%s17734_s0 + %s16340_s14]]   ;;  %s16343_s26 = smov 6  }
   0x5   :  { %s16462_s21 = sld [smem:[%s17734_s0 + %s16341_s18]]   ;;  %s16344_s30 = smov 7  }
   0x6   :  { %s16467_s25 = sld [smem:[%s17734_s0 + %s16342_s22]]   ;;  %s16345_s4 = smov 8  }
   0x7   :  { %17747 = sst [smem:[#allocation77_spill]] %s16442_s5  ;;  %s16346_s10 = smov 9  }
   0x8   :  { %17748 = sst [smem:[#allocation78_spill]] %s16447_s9  ;;  %s16347_s15 = smov 10  }
   0x9   :  { %17749 = sst [smem:[#allocation79_spill]] %s16452_s13  ;;  %s16348_s20 = smov 11  }
   0xa   :  { %17750 = sst [smem:[#allocation80_spill]] %s16457_s17  ;;  %s16350_s1 = smov 13  }
   0xb   :  { %17751 = sst [smem:[#allocation81_spill]] %s16462_s21  ;;  %s16351_s7 = smov 14  }
   0xc   :  { %s16472_s29 = sld [smem:[%s17734_s0 + %s16343_s26]]   ;;  %s16349_s26 = smov 12  }
   0xd   :  { %s16477_s3 = sld [smem:[%s17734_s0 + %s16344_s30]]   ;;  %s16353_s22 = smov 16  }
   0xe   :  { %s16482_s8 = sld [smem:[%s17734_s0 + %s16345_s4]]   ;;  %s16354_s28 = smov 17  }
   0xf   :  { %s16487_s14 = sld [smem:[%s17734_s0 + %s16346_s10]]  }
  0x10   :  { %s16492_s19 = sld [smem:[%s17734_s0 + %s16347_s15]]   ;;  %s16352_s15 = smov 15  }
  0x11   :  { %s16497_s24 = sld [smem:[%s17734_s0 + %s16348_s20]]  }
  0x12   :  { %17752 = sst [smem:[#allocation82_spill]] %s16472_s29 }
  0x13   :  { %s16502_s30 = sld [smem:[%s17734_s0 + %s16349_s26]]  }
  0x14   :  { %17753 = sst [smem:[#allocation83_spill]] %s16482_s8 }
  0x15   :  { %17754 = sst [smem:[#allocation84_spill]] %s16487_s14 }
  0x16   :  { %s16507_s6 = sld [smem:[%s17734_s0 + %s16350_s1]]  }
  0x17   :  { %17755 = sst [smem:[#allocation85_spill]] %s16497_s24 }
  0x18   :  { %s16512_s12 = sld [smem:[%s17734_s0 + %s16351_s7]]   ;;  %s16355_s7 = smov 18  }
  0x19   :  { %s16517_s20 = sld [smem:[%s17734_s0 + %s16352_s15]]   ;;  %s16356_s15 = smov 19  }
  0x1a   :  { %s16522_s27 = sld [smem:[%s17734_s0 + %s16353_s22]]   ;;  %s16357_s22 = smov 20  }
  0x1b   :  { %s16527_s4 = sld [smem:[%s17734_s0 + %s16354_s28]]   ;;  %s16358_s28 = smov 21  }
  0x1c   :  { %17756 = sst [smem:[#allocation86_spill]] %s16507_s6 }
  0x1d   :  { %s16542_s8 = sld [smem:[%s17734_s0 + %s16357_s22]]   ;;  %s16361_s22 = smov 24  }
  0x1e   :  { %17757 = sst [smem:[#allocation87_spill]] %s16512_s12 }
  0x1f   :  { %17758 = sst [smem:[#allocation88_spill]] %s16517_s20 }
  0x20   :  { %s16532_s12 = sld [smem:[%s17734_s0 + %s16355_s7]]   ;;  %s16359_s7 = smov 22  }
  0x21   :  { %17759 = sst [smem:[#allocation89_spill]] %s16527_s4 }
  0x22   :  { %s16537_s20 = sld [smem:[%s17734_s0 + %s16356_s15]]   ;;  %s16360_s15 = smov 23  }
  0x23   :  { %s16547_s9 = sld [smem:[%s17734_s0 + %s16358_s28]]   ;;  %s16362_s28 = smov 25  }
  0x24   :  { %s16552_s21 = sld [smem:[%s17734_s0 + %s16359_s7]]   ;;  %s16363_s7 = smov 26  }
  0x25   :  { %s16557_s5 = sld [smem:[%s17734_s0 + %s16360_s15]]   ;;  %s16364_s15 = smov 27  }
  0x26   :  { %s16562_s13 = sld [smem:[%s17734_s0 + %s16361_s22]]   ;;  %s16365_s22 = smov 28  }
  0x28   :  { %17760 = sst [smem:[#allocation90_spill]] %s16537_s20 }
  0x29   :  { %17761 = sst [smem:[#allocation91_spill]] %s16547_s9 }
  0x2a   :  { %s16567_s9 = sld [smem:[%s17734_s0 + %s16362_s28]]   ;;  %s16366_s28 = smov 29  }
  0x2b   :  { %17762 = sst [smem:[#allocation92_spill]] %s16557_s5 }
  0x2c   :  { %17763 = sst [smem:[#allocation93_spill]] %s16562_s13 }
  0x2d   :  { %s16572_s20 = sld [smem:[%s17734_s0 + %s16363_s7]]   ;;  %s16367_s7 = smov 30  }
  0x2e   :  { %s16577_s5 = sld [smem:[%s17734_s0 + %s16364_s15]]   ;;  %s16368_s15 = smov 31  }
  0x2f   :  { %s16582_s13 = sld [smem:[%s17734_s0 + %s16365_s22]]   ;;  %s16369_s22 = smov 32  }
  0x30   :  { %s16587_s4 = sld [smem:[%s17734_s0 + %s16366_s28]]   ;;  %s16370_s28 = smov 33  }
  0x31   :  { %s16597_s6 = sld [smem:[%s17734_s0 + %s16368_s15]]   ;;  %s16372_s15 = smov 35  }
  0x32   :  { %s16607_s24 = sld [smem:[%s17734_s0 + %s16370_s28]]   ;;  %s16374_s28 = smov 37  }
  0x33   :  { %17764 = sst [smem:[#allocation94_spill]] %s16572_s20 }
  0x34   :  { %s16592_s20 = sld [smem:[%s17734_s0 + %s16367_s7]]   ;;  %s16371_s7 = smov 34  }
  0x35   :  { %17765 = sst [smem:[#allocation95_spill]] %s16582_s13 }
  0x36   :  { %s16602_s13 = sld [smem:[%s17734_s0 + %s16369_s22]]   ;;  %s16373_s22 = smov 36  }
  0x37   :  { %s16617_s14 = sld [smem:[%s17734_s0 + %s16372_s15]]   ;;  %s16376_s15 = smov 39  }
  0x38   :  { %17768 = sst [smem:[#allocation98_spill]] %s16607_s24 }
  0x39   :  { %s16627_s24 = sld [smem:[%s17734_s0 + %s16374_s28]]   ;;  %s16378_s28 = smov 41  }
  0x3a   :  { %17766 = sst [smem:[#allocation96_spill]] %s16592_s20 }
  0x3b   :  { %s16612_s20 = sld [smem:[%s17734_s0 + %s16371_s7]]   ;;  %s16375_s7 = smov 38  }
  0x3c   :  { %17767 = sst [smem:[#allocation97_spill]] %s16602_s13 }
  0x3d   :  { %17769 = sst [smem:[#allocation99_spill]] %s16617_s14 }
  0x3e   :  { %s16622_s13 = sld [smem:[%s17734_s0 + %s16373_s22]]   ;;  %s16377_s22 = smov 40  }
  0x3f   :  { %17770 = sst [smem:[#allocation100_spill]] %s16627_s24 }
  0x40   :  { %s16632_s29 = sld [smem:[%s17734_s0 + %s16375_s7]]   ;;  %s16379_s7 = smov 42  }
  0x41   :  { %s16637_s14 = sld [smem:[%s17734_s0 + %s16376_s15]]   ;;  %s16380_s15 = smov 43  }
  0x42   :  { %s16642_s17 = sld [smem:[%s17734_s0 + %s16377_s22]]   ;;  %s16381_s22 = smov 44  }
  0x43   :  { %s16647_s24 = sld [smem:[%s17734_s0 + %s16378_s28]]   ;;  %s16382_s28 = smov 45  }
  0x46   :  { %17771 = sst [smem:[#allocation101_spill]] %s16632_s29 }
  0x47   :  { %17772 = sst [smem:[#allocation102_spill]] %s16637_s14 }
  0x48   :  { %17773 = sst [smem:[#allocation103_spill]] %s16642_s17 }
  0x49   :  { %17774 = sst [smem:[#allocation104_spill]] %s16647_s24 }
  0x4a   :  { %s16652_s29 = sld [smem:[%s17734_s0 + %s16379_s7]]   ;;  %s16383_s7 = smov 46  }
  0x4b   :  { %s16657_s14 = sld [smem:[%s17734_s0 + %s16380_s15]]   ;;  %s16384_s15 = smov 47  }
  0x4c   :  { %s16662_s17 = sld [smem:[%s17734_s0 + %s16381_s22]]   ;;  %s16385_s22 = smov 48  }
  0x4d   :  { %s16667_s24 = sld [smem:[%s17734_s0 + %s16382_s28]]  }
  0x50   :  { %17775 = sst [smem:[#allocation105_spill]] %s16652_s29 }
  0x51   :  { %17776 = sst [smem:[#allocation106_spill]] %s16657_s14 }
  0x52   :  { %17777 = sst [smem:[#allocation107_spill]] %s16662_s17 }
  0x53   :  { %s16672_s29 = sld [smem:[%s17734_s0 + %s16383_s7]]  }
  0x54   :  { %s16677_s14 = sld [smem:[%s17734_s0 + %s16384_s15]]  }
  0x55   :  { %s16682_s17 = sld [smem:[%s17734_s0 + %s16385_s22]]  }
  0x56   :  { %102 = vsyncpa [#allocation3], 0 }
  0x57   :  { %103 = vsyncpa [#allocation5], 0 }
  0x58   :  { %104 = vsyncpa [#allocation8], 0 }
  0x59   :  { %105 = vsyncpa [#allocation11], 0 }
  0x5a   :  { %106 = vsyncpa [#allocation14], 0 }
  0x5b   :  { %107 = vsyncpa [#allocation17], 0 }
  0x5c   :  { %108 = vsyncpa [#allocation20], 0 }
  0x5d   :  { %109 = vsyncpa [#allocation23], 0 }
  0x5e   :  { %110 = vsyncpa [#allocation26], 0 }
  0x5f   :  { %111 = vsyncpa [#allocation29], 0 }
  0x60   :  { %112 = vsyncpa [#allocation32], 0 }
  0x61   :  { %113 = vsyncpa [#allocation35], 0 }
  0x62   :  { %114 = vsyncpa [#allocation38], 0 }
  0x63   :  { %115 = vsyncpa [#allocation41], 0 }
  0x64   :  { %116 = vsyncpa [#allocation44], 0 }
  0x65   :  { %117 = vsyncpa [#allocation47], 0 }
  0x66   :  { %118 = vsyncpa [#allocation50], 0 }
  0x67   :  { %119 = vsyncpa [#allocation53], 0 }
  0x68   :  { %120 = vsyncpa [#allocation56], 0  ;;  %s16684_s0 = smov 0  }
  0x69 LB: > { %s16690_s28 = sadd.s32 4294967295, %s16336_s0   ;;  %p12312_p0 = scmp.ge.s32.totalorder %s16336_s0, 1  ;;  %s16336_s0 = sphi %s16684_s0, %s126_s0  }
  0x6a   : > { %p1170_p1 = scmp.lt.s32.totalorder %s16336_s0, 3 }
  0x6c   : > { %p16694_p2 = pnand %p12312_p0, %p1170_p1 }
  0x6d   : > { %p13978_p3 = scmp.eq.s32.totalorder (!%p16694_p2), %s16690_s28, 0  ;;  %s16386_s2 = smov (!%p16694_p2), [#allocation4]  }
  0x6e   : > { %s17778_s1 = scalar_select %p16694_p2, 1, 0 }
  0x6f   : > { %1174 = sbr.rel (%p16694_p2) target bundleno = 537 (0x219), region = 12  ;;  %s1203_s7 = sshll.u32 (!%p16694_p2), %s16386_s2, 4  ;;  %s1204_s7 = int_to_ptr.vmem [resolvable:$true] %s1203_s7 }
  0x70   : > { %s15376_s10 = scalar_lea.vmem (!%p16694_p2), %s1204_s7, 32  ;;  %p15383_p7 = scmp.lt.s32.totalorder (!%p16694_p2), %s1204_s7, %s1204_s7 }
  0x71   : > { %p15377_p4 = scmp.ne.s32.totalorder (!%p16694_p2), %s1204_s7, %s15376_s10  ;;  %p15384_p8 = scmp.lt.s32.totalorder (!%p16694_p2), %s15376_s10, %s15376_s10 }
  0x73   : > { %p15378_p5 = pnand (!%p16694_p2), %p15377_p4, %p13978_p3  ;;  %p15385_p9 = por (!%p16694_p2), %p15384_p8, %p15383_p7 }
  0x75   : > { %p15379_p6 = pneg %p15378_p5 }
  0x77   : > { %p15386_p10 = pnand %p15385_p9, %p15379_p6 }
  0x79   : > { %15389 = shalt.err (!%p15386_p10)
}
  0x7a   : > { %13833 = dma.hbm_to_vmem [thread:$0]  (%p13978_p3), %s16467_s25, 32, %s1204_s7, [#allocation5]  }
  0x7b   : > { %s16387_s11 = smov [#allocation7]   ;;  %s16388_s16 = smov [#allocation10]  }
  0x7c   : > { %s1226_s15 = sshll.u32 %s16387_s11, 4  ;;  %s1256_s18 = sshll.u32 %s16388_s16, 4  ;;  %s1227_s15 = int_to_ptr.vmem [resolvable:$true] %s1226_s15  ;;  %s1257_s18 = int_to_ptr.vmem [resolvable:$true] %s1256_s18 }
  0x7d   : > { %s15400_s22 = scalar_lea.vmem %s1227_s15, 384  ;;  %p15407_p0 = scmp.lt.s32.totalorder %s1227_s15, %s1227_s15 }
  0x7e   : > { %p15401_p11 = scmp.ne.s32.totalorder %s1227_s15, %s15400_s22  ;;  %p15408_p1 = scmp.lt.s32.totalorder %s15400_s22, %s15400_s22 }
  0x80   : > { %p15402_p12 = pnand %p15401_p11, %p13978_p3  ;;  %p15409_p4 = por %p15408_p1, %p15407_p0 }
  0x82   : > { %p15403_p13 = pneg %p15402_p12 }
  0x84   : > { %p15410_p5 = pnand %p15409_p4, %p15403_p13 }
  0x86   : > { %15413 = shalt.err (!%p15410_p5)
}
  0x87   : > { %s17743_s23 = smov 128   ;;  %s17745_s26 = smov 8  }
  0x88   : > { %13837 = dma.hbm_to_vmem [thread:$0]  (%p13978_p3), %s16477_s3, 384, %s1227_s15, [#allocation8], %s17743_s23, %s17743_s23, %s17745_s26  }
  0x89   : > { %s15424_s2 = scalar_lea.vmem %s1257_s18, 32  ;;  %p15431_p9 = scmp.lt.s32.totalorder %s1257_s18, %s1257_s18 }
  0x8a   : > { %p15425_p6 = scmp.ne.s32.totalorder %s1257_s18, %s15424_s2  ;;  %p15432_p10 = scmp.lt.s32.totalorder %s15424_s2, %s15424_s2 }
  0x8c   : > { %p15426_p7 = pnand %p15425_p6, %p13978_p3  ;;  %p15433_p11 = por %p15432_p10, %p15431_p9 }
  0x8e   : > { %p15427_p8 = pneg %p15426_p7 }
  0x90   : > { %p15434_p12 = pnand %p15433_p11, %p15427_p8 }
  0x92   : > { %15437 = shalt.err (!%p15434_p12)
}
  0x93   : > { %13841 = dma.hbm_to_vmem [thread:$0]  (%p13978_p3), %s16492_s19, 32, %s1257_s18, [#allocation11]  }
  0x94   : > { %s16391_s7 = smov [#allocation13]   ;;  %s16392_s11 = smov [#allocation16]  }
  0x95   : > { %s1280_s10 = sshll.u32 %s16391_s7, 4  ;;  %s1309_s16 = sshll.u32 %s16392_s11, 4  ;;  %s1281_s10 = int_to_ptr.vmem [resolvable:$true] %s1280_s10  ;;  %s1310_s16 = int_to_ptr.vmem [resolvable:$true] %s1309_s16 }
  0x96   : > { %s15448_s15 = scalar_lea.vmem %s1281_s10, 32  ;;  %p15455_p4 = scmp.lt.s32.totalorder %s1281_s10, %s1281_s10 }
  0x97   : > { %p15449_p13 = scmp.ne.s32.totalorder %s1281_s10, %s15448_s15  ;;  %p15456_p5 = scmp.lt.s32.totalorder %s15448_s15, %s15448_s15 }
  0x99   : > { %p15450_p0 = pnand %p15449_p13, %p13978_p3  ;;  %p15457_p6 = por %p15456_p5, %p15455_p4 }
  0x9b   : > { %p15451_p1 = pneg %p15450_p0 }
  0x9d   : > { %p15458_p7 = pnand %p15457_p6, %p15451_p1 }
  0x9f   : > { %15461 = shalt.err (!%p15458_p7)
}
  0xa0   : > { %13845 = dma.hbm_to_vmem [thread:$0]  (%p13978_p3), %s16502_s30, 32, %s1281_s10, [#allocation14]  }
  0xa1   : > { %s15472_s18 = scalar_lea.vmem %s1310_s16, 6144  ;;  %p15479_p11 = scmp.lt.s32.totalorder %s1310_s16, %s1310_s16 }
  0xa2   : > { %p15473_p8 = scmp.ne.s32.totalorder %s1310_s16, %s15472_s18  ;;  %p15480_p12 = scmp.lt.s32.totalorder %s15472_s18, %s15472_s18 }
  0xa4   : > { %p15474_p9 = pnand %p15473_p8, %p13978_p3  ;;  %p15481_p2 = por %p15480_p12, %p15479_p11 }
  0xa6   : > { %p15475_p10 = pneg %p15474_p9 }
  0xa8   : > { %p15482_p13 = pnand %p15481_p2, %p15475_p10 }
  0xaa   : > { %15485 = shalt.err (!%p15482_p13)
}
  0xab   : > { %13849 = dma.hbm_to_vmem [thread:$0]  (%p13978_p3), %s16522_s27, 6144, %s1310_s16, [#allocation17], %s17743_s23, %s17743_s23, %s17745_s26  }
  0xac   : > { %s16393_s22 = smov [#allocation19]   ;;  %s16394_s7 = smov [#allocation22]  }
  0xad   : > { %s1333_s2 = sshll.u32 %s16393_s22, 4  ;;  %s1357_s10 = sshll.u32 %s16394_s7, 4  ;;  %s1334_s2 = int_to_ptr.vmem [resolvable:$true] %s1333_s2  ;;  %s1358_s10 = int_to_ptr.vmem [resolvable:$true] %s1357_s10 }
  0xae   : > { %s15496_s11 = scalar_lea.vmem %s1334_s2, 12288  ;;  %p15503_p4 = scmp.lt.s32.totalorder %s1334_s2, %s1334_s2 }
  0xaf   : > { %p15497_p0 = scmp.ne.s32.totalorder %s1334_s2, %s15496_s11  ;;  %p15504_p5 = scmp.lt.s32.totalorder %s15496_s11, %s15496_s11 }
  0xb1   : > { %p15498_p1 = pnand %p15497_p0, %p13978_p3  ;;  %p15505_p6 = por %p15504_p5, %p15503_p4 }
  0xb3   : > { %p15499_p2 = pneg %p15498_p1 }
  0xb5   : > { %p15506_p7 = pnand %p15505_p6, %p15499_p2 }
  0xb7   : > { %15509 = shalt.err (!%p15506_p7)
}
  0xb8   : > { %13853 = dma.hbm_to_vmem [thread:$0]  (%p13978_p3), %s16532_s12, 12288, %s1334_s2, [#allocation20], %s17743_s23, %s17743_s23, %s17745_s26  }
  0xb9   : > { %s15520_s16 = scalar_lea.vmem %s1358_s10, 12288  ;;  %p15527_p11 = scmp.lt.s32.totalorder %s1358_s10, %s1358_s10 }
  0xba   : > { %p15521_p8 = scmp.ne.s32.totalorder %s1358_s10, %s15520_s16  ;;  %p15528_p12 = scmp.lt.s32.totalorder %s15520_s16, %s15520_s16 }
  0xbc   : > { %p15522_p9 = pnand %p15521_p8, %p13978_p3  ;;  %p15529_p13 = por %p15528_p12, %p15527_p11 }
  0xbe   : > { %p15523_p10 = pneg %p15522_p9 }
  0xc0   : > { %p15530_p0 = pnand %p15529_p13, %p15523_p10 }
  0xc2   : > { %15533 = shalt.err (!%p15530_p0)
}
  0xc3   : > { %13857 = dma.hbm_to_vmem [thread:$0]  (%p13978_p3), %s16542_s8, 12288, %s1358_s10, [#allocation23], %s17743_s23, %s17743_s23, %s17745_s26  }
  0xc4   : > { %s16395_s15 = smov [#allocation25]   ;;  %s16396_s22 = smov [#allocation28]  }
  0xc5   : > { %s1381_s18 = sshll.u32 %s16395_s15, 4  ;;  %s1408_s2 = sshll.u32 %s16396_s22, 4  ;;  %s1382_s18 = int_to_ptr.vmem [resolvable:$true] %s1381_s18  ;;  %s1409_s2 = int_to_ptr.vmem [resolvable:$true] %s1408_s2 }
  0xc6   : > { %s15544_s7 = scalar_lea.vmem %s1382_s18, 3584  ;;  %p15551_p5 = scmp.lt.s32.totalorder %s1382_s18, %s1382_s18 }
  0xc7   : > { %p15545_p1 = scmp.ne.s32.totalorder %s1382_s18, %s15544_s7  ;;  %p15552_p6 = scmp.lt.s32.totalorder %s15544_s7, %s15544_s7 }
  0xc9   : > { %p15546_p2 = pnand %p15545_p1, %p13978_p3  ;;  %p15553_p7 = por %p15552_p6, %p15551_p5 }
  0xcb   : > { %p15547_p4 = pneg %p15546_p2 }
  0xcd   : > { %p15554_p8 = pnand %p15553_p7, %p15547_p4 }
  0xcf   : > { %15557 = shalt.err (!%p15554_p8)
}
  0xd0   : > { %13861 = dma.hbm_to_vmem [thread:$0]  (%p13978_p3), %s16552_s21, 3584, %s1382_s18, [#allocation26], %s17743_s23, %s17743_s23, %s17745_s26  }
  0xd1   : > { %s15568_s10 = scalar_lea.vmem %s1409_s2, 6144  ;;  %p15575_p12 = scmp.lt.s32.totalorder %s1409_s2, %s1409_s2 }
  0xd2   : > { %p15569_p9 = scmp.ne.s32.totalorder %s1409_s2, %s15568_s10  ;;  %p15576_p13 = scmp.lt.s32.totalorder %s15568_s10, %s15568_s10 }
  0xd4   : > { %p15570_p10 = pnand %p15569_p9, %p13978_p3  ;;  %p15577_p0 = por %p15576_p13, %p15575_p12 }
  0xd6   : > { %p15571_p11 = pneg %p15570_p10 }
  0xd8   : > { %p15578_p1 = pnand %p15577_p0, %p15571_p11 }
  0xda   : > { %15581 = shalt.err (!%p15578_p1)
}
  0xdb   : > { %13865 = dma.hbm_to_vmem [thread:$0]  (%p13978_p3), %s16567_s9, 6144, %s1409_s2, [#allocation29], %s17743_s23, %s17743_s23, %s17745_s26  }
  0xdc   : > { %s16397_s11 = smov [#allocation31]   ;;  %s16398_s15 = smov [#allocation34]  }
  0xdd   : > { %s1432_s16 = sshll.u32 %s16397_s11, 4  ;;  %s1456_s18 = sshll.u32 %s16398_s15, 4  ;;  %s1433_s16 = int_to_ptr.vmem [resolvable:$true] %s1432_s16  ;;  %s1457_s18 = int_to_ptr.vmem [resolvable:$true] %s1456_s18 }
  0xde   : > { %s15592_s22 = scalar_lea.vmem %s1433_s16, 12288  ;;  %p15599_p6 = scmp.lt.s32.totalorder %s1433_s16, %s1433_s16 }
  0xdf   : > { %p15593_p2 = scmp.ne.s32.totalorder %s1433_s16, %s15592_s22  ;;  %p15600_p7 = scmp.lt.s32.totalorder %s15592_s22, %s15592_s22 }
  0xe1   : > { %p15594_p4 = pnand %p15593_p2, %p13978_p3  ;;  %p15601_p8 = por %p15600_p7, %p15599_p6 }
  0xe3   : > { %p15595_p5 = pneg %p15594_p4 }
  0xe5   : > { %p15602_p9 = pnand %p15601_p8, %p15595_p5 }
  0xe7   : > { %15605 = shalt.err (!%p15602_p9)
}
  0xe8   : > { %13869 = dma.hbm_to_vmem [thread:$0]  (%p13978_p3), %s16577_s5, 12288, %s1433_s16, [#allocation32], %s17743_s23, %s17743_s23, %s17745_s26  }
  0xe9   : > { %s15616_s2 = scalar_lea.vmem %s1457_s18, 12288  ;;  %p15623_p13 = scmp.lt.s32.totalorder %s1457_s18, %s1457_s18 }
  0xea   : > { %p15617_p10 = scmp.ne.s32.totalorder %s1457_s18, %s15616_s2  ;;  %p15624_p0 = scmp.lt.s32.totalorder %s15616_s2, %s15616_s2 }
  0xec   : > { %p15618_p11 = pnand %p15617_p10, %p13978_p3  ;;  %p15625_p1 = por %p15624_p0, %p15623_p13 }
  0xee   : > { %p15619_p12 = pneg %p15618_p11 }
  0xf0   : > { %p15626_p2 = pnand %p15625_p1, %p15619_p12 }
  0xf2   : > { %15629 = shalt.err (!%p15626_p2)
}
  0xf3   : > { %13873 = dma.hbm_to_vmem [thread:$0]  (%p13978_p3), %s16587_s4, 12288, %s1457_s18, [#allocation35], %s17743_s23, %s17743_s23, %s17745_s26  }
  0xf4   : > { %s16399_s7 = smov [#allocation37]   ;;  %s16400_s11 = smov [#allocation40]  }
  0xf5   : > { %s1480_s10 = sshll.u32 %s16399_s7, 4  ;;  %s1507_s16 = sshll.u32 %s16400_s11, 4  ;;  %s1481_s10 = int_to_ptr.vmem [resolvable:$true] %s1480_s10  ;;  %s1508_s16 = int_to_ptr.vmem [resolvable:$true] %s1507_s16 }
  0xf6   : > { %s15640_s15 = scalar_lea.vmem %s1481_s10, 3072  ;;  %p15647_p7 = scmp.lt.s32.totalorder %s1481_s10, %s1481_s10 }
  0xf7   : > { %p15641_p4 = scmp.ne.s32.totalorder %s1481_s10, %s15640_s15  ;;  %p15648_p8 = scmp.lt.s32.totalorder %s15640_s15, %s15640_s15 }
  0xf9   : > { %p15642_p5 = pnand %p15641_p4, %p13978_p3  ;;  %p15649_p9 = por %p15648_p8, %p15647_p7 }
  0xfb   : > { %p15643_p6 = pneg %p15642_p5 }
  0xfd   : > { %p15650_p10 = pnand %p15649_p9, %p15643_p6 }
  0xff   : > { %15653 = shalt.err (!%p15650_p10)
}
 0x100   : > { %13877 = dma.hbm_to_vmem [thread:$0]  (%p13978_p3), %s16597_s6, 3072, %s1481_s10, [#allocation38], %s17743_s23, %s17743_s23, %s17745_s26  }
 0x101   : > { %s15664_s18 = scalar_lea.vmem %s1508_s16, 3072  ;;  %p15671_p0 = scmp.lt.s32.totalorder %s1508_s16, %s1508_s16 }
 0x102   : > { %p15665_p11 = scmp.ne.s32.totalorder %s1508_s16, %s15664_s18  ;;  %p15672_p1 = scmp.lt.s32.totalorder %s15664_s18, %s15664_s18 }
 0x104   : > { %p15666_p12 = pnand %p15665_p11, %p13978_p3  ;;  %p15673_p2 = por %p15672_p1, %p15671_p0 }
 0x106   : > { %p15667_p13 = pneg %p15666_p12 }
 0x108   : > { %p15674_p4 = pnand %p15673_p2, %p15667_p13 }
 0x10a   : > { %15677 = shalt.err (!%p15674_p4)
}
 0x10b   : > { %s16401_s22 = smov 64   ;;  %s16402_s2 = smov 4  }
 0x10c   : > { %13881 = dma.hbm_to_vmem [thread:$0]  (%p13978_p3), %s16612_s20, 3072, %s1508_s16, [#allocation41], %s16401_s22, %s16401_s22, %s16402_s2  }
 0x10d   : > { %s16403_s7 = smov [#allocation43]   ;;  %s16404_s11 = smov [#allocation46]  }
 0x10e   : > { %s1531_s10 = sshll.u32 %s16403_s7, 4  ;;  %s1555_s15 = sshll.u32 %s16404_s11, 4  ;;  %s1532_s10 = int_to_ptr.vmem [resolvable:$true] %s1531_s10  ;;  %s1556_s15 = int_to_ptr.vmem [resolvable:$true] %s1555_s15 }
 0x10f   : > { %s15688_s18 = scalar_lea.vmem %s1532_s10, 3072  ;;  %p15695_p8 = scmp.lt.s32.totalorder %s1532_s10, %s1532_s10 }
 0x110   : > { %p15689_p5 = scmp.ne.s32.totalorder %s1532_s10, %s15688_s18  ;;  %p15696_p9 = scmp.lt.s32.totalorder %s15688_s18, %s15688_s18 }
 0x112   : > { %p15690_p6 = pnand %p15689_p5, %p13978_p3  ;;  %p15697_p10 = por %p15696_p9, %p15695_p8 }
 0x114   : > { %p15691_p7 = pneg %p15690_p6 }
 0x116   : > { %p15698_p11 = pnand %p15697_p10, %p15691_p7 }
 0x118   : > { %15701 = shalt.err (!%p15698_p11)
}
 0x119   : > { %13885 = dma.hbm_to_vmem [thread:$0]  (%p13978_p3), %s16622_s13, 3072, %s1532_s10, [#allocation44], %s16401_s22, %s16401_s22, %s16402_s2  }
 0x11a   : > { %s15712_s16 = scalar_lea.vmem %s1556_s15, 3072  ;;  %p15719_p1 = scmp.lt.s32.totalorder %s1556_s15, %s1556_s15 }
 0x11b   : > { %p15713_p12 = scmp.ne.s32.totalorder %s1556_s15, %s15712_s16  ;;  %p15720_p2 = scmp.lt.s32.totalorder %s15712_s16, %s15712_s16 }
 0x11d   : > { %p15714_p13 = pnand %p15713_p12, %p13978_p3  ;;  %p15721_p4 = por %p15720_p2, %p15719_p1 }
 0x11f   : > { %p15715_p0 = pneg %p15714_p13 }
 0x121   : > { %p15722_p5 = pnand %p15721_p4, %p15715_p0 }
 0x123   : > { %15725 = shalt.err (!%p15722_p5)
}
 0x124   : > { %s17779_s7 = sld [smem:[#allocation101_spill]]  ;;  %s16405_s11 = smov [#allocation49]  }
 0x125   : > { %s1579_s10 = sshll.u32 %s16405_s11, 4  ;;  %s16406_s18 = smov [#allocation52]   ;;  %s1580_s10 = int_to_ptr.vmem [resolvable:$true] %s1579_s10 }
 0x126   : > { %s1603_s23 = sshll.u32 %s16406_s18, 4  ;;  %s15736_s26 = scalar_lea.vmem %s1580_s10, 1024  ;;  %s1604_s23 = int_to_ptr.vmem [resolvable:$true] %s1603_s23 }
 0x127   : > { %p15737_p6 = scmp.ne.s32.totalorder %s1580_s10, %s15736_s26  ;;  %p15743_p9 = scmp.lt.s32.totalorder %s1580_s10, %s1580_s10 }
 0x128   : > { %p15744_p10 = scmp.lt.s32.totalorder %s15736_s26, %s15736_s26 }
 0x129   : > { %p15738_p7 = pnand %p15737_p6, %p13978_p3 }
 0x12a   : > { %13889 = dma.hbm_to_vmem [thread:$0]  (%p13978_p3), %s17779_s7, 3072, %s1556_s15, [#allocation47], %s16401_s22, %s16401_s22, %s16402_s2  }
 0x12b   : > { %p15739_p8 = pneg %p15738_p7  ;;  %p15745_p11 = por %p15744_p10, %p15743_p9 }
 0x12d   : > { %p15746_p12 = pnand %p15745_p11, %p15739_p8 }
 0x12f   : > { %15749 = shalt.err (!%p15746_p12)
}
 0x130   : > { %s17780_s16 = smov 8   ;;  %s17781_s22 = smov 128  }
 0x131   : > { %s17782_s2 = sld [smem:[#allocation103_spill]]  ;;  %s15760_s15 = scalar_lea.vmem %s1604_s23, 1024 }
 0x132   : > { %p15761_p13 = scmp.ne.s32.totalorder %s1604_s23, %s15760_s15  ;;  %p15767_p2 = scmp.lt.s32.totalorder %s1604_s23, %s1604_s23 }
 0x133   : > { %p15768_p4 = scmp.lt.s32.totalorder %s15760_s15, %s15760_s15 }
 0x134   : > { %p15762_p0 = pnand %p15761_p13, %p13978_p3 }
 0x135   : > { %p15769_p5 = por %p15768_p4, %p15767_p2 }
 0x136   : > { %p15763_p1 = pneg %p15762_p0 }
 0x137   : > { %13893 = dma.hbm_to_vmem [thread:$0]  (%p13978_p3), %s17782_s2, 1024, %s1580_s10, [#allocation50], %s17781_s22, %s17781_s22, %s17780_s16  }
 0x138   : > { %p15770_p6 = pnand %p15769_p5, %p15763_p1 }
 0x13a   : > { %15773 = shalt.err (!%p15770_p6)
}
 0x13b   : > { %s17783_s26 = sld [smem:[#allocation105_spill]]  ;;  %s16407_s7 = smov [#allocation55]  }
 0x13c   : > { %s1631_s11 = sshll.u32 %s16407_s7, 4  ;;  %s16408_s10 = smov [#allocation2]   ;;  %s1632_s11 = int_to_ptr.vmem [resolvable:$true] %s1631_s11 }
 0x13d   : > { %s1189_s18 = sshll.u32 %s16408_s10, 4  ;;  %s15784_s2 = scalar_lea.vmem %s1632_s11, 16  ;;  %s1190_s18 = int_to_ptr.vmem [resolvable:$true] %s1189_s18 }
 0x13e   : > { %p15785_p7 = scmp.ne.s32.totalorder %s1632_s11, %s15784_s2  ;;  %s15790_s15 = scalar_lea.vmem %s1632_s11, 32 }
 0x13f   : > { %p15791_p10 = scmp.lt.s32.totalorder %s1632_s11, %s1632_s11  ;;  %p15792_p11 = scmp.lt.s32.totalorder %s15790_s15, %s15784_s2 }
 0x140   : > { %p15786_p8 = pnand %p15785_p7, %p13978_p3 }
 0x141   : > { %13897 = dma.hbm_to_vmem [thread:$0]  (%p13978_p3), %s17783_s26, 1024, %s1604_s23, [#allocation53], %s17781_s22, %s17781_s22, %s17780_s16  }
 0x142   : > { %p15787_p9 = pneg %p15786_p8  ;;  %p15793_p12 = por %p15792_p11, %p15791_p10 }
 0x144   : > { %p15794_p13 = pnand %p15793_p12, %p15787_p9 }
 0x146   : > { %15797 = shalt.err (!%p15794_p13)
}
 0x147   : > { %13901 = dma.hbm_to_vmem [thread:$0]  (%p13978_p3), %s16667_s24, 16, %s1632_s11, [#allocation56]  }
 0x148   : > { %s15808_s23 = scalar_lea.vmem %s1190_s18, 32  ;;  %p15815_p4 = scmp.lt.s32.totalorder %s1190_s18, %s1190_s18 }
 0x149   : > { %p15809_p0 = scmp.ne.s32.totalorder %s1190_s18, %s15808_s23  ;;  %p15816_p5 = scmp.lt.s32.totalorder %s15808_s23, %s15808_s23 }
 0x14b   : > { %p15810_p1 = pnand %p15809_p0, %p13978_p3  ;;  %p15817_p6 = por %p15816_p5, %p15815_p4 }
 0x14d   : > { %p15811_p2 = pneg %p15810_p1 }
 0x14f   : > { %p15818_p7 = pnand %p15817_p6, %p15811_p2 }
 0x151   : > { %15821 = shalt.err (!%p15818_p7)
}
 0x152   : > { %s17784_s26 = sld [smem:[#allocation80_spill]]  ;;  %s16409_s7 = smov [#allocation6]  }
 0x153   : > { %s1213_s10 = sshll.u32 %s16409_s7, 4  ;;  %s16410_s11 = smov [#allocation9]   ;;  %s1214_s10 = int_to_ptr.vmem [resolvable:$true] %s1213_s10 }
 0x154   : > { %s1242_s2 = sshll.u32 %s16410_s11, 4  ;;  %s15832_s15 = scalar_lea.vmem %s1214_s10, 3968  ;;  %s1243_s2 = int_to_ptr.vmem [resolvable:$true] %s1242_s2 }
 0x155   : > { %p15833_p8 = scmp.ne.s32.totalorder %s1214_s10, %s15832_s15  ;;  %p15839_p11 = scmp.lt.s32.totalorder %s1214_s10, %s1214_s10 }
 0x156   : > { %p15840_p12 = scmp.lt.s32.totalorder %s15832_s15, %s15832_s15 }
 0x157   : > { %p15834_p9 = pnand %p15833_p8, %p13978_p3 }
 0x158   : > { %13831 = dma.hbm_to_vmem [thread:$0]  (%p13978_p3), %s17784_s26, 32, %s1190_s18, [#allocation3]  }
 0x159   : > { %p15835_p10 = pneg %p15834_p9  ;;  %p15841_p13 = por %p15840_p12, %p15839_p11 }
 0x15b   : > { %p15842_p0 = pnand %p15841_p13, %p15835_p10 }
 0x15d   : > { %15845 = shalt.err (!%p15842_p0)
}
 0x15e   : > { %s17785_s18 = sld [smem:[#allocation82_spill]]  ;;  %s15856_s23 = scalar_lea.vmem %s1243_s2, 6144 }
 0x15f   : > { %p15857_p1 = scmp.ne.s32.totalorder %s1243_s2, %s15856_s23  ;;  %p15863_p5 = scmp.lt.s32.totalorder %s1243_s2, %s1243_s2 }
 0x160   : > { %p15864_p6 = scmp.lt.s32.totalorder %s15856_s23, %s15856_s23 }
 0x161   : > { %p15858_p2 = pnand %p15857_p1, %p13978_p3 }
 0x162   : > { %p15865_p7 = por %p15864_p6, %p15863_p5 }
 0x163   : > { %p15859_p4 = pneg %p15858_p2 }
 0x164   : > { %13835 = dma.hbm_to_vmem [thread:$0]  (%p13978_p3), %s17785_s18, 3968, %s1214_s10, [#allocation5], %s17781_s22, %s17781_s22, %s17780_s16  }
 0x165   : > { %p15866_p8 = pnand %p15865_p7, %p15859_p4 }
 0x167   : > { %15869 = shalt.err (!%p15866_p8)
}
 0x168   : > { %s17786_s26 = sld [smem:[#allocation84_spill]]  ;;  %s16411_s7 = smov [#allocation12]  }
 0x169   : > { %s1266_s10 = sshll.u32 %s16411_s7, 4  ;;  %s16412_s11 = smov [#allocation15]   ;;  %s1267_s10 = int_to_ptr.vmem [resolvable:$true] %s1266_s10 }
 0x16a   : > { %s1290_s15 = sshll.u32 %s16412_s11, 4  ;;  %s15880_s18 = scalar_lea.vmem %s1267_s10, 12288  ;;  %s1291_s15 = int_to_ptr.vmem [resolvable:$true] %s1290_s15 }
 0x16b   : > { %p15881_p9 = scmp.ne.s32.totalorder %s1267_s10, %s15880_s18  ;;  %p15887_p12 = scmp.lt.s32.totalorder %s1267_s10, %s1267_s10 }
 0x16c   : > { %p15888_p13 = scmp.lt.s32.totalorder %s15880_s18, %s15880_s18 }
 0x16d   : > { %p15882_p10 = pnand %p15881_p9, %p13978_p3 }
 0x16e   : > { %13839 = dma.hbm_to_vmem [thread:$0]  (%p13978_p3), %s17786_s26, 6144, %s1243_s2, [#allocation8], %s17781_s22, %s17781_s22, %s17780_s16  }
 0x16f   : > { %p15883_p11 = pneg %p15882_p10  ;;  %p15889_p0 = por %p15888_p13, %p15887_p12 }
 0x171   : > { %p15890_p1 = pnand %p15889_p0, %p15883_p11 }
 0x173   : > { %15893 = shalt.err (!%p15890_p1)
}
 0x174   : > { %s17787_s2 = sld [smem:[#allocation85_spill]]  ;;  %s15904_s23 = scalar_lea.vmem %s1291_s15, 3840 }
 0x175   : > { %p15905_p2 = scmp.ne.s32.totalorder %s1291_s15, %s15904_s23  ;;  %p15911_p6 = scmp.lt.s32.totalorder %s1291_s15, %s1291_s15 }
 0x176   : > { %p15912_p7 = scmp.lt.s32.totalorder %s15904_s23, %s15904_s23 }
 0x177   : > { %p15906_p4 = pnand %p15905_p2, %p13978_p3 }
 0x178   : > { %p15913_p8 = por %p15912_p7, %p15911_p6 }
 0x179   : > { %p15907_p5 = pneg %p15906_p4 }
 0x17a   : > { %13843 = dma.hbm_to_vmem [thread:$0]  (%p13978_p3), %s17787_s2, 12288, %s1267_s10, [#allocation11], %s17781_s22, %s17781_s22, %s17780_s16  }
 0x17b   : > { %p15914_p9 = pnand %p15913_p8, %p15907_p5 }
 0x17d   : > { %15917 = shalt.err (!%p15914_p9)
}
 0x17e   : > { %s17788_s26 = sld [smem:[#allocation86_spill]]  ;;  %s16413_s7 = smov [#allocation18]  }
 0x17f   : > { %s1323_s10 = sshll.u32 %s16413_s7, 4  ;;  %s16414_s11 = smov [#allocation21]   ;;  %s1324_s10 = int_to_ptr.vmem [resolvable:$true] %s1323_s10 }
 0x180   : > { %s1347_s18 = sshll.u32 %s16414_s11, 4  ;;  %s15928_s2 = scalar_lea.vmem %s1324_s10, 32  ;;  %s1348_s18 = int_to_ptr.vmem [resolvable:$true] %s1347_s18 }
 0x181   : > { %p15929_p10 = scmp.ne.s32.totalorder %s1324_s10, %s15928_s2  ;;  %p15935_p13 = scmp.lt.s32.totalorder %s1324_s10, %s1324_s10 }
 0x182   : > { %p15936_p0 = scmp.lt.s32.totalorder %s15928_s2, %s15928_s2 }
 0x183   : > { %p15930_p11 = pnand %p15929_p10, %p13978_p3 }
 0x184   : > { %13847 = dma.hbm_to_vmem [thread:$0]  (%p13978_p3), %s17788_s26, 3840, %s1291_s15, [#allocation14], %s17781_s22, %s17781_s22, %s17780_s16  }
 0x185   : > { %p15931_p12 = pneg %p15930_p11  ;;  %p15937_p1 = por %p15936_p0, %p15935_p13 }
 0x187   : > { %p15938_p2 = pnand %p15937_p1, %p15931_p12 }
 0x189   : > { %15941 = shalt.err (!%p15938_p2)
}
 0x18a   : > { %s17789_s23 = sld [smem:[#allocation89_spill]]  ;;  %s15952_s16 = scalar_lea.vmem %s1348_s18, 32 }
 0x18b   : > { %p15953_p4 = scmp.ne.s32.totalorder %s1348_s18, %s15952_s16  ;;  %p15959_p7 = scmp.lt.s32.totalorder %s1348_s18, %s1348_s18 }
 0x18c   : > { %p15960_p8 = scmp.lt.s32.totalorder %s15952_s16, %s15952_s16 }
 0x18d   : > { %p15954_p5 = pnand %p15953_p4, %p13978_p3 }
 0x18e   : > { %p15961_p9 = por %p15960_p8, %p15959_p7 }
 0x18f   : > { %p15955_p6 = pneg %p15954_p5 }
 0x190   : > { %13851 = dma.hbm_to_vmem [thread:$0]  (%p13978_p3), %s17789_s23, 32, %s1324_s10, [#allocation17]  }
 0x191   : > { %p15962_p10 = pnand %p15961_p9, %p15955_p6 }
 0x193   : > { %15965 = shalt.err (!%p15962_p10)
}
 0x194   : > { %s17790_s22 = sld [smem:[#allocation90_spill]]  ;;  %s16415_s15 = smov [#allocation24]  }
 0x195   : > { %s1371_s26 = sshll.u32 %s16415_s15, 4  ;;  %s16416_s7 = smov [#allocation27]   ;;  %s1372_s26 = int_to_ptr.vmem [resolvable:$true] %s1371_s26 }
 0x196   : > { %s1395_s10 = sshll.u32 %s16416_s7, 4  ;;  %s15976_s11 = scalar_lea.vmem %s1372_s26, 32  ;;  %s1396_s10 = int_to_ptr.vmem [resolvable:$true] %s1395_s10 }
 0x197   : > { %p15977_p11 = scmp.ne.s32.totalorder %s1372_s26, %s15976_s11  ;;  %p15983_p0 = scmp.lt.s32.totalorder %s1372_s26, %s1372_s26 }
 0x198   : > { %p15984_p1 = scmp.lt.s32.totalorder %s15976_s11, %s15976_s11 }
 0x199   : > { %p15978_p12 = pnand %p15977_p11, %p13978_p3 }
 0x19a   : > { %13855 = dma.hbm_to_vmem [thread:$0]  (%p13978_p3), %s17790_s22, 32, %s1348_s18, [#allocation20]  }
 0x19b   : > { %p15979_p13 = pneg %p15978_p12  ;;  %p15985_p2 = por %p15984_p1, %p15983_p0 }
 0x19d   : > { %p15986_p4 = pnand %p15985_p2, %p15979_p13 }
 0x19f   : > { %15989 = shalt.err (!%p15986_p4)
}
 0x1a0   : > { %s17791_s2 = sld [smem:[#allocation91_spill]]  ;;  %s16000_s18 = scalar_lea.vmem %s1396_s10, 128 }
 0x1a1   : > { %p16001_p5 = scmp.ne.s32.totalorder %s1396_s10, %s16000_s18  ;;  %p16007_p8 = scmp.lt.s32.totalorder %s1396_s10, %s1396_s10 }
 0x1a2   : > { %p16008_p9 = scmp.lt.s32.totalorder %s16000_s18, %s16000_s18 }
 0x1a3   : > { %p16002_p6 = pnand %p16001_p5, %p13978_p3 }
 0x1a4   : > { %p16009_p10 = por %p16008_p9, %p16007_p8 }
 0x1a5   : > { %p16003_p7 = pneg %p16002_p6 }
 0x1a6   : > { %13859 = dma.hbm_to_vmem [thread:$0]  (%p13978_p3), %s17791_s2, 32, %s1372_s26, [#allocation23]  }
 0x1a7   : > { %p16010_p11 = pnand %p16009_p10, %p16003_p7 }
 0x1a9   : > { %16013 = shalt.err (!%p16010_p11)
}
 0x1aa   : > { %s17792_s23 = sld [smem:[#allocation92_spill]]  ;;  %s16417_s16 = smov [#allocation30]  }
 0x1ab   : > { %s1422_s22 = sshll.u32 %s16417_s16, 4  ;;  %s16418_s15 = smov [#allocation33]   ;;  %s1423_s22 = int_to_ptr.vmem [resolvable:$true] %s1422_s22 }
 0x1ac   : > { %s1446_s26 = sshll.u32 %s16418_s15, 4  ;;  %s16024_s7 = scalar_lea.vmem %s1423_s22, 32  ;;  %s1447_s26 = int_to_ptr.vmem [resolvable:$true] %s1446_s26 }
 0x1ad   : > { %p16025_p12 = scmp.ne.s32.totalorder %s1423_s22, %s16024_s7  ;;  %p16031_p1 = scmp.lt.s32.totalorder %s1423_s22, %s1423_s22 }
 0x1ae   : > { %p16032_p2 = scmp.lt.s32.totalorder %s16024_s7, %s16024_s7 }
 0x1af   : > { %p16026_p13 = pnand %p16025_p12, %p13978_p3 }
 0x1b0   : > { %13863 = dma.hbm_to_vmem [thread:$0]  (%p13978_p3), %s17792_s23, 128, %s1396_s10, [#allocation26]  }
 0x1b1   : > { %p16027_p0 = pneg %p16026_p13  ;;  %p16033_p4 = por %p16032_p2, %p16031_p1 }
 0x1b3   : > { %p16034_p5 = pnand %p16033_p4, %p16027_p0 }
 0x1b5   : > { %16037 = shalt.err (!%p16034_p5)
}
 0x1b6   : > { %s17793_s11 = sld [smem:[#allocation94_spill]]  ;;  %s16048_s10 = scalar_lea.vmem %s1447_s26, 32 }
 0x1b7   : > { %p16049_p6 = scmp.ne.s32.totalorder %s1447_s26, %s16048_s10  ;;  %p16055_p9 = scmp.lt.s32.totalorder %s1447_s26, %s1447_s26 }
 0x1b8   : > { %p16056_p10 = scmp.lt.s32.totalorder %s16048_s10, %s16048_s10 }
 0x1b9   : > { %p16050_p7 = pnand %p16049_p6, %p13978_p3 }
 0x1ba   : > { %p16057_p11 = por %p16056_p10, %p16055_p9 }
 0x1bb   : > { %p16051_p8 = pneg %p16050_p7 }
 0x1bc   : > { %13867 = dma.hbm_to_vmem [thread:$0]  (%p13978_p3), %s17793_s11, 32, %s1423_s22, [#allocation29]  }
 0x1bd   : > { %p16058_p12 = pnand %p16057_p11, %p16051_p8 }
 0x1bf   : > { %16061 = shalt.err (!%p16058_p12)
}
 0x1c0   : > { %s17794_s2 = sld [smem:[#allocation95_spill]]  ;;  %s16419_s18 = smov [#allocation36]  }
 0x1c1   : > { %s1470_s23 = sshll.u32 %s16419_s18, 4  ;;  %s16420_s16 = smov [#allocation39]   ;;  %s1471_s23 = int_to_ptr.vmem [resolvable:$true] %s1470_s23 }
 0x1c2   : > { %s1494_s22 = sshll.u32 %s16420_s16, 4  ;;  %s16072_s15 = scalar_lea.vmem %s1471_s23, 32  ;;  %s1495_s22 = int_to_ptr.vmem [resolvable:$true] %s1494_s22 }
 0x1c3   : > { %p16073_p13 = scmp.ne.s32.totalorder %s1471_s23, %s16072_s15  ;;  %p16079_p2 = scmp.lt.s32.totalorder %s1471_s23, %s1471_s23 }
 0x1c4   : > { %p16080_p4 = scmp.lt.s32.totalorder %s16072_s15, %s16072_s15 }
 0x1c5   : > { %p16074_p0 = pnand %p16073_p13, %p13978_p3 }
 0x1c6   : > { %13871 = dma.hbm_to_vmem [thread:$0]  (%p13978_p3), %s17794_s2, 32, %s1447_s26, [#allocation32]  }
 0x1c7   : > { %p16075_p1 = pneg %p16074_p0  ;;  %p16081_p5 = por %p16080_p4, %p16079_p2 }
 0x1c9   : > { %p16082_p6 = pnand %p16081_p5, %p16075_p1 }
 0x1cb   : > { %16085 = shalt.err (!%p16082_p6)
}
 0x1cc   : > { %s17795_s7 = sld [smem:[#allocation96_spill]]  ;;  %s16096_s26 = scalar_lea.vmem %s1495_s22, 64 }
 0x1cd   : > { %p16097_p7 = scmp.ne.s32.totalorder %s1495_s22, %s16096_s26  ;;  %p16103_p10 = scmp.lt.s32.totalorder %s1495_s22, %s1495_s22 }
 0x1ce   : > { %p16104_p11 = scmp.lt.s32.totalorder %s16096_s26, %s16096_s26 }
 0x1cf   : > { %p16098_p8 = pnand %p16097_p7, %p13978_p3 }
 0x1d0   : > { %p16105_p12 = por %p16104_p11, %p16103_p10 }
 0x1d1   : > { %p16099_p9 = pneg %p16098_p8 }
 0x1d2   : > { %13875 = dma.hbm_to_vmem [thread:$0]  (%p13978_p3), %s17795_s7, 32, %s1471_s23, [#allocation35]  }
 0x1d3   : > { %p16106_p13 = pnand %p16105_p12, %p16099_p9 }
 0x1d5   : > { %16109 = shalt.err (!%p16106_p13)
}
 0x1d6   : > { %s17796_s11 = sld [smem:[#allocation97_spill]]  ;;  %s16421_s10 = smov [#allocation42]  }
 0x1d7   : > { %s1521_s2 = sshll.u32 %s16421_s10, 4  ;;  %s16422_s18 = smov [#allocation45]   ;;  %s1522_s2 = int_to_ptr.vmem [resolvable:$true] %s1521_s2 }
 0x1d8   : > { %s1545_s23 = sshll.u32 %s16422_s18, 4  ;;  %s16120_s16 = scalar_lea.vmem %s1522_s2, 16  ;;  %s1546_s23 = int_to_ptr.vmem [resolvable:$true] %s1545_s23 }
 0x1d9   : > { %p16121_p0 = scmp.ne.s32.totalorder %s1522_s2, %s16120_s16  ;;  %s16126_s15 = scalar_lea.vmem %s1522_s2, 32 }
 0x1da   : > { %p16127_p4 = scmp.lt.s32.totalorder %s1522_s2, %s1522_s2  ;;  %p16128_p5 = scmp.lt.s32.totalorder %s16126_s15, %s16120_s16 }
 0x1db   : > { %p16122_p1 = pnand %p16121_p0, %p13978_p3 }
 0x1dc   : > { %13879 = dma.hbm_to_vmem [thread:$0]  (%p13978_p3), %s17796_s11, 64, %s1495_s22, [#allocation38]  }
 0x1dd   : > { %p16123_p2 = pneg %p16122_p1  ;;  %p16129_p6 = por %p16128_p5, %p16127_p4 }
 0x1df   : > { %p16130_p7 = pnand %p16129_p6, %p16123_p2 }
 0x1e1   : > { %16133 = shalt.err (!%p16130_p7)
}
 0x1e2   : > { %s17797_s7 = sld [smem:[#allocation99_spill]]  ;;  %s16144_s22 = scalar_lea.vmem %s1546_s23, 16 }
 0x1e3   : > { %p16145_p8 = scmp.ne.s32.totalorder %s1546_s23, %s16144_s22  ;;  %s16150_s26 = scalar_lea.vmem %s1546_s23, 32 }
 0x1e4   : > { %p16151_p11 = scmp.lt.s32.totalorder %s1546_s23, %s1546_s23  ;;  %p16152_p12 = scmp.lt.s32.totalorder %s16150_s26, %s16144_s22 }
 0x1e5   : > { %p16146_p9 = pnand %p16145_p8, %p13978_p3 }
 0x1e6   : > { %p16153_p13 = por %p16152_p12, %p16151_p11 }
 0x1e7   : > { %p16147_p10 = pneg %p16146_p9 }
 0x1e8   : > { %13883 = dma.hbm_to_vmem [thread:$0]  (%p13978_p3), %s17797_s7, 16, %s1522_s2, [#allocation41]  }
 0x1e9   : > { %p16154_p0 = pnand %p16153_p13, %p16147_p10 }
 0x1eb   : > { %16157 = shalt.err (!%p16154_p0)
}
 0x1ec   : > { %s17798_s11 = sld [smem:[#allocation100_spill]]  ;;  %s16423_s10 = smov [#allocation48]  }
 0x1ed   : > { %s1569_s18 = sshll.u32 %s16423_s10, 4  ;;  %s16424_s2 = smov [#allocation51]   ;;  %s1570_s18 = int_to_ptr.vmem [resolvable:$true] %s1569_s18 }
 0x1ee   : > { %s1593_s16 = sshll.u32 %s16424_s2, 4  ;;  %s16168_s15 = scalar_lea.vmem %s1570_s18, 16  ;;  %s1594_s16 = int_to_ptr.vmem [resolvable:$true] %s1593_s16 }
 0x1ef   : > { %p16169_p1 = scmp.ne.s32.totalorder %s1570_s18, %s16168_s15  ;;  %s16174_s7 = scalar_lea.vmem %s1570_s18, 32 }
 0x1f0   : > { %p16175_p5 = scmp.lt.s32.totalorder %s1570_s18, %s1570_s18  ;;  %p16176_p6 = scmp.lt.s32.totalorder %s16174_s7, %s16168_s15 }
 0x1f1   : > { %p16170_p2 = pnand %p16169_p1, %p13978_p3 }
 0x1f2   : > { %13887 = dma.hbm_to_vmem [thread:$0]  (%p13978_p3), %s17798_s11, 16, %s1546_s23, [#allocation44]  }
 0x1f3   : > { %p16171_p4 = pneg %p16170_p2  ;;  %p16177_p7 = por %p16176_p6, %p16175_p5 }
 0x1f5   : > { %p16178_p8 = pnand %p16177_p7, %p16171_p4 }
 0x1f7   : > { %16181 = shalt.err (!%p16178_p8)
}
 0x1f8   : > { %s17799_s22 = sld [smem:[#allocation102_spill]]  ;;  %s16192_s23 = scalar_lea.vmem %s1594_s16, 16 }
 0x1f9   : > { %p16193_p9 = scmp.ne.s32.totalorder %s1594_s16, %s16192_s23  ;;  %s16198_s26 = scalar_lea.vmem %s1594_s16, 32 }
 0x1fa   : > { %p16199_p12 = scmp.lt.s32.totalorder %s1594_s16, %s1594_s16  ;;  %p16200_p13 = scmp.lt.s32.totalorder %s16198_s26, %s16192_s23 }
 0x1fb   : > { %p16194_p10 = pnand %p16193_p9, %p13978_p3 }
 0x1fc   : > { %p16201_p0 = por %p16200_p13, %p16199_p12 }
 0x1fd   : > { %p16195_p11 = pneg %p16194_p10 }
 0x1fe   : > { %13891 = dma.hbm_to_vmem [thread:$0]  (%p13978_p3), %s17799_s22, 16, %s1570_s18, [#allocation47]  }
 0x1ff   : > { %p16202_p1 = pnand %p16201_p0, %p16195_p11 }
 0x201   : > { %16205 = shalt.err (!%p16202_p1)
}
 0x202   : > { %s17800_s11 = sld [smem:[#allocation104_spill]]  ;;  %s16425_s10 = smov [#allocation54]  }
 0x203   : > { %s1617_s2 = sshll.u32 %s16425_s10, 4  ;;  %s16426_s18 = smov [#allocation57]   ;;  %s1618_s2 = int_to_ptr.vmem [resolvable:$true] %s1617_s2 }
 0x204   : > { %s1645_s15 = sshll.u32 %s16426_s18, 4  ;;  %s16216_s7 = scalar_lea.vmem %s1618_s2, 16  ;;  %s1646_s15 = int_to_ptr.vmem [resolvable:$true] %s1645_s15 }
 0x205   : > { %p16217_p2 = scmp.ne.s32.totalorder %s1618_s2, %s16216_s7  ;;  %s16222_s22 = scalar_lea.vmem %s1618_s2, 32 }
 0x206   : > { %p16223_p6 = scmp.lt.s32.totalorder %s1618_s2, %s1618_s2  ;;  %p16224_p7 = scmp.lt.s32.totalorder %s16222_s22, %s16216_s7 }
 0x207   : > { %p16218_p4 = pnand %p16217_p2, %p13978_p3 }
 0x208   : > { %13895 = dma.hbm_to_vmem [thread:$0]  (%p13978_p3), %s17800_s11, 16, %s1594_s16, [#allocation50]  }
 0x209   : > { %p16219_p5 = pneg %p16218_p4  ;;  %p16225_p8 = por %p16224_p7, %p16223_p6 }
 0x20b   : > { %p16226_p9 = pnand %p16225_p8, %p16219_p5 }
 0x20d   : > { %16229 = shalt.err (!%p16226_p9)
}
 0x20e   : > { %s17801_s23 = sld [smem:[#allocation106_spill]]  ;;  %s16240_s16 = scalar_lea.vmem %s1646_s15, 16 }
 0x20f   : > { %p16241_p10 = scmp.ne.s32.totalorder %s1646_s15, %s16240_s16  ;;  %s16246_s26 = scalar_lea.vmem %s1646_s15, 32 }
 0x210   : > { %p16247_p13 = scmp.lt.s32.totalorder %s1646_s15, %s1646_s15  ;;  %p16248_p0 = scmp.lt.s32.totalorder %s16246_s26, %s16240_s16 }
 0x211   : > { %p16242_p11 = pnand %p16241_p10, %p13978_p3 }
 0x212   : > { %p16249_p1 = por %p16248_p0, %p16247_p13 }
 0x213   : > { %p16243_p12 = pneg %p16242_p11 }
 0x214   : > { %13899 = dma.hbm_to_vmem [thread:$0]  (%p13978_p3), %s17801_s23, 16, %s1618_s2, [#allocation53]  }
 0x215   : > { %p16250_p2 = pnand %p16249_p1, %p16243_p12 }
 0x217   : > { %16253 = shalt.err (!%p16250_p2)
}
 0x218   : > { %13903 = dma.hbm_to_vmem [thread:$0]  (%p13978_p3), %s16677_s14, 16, %s1646_s15, [#allocation56]  }
 0x219 PF: > { %p17802_p4 = scmp.ne.s32.totalorder %s17778_s1, 0 }
 0x21a   : > { %p14015_p5 = scmp.eq.s32.totalorder (!%p17802_p4), %s16690_s28, 0 }
 0x21b   : > { %1667 = sbr.rel (%p17802_p4) target bundleno = 10053 (0x2745), region = 212 }
 0x220   : > { %16259 = dma.done.wait (%p14015_p5), [#allocation3], 32  }
 0x221   : > { %16261 = vsyncadd (%p14015_p5), [#allocation3], 4294967264 }
 0x222   : > { %16263 = dma.done.wait (%p14015_p5), [#allocation5], 4000  }
 0x223   : > { %16265 = vsyncadd (%p14015_p5), [#allocation5], 4294963296 }
 0x224   : > { %16267 = dma.done.wait (%p14015_p5), [#allocation8], 6528  }
 0x225   : > { %16269 = vsyncadd (%p14015_p5), [#allocation8], 4294960768 }
 0x226   : > { %16271 = dma.done.wait (%p14015_p5), [#allocation11], 12320  }
 0x227   : > { %16273 = vsyncadd (%p14015_p5), [#allocation11], 4294954976 }
 0x228   : > { %16275 = dma.done.wait (%p14015_p5), [#allocation14], 3872  }
 0x229   : > { %16277 = vsyncadd (%p14015_p5), [#allocation14], 4294963424 }
 0x22a   : > { %16279 = dma.done.wait (%p14015_p5), [#allocation17], 6176  }
 0x22b   : > { %16281 = vsyncadd (%p14015_p5), [#allocation17], 4294961120 }
 0x22c   : > { %16283 = dma.done.wait (%p14015_p5), [#allocation20], 12320  }
 0x22d   : > { %16285 = vsyncadd (%p14015_p5), [#allocation20], 4294954976 }
 0x22e   : > { %16287 = dma.done.wait (%p14015_p5), [#allocation23], 12320  }
 0x22f   : > { %16289 = vsyncadd (%p14015_p5), [#allocation23], 4294954976 }
 0x230   : > { %16291 = dma.done.wait (%p14015_p5), [#allocation26], 3712  }
 0x231   : > { %16293 = vsyncadd (%p14015_p5), [#allocation26], 4294963584 }
 0x232   : > { %16295 = dma.done.wait (%p14015_p5), [#allocation29], 6176  }
 0x233   : > { %16297 = vsyncadd (%p14015_p5), [#allocation29], 4294961120 }
 0x234   : > { %16299 = dma.done.wait (%p14015_p5), [#allocation32], 12320  }
 0x235   : > { %16301 = vsyncadd (%p14015_p5), [#allocation32], 4294954976 }
 0x236   : > { %16303 = dma.done.wait (%p14015_p5), [#allocation35], 12320  }
 0x237   : > { %16305 = vsyncadd (%p14015_p5), [#allocation35], 4294954976 }
 0x238   : > { %16307 = dma.done.wait (%p14015_p5), [#allocation38], 3136  }
 0x239   : > { %16309 = vsyncadd (%p14015_p5), [#allocation38], 4294964160 }
 0x23a   : > { %16311 = dma.done.wait (%p14015_p5), [#allocation41], 3088  }
 0x23b   : > { %16313 = vsyncadd (%p14015_p5), [#allocation41], 4294964208 }
 0x23c   : > { %16315 = dma.done.wait (%p14015_p5), [#allocation44], 3088  }
 0x23d   : > { %16317 = vsyncadd (%p14015_p5), [#allocation44], 4294964208 }
 0x23e   : > { %16319 = dma.done.wait (%p14015_p5), [#allocation47], 3088  }
 0x23f   : > { %16321 = vsyncadd (%p14015_p5), [#allocation47], 4294964208 }
 0x240   : > { %16323 = dma.done.wait (%p14015_p5), [#allocation50], 1040  }
 0x241   : > { %16325 = vsyncadd (%p14015_p5), [#allocation50], 4294966256 }
 0x242   : > { %16327 = dma.done.wait (%p14015_p5), [#allocation53], 1040  }
 0x243   : > { %16329 = vsyncadd (%p14015_p5), [#allocation53], 4294966256 }
 0x244   : > { %16331 = dma.done.wait (%p14015_p5), [#allocation56], 32  }
 0x245   : > { %16333 = vsyncadd (%p14015_p5), [#allocation56], 4294967264  ;;  %s17803_s1 = sld [smem:[#allocation79_spill]]  ;;  %v16427_v0 = vmov 0   ;;  %s1924_s11 = smul.u32 5, %s16690_s28  ;;  %vm2054_vm1 = vcmask 785408  }
 0x246   : > { %2093 = vmatprep.mubr.bf16.mxu0 %v16427_v0  ;;  %2210 = vmatprep.mubr.bf16.mxu1 %v16427_v0  ;;  %s17804_s10 = sld [smem:[#allocation77_spill]]  ;;  %vm1973_vm0 = vsmask.f32 7424  ;;  %vm2247_vm2 = vcmask 1046528   ;;  %v16428_v62 = vmov 0.0   ;;  %vm2408_vm3 = vcmask 261120  }
 0x247   : > { %p1925_p3 = scmp.lt.s32.totalorder %s1924_s11, 9  ;;  %s17805_s15 = sld [smem:[#allocation81_spill]]  ;;  %vm3487_vm4 = vcmask 982016   ;;  %vm16430_vm5 = vmmov 0   ;;  %vm3687_vm6 = vcmask 1040384   ;;  %vm3677_vm7 = vcmask 269312  }
 0x248   : > { %s17806_s7 = sld [smem:[#allocation78_spill]]  ;;  %s16429_s22 = smov 120   ;;  %vm4238_vm8 = vcmask 130048   ;;  %vm5205_vm9 = vcmask 916480   ;;  %vm5356_vm10 = vcmask 138240   ;;  %vm5887_vm11 = vcmask 64512  }
 0x249   : > { %s17814_s11 = smov (!%p1925_p3, %s1924_s11), 9  ;;  %s17807_s23 = sld [smem:[#allocation83_spill]]  ;;  %vm7756_vm12 = vcmask 72704   ;;  %vm8281_vm13 = vcmask 1043456   ;;  %vm8277_vm14 = vcmask 31744   ;;  %vm10005_vm15 = vcmask 523264  }
 0x24a   : > { %s12389_s2 = sshll.u32 %s17814_s11, 3  ;;  %s16431_s16 = smov 112  }
 0x24b   : > { %v14156_v1 = vld [vmem:[%s17803_s1 + $0xb4] ss:$8 sps:$4 sm:$0xff]   ;;  %v14160_v3 = vld [vmem:[%s17803_s1 + $0xb0] ss:$8 sps:$4 sm:$0xff]   ;;  %v14162_v5 = vld [vmem:[%s17803_s1 + $0xa4] ss:$8 sps:$4 sm:$0xff]  }
 0x24c   : > { %v14158_v2 = vld [vmem:[%s17803_s1 + $0x54] ss:$8 sps:$4 sm:$0xff]   ;;  %2065 = vmatprep.subr.bf16.mxu0 %v14156_v1  ;;  %v14161_v4 = vld [vmem:[%s17803_s1 + $0x50] ss:$8 sps:$4 sm:$0xff]   ;;  %v14164_v6 = vld [vmem:[%s17803_s1 + $0x44] ss:$8 sps:$4 sm:$0xff]   ;;  %s1928_s18 = scalar_lea.vmem %s17804_s10, %s12389_s2 }
 0x24d   : > { %2182 = vmatprep.subr.bf16.mxu1 %v14158_v2  ;;  %2066 = vmatpush1.bf16.msra.mxu0 %v14160_v3  ;;  %v14166_v7 = vld [vmem:[%s17803_s1 + $0xa0] ss:$8 sps:$4 sm:$0xff]   ;;  %v14168_v9 = vld [vmem:[%s17803_s1 + $0x94] ss:$8 sps:$4 sm:$0xff]   ;;  %v14172_v11 = vld [vmem:[%s17803_s1 + $0x90] ss:$8 sps:$4 sm:$0xff]  }
 0x24e   : > { %2183 = vmatpush1.bf16.msra.mxu1 %v14161_v4  ;;  %2067 = vmatprep.subr.bf16.mxu0 %v14162_v5  ;;  %v14167_v8 = vld [vmem:[%s17803_s1 + $0x40] ss:$8 sps:$4 sm:$0xff]   ;;  %v14170_v10 = vld [vmem:[%s17803_s1 + $0x34] ss:$8 sps:$4 sm:$0xff]   ;;  %v14173_v12 = vld [vmem:[%s17803_s1 + $0x30] ss:$8 sps:$4 sm:$0xff]  }
 0x24f   : > { %2184 = vmatprep.subr.bf16.mxu1 %v14164_v6  ;;  %v14174_v13 = vld [vmem:[%s17803_s1 + $0x84] ss:$8 sps:$4 sm:$0xff]   ;;  %v14178_v15 = vld [vmem:[%s17803_s1 + $0x80] ss:$8 sps:$4 sm:$0xff]   ;;  %v14180_v17 = vld [vmem:[%s17803_s1 + $0x74] ss:$8 sps:$4 sm:$0xff]  }
 0x250   : > { %v14176_v14 = vld [vmem:[%s17803_s1 + $0x24] ss:$8 sps:$4 sm:$0xff]   ;;  %v14179_v16 = vld [vmem:[%s17803_s1 + $0x20] ss:$8 sps:$4 sm:$0xff]   ;;  %v14182_v18 = vld [vmem:[%s17803_s1 + $0x14] ss:$8 sps:$4 sm:$0xff]  }
 0x251   : > { %2068 = vmatpush1.bf16.msra.mxu0 %v14166_v7  ;;  %v14184_v19 = vld [vmem:[%s17803_s1 + $0x70] ss:$8 sps:$4 sm:$0xff]   ;;  %v14186_v21 = vld [vmem:[%s17803_s1 + $0x64] ss:$8 sps:$4 sm:$0xff]   ;;  %v14190_v31 = vld [vmem:[%s17803_s1 + $0x60] ss:$8 sps:$4 sm:$0xff]  }
 0x252   : > { %2185 = vmatpush1.bf16.msra.mxu1 %v14167_v8  ;;  %2069 = vmatprep.subr.bf16.mxu0 %v14168_v9  ;;  %v14185_v20 = vld [vmem:[%s17803_s1 + $0x10] ss:$8 sps:$4 sm:$0xff]   ;;  %v14188_v22 = vld [vmem:[%s17803_s1 + $0x4] ss:$8 sps:$4 sm:$0xff]   ;;  %v14191_v32 = vld [vmem:[%s17803_s1] ss:$8 sps:$4 sm:$0xff]  }
 0x253   : > { %2186 = vmatprep.subr.bf16.mxu1 %v14170_v10  ;;  %v1935_v23 = vld [vmem:[%s1928_s18] sm:$0xff]  ;;  %v1936_v24 = vld [vmem:[%s1928_s18 + $0x8] sm:$0xff]  ;;  %v1937_v25 = vld [vmem:[%s1928_s18 + $0x10] sm:$0xff]  ;;  %s17808_s26 = sld [smem:[#allocation87_spill]]  ;;  %s16432_s10 = smov 96  }
 0x254   : > { %v1938_v26 = vld [vmem:[%s1928_s18 + $0x18] sm:$0xff]  ;;  %v1945_v27 = vpack.c.bf16 %v1936_v24, %v1935_v23  ;;  %v1939_v36 = vld [vmem:[%s1928_s18 + $0x20] sm:$0xff]  ;;  %s17809_s11 = sld [smem:[#allocation88_spill]]  ;;  %s16433_s18 = smov 64  }
 0x255   : > { %2070 = vmatpush1.bf16.msra.mxu0 %v14172_v11  ;;  %v17045_v28 = vpack.c.bf16 %v1938_v26, %v1937_v25  ;;  %v14194_v35 = vld [vmem:[%s17803_s1 + $0x114] ss:$8 sps:$4 sm:$0xff]   ;;  %v1959_v38 = vpack.c.bf16 %v1939_v36, %v1939_v36  ;;  %v14192_v40 = vld [vmem:[%s17803_s1 + $0x110] ss:$8 sps:$4 sm:$0xff]   ;;  %v14197_v44 = vld [vmem:[%s17803_s1 + $0x104] ss:$8 sps:$4 sm:$0xff]  }
 0x256   : > { %2187 = vmatpush1.bf16.msra.mxu1 %v14173_v12  ;;  %2071 = vmatprep.subr.bf16.mxu0 %v14174_v13  ;;  %v1975_v29 = vshrl.u32 %v1945_v27, 16  ;;  %v1977_v30 = vshll.u32 %v1945_v27, 16  ;;  %v14195_v45 = vld [vmem:[%s17803_s1 + $0x100] ss:$8 sps:$4 sm:$0xff]   ;;  %v14200_v46 = vld [vmem:[%s17803_s1 + $0xf4] ss:$8 sps:$4 sm:$0xff]  }
 0x257   : > { %2188 = vmatprep.subr.bf16.mxu1 %v14176_v14  ;;  %v1982_v33 = vshll.u32 %v17045_v28, 16  ;;  %v1986_v41 = vshrl.u32 %v17045_v28, 16  ;;  %v1990_v42 = vshll.u32 %v1959_v38, 16  ;;  %v14198_v49 = vld [vmem:[%s17803_s1 + $0xf0] ss:$8 sps:$4 sm:$0xff]   ;;  %v2248_v57 = vrot.slane %v1945_v27, 1 }
 0x258   : > { %v1979_v34 = vrot.slane %v1977_v30, 1  ;;  %v14203_v50 = vld [vmem:[%s17803_s1 + $0xe4] ss:$8 sps:$4 sm:$0xff]   ;;  %v14201_v52 = vld [vmem:[%s17803_s1 + $0xe0] ss:$8 sps:$4 sm:$0xff]   ;;  %v2249_v58 = vrot.slane %v17045_v28, 1 }
 0x259   : > { %2072 = vmatpush1.bf16.msra.mxu0 %v14178_v15  ;;  %v1984_v37 = vrot.slane %v1982_v33, 1  ;;  %v1992_v48 = vrot.slane %v1990_v42, 1  ;;  %v14206_v53 = vld [vmem:[%s17803_s1 + $0xd4] ss:$8 sps:$4 sm:$0xff]   ;;  %v14204_v54 = vld [vmem:[%s17803_s1 + $0xd0] ss:$8 sps:$4 sm:$0xff]  }
 0x25a   : > { %2189 = vmatpush1.bf16.msra.mxu1 %v14179_v16  ;;  %2073 = vmatprep.subr.bf16.mxu0 %v14180_v17  ;;  %v1980_v39 = vor.u32 %v1979_v34, %v1975_v29  ;;  %v14209_v55 = vld [vmem:[%s17803_s1 + $0xc4] ss:$8 sps:$4 sm:$0xff]   ;;  %v14207_v56 = vld [vmem:[%s17803_s1 + $0xc0] ss:$8 sps:$4 sm:$0xff]   ;;  %v2250_v59 = vsel %vm2247_vm2, %v2248_v57, %v2249_v58  ;;  %v2251_v60 = vrot.slane %v1959_v38, 1  ;;  %s17810_s2 = sld [smem:[#allocation93_spill]] }
 0x25b   : > { %2190 = vmatprep.subr.bf16.mxu1 %v14182_v18  ;;  %v1988_v47 = vor.u32 %v1986_v41, %v1984_v37  ;;  %v14210_v63 = vld [vmem:[%s17805_s15 + $0x70] ss:$8 sps:$4 sm:$0xff]   ;;  %v14212_v1 = vld [vmem:[%s17805_s15 + $0x74] ss:$8 sps:$4 sm:$0xff]   ;;  %v14215_v2 = vld [vmem:[%s17805_s15 + $0x64] ss:$8 sps:$4 sm:$0xff]  }
 0x25c   : > { %v1985_v43 = vsel %vm1973_vm0, %v1980_v39, %v1984_v37  ;;  %v2252_v61 = vsel %vm2247_vm2, %v2249_v58, %v2251_v60  ;;  %v14213_v3 = vld [vmem:[%s17805_s15 + $0x60] ss:$8 sps:$4 sm:$0xff]   ;;  %v14218_v4 = vld [vmem:[%s17805_s15 + $0x54] ss:$8 sps:$4 sm:$0xff]   ;;  %v14216_v5 = vld [vmem:[%s17805_s15 + $0x50] ss:$8 sps:$4 sm:$0xff]  }
 0x25d   : > { %2074 = vmatpush1.bf16.msra.mxu0 %v14184_v19  ;;  %v1993_v51 = vsel %vm1973_vm0, %v1988_v47, %v1992_v48  ;;  %v14224_v6 = vld [vmem:[%s17805_s15 + $0x44] ss:$8 sps:$4 sm:$0xff]   ;;  %v14222_v7 = vld [vmem:[%s17805_s15 + $0x40] ss:$8 sps:$4 sm:$0xff]   ;;  %v14230_v8 = vld [vmem:[%s17805_s15 + $0x34] ss:$8 sps:$4 sm:$0xff]  }
 0x25e   : > { %2191 = vmatpush1.bf16.msra.mxu1 %v14185_v20  ;;  %2075 = vmatprep.subr.bf16.mxu0 %v14186_v21  ;;  %v14228_v9 = vld [vmem:[%s17805_s15 + $0x30] ss:$8 sps:$4 sm:$0xff]   ;;  %v14236_v10 = vld [vmem:[%s17805_s15 + $0x24] ss:$8 sps:$4 sm:$0xff]   ;;  %v14234_v11 = vld [vmem:[%s17805_s15 + $0x20] ss:$8 sps:$4 sm:$0xff]  }
 0x25f   : > { %2192 = vmatprep.subr.bf16.mxu1 %v14188_v22  ;;  %v14242_v12 = vld [vmem:[%s17805_s15 + $0x14] ss:$8 sps:$4 sm:$0xff]   ;;  %v14240_v13 = vld [vmem:[%s17805_s15 + $0x10] ss:$8 sps:$4 sm:$0xff]   ;;  %v14248_v14 = vld [vmem:[%s17805_s15 + $0x4] ss:$8 sps:$4 sm:$0xff]  }
 0x260   : > { %v14246_v15 = vld [vmem:[%s17805_s15] ss:$8 sps:$4 sm:$0xff]   ;;  %v14254_v16 = vld [vmem:[%s17805_s15 + $0xf4] ss:$8 sps:$4 sm:$0xff]   ;;  %v14252_v17 = vld [vmem:[%s17805_s15 + $0xf0] ss:$8 sps:$4 sm:$0xff]  }
 0x261   : > { %2076 = vmatpush1.bf16.msra.mxu0 %v14190_v31  ;;  %v14260_v18 = vld [vmem:[%s17805_s15 + $0xe4] ss:$8 sps:$4 sm:$0xff]   ;;  %v14258_v19 = vld [vmem:[%s17805_s15 + $0xe0] ss:$8 sps:$4 sm:$0xff]   ;;  %v14266_v20 = vld [vmem:[%s17805_s15 + $0xd4] ss:$8 sps:$4 sm:$0xff]  }
 0x262   : > { %2193 = vmatpush1.bf16.msra.mxu1 %v14191_v32  ;;  %2323 = vmatprep.subr.bf16.mxu0 %v14194_v35  ;;  %v14264_v21 = vld [vmem:[%s17805_s15 + $0xd0] ss:$8 sps:$4 sm:$0xff]   ;;  %v14272_v22 = vld [vmem:[%s17805_s15 + $0xc4] ss:$8 sps:$4 sm:$0xff]   ;;  %v14270_v23 = vld [vmem:[%s17805_s15 + $0xc0] ss:$8 sps:$4 sm:$0xff]  }
 0x263   : > { %v14278_v24 = vld [vmem:[%s17805_s15 + $0xb4] ss:$8 sps:$4 sm:$0xff]   ;;  %v14276_v25 = vld [vmem:[%s17805_s15 + $0xb0] ss:$8 sps:$4 sm:$0xff]   ;;  %v14284_v26 = vld [vmem:[%s17805_s15 + $0xa4] ss:$8 sps:$4 sm:$0xff]  }
 0x264   : > { %12415 = vmatmul.mubr.msk.bf16.vlgmr.msra.gmra.mxu0 %vm2054_vm1, %v1985_v43  ;;  %v2382_v43 = vlaneseq  ;;  %p1930_p6 = scmp.lt.s32.totalorder %s16690_s28, 1 }
 0x265   : > { %12429 = vmatmul.mubr.msk.bf16.vlgmr.msra.gmra.mxu1 %vm2054_vm1, %v1945_v27  ;;  %2324 = vmatpush1.bf16.msra.mxu0 %v14192_v40  ;;  %v14282_v27 = vld [vmem:[%s17805_s15 + $0xa0] ss:$8 sps:$4 sm:$0xff]  }
 0x266   : > { %2103 = vmatprep.mubr.bf16.mxu0 %v16427_v0  ;;  %2325 = vmatprep.subr.bf16.mxu0 %v14197_v44  ;;  %v2383_v47 = vshrl.u32 %v2382_v43, 7  ;;  %v14243_v43 = vld [vmem:[%s17805_s15 + $0x130] ss:$8 sps:$4 sm:$0xff]   ;;  %s17816_s28 = smov (!%p1930_p6, %s16690_s28), 1 }
 0x267   : > { %2220 = vmatprep.mubr.bf16.mxu1 %v16427_v0 }
 0x269   : > { %2326 = vmatpush1.bf16.msra.mxu0 %v14195_v45 }
 0x26a   : > { %2327 = vmatprep.subr.bf16.mxu0 %v14200_v46 }
 0x26c   : > { %12416 = vmatmul.mubr.msk.bf16.gmra.mxu0 %vm2054_vm1, %v1993_v51 }
 0x26d   : > { %12430 = vmatmul.mubr.msk.bf16.gmra.mxu1 %vm2054_vm1, %v17045_v28  ;;  %2328 = vmatpush1.bf16.msra.mxu0 %v14198_v49 }
 0x26e   : > { %2351 = vmatprep.mubr.bf16.mxu0 %v16427_v0  ;;  %2329 = vmatprep.subr.bf16.mxu0 %v14203_v50  ;;  %v2380_v50 = vld [vmem:[#allocation2] sm:$0x3] }
 0x26f   : > { %2488 = vmatprep.mubr.f32.mxu1 %v16428_v62 }
 0x271   : > { %2330 = vmatpush1.bf16.msra.mxu0 %v14201_v52  ;;  %v17108_v52 = vsub.s32 0, %v2383_v47 }
 0x272   : > { %2331 = vmatprep.subr.bf16.mxu0 %v14206_v53 }
 0x275   : > { %2332 = vmatpush1.bf16.msra.mxu0 %v14204_v54 }
 0x276   : > { %2333 = vmatprep.subr.bf16.mxu0 %v14209_v55 }
 0x279   : > { %2334 = vmatpush1.bf16.msra.mxu0 %v14207_v56  ;;  %v17110_v56 = vsub.s32 1, %v2383_v47  ;;  %v14255_v47 = vld [vmem:[%s17805_s15 + $0x110] ss:$8 sps:$4 sm:$0xff]  }
 0x27a   : > { %3007 = vmatprep.subr.bf16.mxu0 %v14212_v1 }
 0x27c   : > { %12455 = vmatmul.mubr.msk.bf16.vlgmr.msra.gmra.mxu0 %vm2054_vm1, %v2250_v59 }
 0x27d   : > { %2361 = vmatprep.mubr.bf16.mxu0 %v16427_v0  ;;  %3008 = vmatpush1.bf16.msra.mxu0 %v14210_v63 }
 0x27e   : > { %3009 = vmatprep.subr.bf16.mxu0 %v14215_v2  ;;  %v2385_v2 = vrot.slane %v2380_v50, %v17108_v52 }
 0x281   : > { %3010 = vmatpush1.bf16.msra.mxu0 %v14213_v3 }
 0x282   : > { %3011 = vmatprep.subr.bf16.mxu0 %v14218_v4 }
 0x284   : > { %12456 = vmatmul.mubr.msk.bf16.gmra.mxu0 %vm2054_vm1, %v2252_v61 }
 0x285   : > { %3012 = vmatpush1.bf16.msra.mxu0 %v14216_v5 }
 0x286   : > { %3013 = vmatprep.subr.bf16.mxu0 %v14224_v6  ;;  %v2389_v6 = vrot.slane %v2380_v50, %v17110_v56  ;;  %v14269_v50 = vld [vmem:[%s17805_s15 + $0x1f4] ss:$8 sps:$4 sm:$0xff]  }
 0x289   : > { %3014 = vmatpush1.bf16.msra.mxu0 %v14222_v7 }
 0x28a   : > { %3015 = vmatprep.subr.bf16.mxu0 %v14230_v8 }
 0x28d   : > { %3016 = vmatpush1.bf16.msra.mxu0 %v14228_v9 }
 0x28e   : > { %3017 = vmatprep.subr.bf16.mxu0 %v14236_v10 }
 0x291   : > { %3018 = vmatpush1.bf16.msra.mxu0 %v14234_v11 }
 0x292   : > { %3019 = vmatprep.subr.bf16.mxu0 %v14242_v12 }
 0x295   : > { %3020 = vmatpush1.bf16.msra.mxu0 %v14240_v13 }
 0x296   : > { %3021 = vmatprep.subr.bf16.mxu0 %v14248_v14 }
 0x299   : > { %3022 = vmatpush1.bf16.msra.mxu0 %v14246_v15 }
 0x29a   : > { %3023 = vmatprep.subr.bf16.mxu0 %v14254_v16 }
 0x29d   : > { %3024 = vmatpush2.bf16.msra.mxu0 %v14252_v17 }
 0x29e   : > { %3025 = vmatprep.subr.bf16.mxu0 %v14260_v18 }
 0x2a1   : > { %3026 = vmatpush2.bf16.msra.mxu0 %v14258_v19 }
 0x2a2   : > { %3027 = vmatprep.subr.bf16.mxu0 %v14266_v20 }
 0x2a5   : > { %3028 = vmatpush2.bf16.msra.mxu0 %v14264_v21 }
 0x2a6   : > { %3029 = vmatprep.subr.bf16.mxu0 %v14272_v22 }
 0x2a9   : > { %3030 = vmatpush2.bf16.msra.mxu0 %v14270_v23 }
 0x2aa   : > { %3031 = vmatprep.subr.bf16.mxu0 %v14278_v24 }
 0x2ad   : > { %3032 = vmatpush2.bf16.msra.mxu0 %v14276_v25 }
 0x2ae   : > { %3033 = vmatprep.subr.bf16.mxu0 %v14284_v26  ;;  %v14221_v26 = vld [vmem:[%s17805_s15 + $0x174] ss:$8 sps:$4 sm:$0xff]  }
 0x2b1   : > { %3034 = vmatpush2.bf16.msra.mxu0 %v14282_v27 }
 0x324   : > { %v2095_v28 = vpop.f32.mrf.mxu0 }
 0x325   : > { %v2212_v31 = vpop.f32.mrf.mxu1 }
 0x326   : > { %v2097_v29 = vpop.f32.mrf.mxu0  ;;  %v2213_v9 = vadd.f32 %v2212_v31, %v2095_v28  ;;  %v17116_v28 = vld [vmem:[%s17806_s7] sm:$0xff] }
 0x327   : > { %v2214_v34 = vpop.f32.mrf.mxu1  ;;  %v14227_v31 = vld [vmem:[%s17805_s15 + $0x164] ss:$8 sps:$4 sm:$0xff]  }
 0x328   : > { %v2099_v30 = vpop.f32.mrf.mxu0  ;;  %v2215_v5 = vadd.f32 %v2214_v34, %v2097_v29  ;;  %v14219_v29 = vld [vmem:[%s17805_s15 + $0x170] ss:$8 sps:$4 sm:$0xff]   ;;  %v14225_v34 = vld [vmem:[%s17805_s15 + $0x160] ss:$8 sps:$4 sm:$0xff]  }
 0x329   : > { %v2216_v36 = vpop.f32.mrf.mxu1 }
 0x32a   : > { %v2101_v32 = vpop.f32.mrf.mxu0  ;;  %v2217_v1 = vadd.f32 %v2216_v36, %v2099_v30  ;;  %v17129_v36 = vld [vmem:[%s17806_s7 + $0x10] sm:$0xff] }
 0x32b   : > { %v2218_v38 = vpop.f32.mrf.mxu1 }
 0x32c   : > { %v2105_v33 = vpop.f32.mrf.mxu0  ;;  %v2219_v59 = vadd.f32 %v2218_v38, %v2101_v32  ;;  %v14239_v38 = vld [vmem:[%s17805_s15 + $0x144] ss:$8 sps:$4 sm:$0xff]  }
 0x32d   : > { %v2222_v39 = vpop.f32.mrf.mxu1 }
 0x32e   : > { %v2107_v35 = vpop.f32.mrf.mxu0  ;;  %v2223_v57 = vadd.f32 %v2222_v39, %v2105_v33  ;;  %v17121_v33 = vld [vmem:[%s17806_s7 + $0x8] sm:$0xff]  ;;  %v17137_v39 = vld [vmem:[%s17806_s7 + $0x18] sm:$0xff] }
 0x32f   : > { %v2224_v42 = vpop.f32.mrf.mxu1 }
 0x330   : > { %v2109_v37 = vpop.f32.mrf.mxu0  ;;  %v2225_v54 = vadd.f32 %v2224_v42, %v2107_v35  ;;  %v14233_v35 = vld [vmem:[%s17805_s15 + $0x154] ss:$8 sps:$4 sm:$0xff]   ;;  %v17145_v42 = vld [vmem:[%s17806_s7 + $0x20] sm:$0x3] }
 0x331   : > { %v2226_v46 = vpop.f32.mrf.mxu1 }
 0x332   : > { %v2111_v40 = vpop.f32.mrf.mxu0  ;;  %v2227_v55 = vadd.f32 %v2226_v46, %v2109_v37  ;;  %v14231_v37 = vld [vmem:[%s17805_s15 + $0x150] ss:$8 sps:$4 sm:$0xff]   ;;  %v14257_v46 = vld [vmem:[%s17805_s15 + $0x114] ss:$8 sps:$4 sm:$0xff]  }
 0x333   : > { %v2228_v51 = vpop.f32.mrf.mxu1 }
 0x334   : > { %v2229_v60 = vadd.f32 %v2228_v51, %v2111_v40  ;;  %v14237_v40 = vld [vmem:[%s17805_s15 + $0x140] ss:$8 sps:$4 sm:$0xff]   ;;  %v14267_v51 = vld [vmem:[%s17805_s15 + $0x1f0] ss:$8 sps:$4 sm:$0xff]  }
 0x33c   : > { %v2353_v41 = vpop.f32.mrf.mxu0 }
 0x33d   : > { %v2372_v15 = vadd.f32 %v2353_v41, %v2213_v9  ;;  %v14245_v41 = vld [vmem:[%s17805_s15 + $0x134] ss:$8 sps:$4 sm:$0xff]   ;;  %v14303_v9 = vld [vmem:[%s17805_s15 + $0x180] ss:$8 sps:$4 sm:$0xff]  }
 0x33e   : > { %v2355_v44 = vpop.f32.mrf.mxu0 }
 0x33f   : > { %v2373_v12 = vadd.f32 %v2355_v44, %v2215_v5  ;;  %v2392_v23 = vadd.f32 %v2385_v2, %v2372_v15  ;;  %v14251_v44 = vld [vmem:[%s17805_s15 + $0x124] ss:$8 sps:$4 sm:$0xff]   ;;  %v14297_v5 = vld [vmem:[%s17805_s15 + $0x1a0] ss:$8 sps:$4 sm:$0xff]  }
 0x340   : > { %v2357_v45 = vpop.f32.mrf.mxu0 }
 0x341   : > { %v2374_v10 = vadd.f32 %v2357_v45, %v2217_v1  ;;  %v2393_v21 = vadd.f32 %v2389_v6, %v2373_v12  ;;  %v2400_v32 = vmax.f32 %v2392_v23, 0.0  ;;  %v14249_v45 = vld [vmem:[%s17805_s15 + $0x120] ss:$8 sps:$4 sm:$0xff]   ;;  %v14296_v1 = vld [vmem:[%s17805_s15 + $0x84] ss:$8 sps:$4 sm:$0xff]  }
 0x342   : > { %v2359_v48 = vpop.f32.mrf.mxu0 }
 0x343   : > { %v2375_v7 = vadd.f32 %v2359_v48, %v2219_v59  ;;  %v2394_v19 = vadd.f32 %v2385_v2, %v2374_v10  ;;  %v2401_v30 = vmax.f32 %v2393_v21, 0.0  ;;  %v14263_v48 = vld [vmem:[%s17805_s15 + $0x104] ss:$8 sps:$4 sm:$0xff]   ;;  %v14290_v59 = vld [vmem:[%s17805_s15 + $0x94] ss:$8 sps:$4 sm:$0xff]  }
 0x344   : > { %v2363_v49 = vpop.f32.mrf.mxu0  ;;  %3035 = vmatprep.subr.bf16.mxu0 %v14290_v59  ;;  %v14308_v10 = vld [vmem:[%s17805_s15 + $0x274] ss:$8 sps:$4 sm:$0xff]  }
 0x345   : > { %v2376_v3 = vadd.f32 %v2363_v49, %v2223_v57  ;;  %v2395_v17 = vadd.f32 %v2389_v6, %v2375_v7  ;;  %v2402_v27 = vmax.f32 %v2394_v19, 0.0  ;;  %v14261_v49 = vld [vmem:[%s17805_s15 + $0x100] ss:$8 sps:$4 sm:$0xff]   ;;  %v14279_v57 = vld [vmem:[%s17805_s15 + $0x1d0] ss:$8 sps:$4 sm:$0xff]  }
 0x346   : > { %v2365_v53 = vpop.f32.mrf.mxu0  ;;  %v14300_v7 = vld [vmem:[%s17805_s15 + $0x190] ss:$8 sps:$4 sm:$0xff]  }
 0x347   : > { %v2377_v61 = vadd.f32 %v2365_v53, %v2225_v54  ;;  %v2396_v16 = vadd.f32 %v2385_v2, %v2376_v3  ;;  %v2403_v25 = vmax.f32 %v2395_v17, 0.0  ;;  %v14275_v53 = vld [vmem:[%s17805_s15 + $0x1e4] ss:$8 sps:$4 sm:$0xff]   ;;  %v14273_v54 = vld [vmem:[%s17805_s15 + $0x1e0] ss:$8 sps:$4 sm:$0xff]  }
 0x348   : > { %v2367_v58 = vpop.f32.mrf.mxu0  ;;  %v14294_v3 = vld [vmem:[%s17805_s15 + $0x80] ss:$8 sps:$4 sm:$0xff]  }
 0x349   : > { %v2378_v63 = vadd.f32 %v2367_v58, %v2227_v55  ;;  %v2397_v13 = vadd.f32 %v2389_v6, %v2377_v61  ;;  %v2404_v24 = vmax.f32 %v2396_v16, 0.0  ;;  %v14281_v55 = vld [vmem:[%s17805_s15 + $0x1d4] ss:$8 sps:$4 sm:$0xff]   ;;  %v14287_v58 = vld [vmem:[%s17805_s15 + $0x1c4] ss:$8 sps:$4 sm:$0xff]  }
 0x34a   : > { %v2369_v4 = vpop.f32.mrf.mxu0  ;;  %v14288_v61 = vld [vmem:[%s17805_s15 + $0x90] ss:$8 sps:$4 sm:$0xff]  }
 0x34b   : > { %v2379_v8 = vadd.f32 %v2369_v4, %v2229_v60  ;;  %v2398_v11 = vadd.f32 %v2385_v2, %v2378_v63  ;;  %v2405_v22 = vmax.f32 %v2397_v13, 0.0  ;;  %v14285_v60 = vld [vmem:[%s17805_s15 + $0x1c0] ss:$8 sps:$4 sm:$0xff]   ;;  %3036 = vmatpush2.bf16.msra.mxu0 %v14288_v61  ;;  %v14293_v63 = vld [vmem:[%s17805_s15 + $0x1b4] ss:$8 sps:$4 sm:$0xff]  }
 0x34c   : > { %v14291_v2 = vld [vmem:[%s17805_s15 + $0x1b0] ss:$8 sps:$4 sm:$0xff]   ;;  %3037 = vmatprep.subr.bf16.mxu0 %v14296_v1  ;;  %v14299_v4 = vld [vmem:[%s17805_s15 + $0x1a4] ss:$8 sps:$4 sm:$0xff]  }
 0x34d   : > { %v2399_v14 = vadd.f32 %v2389_v6, %v2379_v8  ;;  %v2406_v20 = vmax.f32 %v2398_v11, 0.0  ;;  %v14302_v6 = vld [vmem:[%s17805_s15 + $0x194] ss:$8 sps:$4 sm:$0xff]   ;;  %v14305_v8 = vld [vmem:[%s17805_s15 + $0x184] ss:$8 sps:$4 sm:$0xff]  }
 0x34f   : > { %v2407_v18 = vmax.f32 %v2399_v14, 0.0  ;;  %3038 = vmatpush2.bf16.msra.mxu0 %v14294_v3 }
 0x351   : > { %2448 = vmatprep.subr.mxu1 %v2407_v18 }
 0x352   : > { %2449 = vmatpush1.msra.mxu1 %v2406_v20 }
 0x353   : > { %2450 = vmatprep.subr.mxu1 %v2405_v22 }
 0x354   : > { %2451 = vmatpush1.msra.mxu1 %v2404_v24 }
 0x355   : > { %2452 = vmatprep.subr.mxu1 %v2403_v25 }
 0x356   : > { %2453 = vmatpush1.msra.mxu1 %v2402_v27 }
 0x357   : > { %2454 = vmatprep.subr.mxu1 %v2401_v30 }
 0x358   : > { %2455 = vmatpush1.msra.mxu1 %v2400_v32 }
 0x359   : > { %12457 = vmatmul.mubr.msk.f32.vlgmr.msra.gmra.mxu1 %vm2408_vm3, %v17116_v28  ;;  %2794 = vmatprep.subr.bf16.mxu1 %v14221_v26 }
 0x35a   : > { %2494 = vmatprep.mubr.f32.mxu1 %v16428_v62  ;;  %2795 = vmatpush1.bf16.msra.mxu1 %v14219_v29 }
 0x35b   : > { %2796 = vmatprep.subr.bf16.mxu1 %v14227_v31 }
 0x35d   : > { %12458 = vmatmul.mubr.msk.f32.gmra.mxu1 %vm2408_vm3, %v17121_v33 }
 0x35e   : > { %2500 = vmatprep.mubr.f32.mxu1 %v16428_v62  ;;  %2797 = vmatpush1.bf16.msra.mxu1 %v14225_v34 }
 0x35f   : > { %2798 = vmatprep.subr.bf16.mxu1 %v14233_v35 }
 0x361   : > { %12459 = vmatmul.mubr.msk.f32.gmra.mxu1 %vm2408_vm3, %v17129_v36 }
 0x362   : > { %2506 = vmatprep.mubr.f32.mxu1 %v16428_v62  ;;  %2799 = vmatpush1.bf16.msra.mxu1 %v14231_v37 }
 0x363   : > { %2800 = vmatprep.subr.bf16.mxu1 %v14239_v38 }
 0x365   : > { %12460 = vmatmul.mubr.msk.f32.gmra.mxu1 %vm2408_vm3, %v17137_v39 }
 0x366   : > { %2512 = vmatprep.mubr.f32.mxu1 %v16428_v62  ;;  %2801 = vmatpush1.bf16.msra.mxu1 %v14237_v40 }
 0x367   : > { %2802 = vmatprep.subr.bf16.mxu1 %v14245_v41 }
 0x369   : > { %12461 = vmatmul.mubr.msk.f32.gmra.mxu1 %vm2408_vm3, %v17145_v42 }
 0x36a   : > { %2803 = vmatpush1.bf16.msra.mxu1 %v14243_v43 }
 0x36b   : > { %2804 = vmatprep.subr.bf16.mxu1 %v14251_v44 }
 0x36e   : > { %2805 = vmatpush1.bf16.msra.mxu1 %v14249_v45 }
 0x36f   : > { %2806 = vmatprep.subr.bf16.mxu1 %v14257_v46 }
 0x372   : > { %2807 = vmatpush1.bf16.msra.mxu1 %v14255_v47  ;;  %v14306_v47 = vld [vmem:[%s17805_s15 + $0x270] ss:$8 sps:$4 sm:$0xff]  }
 0x373   : > { %2808 = vmatprep.subr.bf16.mxu1 %v14263_v48 }
 0x376   : > { %2809 = vmatpush1.bf16.msra.mxu1 %v14261_v49 }
 0x377   : > { %2810 = vmatprep.subr.bf16.mxu1 %v14269_v50 }
 0x37a   : > { %2811 = vmatpush2.bf16.msra.mxu1 %v14267_v51 }
 0x37b   : > { %2812 = vmatprep.subr.bf16.mxu1 %v14275_v53  ;;  %v14311_v53 = vld [vmem:[%s17805_s15 + $0x264] ss:$8 sps:$4 sm:$0xff]  }
 0x37e   : > { %2813 = vmatpush2.bf16.msra.mxu1 %v14273_v54 }
 0x37f   : > { %2814 = vmatprep.subr.bf16.mxu1 %v14281_v55 }
 0x382   : > { %2815 = vmatpush2.bf16.msra.mxu1 %v14279_v57 }
 0x383   : > { %2816 = vmatprep.subr.bf16.mxu1 %v14287_v58 }
 0x386   : > { %2817 = vmatpush2.bf16.msra.mxu1 %v14285_v60  ;;  %v14309_v60 = vld [vmem:[%s17805_s15 + $0x260] ss:$8 sps:$4 sm:$0xff]  }
 0x387   : > { %2818 = vmatprep.subr.bf16.mxu1 %v14293_v63  ;;  %v14314_v63 = vld [vmem:[%s17805_s15 + $0x254] ss:$8 sps:$4 sm:$0xff]  }
 0x38a   : > { %2819 = vmatpush2.bf16.msra.mxu1 %v14291_v2 }
 0x38b   : > { %2820 = vmatprep.subr.bf16.mxu1 %v14299_v4  ;;  %v14312_v4 = vld [vmem:[%s17805_s15 + $0x250] ss:$8 sps:$4 sm:$0xff]  }
 0x38e   : > { %2821 = vmatpush2.bf16.msra.mxu1 %v14297_v5 }
 0x38f   : > { %2822 = vmatprep.subr.bf16.mxu1 %v14302_v6 }
 0x392   : > { %2823 = vmatpush2.bf16.msra.mxu1 %v14300_v7  ;;  %v14317_v7 = vld [vmem:[%s17805_s15 + $0x244] ss:$8 sps:$4 sm:$0xff]  }
 0x393   : > { %2824 = vmatprep.subr.bf16.mxu1 %v14305_v8 }
 0x396   : > { %2825 = vmatpush2.bf16.msra.mxu1 %v14303_v9 }
 0x397   : > { %3273 = vmatprep.subr.bf16.mxu1 %v14308_v10  ;;  %v14315_v10 = vld [vmem:[%s17805_s15 + $0x240] ss:$8 sps:$4 sm:$0xff]  }
 0x419   : > { %v2490_v11 = vpop.f32.mrf.mxu1 }
 0x41b   : > { %v2492_v12 = vpop.f32.mrf.mxu1 }
 0x41d   : > { %v2496_v13 = vpop.f32.mrf.mxu1 }
 0x41e   : > { %v2519_v16 = vpack.c.bf16 %v2496_v13, %v2490_v11  ;;  %v14320_v11 = vld [vmem:[%s17805_s15 + $0x234] ss:$8 sps:$4 sm:$0xff]   ;;  %v14323_v13 = vld [vmem:[%s17805_s15 + $0x224] ss:$8 sps:$4 sm:$0xff]  }
 0x41f   : > { %v2498_v14 = vpop.f32.mrf.mxu1 }
 0x420   : > { %v17180_v15 = vpack.c.bf16 %v2498_v14, %v2492_v12  ;;  %v2593_v20 = vshll.u32 %v2519_v16, 16  ;;  %v3099_v30 = vrot.slane %v2519_v16, 1  ;;  %v2591_v37 = vshrl.u32 %v2519_v16, 16  ;;  %v14318_v12 = vld [vmem:[%s17805_s15 + $0x230] ss:$8 sps:$4 sm:$0xff]  }
 0x421   : > { %v2502_v17 = vpop.f32.mrf.mxu1  ;;  %v14321_v14 = vld [vmem:[%s17805_s15 + $0x220] ss:$8 sps:$4 sm:$0xff]  }
 0x422   : > { %3039 = vmatprep.mubr.bf16.mxu0 %v17180_v15  ;;  %v2605_v19 = vshll.u32 %v17180_v15, 16  ;;  %v2595_v29 = vrot.slane %v2593_v20, 1  ;;  %v2603_v34 = vshrl.u32 %v17180_v15, 16  ;;  %v3102_v6 = vrot.slane %v17180_v15, 1  ;;  %v14326_v15 = vld [vmem:[%s17805_s15 + $0x214] ss:$8 sps:$4 sm:$0xff]  }
 0x423   : > { %v2504_v18 = vpop.f32.mrf.mxu1  ;;  %3040 = vmatmul.mubr.bf16.vlgmr.msra.gmra.mxu0 %v2519_v16  ;;  %v14324_v16 = vld [vmem:[%s17805_s15 + $0x210] ss:$8 sps:$4 sm:$0xff]  }
 0x424   : > { %v2607_v27 = vrot.slane %v2605_v19, 1  ;;  %v2596_v48 = vor.u32 %v2595_v29, %v2591_v37  ;;  %v14332_v19 = vld [vmem:[%s17805_s15 + $0x2f4] ss:$8 sps:$4 sm:$0xff]   ;;  %v14330_v20 = vld [vmem:[%s17805_s15 + $0x2f0] ss:$8 sps:$4 sm:$0xff]  }
 0x425   : > { %v2508_v21 = vpop.f32.mrf.mxu1  ;;  %v14344_v29 = vld [vmem:[%s17805_s15 + $0x2b4] ss:$8 sps:$4 sm:$0xff]   ;;  %v14353_v37 = vld [vmem:[%s17805_s15 + $0x284] ss:$8 sps:$4 sm:$0xff]  }
 0x426   : > { %v2521_v22 = vpack.c.bf16 %v2508_v21, %v2502_v17  ;;  %v2608_v45 = vor.u32 %v2607_v27, %v2603_v34  ;;  %v14329_v17 = vld [vmem:[%s17805_s15 + $0x204] ss:$8 sps:$4 sm:$0xff]   ;;  %v14339_v27 = vld [vmem:[%s17805_s15 + $0x2c0] ss:$8 sps:$4 sm:$0xff]   ;;  %v14350_v34 = vld [vmem:[%s17805_s15 + $0x294] ss:$8 sps:$4 sm:$0xff]  }
 0x427   : > { %v2510_v23 = vpop.f32.mrf.mxu1  ;;  %v14335_v21 = vld [vmem:[%s17805_s15 + $0x2e4] ss:$8 sps:$4 sm:$0xff]  }
 0x428   : > { %v2598_v24 = vshll.u32 %v2521_v22, 16  ;;  %v3100_v25 = vrot.slane %v2521_v22, 1  ;;  %v17184_v26 = vpack.c.bf16 %v2510_v23, %v2504_v18  ;;  %v2614_v2 = vshrl.u32 %v2521_v22, 16  ;;  %v14327_v18 = vld [vmem:[%s17805_s15 + $0x200] ss:$8 sps:$4 sm:$0xff]  }
 0x429   : > { %v2514_v31 = vpop.f32.mrf.mxu1  ;;  %v14338_v23 = vld [vmem:[%s17805_s15 + $0x2d4] ss:$8 sps:$4 sm:$0xff]  }
 0x42a   : > { %v2555_v32 = vpack.c.bf16 %v2514_v31, %v2514_v31  ;;  %3049 = vmatprep.mubr.bf16.mxu0 %v17184_v26  ;;  %v2610_v35 = vshll.u32 %v17184_v26, 16  ;;  %v2600_v38 = vrot.slane %v2598_v24, 1  ;;  %v17190_v41 = vsel %vm2247_vm2, %v3099_v30, %v3100_v25  ;;  %v14336_v24 = vld [vmem:[%s17805_s15 + $0x2d0] ss:$8 sps:$4 sm:$0xff]   ;;  %v14347_v31 = vld [vmem:[%s17805_s15 + $0x2a4] ss:$8 sps:$4 sm:$0xff]  }
 0x42b   : > { %v2516_v40 = vpop.f32.mrf.mxu1  ;;  %3050 = vmatmul.mubr.bf16.gmra.mxu0 %v2521_v22  ;;  %v2622_v51 = vshrl.u32 %v17184_v26, 16  ;;  %v3103_v3 = vrot.slane %v17184_v26, 1  ;;  %v14333_v22 = vld [vmem:[%s17805_s15 + $0x2e0] ss:$8 sps:$4 sm:$0xff]   ;;  %v14342_v30 = vld [vmem:[%s17805_s15 + $0x2b0] ss:$8 sps:$4 sm:$0xff]  }
 0x42c   : > { %v3105_v43 = vrot.slane %v2555_v32, 1  ;;  %v17192_v44 = vpack.c.bf16 %v2516_v40, %v2516_v40  ;;  %v2612_v46 = vrot.slane %v2610_v35, 1  ;;  %3426 = vmatprep.mubr.f32.mxu0 %v16428_v62  ;;  %v2618_v54 = vshll.u32 %v2555_v32, 16  ;;  %v14345_v32 = vld [vmem:[%s17805_s15 + $0x2a0] ss:$8 sps:$4 sm:$0xff]  }
 0x42d   : > { %v2601_v55 = vsel %vm1973_vm0, %v2596_v48, %v2600_v38  ;;  %v2616_v5 = vor.u32 %v2614_v2, %v2600_v38  ;;  %v3104_v9 = vsel %vm2247_vm2, %v3102_v6, %v3103_v3  ;;  %v14348_v35 = vld [vmem:[%s17805_s15 + $0x290] ss:$8 sps:$4 sm:$0xff]   ;;  %v14351_v38 = vld [vmem:[%s17805_s15 + $0x280] ss:$8 sps:$4 sm:$0xff]  }
 0x42e   : > { %v2626_v49 = vshll.u32 %v17192_v44, 16  ;;  %v2613_v50 = vsel %vm1973_vm0, %v2608_v45, %v2612_v46  ;;  %v17202_v57 = vsel %vm2247_vm2, %v3100_v25, %v3105_v43  ;;  %v2624_v59 = vor.u32 %v2622_v51, %v2612_v46  ;;  %v14341_v25 = vld [vmem:[%s17805_s15 + $0x2c4] ss:$8 sps:$4 sm:$0xff]  }
 0x42f   : > { %2826 = vmatprep.mubr.bf16.mxu1 %v2613_v50  ;;  %v2620_v1 = vrot.slane %v2618_v54, 1  ;;  %v3107_v40 = vrot.slane %v17192_v44, 1 }
 0x430   : > { %v2628_v58 = vrot.slane %v2626_v49, 1  ;;  %2827 = vmatmul.mubr.bf16.vlgmr.msra.gmra.mxu1 %v2601_v55 }
 0x431   : > { %3274 = vmatpush1.bf16.msra.mxu1 %v14306_v47  ;;  %v2621_v8 = vsel %vm1973_vm0, %v2616_v5, %v2620_v1  ;;  %v3108_v43 = vsel %vm2247_vm2, %v3103_v3, %v3107_v40  ;;  %v3334_v5 = vld [vmem:[#allocation4] sm:$0x3] }
 0x432   : > { %v2629_v61 = vsel %vm1973_vm0, %v2624_v59, %v2628_v58  ;;  %3275 = vmatprep.subr.bf16.mxu1 %v14311_v53 }
 0x433   : > { %2836 = vmatprep.mubr.bf16.mxu1 %v2629_v61 }
 0x435   : > { %3276 = vmatpush1.bf16.msra.mxu1 %v14309_v60 }
 0x436   : > { %3277 = vmatprep.subr.bf16.mxu1 %v14314_v63 }
 0x438   : > { %2837 = vmatmul.mubr.bf16.gmra.mxu1 %v2621_v8 }
 0x439   : > { %3278 = vmatpush1.bf16.msra.mxu1 %v14312_v4  ;;  %3305 = vmatprep.mubr.bf16.mxu1 %v3104_v9 }
 0x43a   : > { %3279 = vmatprep.subr.bf16.mxu1 %v14317_v7 }
 0x43d   : > { %3280 = vmatpush1.bf16.msra.mxu1 %v14315_v10 }
 0x43e   : > { %3281 = vmatprep.subr.bf16.mxu1 %v14320_v11 }
 0x441   : > { %3282 = vmatpush1.bf16.msra.mxu1 %v14318_v12 }
 0x442   : > { %3283 = vmatprep.subr.bf16.mxu1 %v14323_v13 }
 0x445   : > { %3284 = vmatpush1.bf16.msra.mxu1 %v14321_v14  ;;  %v3339_v14 = vrot.slane %v3334_v5, %v17108_v52 }
 0x446   : > { %3285 = vmatprep.subr.bf16.mxu1 %v14326_v15 }
 0x449   : > { %3286 = vmatpush1.bf16.msra.mxu1 %v14324_v16 }
 0x44a   : > { %3287 = vmatprep.subr.bf16.mxu1 %v14329_v17 }
 0x44d   : > { %3288 = vmatpush1.bf16.msra.mxu1 %v14327_v18  ;;  %v3343_v18 = vrot.slane %v3334_v5, %v17110_v56  ;;  %v3535_v5 = vld [vmem:[#allocation6 + $0xb0] sm:$0xff] }
 0x44e   : > { %3289 = vmatprep.subr.bf16.mxu1 %v14332_v19 }
 0x451   : > { %3290 = vmatpush2.bf16.msra.mxu1 %v14330_v20 }
 0x452   : > { %3291 = vmatprep.subr.bf16.mxu1 %v14335_v21 }
 0x455   : > { %3292 = vmatpush2.bf16.msra.mxu1 %v14333_v22 }
 0x456   : > { %3293 = vmatprep.subr.bf16.mxu1 %v14338_v23 }
 0x459   : > { %3294 = vmatpush2.bf16.msra.mxu1 %v14336_v24 }
 0x45a   : > { %3295 = vmatprep.subr.bf16.mxu1 %v14341_v25 }
 0x45d   : > { %3296 = vmatpush2.bf16.msra.mxu1 %v14339_v27 }
 0x45e   : > { %3297 = vmatprep.subr.bf16.mxu1 %v14344_v29 }
 0x461   : > { %3298 = vmatpush2.bf16.msra.mxu1 %v14342_v30 }
 0x462   : > { %3299 = vmatprep.subr.bf16.mxu1 %v14347_v31 }
 0x465   : > { %3300 = vmatpush2.bf16.msra.mxu1 %v14345_v32 }
 0x466   : > { %3301 = vmatprep.subr.bf16.mxu1 %v14350_v34 }
 0x469   : > { %3302 = vmatpush2.bf16.msra.mxu1 %v14348_v35 }
 0x46a   : > { %3303 = vmatprep.subr.bf16.mxu1 %v14353_v37 }
 0x46d   : > { %3304 = vmatpush2.bf16.msra.mxu1 %v14351_v38 }
 0x46e   : > { %13522 = vmatprep.subr.mxu1 %v16428_v62 }
 0x470   : > { %3306 = vmatmul.mubr.bf16.vlgmr.msra.gmra.mxu1 %v17190_v41 }
 0x471   : > { %3315 = vmatprep.mubr.bf16.mxu1 %v3108_v43 }
 0x478   : > { %3316 = vmatmul.mubr.bf16.gmra.mxu1 %v17202_v57 }
 0x479   : > { %13532 = vmatprep.mubr.msk.f32.mxu1 %vm16430_vm5, %v16428_v62 }
 0x4e3   : > { %v3041_v49 = vpop.f32.mrf.mxu0 }
 0x4e5   : > { %v3043_v51 = vpop.f32.mrf.mxu0 }
 0x4e7   : > { %v3045_v53 = vpop.f32.mrf.mxu0 }
 0x4e9   : > { %v3047_v55 = vpop.f32.mrf.mxu0 }
 0x4eb   : > { %v3051_v41 = vpop.f32.mrf.mxu0 }
 0x4ed   : > { %v3053_v60 = vpop.f32.mrf.mxu0 }
 0x4ef   : > { %v3055_v1 = vpop.f32.mrf.mxu0 }
 0x4f0   : > { %v2828_v45 = vpop.f32.mrf.mxu1 }
 0x4f1   : > { %v3057_v6 = vpop.f32.mrf.mxu0  ;;  %v3042_v21 = vadd.f32 %v3041_v49, %v2828_v45  ;;  %v3527_v49 = vld [vmem:[#allocation6 + $0x70] sm:$0xff] }
 0x4f2   : > { %v2830_v46 = vpop.f32.mrf.mxu1 }
 0x4f3   : > { %v3044_v17 = vadd.f32 %v3043_v51, %v2830_v46  ;;  %v3521_v51 = vld [vmem:[#allocation6 + $0x40] sm:$0xff] }
 0x4f4   : > { %v2832_v47 = vpop.f32.mrf.mxu1 }
 0x4f5   : > { %v3046_v13 = vadd.f32 %v3045_v53, %v2832_v47  ;;  %v3519_v53 = vld [vmem:[#allocation6 + $0x30] sm:$0xff] }
 0x4f6   : > { %v2834_v48 = vpop.f32.mrf.mxu1 }
 0x4f7   : > { %v3048_v9 = vadd.f32 %v3047_v55, %v2834_v48  ;;  %v3517_v55 = vld [vmem:[#allocation6 + $0x20] sm:$0xff] }
 0x4f8   : > { %v2838_v50 = vpop.f32.mrf.mxu1 }
 0x4f9   : > { %v3052_v7 = vadd.f32 %v3051_v41, %v2838_v50  ;;  %v3524_v50 = vld [vmem:[#allocation6 + $0x58] sm:$0xff]  ;;  %v3515_v41 = vld [vmem:[#allocation6 + $0x10] sm:$0xff] }
 0x4fa   : > { %v2840_v44 = vpop.f32.mrf.mxu1 }
 0x4fb   : > { %v3054_v3 = vadd.f32 %v3053_v60, %v2840_v44  ;;  %v3520_v44 = vld [vmem:[#allocation6 + $0x38] sm:$0xff]  ;;  %v3543_v60 = vld [vmem:[#allocation6 + $0xf0] sm:$0xff] }
 0x4fc   : > { %v2842_v54 = vpop.f32.mrf.mxu1 }
 0x4fd   : > { %v3056_v4 = vadd.f32 %v3055_v1, %v2842_v54  ;;  %v3518_v54 = vld [vmem:[#allocation6 + $0x28] sm:$0xff]  ;;  %v3540_v1 = vld [vmem:[#allocation6 + $0xd8] sm:$0xff] }
 0x4fe   : > { %v2844_v58 = vpop.f32.mrf.mxu1 }
 0x4ff   : > { %v3058_v10 = vadd.f32 %v3057_v6, %v2844_v58  ;;  %v3516_v58 = vld [vmem:[#allocation6 + $0x18] sm:$0xff]  ;;  %v3534_v6 = vld [vmem:[#allocation6 + $0xa8] sm:$0xff] }
 0x530   : > { %v3307_v59 = vpop.f32.mrf.mxu1 }
 0x531   : > { %v3326_v29 = vadd.f32 %v3307_v59, %v3042_v21  ;;  %v3514_v59 = vld [vmem:[#allocation6 + $0x8] sm:$0xff] }
 0x532   : > { %v3309_v26 = vpop.f32.mrf.mxu1 }
 0x533   : > { %v3327_v24 = vadd.f32 %v3309_v26, %v3044_v17  ;;  %v3346_v40 = vadd.f32 %v3339_v14, %v3326_v29  ;;  %v3513_v26 = vld [vmem:[#allocation6] sm:$0xff] }
 0x534   : > { %v3311_v61 = vpop.f32.mrf.mxu1 }
 0x535   : > { %v3328_v22 = vadd.f32 %v3311_v61, %v3046_v13  ;;  %v3347_v37 = vadd.f32 %v3343_v18, %v3327_v24  ;;  %v3354_v48 = vmax.f32 %v3346_v40, 0.0  ;;  %v3542_v61 = vld [vmem:[#allocation6 + $0xe8] sm:$0xff] }
 0x536   : > { %v3313_v63 = vpop.f32.mrf.mxu1 }
 0x537   : > { %v3329_v19 = vadd.f32 %v3313_v63, %v3048_v9  ;;  %v3348_v34 = vadd.f32 %v3339_v14, %v3328_v22  ;;  %v3355_v47 = vmax.f32 %v3347_v37, 0.0  ;;  %v3541_v63 = vld [vmem:[#allocation6 + $0xe0] sm:$0xff]  ;;  %v3531_v9 = vld [vmem:[#allocation6 + $0x90] sm:$0xff] }
 0x538   : > { %v3317_v57 = vpop.f32.mrf.mxu1 }
 0x539   : > { %v3330_v15 = vadd.f32 %v3317_v57, %v3052_v7  ;;  %v3349_v31 = vadd.f32 %v3343_v18, %v3329_v19  ;;  %v3356_v45 = vmax.f32 %v3348_v34, 0.0  ;;  %v3539_v57 = vld [vmem:[#allocation6 + $0xd0] sm:$0xff]  ;;  %v3533_v7 = vld [vmem:[#allocation6 + $0xa0] sm:$0xff] }
 0x53a   : > { %v3319_v2 = vpop.f32.mrf.mxu1 }
 0x53b   : > { %v3331_v11 = vadd.f32 %v3319_v2, %v3054_v3  ;;  %v3350_v30 = vadd.f32 %v3339_v14, %v3330_v15  ;;  %v3357_v46 = vmax.f32 %v3349_v31, 0.0  ;;  %v3538_v2 = vld [vmem:[#allocation6 + $0xc8] sm:$0xff]  ;;  %v3537_v3 = vld [vmem:[#allocation6 + $0xc0] sm:$0xff] }
 0x53c   : > { %v3321_v8 = vpop.f32.mrf.mxu1 }
 0x53d   : > { %v3332_v12 = vadd.f32 %v3321_v8, %v3056_v4  ;;  %v3351_v25 = vadd.f32 %v3343_v18, %v3331_v11  ;;  %v3358_v43 = vmax.f32 %v3350_v30, 0.0  ;;  %v3536_v4 = vld [vmem:[#allocation6 + $0xb8] sm:$0xff]  ;;  %v3529_v11 = vld [vmem:[#allocation6 + $0x80] sm:$0xff] }
 0x53e   : > { %v3323_v16 = vpop.f32.mrf.mxu1  ;;  %v3532_v8 = vld [vmem:[#allocation6 + $0x98] sm:$0xff] }
 0x53f   : > { %v3333_v20 = vadd.f32 %v3323_v16, %v3058_v10  ;;  %v3352_v23 = vadd.f32 %v3339_v14, %v3332_v12  ;;  %v3359_v38 = vmax.f32 %v3351_v25, 0.0  ;;  %v3530_v10 = vld [vmem:[#allocation6 + $0x88] sm:$0xff] }
 0x541   : > { %v3353_v27 = vadd.f32 %v3343_v18, %v3333_v20  ;;  %v3360_v35 = vmax.f32 %v3352_v23, 0.0 }
 0x543   : > { %v3361_v32 = vmax.f32 %v3353_v27, 0.0 }
 0x545   : > { %3386 = vmatprep.subr.mxu0 %v3361_v32 }
 0x546   : > { %3387 = vmatpush1.msra.mxu0 %v3360_v35 }
 0x547   : > { %3388 = vmatprep.subr.mxu0 %v3359_v38 }
 0x548   : > { %3389 = vmatpush1.msra.mxu0 %v3358_v43 }
 0x549   : > { %3390 = vmatprep.subr.mxu0 %v3357_v46 }
 0x54a   : > { %3391 = vmatpush1.msra.mxu0 %v3356_v45 }
 0x54b   : > { %3392 = vmatprep.subr.mxu0 %v3355_v47 }
 0x54c   : > { %3393 = vmatpush1.msra.mxu0 %v3354_v48 }
 0x54d   : > { %12622 = vmatmul.mubr.msk.f32.vlgmr.msra.gmra.mxu0 %vm2408_vm3, %v17116_v28  ;;  %3559 = vmatprep.subr.mxu0 %v16428_v62  ;;  %v3528_v28 = vld [vmem:[#allocation6 + $0x78] sm:$0xff] }
 0x54e   : > { %3432 = vmatprep.mubr.f32.mxu0 %v16428_v62  ;;  %3560 = vmatpush1.msra.mxu0 %v3528_v28 }
 0x54f   : > { %3561 = vmatprep.subr.mxu0 %v16428_v62 }
 0x550   : > { %3562 = vmatpush1.msra.mxu0 %v3527_v49 }
 0x551   : > { %12623 = vmatmul.mubr.msk.f32.gmra.mxu0 %vm2408_vm3, %v17121_v33  ;;  %v3526_v33 = vld [vmem:[#allocation6 + $0x68] sm:$0xff]  ;;  %3563 = vmatprep.subr.mxu0 %v16428_v62 }
 0x552   : > { %3438 = vmatprep.mubr.f32.mxu0 %v16428_v62  ;;  %3564 = vmatpush1.msra.mxu0 %v3526_v33 }
 0x553   : > { %3565 = vmatprep.subr.mxu0 %v16428_v62 }
 0x555   : > { %12624 = vmatmul.mubr.msk.f32.gmra.mxu0 %vm2408_vm3, %v17129_v36  ;;  %v3525_v36 = vld [vmem:[#allocation6 + $0x60] sm:$0xff] }
 0x556   : > { %3444 = vmatprep.mubr.f32.mxu0 %v16428_v62  ;;  %3566 = vmatpush1.msra.mxu0 %v3525_v36 }
 0x557   : > { %3567 = vmatprep.subr.mxu0 %v16428_v62 }
 0x558   : > { %3568 = vmatpush1.msra.mxu0 %v3524_v50 }
 0x559   : > { %12625 = vmatmul.mubr.msk.f32.gmra.mxu0 %vm2408_vm3, %v17137_v39  ;;  %v3523_v39 = vld [vmem:[#allocation6 + $0x50] sm:$0xff]  ;;  %3569 = vmatprep.subr.mxu0 %v16428_v62 }
 0x55a   : > { %3450 = vmatprep.mubr.f32.mxu0 %v16428_v62  ;;  %3570 = vmatpush1.msra.mxu0 %v3523_v39 }
 0x55b   : > { %3571 = vmatprep.subr.mxu0 %v16428_v62 }
 0x55d   : > { %12626 = vmatmul.mubr.msk.f32.gmra.mxu0 %vm2408_vm3, %v17145_v42  ;;  %v3522_v42 = vld [vmem:[#allocation6 + $0x48] sm:$0xff] }
 0x55e   : > { %3572 = vmatpush1.msra.mxu0 %v3522_v42  ;;  %v14354_v42 = vld [vmem:[#allocation9 + $0x70] ss:$8 sps:$4 sm:$0xff]  }
 0x55f   : > { %3573 = vmatprep.subr.mxu0 %v16428_v62 }
 0x560   : > { %3574 = vmatpush1.msra.mxu0 %v3521_v51  ;;  %v14356_v51 = vld [vmem:[#allocation9 + $0x74] ss:$8 sps:$4 sm:$0xff]  }
 0x561   : > { %3575 = vmatprep.subr.mxu0 %v16428_v62 }
 0x562   : > { %3576 = vmatpush1.msra.mxu0 %v3520_v44  ;;  %v14359_v44 = vld [vmem:[#allocation9 + $0x64] ss:$8 sps:$4 sm:$0xff]  }
 0x563   : > { %3577 = vmatprep.subr.mxu0 %v16428_v62 }
 0x564   : > { %3578 = vmatpush1.msra.mxu0 %v3519_v53  ;;  %v14357_v53 = vld [vmem:[#allocation9 + $0x60] ss:$8 sps:$4 sm:$0xff]  }
 0x565   : > { %3579 = vmatprep.subr.mxu0 %v16428_v62 }
 0x566   : > { %3580 = vmatpush1.msra.mxu0 %v3518_v54  ;;  %v14365_v54 = vld [vmem:[#allocation9 + $0x54] ss:$8 sps:$4 sm:$0xff]  }
 0x567   : > { %3581 = vmatprep.subr.mxu0 %v16428_v62 }
 0x568   : > { %3582 = vmatpush1.msra.mxu0 %v3517_v55  ;;  %v14363_v55 = vld [vmem:[#allocation9 + $0x50] ss:$8 sps:$4 sm:$0xff]  }
 0x569   : > { %3583 = vmatprep.subr.mxu0 %v16428_v62 }
 0x56a   : > { %3584 = vmatpush1.msra.mxu0 %v3516_v58  ;;  %v14371_v58 = vld [vmem:[#allocation9 + $0x44] ss:$8 sps:$4 sm:$0xff]  }
 0x56b   : > { %3585 = vmatprep.subr.mxu0 %v16428_v62 }
 0x56c   : > { %3586 = vmatpush1.msra.mxu0 %v3515_v41  ;;  %v14369_v41 = vld [vmem:[#allocation9 + $0x40] ss:$8 sps:$4 sm:$0xff]  }
 0x56d   : > { %3587 = vmatprep.subr.mxu0 %v16428_v62 }
 0x56e   : > { %3588 = vmatpush1.msra.mxu0 %v3514_v59  ;;  %v14377_v59 = vld [vmem:[#allocation9 + $0x34] ss:$8 sps:$4 sm:$0xff]  }
 0x56f   : > { %3589 = vmatprep.subr.mxu0 %v16428_v62 }
 0x570   : > { %3590 = vmatpush1.msra.mxu0 %v3513_v26  ;;  %v14375_v26 = vld [vmem:[#allocation9 + $0x30] ss:$8 sps:$4 sm:$0xff]  }
 0x571   : > { %3593 = vmatprep.subr.mxu0 %v16428_v62 }
 0x572   : > { %3594 = vmatpush2.msra.mxu0 %v3543_v60  ;;  %v14383_v60 = vld [vmem:[#allocation9 + $0x24] ss:$8 sps:$4 sm:$0xff]  }
 0x573   : > { %3595 = vmatprep.subr.mxu0 %v16428_v62 }
 0x574   : > { %3596 = vmatpush2.msra.mxu0 %v3542_v61  ;;  %v14381_v61 = vld [vmem:[#allocation9 + $0x20] ss:$8 sps:$4 sm:$0xff]  }
 0x575   : > { %3597 = vmatprep.subr.mxu0 %v16428_v62 }
 0x576   : > { %3598 = vmatpush2.msra.mxu0 %v3541_v63  ;;  %v14389_v63 = vld [vmem:[#allocation9 + $0x14] ss:$8 sps:$4 sm:$0xff]  }
 0x577   : > { %3599 = vmatprep.subr.mxu0 %v16428_v62 }
 0x578   : > { %3600 = vmatpush2.msra.mxu0 %v3540_v1  ;;  %v14387_v1 = vld [vmem:[#allocation9 + $0x10] ss:$8 sps:$4 sm:$0xff]  }
 0x579   : > { %3601 = vmatprep.subr.mxu0 %v16428_v62 }
 0x57a   : > { %3602 = vmatpush2.msra.mxu0 %v3539_v57 }
 0x57b   : > { %3603 = vmatprep.subr.mxu0 %v16428_v62 }
 0x57c   : > { %3604 = vmatpush2.msra.mxu0 %v3538_v2 }
 0x57d   : > { %3605 = vmatprep.subr.mxu0 %v16428_v62 }
 0x57e   : > { %3606 = vmatpush2.msra.mxu0 %v3537_v3 }
 0x57f   : > { %3607 = vmatprep.subr.mxu0 %v16428_v62 }
 0x580   : > { %3608 = vmatpush2.msra.mxu0 %v3536_v4 }
 0x581   : > { %3609 = vmatprep.subr.mxu0 %v16428_v62 }
 0x582   : > { %3610 = vmatpush2.msra.mxu0 %v3535_v5 }
 0x583   : > { %3611 = vmatprep.subr.mxu0 %v16428_v62 }
 0x584   : > { %3612 = vmatpush2.msra.mxu0 %v3534_v6 }
 0x585   : > { %3613 = vmatprep.subr.mxu0 %v16428_v62 }
 0x586   : > { %3614 = vmatpush2.msra.mxu0 %v3533_v7 }
 0x587   : > { %3615 = vmatprep.subr.mxu0 %v16428_v62 }
 0x588   : > { %3616 = vmatpush2.msra.mxu0 %v3532_v8 }
 0x589   : > { %3617 = vmatprep.subr.mxu0 %v16428_v62 }
 0x58a   : > { %3618 = vmatpush2.msra.mxu0 %v3531_v9 }
 0x58b   : > { %3619 = vmatprep.subr.mxu0 %v16428_v62 }
 0x58c   : > { %3620 = vmatpush2.msra.mxu0 %v3530_v10 }
 0x58d   : > { %3621 = vmatprep.subr.mxu0 %v16428_v62 }
 0x58e   : > { %3622 = vmatpush2.msra.mxu0 %v3529_v11 }
 0x58f   : > { %4025 = vmatprep.subr.bf16.mxu0 %v14356_v51 }
 0x60d   : > { %v3428_v12 = vpop.f32.mrf.mxu0 }
 0x60e   : > { %3467 = vrot.lane.b32.xlu0 %v3428_v12, %s16429_s22 }
 0x60f   : > { %v3430_v13 = vpop.f32.mrf.mxu0 }
 0x611   : > { %v3434_v14 = vpop.f32.mrf.mxu0 }
 0x612   : > { %3469 = vrot.lane.b32.xlu0 %v3430_v13, %s16429_s22  ;;  %3471 = vrot.lane.b32.xlu1 %v3434_v14, %s16429_s22 }
 0x613   : > { %v3436_v15 = vpop.f32.mrf.mxu0 }
 0x615   : > { %v3440_v16 = vpop.f32.mrf.mxu0 }
 0x616   : > { %3473 = vrot.lane.b32.xlu1 %v3436_v15, %s16429_s22  ;;  %3475 = vrot.lane.b32.xlu0 %v3440_v16, %s16429_s22 }
 0x617   : > { %v3442_v17 = vpop.f32.mrf.mxu0 }
 0x619   : > { %v3446_v18 = vpop.f32.mrf.mxu0 }
 0x61a   : > { %3477 = vrot.lane.b32.xlu1 %v3442_v17, %s16429_s22  ;;  %3479 = vrot.lane.b32.xlu0 %v3446_v18, %s16429_s22 }
 0x61b   : > { %v3448_v19 = vpop.f32.mrf.mxu0 }
 0x61d   : > { %v3452_v20 = vpop.f32.mrf.mxu0 }
 0x61e   : > { %3481 = vrot.lane.b32.xlu1 %v3448_v19, %s16429_s22  ;;  %3483 = vrot.lane.b32.xlu0 %v3452_v20, %s16429_s22 }
 0x61f   : > { %v3454_v21 = vpop.f32.mrf.mxu0 }
 0x622   : > { %3485 = vrot.lane.b32.xlu1 %v3454_v21, %s16429_s22  ;;  %s17811_s22 = sld [smem:[#allocation98_spill]] }
 0x680   : > { %v3468_v22 = vpop.permute.xlu0 %3467 }
 0x684   : > { %v3470_v23 = vpop.permute.xlu0 %3469  ;;  %v3472_v24 = vpop.permute.xlu1 %3471 }
 0x685   : > { %v3488_v25 = vsel %vm3487_vm4, %v3468_v22, %v3470_v23  ;;  %v3504_v27 = vmax.f32 %v3430_v13, %v3470_v23 }
 0x686   : > { %v3503_v29 = vmax.f32 %v3428_v12, %v3488_v25 }
 0x687   : > { %12627 = vmatprep.mubr.msk.f32.mxu0 %vm3487_vm4, %v3504_v27  ;;  %v3674_v27 = vld [vmem:[#allocation7] sm:$0xff] }
 0x688   : > { %3624 = vmatmul.mubr.f32.vlgmr.msra.gmra.mxu0 %v3503_v29  ;;  %v3474_v30 = vpop.permute.xlu1 %3473  ;;  %v3476_v31 = vpop.permute.xlu0 %3475  ;;  %v14360_v29 = vld [vmem:[#allocation9 + $0xf0] ss:$8 sps:$4 sm:$0xff]  }
 0x689   : > { %v3489_v32 = vsel %vm3487_vm4, %v3472_v24, %v3474_v30  ;;  %v3506_v34 = vmax.f32 %v3436_v15, %v3474_v30  ;;  %4026 = vmatpush1.bf16.msra.mxu0 %v14354_v42  ;;  %v14362_v24 = vld [vmem:[#allocation9 + $0xf4] ss:$8 sps:$4 sm:$0xff]   ;;  %v14368_v30 = vld [vmem:[#allocation9 + $0xe4] ss:$8 sps:$4 sm:$0xff]  }
 0x68a   : > { %v3505_v35 = vmax.f32 %v3434_v14, %v3489_v32  ;;  %4027 = vmatprep.subr.bf16.mxu0 %v14359_v44  ;;  %v14366_v32 = vld [vmem:[#allocation9 + $0xe0] ss:$8 sps:$4 sm:$0xff]  }
 0x68b   : > { %12628 = vmatprep.mubr.msk.f32.mxu0 %vm3487_vm4, %v3506_v34  ;;  %v14374_v34 = vld [vmem:[#allocation9 + $0xd4] ss:$8 sps:$4 sm:$0xff]  }
 0x68c   : > { %3629 = vmatmul.mubr.f32.gmra.mxu0 %v3505_v35  ;;  %v3478_v37 = vpop.permute.xlu1 %3477  ;;  %v3480_v46 = vpop.permute.xlu0 %3479  ;;  %v3676_v35 = vld [vmem:[#allocation7 + $0x10] sm:$0x3] }
 0x68d   : > { %v3490_v38 = vsel %vm3487_vm4, %v3476_v31, %v3478_v37  ;;  %v3508_v40 = vmax.f32 %v3442_v17, %v3478_v37  ;;  %4028 = vmatpush1.bf16.msra.mxu0 %v14357_v53  ;;  %v3675_v31 = vld [vmem:[#allocation7 + $0x8] sm:$0xff] }
 0x68e   : > { %v3507_v43 = vmax.f32 %v3440_v16, %v3490_v38  ;;  %4029 = vmatprep.subr.bf16.mxu0 %v14365_v54  ;;  %v14372_v37 = vld [vmem:[#allocation9 + $0xd0] ss:$8 sps:$4 sm:$0xff]   ;;  %v14380_v38 = vld [vmem:[#allocation9 + $0xc4] ss:$8 sps:$4 sm:$0xff]  }
 0x68f   : > { %12629 = vmatprep.mubr.msk.f32.mxu0 %vm3487_vm4, %v3508_v40  ;;  %v14378_v40 = vld [vmem:[#allocation9 + $0xc0] ss:$8 sps:$4 sm:$0xff]  }
 0x690   : > { %3634 = vmatmul.mubr.f32.gmra.mxu0 %v3507_v43  ;;  %v3482_v45 = vpop.permute.xlu1 %3481  ;;  %v3484_v49 = vpop.permute.xlu0 %3483  ;;  %v14386_v43 = vld [vmem:[#allocation9 + $0xb4] ss:$8 sps:$4 sm:$0xff]  }
 0x691   : > { %v3491_v47 = vsel %vm3487_vm4, %v3480_v46, %v3482_v45  ;;  %v3510_v48 = vmax.f32 %v3448_v19, %v3482_v45  ;;  %4030 = vmatpush1.bf16.msra.mxu0 %v14363_v55  ;;  %v14384_v46 = vld [vmem:[#allocation9 + $0xb0] ss:$8 sps:$4 sm:$0xff]   ;;  %v14392_v45 = vld [vmem:[#allocation9 + $0xa4] ss:$8 sps:$4 sm:$0xff]  }
 0x692   : > { %v3509_v28 = vmax.f32 %v3446_v18, %v3491_v47  ;;  %4031 = vmatprep.subr.bf16.mxu0 %v14371_v58  ;;  %v14395_v47 = vld [vmem:[#allocation9 + $0x4] ss:$8 sps:$4 sm:$0xff]  }
 0x693   : > { %12630 = vmatprep.mubr.msk.f32.mxu0 %vm3487_vm4, %v3510_v48  ;;  %v14390_v48 = vld [vmem:[#allocation9 + $0xa0] ss:$8 sps:$4 sm:$0xff]  }
 0x694   : > { %3639 = vmatmul.mubr.f32.gmra.mxu0 %v3509_v28  ;;  %v3486_v33 = vpop.permute.xlu1 %3485  ;;  %v14393_v28 = vld [vmem:[#allocation9] ss:$8 sps:$4 sm:$0xff]  }
 0x695   : > { %v3492_v36 = vsel %vm3487_vm4, %v3484_v49, %v3486_v33  ;;  %v3512_v50 = vmax.f32 %v3454_v21, %v3486_v33  ;;  %4032 = vmatpush1.bf16.msra.mxu0 %v14369_v41  ;;  %v14398_v49 = vld [vmem:[#allocation9 + $0x94] ss:$8 sps:$4 sm:$0xff]   ;;  %v14396_v33 = vld [vmem:[#allocation9 + $0x90] ss:$8 sps:$4 sm:$0xff]  }
 0x696   : > { %v3511_v39 = vmax.f32 %v3452_v20, %v3492_v36  ;;  %4033 = vmatprep.subr.bf16.mxu0 %v14377_v59  ;;  %v14401_v36 = vld [vmem:[#allocation9 + $0x84] ss:$8 sps:$4 sm:$0xff]  }
 0x697   : > { %12631 = vmatprep.mubr.msk.f32.mxu0 %vm3487_vm4, %v3512_v50  ;;  %v14399_v50 = vld [vmem:[#allocation9 + $0x80] ss:$8 sps:$4 sm:$0xff]   ;;  %vm10528_vm4 = vcmask 15360  }
 0x698   : > { %3644 = vmatmul.mubr.f32.gmra.mxu0 %v3511_v39  ;;  %v14404_v39 = vld [vmem:[#allocation9 + $0x174] ss:$8 sps:$4 sm:$0xff]  }
 0x699   : > { %4057 = vmatprep.mubr.bf16.mxu0 %v16427_v0  ;;  %4034 = vmatpush1.bf16.msra.mxu0 %v14375_v26 }
 0x69a   : > { %4035 = vmatprep.subr.bf16.mxu0 %v14383_v60 }
 0x69d   : > { %4036 = vmatpush1.bf16.msra.mxu0 %v14381_v61 }
 0x69e   : > { %4037 = vmatprep.subr.bf16.mxu0 %v14389_v63 }
 0x6a1   : > { %4038 = vmatpush1.bf16.msra.mxu0 %v14387_v1  ;;  %v14402_v1 = vld [vmem:[#allocation9 + $0x170] ss:$8 sps:$4 sm:$0xff]  }
 0x6a2   : > { %4039 = vmatprep.subr.bf16.mxu0 %v14395_v47  ;;  %v14477_v47 = vld [vmem:[#allocation12 + $0xe0] ss:$8 sps:$4 sm:$0xff]  }
 0x6a5   : > { %4040 = vmatpush1.bf16.msra.mxu0 %v14393_v28  ;;  %v14483_v28 = vld [vmem:[#allocation12 + $0xd0] ss:$8 sps:$4 sm:$0xff]  }
 0x748   : > { %v3625_v57 = vpop.f32.mrf.mxu0 }
 0x749   : > { %v3655_v19 = vrot.slane %v3625_v57, 1 }
 0x74a   : > { %v3627_v2 = vpop.f32.mrf.mxu0 }
 0x74b   : > { %v14407_v2 = vld [vmem:[#allocation9 + $0x164] ss:$8 sps:$4 sm:$0xff]  }
 0x74c   : > { %v3630_v3 = vpop.f32.mrf.mxu0 }
 0x74d   : > { %v3656_v16 = vrot.slane %v3630_v3, 1 }
 0x74e   : > { %v3632_v4 = vpop.f32.mrf.mxu0 }
 0x74f   : > { %v3657_v22 = vsel %vm2247_vm2, %v3655_v19, %v3656_v16  ;;  %v14405_v4 = vld [vmem:[#allocation9 + $0x160] ss:$8 sps:$4 sm:$0xff]  }
 0x750   : > { %v3635_v5 = vpop.f32.mrf.mxu0  ;;  %v3669_v25 = vmax.f32 %v3625_v57, %v3657_v22  ;;  %v14431_v22 = vld [vmem:[#allocation12 + $0x64] ss:$8 sps:$4 sm:$0xff]  }
 0x751   : > { %v3658_v12 = vrot.slane %v3635_v5, 1 }
 0x752   : > { %v3637_v6 = vpop.f32.mrf.mxu0 }
 0x753   : > { %v3659_v20 = vsel %vm2247_vm2, %v3656_v16, %v3658_v12  ;;  %v14408_v6 = vld [vmem:[#allocation9 + $0x150] ss:$8 sps:$4 sm:$0xff]   ;;  %v14423_v16 = vld [vmem:[#allocation9 + $0x100] ss:$8 sps:$4 sm:$0xff]  }
 0x754   : > { %v3640_v7 = vpop.f32.mrf.mxu0  ;;  %v3670_v23 = vmax.f32 %v3630_v3, %v3659_v20  ;;  %v14426_v20 = vld [vmem:[#allocation12 + $0x70] ss:$8 sps:$4 sm:$0xff]  }
 0x755   : > { %v3660_v9 = vrot.slane %v3640_v7, 1 }
 0x756   : > { %v3642_v8 = vpop.f32.mrf.mxu0 }
 0x757   : > { %v3661_v17 = vsel %vm2247_vm2, %v3658_v12, %v3660_v9  ;;  %v14411_v8 = vld [vmem:[#allocation9 + $0x140] ss:$8 sps:$4 sm:$0xff]  }
 0x758   : > { %v3645_v10 = vpop.f32.mrf.mxu0  ;;  %v3671_v21 = vmax.f32 %v3635_v5, %v3661_v17  ;;  %v14410_v5 = vld [vmem:[#allocation9 + $0x154] ss:$8 sps:$4 sm:$0xff]   ;;  %v14417_v12 = vld [vmem:[#allocation9 + $0x120] ss:$8 sps:$4 sm:$0xff]  }
 0x759   : > { %v3662_v11 = vrot.slane %v3645_v10, 1 }
 0x75a   : > { %v3647_v13 = vpop.f32.mrf.mxu0 }
 0x75b   : > { %v3663_v14 = vsel %vm2247_vm2, %v3660_v9, %v3662_v11  ;;  %v3673_v15 = vmax.f32 %v3645_v10, %v3662_v11  ;;  %v14416_v9 = vld [vmem:[#allocation9 + $0x134] ss:$8 sps:$4 sm:$0xff]   ;;  %v14414_v10 = vld [vmem:[#allocation9 + $0x130] ss:$8 sps:$4 sm:$0xff]   ;;  %v14419_v11 = vld [vmem:[#allocation9 + $0x124] ss:$8 sps:$4 sm:$0xff]  }
 0x75c   : > { %v3672_v18 = vmax.f32 %v3640_v7, %v3663_v14  ;;  %v14413_v7 = vld [vmem:[#allocation9 + $0x144] ss:$8 sps:$4 sm:$0xff]   ;;  %v14422_v13 = vld [vmem:[#allocation9 + $0x114] ss:$8 sps:$4 sm:$0xff]   ;;  %v14420_v14 = vld [vmem:[#allocation9 + $0x110] ss:$8 sps:$4 sm:$0xff]  }
 0x75d   : > { %13523 = vmatpush3.msk.msra.mxu1 %vm3687_vm6, %v3673_v15  ;;  %v14425_v15 = vld [vmem:[#allocation9 + $0x104] ss:$8 sps:$4 sm:$0xff]  }
 0x75e   : > { %13524 = vmatprep.subr.mxu1 %v16428_v62 }
 0x75f   : > { %13525 = vmatpush3.msra.mxu1 %v3672_v18 }
 0x760   : > { %13526 = vmatprep.subr.mxu1 %v16428_v62 }
 0x761   : > { %13527 = vmatpush3.msra.mxu1 %v3671_v21  ;;  %v14428_v21 = vld [vmem:[#allocation12 + $0x74] ss:$8 sps:$4 sm:$0xff]  }
 0x762   : > { %13528 = vmatprep.subr.mxu1 %v16428_v62 }
 0x763   : > { %13529 = vmatpush3.msra.mxu1 %v3670_v23  ;;  %v14429_v23 = vld [vmem:[#allocation12 + $0x60] ss:$8 sps:$4 sm:$0xff]  }
 0x764   : > { %13530 = vmatprep.subr.mxu1 %v16428_v62 }
 0x765   : > { %13531 = vmatpush3.msra.mxu1 %v3669_v25  ;;  %v14435_v25 = vld [vmem:[#allocation12 + $0x50] ss:$8 sps:$4 sm:$0xff]  }
 0x766   : > { %13533 = vmatmul.mubr.msk.f32.vlgmr.msra.gmra.mxu1 %vm3677_vm7, %v3674_v27  ;;  %3902 = vmatprep.subr.bf16.mxu1 %v14362_v24  ;;  %v14437_v24 = vld [vmem:[#allocation12 + $0x54] ss:$8 sps:$4 sm:$0xff]   ;;  %v14443_v27 = vld [vmem:[#allocation12 + $0x44] ss:$8 sps:$4 sm:$0xff]  }
 0x767   : > { %13535 = vmatprep.mubr.msk.f32.mxu1 %vm16430_vm5, %v16428_v62  ;;  %3903 = vmatpush1.bf16.msra.mxu1 %v14360_v29  ;;  %v14441_v29 = vld [vmem:[#allocation12 + $0x40] ss:$8 sps:$4 sm:$0xff]  }
 0x768   : > { %3904 = vmatprep.subr.bf16.mxu1 %v14368_v30  ;;  %v14449_v30 = vld [vmem:[#allocation12 + $0x34] ss:$8 sps:$4 sm:$0xff]  }
 0x76a   : > { %13536 = vmatmul.mubr.msk.f32.gmra.mxu1 %vm3677_vm7, %v3675_v31  ;;  %v14447_v31 = vld [vmem:[#allocation12 + $0x30] ss:$8 sps:$4 sm:$0xff]  }
 0x76b   : > { %13538 = vmatprep.mubr.msk.f32.mxu1 %vm16430_vm5, %v16428_v62  ;;  %3905 = vmatpush1.bf16.msra.mxu1 %v14366_v32  ;;  %v14455_v32 = vld [vmem:[#allocation12 + $0x24] ss:$8 sps:$4 sm:$0xff]  }
 0x76c   : > { %3906 = vmatprep.subr.bf16.mxu1 %v14374_v34  ;;  %v14453_v34 = vld [vmem:[#allocation12 + $0x20] ss:$8 sps:$4 sm:$0xff]  }
 0x76e   : > { %13539 = vmatmul.mubr.msk.f32.gmra.mxu1 %vm3677_vm7, %v3676_v35  ;;  %v14461_v35 = vld [vmem:[#allocation12 + $0x14] ss:$8 sps:$4 sm:$0xff]   ;;  %vm11515_vm7 = vcmask 23552  }
 0x76f   : > { %3907 = vmatpush1.bf16.msra.mxu1 %v14372_v37  ;;  %3934 = vmatprep.mubr.bf16.mxu1 %v16427_v0  ;;  %v14459_v37 = vld [vmem:[#allocation12 + $0x10] ss:$8 sps:$4 sm:$0xff]  }
 0x770   : > { %3908 = vmatprep.subr.bf16.mxu1 %v14380_v38  ;;  %v14467_v38 = vld [vmem:[#allocation12 + $0x4] ss:$8 sps:$4 sm:$0xff]  }
 0x773   : > { %3909 = vmatpush1.bf16.msra.mxu1 %v14378_v40  ;;  %v14465_v40 = vld [vmem:[#allocation12] ss:$8 sps:$4 sm:$0xff]  }
 0x774   : > { %3910 = vmatprep.subr.bf16.mxu1 %v14386_v43  ;;  %v14473_v43 = vld [vmem:[#allocation12 + $0xf4] ss:$8 sps:$4 sm:$0xff]  }
 0x777   : > { %3911 = vmatpush1.bf16.msra.mxu1 %v14384_v46  ;;  %v14471_v46 = vld [vmem:[#allocation12 + $0xf0] ss:$8 sps:$4 sm:$0xff]  }
 0x778   : > { %3912 = vmatprep.subr.bf16.mxu1 %v14392_v45  ;;  %v14479_v45 = vld [vmem:[#allocation12 + $0xe4] ss:$8 sps:$4 sm:$0xff]  }
 0x77b   : > { %3913 = vmatpush1.bf16.msra.mxu1 %v14390_v48  ;;  %v14485_v48 = vld [vmem:[#allocation12 + $0xd4] ss:$8 sps:$4 sm:$0xff]  }
 0x77c   : > { %3914 = vmatprep.subr.bf16.mxu1 %v14398_v49  ;;  %v14491_v49 = vld [vmem:[#allocation12 + $0xc4] ss:$8 sps:$4 sm:$0xff]  }
 0x77f   : > { %3915 = vmatpush1.bf16.msra.mxu1 %v14396_v33  ;;  %v14489_v33 = vld [vmem:[#allocation12 + $0xc0] ss:$8 sps:$4 sm:$0xff]  }
 0x780   : > { %3916 = vmatprep.subr.bf16.mxu1 %v14401_v36  ;;  %v14497_v36 = vld [vmem:[#allocation12 + $0xb4] ss:$8 sps:$4 sm:$0xff]  }
 0x783   : > { %3917 = vmatpush1.bf16.msra.mxu1 %v14399_v50  ;;  %v14495_v50 = vld [vmem:[#allocation12 + $0xb0] ss:$8 sps:$4 sm:$0xff]  }
 0x784   : > { %4171 = vmatprep.subr.bf16.mxu1 %v14404_v39  ;;  %v14503_v39 = vld [vmem:[#allocation12 + $0xa4] ss:$8 sps:$4 sm:$0xff]  }
 0x826   : > { %v3757_v42 = vpop.f32.mrf.mxu1 }
 0x828   : > { %v13534_v51 = vpop.f32.mrf.mxu1 }
 0x82a   : > { %v3762_v44 = vpop.f32.mrf.mxu1 }
 0x82b   : > { %v3774_v53 = vpack.c.bf16 %v3762_v44, %v3757_v42  ;;  %v14501_v42 = vld [vmem:[#allocation12 + $0xa0] ss:$8 sps:$4 sm:$0xff]  }
 0x82c   : > { %v13537_v54 = vpop.f32.mrf.mxu1 }
 0x82d   : > { %v3812_v55 = vshll.u32 %v3774_v53, 16  ;;  %4058 = vmatmul.mubr.bf16.vlgmr.msra.gmra.mxu0 %v3774_v53  ;;  %v3810_v60 = vshrl.u32 %v3774_v53, 16  ;;  %v4087_v18 = vrot.slane %v3774_v53, 1 }
 0x82e   : > { %v3767_v58 = vpop.f32.mrf.mxu1  ;;  %4312 = vmatprep.mubr.f32.mxu0 %v16428_v62 }
 0x82f   : > { %v3814_v41 = vrot.slane %v3812_v55, 1  ;;  %v3791_v59 = vpack.c.bf16 %v3767_v58, %v3767_v58 }
 0x830   : > { %v13540_v26 = vpop.f32.mrf.mxu1 }
 0x831   : > { %v3817_v61 = vshll.u32 %v3791_v59, 16  ;;  %v3815_v57 = vor.u32 %v3814_v41, %v3810_v60  ;;  %v4088_v17 = vrot.slane %v3791_v59, 1 }
 0x833   : > { %v3819_v63 = vrot.slane %v3817_v61, 1  ;;  %v4089_v19 = vsel %vm2247_vm2, %v4087_v18, %v4088_v17  ;;  %v14434_v18 = vld [vmem:[#allocation12 + $0x174] ss:$8 sps:$4 sm:$0xff]  }
 0x835   : > { %v3820_v3 = vsel %vm1973_vm0, %v3815_v57, %v3819_v63  ;;  %v4218_v63 = vld [vmem:[#allocation10] sm:$0x3] }
 0x836   : > { %3935 = vmatmul.mubr.bf16.vlgmr.msra.gmra.mxu1 %v3820_v3 }
 0x837   : > { %4172 = vmatpush1.bf16.msra.mxu1 %v14402_v1  ;;  %4203 = vmatprep.mubr.bf16.mxu1 %v16427_v0 }
 0x838   : > { %4173 = vmatprep.subr.bf16.mxu1 %v14407_v2 }
 0x83b   : > { %4174 = vmatpush1.bf16.msra.mxu1 %v14405_v4 }
 0x83c   : > { %4175 = vmatprep.subr.bf16.mxu1 %v14410_v5  ;;  %v4227_v5 = vrot.slane %v4218_v63, %v17110_v56 }
 0x83f   : > { %4176 = vmatpush1.bf16.msra.mxu1 %v14408_v6 }
 0x840   : > { %4177 = vmatprep.subr.bf16.mxu1 %v14413_v7 }
 0x843   : > { %4178 = vmatpush1.bf16.msra.mxu1 %v14411_v8  ;;  %v4223_v8 = vrot.slane %v4218_v63, %v17108_v52 }
 0x844   : > { %4179 = vmatprep.subr.bf16.mxu1 %v14416_v9 }
 0x847   : > { %4180 = vmatpush1.bf16.msra.mxu1 %v14414_v10 }
 0x848   : > { %4181 = vmatprep.subr.bf16.mxu1 %v14419_v11 }
 0x84b   : > { %4182 = vmatpush1.bf16.msra.mxu1 %v14417_v12 }
 0x84c   : > { %4183 = vmatprep.subr.bf16.mxu1 %v14422_v13 }
 0x84f   : > { %4184 = vmatpush1.bf16.msra.mxu1 %v14420_v14 }
 0x850   : > { %4185 = vmatprep.subr.bf16.mxu1 %v14425_v15 }
 0x853   : > { %4186 = vmatpush1.bf16.msra.mxu1 %v14423_v16 }
 0x854   : > { %4789 = vmatprep.subr.bf16.mxu1 %v14428_v21  ;;  %v14432_v21 = vld [vmem:[#allocation12 + $0x170] ss:$8 sps:$4 sm:$0xff]  }
 0x856   : > { %4204 = vmatmul.mubr.bf16.vlgmr.msra.gmra.mxu1 %v4089_v19 }
 0x857   : > { %4790 = vmatpush1.bf16.msra.mxu1 %v14426_v20  ;;  %v17331_v20 = vld [vmem:[%s17807_s23] sm:$0xff] }
 0x858   : > { %4791 = vmatprep.subr.bf16.mxu1 %v14431_v22  ;;  %v14440_v22 = vld [vmem:[#allocation12 + $0x164] ss:$8 sps:$4 sm:$0xff]  }
 0x85b   : > { %4792 = vmatpush1.bf16.msra.mxu1 %v14429_v23  ;;  %v17337_v23 = vld [vmem:[%s17807_s23 + $0x8] sm:$0xff] }
 0x85c   : > { %4793 = vmatprep.subr.bf16.mxu1 %v14437_v24  ;;  %v14438_v24 = vld [vmem:[#allocation12 + $0x160] ss:$8 sps:$4 sm:$0xff]  }
 0x85f   : > { %4794 = vmatpush1.bf16.msra.mxu1 %v14435_v25  ;;  %v14446_v25 = vld [vmem:[#allocation12 + $0x154] ss:$8 sps:$4 sm:$0xff]  }
 0x860   : > { %4795 = vmatprep.subr.bf16.mxu1 %v14443_v27  ;;  %v17343_v27 = vld [vmem:[%s17807_s23 + $0x10] sm:$0x3] }
 0x863   : > { %4796 = vmatpush1.bf16.msra.mxu1 %v14441_v29  ;;  %v14444_v29 = vld [vmem:[#allocation12 + $0x150] ss:$8 sps:$4 sm:$0xff]  }
 0x864   : > { %4797 = vmatprep.subr.bf16.mxu1 %v14449_v30  ;;  %v14452_v30 = vld [vmem:[#allocation12 + $0x144] ss:$8 sps:$4 sm:$0xff]  }
 0x867   : > { %4798 = vmatpush1.bf16.msra.mxu1 %v14447_v31  ;;  %v14450_v31 = vld [vmem:[#allocation12 + $0x140] ss:$8 sps:$4 sm:$0xff]  }
 0x868   : > { %4799 = vmatprep.subr.bf16.mxu1 %v14455_v32  ;;  %v14458_v32 = vld [vmem:[#allocation12 + $0x134] ss:$8 sps:$4 sm:$0xff]  }
 0x86b   : > { %4800 = vmatpush1.bf16.msra.mxu1 %v14453_v34  ;;  %v14456_v34 = vld [vmem:[#allocation12 + $0x130] ss:$8 sps:$4 sm:$0xff]  }
 0x86c   : > { %4801 = vmatprep.subr.bf16.mxu1 %v14461_v35  ;;  %v14464_v35 = vld [vmem:[#allocation12 + $0x124] ss:$8 sps:$4 sm:$0xff]  }
 0x86f   : > { %4802 = vmatpush1.bf16.msra.mxu1 %v14459_v37  ;;  %v14462_v37 = vld [vmem:[#allocation12 + $0x120] ss:$8 sps:$4 sm:$0xff]  }
 0x870   : > { %4803 = vmatprep.subr.bf16.mxu1 %v14467_v38  ;;  %v14470_v38 = vld [vmem:[#allocation12 + $0x114] ss:$8 sps:$4 sm:$0xff]  }
 0x873   : > { %4804 = vmatpush1.bf16.msra.mxu1 %v14465_v40  ;;  %v14468_v40 = vld [vmem:[#allocation12 + $0x110] ss:$8 sps:$4 sm:$0xff]  }
 0x874   : > { %4805 = vmatprep.subr.bf16.mxu1 %v14473_v43  ;;  %v14476_v43 = vld [vmem:[#allocation12 + $0x104] ss:$8 sps:$4 sm:$0xff]  }
 0x877   : > { %4806 = vmatpush2.bf16.msra.mxu1 %v14471_v46  ;;  %v14474_v46 = vld [vmem:[#allocation12 + $0x100] ss:$8 sps:$4 sm:$0xff]  }
 0x878   : > { %4807 = vmatprep.subr.bf16.mxu1 %v14479_v45  ;;  %v14482_v45 = vld [vmem:[#allocation12 + $0x1f4] ss:$8 sps:$4 sm:$0xff]  }
 0x87b   : > { %4808 = vmatpush2.bf16.msra.mxu1 %v14477_v47  ;;  %v14480_v47 = vld [vmem:[#allocation12 + $0x1f0] ss:$8 sps:$4 sm:$0xff]  }
 0x87c   : > { %4809 = vmatprep.subr.bf16.mxu1 %v14485_v48  ;;  %v14488_v48 = vld [vmem:[#allocation12 + $0x1e4] ss:$8 sps:$4 sm:$0xff]  }
 0x87f   : > { %4810 = vmatpush2.bf16.msra.mxu1 %v14483_v28  ;;  %v14486_v28 = vld [vmem:[#allocation12 + $0x1e0] ss:$8 sps:$4 sm:$0xff]  }
 0x880   : > { %4811 = vmatprep.subr.bf16.mxu1 %v14491_v49  ;;  %v14494_v49 = vld [vmem:[#allocation12 + $0x1d4] ss:$8 sps:$4 sm:$0xff]  }
 0x883   : > { %4812 = vmatpush2.bf16.msra.mxu1 %v14489_v33  ;;  %v14492_v33 = vld [vmem:[#allocation12 + $0x1d0] ss:$8 sps:$4 sm:$0xff]  }
 0x884   : > { %4813 = vmatprep.subr.bf16.mxu1 %v14497_v36  ;;  %v14500_v36 = vld [vmem:[#allocation12 + $0x1c4] ss:$8 sps:$4 sm:$0xff]  }
 0x887   : > { %4814 = vmatpush2.bf16.msra.mxu1 %v14495_v50  ;;  %v14498_v50 = vld [vmem:[#allocation12 + $0x1c0] ss:$8 sps:$4 sm:$0xff]  }
 0x888   : > { %4815 = vmatprep.subr.bf16.mxu1 %v14503_v39  ;;  %v14506_v39 = vld [vmem:[#allocation12 + $0x1b4] ss:$8 sps:$4 sm:$0xff]  }
 0x88b   : > { %4816 = vmatpush2.bf16.msra.mxu1 %v14501_v42  ;;  %v14509_v42 = vld [vmem:[#allocation12 + $0x94] ss:$8 sps:$4 sm:$0xff]  }
 0x88c   : > { %4817 = vmatprep.subr.bf16.mxu1 %v14509_v42  ;;  %v14548_v42 = vld [vmem:[#allocation12 + $0x2f4] ss:$8 sps:$4 sm:$0xff]  }
 0x8ed   : > { %v4059_v53 = vpop.f32.mrf.mxu0 }
 0x8ef   : > { %v4061_v55 = vpop.f32.mrf.mxu0 }
 0x8f1   : > { %v4063_v41 = vpop.f32.mrf.mxu0 }
 0x8f3   : > { %v4065_v1 = vpop.f32.mrf.mxu0 }
 0x8f6   : > { %v3936_v51 = vpop.f32.mrf.mxu1 }
 0x8f7   : > { %v4060_v57 = vadd.f32 %v4059_v53, %v3936_v51  ;;  %v14504_v51 = vld [vmem:[#allocation12 + $0x1b0] ss:$8 sps:$4 sm:$0xff]   ;;  %v14512_v53 = vld [vmem:[#allocation12 + $0x1a4] ss:$8 sps:$4 sm:$0xff]  }
 0x8f8   : > { %v3938_v44 = vpop.f32.mrf.mxu1 }
 0x8f9   : > { %v4062_v60 = vadd.f32 %v4061_v55, %v3938_v44  ;;  %v14507_v44 = vld [vmem:[#allocation12 + $0x90] ss:$8 sps:$4 sm:$0xff]   ;;  %v14510_v55 = vld [vmem:[#allocation12 + $0x1a0] ss:$8 sps:$4 sm:$0xff]  }
 0x8fa   : > { %v3940_v54 = vpop.f32.mrf.mxu1  ;;  %4818 = vmatpush2.bf16.msra.mxu1 %v14507_v44  ;;  %v14551_v44 = vld [vmem:[#allocation12 + $0x2e4] ss:$8 sps:$4 sm:$0xff]  }
 0x8fb   : > { %v4064_v61 = vadd.f32 %v4063_v41, %v3940_v54  ;;  %v14515_v54 = vld [vmem:[#allocation12 + $0x84] ss:$8 sps:$4 sm:$0xff]   ;;  %v14518_v41 = vld [vmem:[#allocation12 + $0x194] ss:$8 sps:$4 sm:$0xff]  }
 0x8fc   : > { %v3942_v58 = vpop.f32.mrf.mxu1  ;;  %4819 = vmatprep.subr.bf16.mxu1 %v14515_v54  ;;  %v14554_v54 = vld [vmem:[#allocation12 + $0x2d4] ss:$8 sps:$4 sm:$0xff]  }
 0x8fd   : > { %v4066_v3 = vadd.f32 %v4065_v1, %v3942_v58  ;;  %v14513_v58 = vld [vmem:[#allocation12 + $0x80] ss:$8 sps:$4 sm:$0xff]  }
 0x8fe   : > { %4820 = vmatpush2.bf16.msra.mxu1 %v14513_v58  ;;  %v14557_v58 = vld [vmem:[#allocation12 + $0x2c4] ss:$8 sps:$4 sm:$0xff]  }
 0x916   : > { %v4205_v59 = vpop.f32.mrf.mxu1 }
 0x917   : > { %v4214_v7 = vadd.f32 %v4205_v59, %v4060_v57  ;;  %v14516_v59 = vld [vmem:[#allocation12 + $0x190] ss:$8 sps:$4 sm:$0xff]  }
 0x918   : > { %v4207_v26 = vpop.f32.mrf.mxu1 }
 0x919   : > { %v4215_v4 = vadd.f32 %v4207_v26, %v4062_v60  ;;  %v4230_v14 = vadd.f32 %v4223_v8, %v4214_v7  ;;  %v14521_v26 = vld [vmem:[#allocation12 + $0x184] ss:$8 sps:$4 sm:$0xff]   ;;  %v14519_v60 = vld [vmem:[#allocation12 + $0x180] ss:$8 sps:$4 sm:$0xff]  }
 0x91a   : > { %v4209_v2 = vpop.f32.mrf.mxu1 }
 0x91b   : > { %v4216_v6 = vadd.f32 %v4209_v2, %v4064_v61  ;;  %v4231_v12 = vadd.f32 %v4227_v5, %v4215_v4  ;;  %v4234_v19 = vmax.f32 %v4230_v14, 0.0  ;;  %v14524_v61 = vld [vmem:[#allocation12 + $0x274] ss:$8 sps:$4 sm:$0xff]  }
 0x91c   : > { %v4211_v9 = vpop.f32.mrf.mxu1 }
 0x91d   : > { %v4217_v10 = vadd.f32 %v4211_v9, %v4066_v3  ;;  %v4232_v11 = vadd.f32 %v4223_v8, %v4216_v6  ;;  %v4235_v17 = vmax.f32 %v4231_v12, 0.0 }
 0x91f   : > { %v4233_v13 = vadd.f32 %v4227_v5, %v4217_v10  ;;  %v4236_v16 = vmax.f32 %v4232_v11, 0.0 }
 0x921   : > { %v4237_v15 = vmax.f32 %v4233_v13, 0.0 }
 0x923   : > { %4276 = vmatprep.subr.mxu0 %v4237_v15 }
 0x924   : > { %4277 = vmatpush1.msra.mxu0 %v4236_v16 }
 0x925   : > { %4278 = vmatprep.subr.mxu0 %v4235_v17 }
 0x926   : > { %4279 = vmatpush1.msra.mxu0 %v4234_v19 }
 0x927   : > { %12684 = vmatmul.mubr.msk.f32.vlgmr.msra.gmra.mxu0 %vm4238_vm8, %v17331_v20  ;;  %4586 = vmatprep.subr.bf16.mxu0 %v14434_v18 }
 0x928   : > { %4318 = vmatprep.mubr.f32.mxu0 %v16428_v62  ;;  %4587 = vmatpush1.bf16.msra.mxu0 %v14432_v21 }
 0x929   : > { %4588 = vmatprep.subr.bf16.mxu0 %v14440_v22 }
 0x92b   : > { %12685 = vmatmul.mubr.msk.f32.gmra.mxu0 %vm4238_vm8, %v17337_v23 }
 0x92c   : > { %4324 = vmatprep.mubr.f32.mxu0 %v16428_v62  ;;  %4589 = vmatpush1.bf16.msra.mxu0 %v14438_v24 }
 0x92d   : > { %4590 = vmatprep.subr.bf16.mxu0 %v14446_v25 }
 0x92f   : > { %12686 = vmatmul.mubr.msk.f32.gmra.mxu0 %vm4238_vm8, %v17343_v27 }
 0x930   : > { %4591 = vmatpush1.bf16.msra.mxu0 %v14444_v29  ;;  %v14522_v29 = vld [vmem:[#allocation12 + $0x270] ss:$8 sps:$4 sm:$0xff]  }
 0x931   : > { %4592 = vmatprep.subr.bf16.mxu0 %v14452_v30 }
 0x934   : > { %4593 = vmatpush1.bf16.msra.mxu0 %v14450_v31 }
 0x935   : > { %4594 = vmatprep.subr.bf16.mxu0 %v14458_v32 }
 0x938   : > { %4595 = vmatpush1.bf16.msra.mxu0 %v14456_v34  ;;  %v14527_v34 = vld [vmem:[#allocation12 + $0x264] ss:$8 sps:$4 sm:$0xff]  }
 0x939   : > { %4596 = vmatprep.subr.bf16.mxu0 %v14464_v35 }
 0x93c   : > { %4597 = vmatpush1.bf16.msra.mxu0 %v14462_v37 }
 0x93d   : > { %4598 = vmatprep.subr.bf16.mxu0 %v14470_v38  ;;  %v14525_v38 = vld [vmem:[#allocation12 + $0x260] ss:$8 sps:$4 sm:$0xff]  }
 0x940   : > { %4599 = vmatpush1.bf16.msra.mxu0 %v14468_v40  ;;  %v14530_v40 = vld [vmem:[#allocation12 + $0x254] ss:$8 sps:$4 sm:$0xff]  }
 0x941   : > { %4600 = vmatprep.subr.bf16.mxu0 %v14476_v43  ;;  %v14528_v43 = vld [vmem:[#allocation12 + $0x250] ss:$8 sps:$4 sm:$0xff]  }
 0x944   : > { %4601 = vmatpush1.bf16.msra.mxu0 %v14474_v46  ;;  %v14533_v46 = vld [vmem:[#allocation12 + $0x244] ss:$8 sps:$4 sm:$0xff]  }
 0x945   : > { %4602 = vmatprep.subr.bf16.mxu0 %v14482_v45  ;;  %v14531_v45 = vld [vmem:[#allocation12 + $0x240] ss:$8 sps:$4 sm:$0xff]  }
 0x948   : > { %4603 = vmatpush2.bf16.msra.mxu0 %v14480_v47  ;;  %v14536_v47 = vld [vmem:[#allocation12 + $0x234] ss:$8 sps:$4 sm:$0xff]  }
 0x949   : > { %4604 = vmatprep.subr.bf16.mxu0 %v14488_v48  ;;  %v14534_v48 = vld [vmem:[#allocation12 + $0x230] ss:$8 sps:$4 sm:$0xff]  }
 0x94c   : > { %4605 = vmatpush2.bf16.msra.mxu0 %v14486_v28  ;;  %v14539_v28 = vld [vmem:[#allocation12 + $0x224] ss:$8 sps:$4 sm:$0xff]  }
 0x94d   : > { %4606 = vmatprep.subr.bf16.mxu0 %v14494_v49  ;;  %v14537_v49 = vld [vmem:[#allocation12 + $0x220] ss:$8 sps:$4 sm:$0xff]  }
 0x950   : > { %4607 = vmatpush2.bf16.msra.mxu0 %v14492_v33  ;;  %v14542_v33 = vld [vmem:[#allocation12 + $0x214] ss:$8 sps:$4 sm:$0xff]  }
 0x951   : > { %4608 = vmatprep.subr.bf16.mxu0 %v14500_v36  ;;  %v14540_v36 = vld [vmem:[#allocation12 + $0x210] ss:$8 sps:$4 sm:$0xff]  }
 0x954   : > { %4609 = vmatpush2.bf16.msra.mxu0 %v14498_v50  ;;  %v14545_v50 = vld [vmem:[#allocation12 + $0x204] ss:$8 sps:$4 sm:$0xff]  }
 0x955   : > { %4610 = vmatprep.subr.bf16.mxu0 %v14506_v39  ;;  %v14543_v39 = vld [vmem:[#allocation12 + $0x200] ss:$8 sps:$4 sm:$0xff]  }
 0x958   : > { %4611 = vmatpush2.bf16.msra.mxu0 %v14504_v51  ;;  %v14546_v51 = vld [vmem:[#allocation12 + $0x2f0] ss:$8 sps:$4 sm:$0xff]  }
 0x959   : > { %4612 = vmatprep.subr.bf16.mxu0 %v14512_v53  ;;  %v14549_v53 = vld [vmem:[#allocation12 + $0x2e0] ss:$8 sps:$4 sm:$0xff]  }
 0x95c   : > { %4613 = vmatpush2.bf16.msra.mxu0 %v14510_v55  ;;  %v14552_v55 = vld [vmem:[#allocation12 + $0x2d0] ss:$8 sps:$4 sm:$0xff]  }
 0x95d   : > { %4614 = vmatprep.subr.bf16.mxu0 %v14518_v41  ;;  %v14555_v41 = vld [vmem:[#allocation12 + $0x2c0] ss:$8 sps:$4 sm:$0xff]  }
 0x960   : > { %4615 = vmatpush2.bf16.msra.mxu0 %v14516_v59  ;;  %v14560_v59 = vld [vmem:[#allocation12 + $0x2b4] ss:$8 sps:$4 sm:$0xff]  }
 0x961   : > { %4616 = vmatprep.subr.bf16.mxu0 %v14521_v26  ;;  %v14558_v26 = vld [vmem:[#allocation12 + $0x2b0] ss:$8 sps:$4 sm:$0xff]  }
 0x964   : > { %4617 = vmatpush2.bf16.msra.mxu0 %v14519_v60  ;;  %v14563_v60 = vld [vmem:[#allocation12 + $0x2a4] ss:$8 sps:$4 sm:$0xff]  }
 0x965   : > { %5037 = vmatprep.subr.bf16.mxu0 %v14524_v61  ;;  %v14561_v61 = vld [vmem:[#allocation12 + $0x2a0] ss:$8 sps:$4 sm:$0xff]  }
 0x9e7   : > { %v4314_v63 = vpop.f32.mrf.mxu0 }
 0x9e9   : > { %v4316_v1 = vpop.f32.mrf.mxu0 }
 0x9eb   : > { %v4320_v57 = vpop.f32.mrf.mxu0 }
 0x9ec   : > { %v4331_v2 = vpack.c.bf16 %v4320_v57, %v4314_v63  ;;  %v14566_v63 = vld [vmem:[#allocation12 + $0x294] ss:$8 sps:$4 sm:$0xff]   ;;  %v14569_v57 = vld [vmem:[#allocation12 + $0x284] ss:$8 sps:$4 sm:$0xff]  }
 0x9ed   : > { %v4322_v3 = vpop.f32.mrf.mxu0 }
 0x9ee   : > { %v4332_v4 = vpack.c.bf16 %v4322_v3, %v4316_v1  ;;  %v4403_v5 = vshll.u32 %v4331_v2, 16  ;;  %v4869_v15 = vrot.slane %v4331_v2, 1  ;;  %v4401_v18 = vshrl.u32 %v4331_v2, 16  ;;  %v14564_v1 = vld [vmem:[#allocation12 + $0x290] ss:$8 sps:$4 sm:$0xff]  }
 0x9ef   : > { %v4326_v6 = vpop.f32.mrf.mxu0 }
 0x9f0   : > { %v4415_v7 = vshll.u32 %v4332_v4, 16  ;;  %v4365_v8 = vpack.c.bf16 %v4326_v6, %v4326_v6  ;;  %4821 = vmatprep.mubr.bf16.mxu1 %v4332_v4  ;;  %v4405_v14 = vrot.slane %v4403_v5, 1  ;;  %v4413_v17 = vshrl.u32 %v4332_v4, 16 }
 0x9f1   : > { %v4328_v9 = vpop.f32.mrf.mxu0  ;;  %4822 = vmatmul.mubr.bf16.vlgmr.msra.gmra.mxu1 %v4331_v2  ;;  %v4872_v32 = vrot.slane %v4332_v4, 1  ;;  %v14567_v2 = vld [vmem:[#allocation12 + $0x280] ss:$8 sps:$4 sm:$0xff]  }
 0x9f2   : > { %v4408_v10 = vshll.u32 %v4365_v8, 16  ;;  %v4870_v11 = vrot.slane %v4365_v8, 1  ;;  %v4366_v12 = vpack.c.bf16 %v4328_v9, %v4328_v9  ;;  %v4417_v13 = vrot.slane %v4415_v7, 1  ;;  %5168 = vmatprep.mubr.f32.mxu1 %v16428_v62 }
 0x9f3   : > { %v4406_v30 = vor.u32 %v4405_v14, %v4401_v18  ;;  %v5084_v14 = vld [vmem:[#allocation13] sm:$0x3] }
 0x9f4   : > { %v4420_v16 = vshll.u32 %v4366_v12, 16  ;;  %v4410_v19 = vrot.slane %v4408_v10, 1  ;;  %v17349_v21 = vsel %vm2247_vm2, %v4869_v15, %v4870_v11  ;;  %v4873_v24 = vrot.slane %v4366_v12, 1 }
 0x9f5   : > { %v4418_v25 = vor.u32 %v4417_v13, %v4413_v17 }
 0x9f6   : > { %v4422_v22 = vrot.slane %v4420_v16, 1  ;;  %v4411_v35 = vsel %vm1973_vm0, %v4406_v30, %v4410_v19  ;;  %v4874_v37 = vsel %vm2247_vm2, %v4872_v32, %v4873_v24 }
 0x9f8   : > { %v4423_v31 = vsel %vm1973_vm0, %v4418_v25, %v4422_v22  ;;  %v5093_v22 = vrot.slane %v5084_v14, %v17110_v56  ;;  %v5089_v25 = vrot.slane %v5084_v14, %v17108_v52  ;;  %vm10117_vm0 = vcmask 1044480  }
 0x9f9   : > { %4618 = vmatprep.mubr.bf16.mxu0 %v4423_v31 }
 0x9fa   : > { %4619 = vmatmul.mubr.bf16.vlgmr.msra.gmra.mxu0 %v4411_v35 }
 0x9fb   : > { %5038 = vmatpush1.bf16.msra.mxu0 %v14522_v29  ;;  %5069 = vmatprep.mubr.bf16.mxu0 %v4874_v37 }
 0x9fc   : > { %5039 = vmatprep.subr.bf16.mxu0 %v14527_v34 }
 0x9ff   : > { %5040 = vmatpush1.bf16.msra.mxu0 %v14525_v38 }
 0xa00   : > { %5041 = vmatprep.subr.bf16.mxu0 %v14530_v40 }
 0xa03   : > { %5042 = vmatpush1.bf16.msra.mxu0 %v14528_v43 }
 0xa04   : > { %5043 = vmatprep.subr.bf16.mxu0 %v14533_v46  ;;  %v5236_v46 = vld [vmem:[#allocation15 + $0x78] sm:$0xff] }
 0xa07   : > { %5044 = vmatpush1.bf16.msra.mxu0 %v14531_v45  ;;  %v5235_v45 = vld [vmem:[#allocation15 + $0x70] sm:$0xff] }
 0xa08   : > { %5045 = vmatprep.subr.bf16.mxu0 %v14536_v47  ;;  %v5234_v47 = vld [vmem:[#allocation15 + $0x68] sm:$0xff] }
 0xa0b   : > { %5046 = vmatpush1.bf16.msra.mxu0 %v14534_v48  ;;  %v5232_v48 = vld [vmem:[#allocation15 + $0x58] sm:$0xff] }
 0xa0c   : > { %5047 = vmatprep.subr.bf16.mxu0 %v14539_v28  ;;  %v5229_v28 = vld [vmem:[#allocation15 + $0x40] sm:$0xff] }
 0xa0f   : > { %5048 = vmatpush1.bf16.msra.mxu0 %v14537_v49  ;;  %v5228_v49 = vld [vmem:[#allocation15 + $0x38] sm:$0xff] }
 0xa10   : > { %5049 = vmatprep.subr.bf16.mxu0 %v14542_v33  ;;  %v5227_v33 = vld [vmem:[#allocation15 + $0x30] sm:$0xff] }
 0xa13   : > { %5050 = vmatpush1.bf16.msra.mxu0 %v14540_v36  ;;  %v5226_v36 = vld [vmem:[#allocation15 + $0x28] sm:$0xff] }
 0xa14   : > { %5051 = vmatprep.subr.bf16.mxu0 %v14545_v50  ;;  %v5225_v50 = vld [vmem:[#allocation15 + $0x20] sm:$0xff] }
 0xa17   : > { %5052 = vmatpush1.bf16.msra.mxu0 %v14543_v39  ;;  %v5224_v39 = vld [vmem:[#allocation15 + $0x18] sm:$0xff] }
 0xa18   : > { %5053 = vmatprep.subr.bf16.mxu0 %v14548_v42  ;;  %v5223_v42 = vld [vmem:[#allocation15 + $0x10] sm:$0xff] }
 0xa1b   : > { %5054 = vmatpush2.bf16.msra.mxu0 %v14546_v51  ;;  %v5222_v51 = vld [vmem:[#allocation15 + $0x8] sm:$0xff] }
 0xa1c   : > { %5055 = vmatprep.subr.bf16.mxu0 %v14551_v44  ;;  %v5221_v44 = vld [vmem:[#allocation15] sm:$0xff] }
 0xa1f   : > { %5056 = vmatpush2.bf16.msra.mxu0 %v14549_v53  ;;  %v5250_v53 = vld [vmem:[#allocation15 + $0xe8] sm:$0xff] }
 0xa20   : > { %5057 = vmatprep.subr.bf16.mxu0 %v14554_v54  ;;  %v5249_v54 = vld [vmem:[#allocation15 + $0xe0] sm:$0xff] }
 0xa23   : > { %5058 = vmatpush2.bf16.msra.mxu0 %v14552_v55  ;;  %v5248_v55 = vld [vmem:[#allocation15 + $0xd8] sm:$0xff] }
 0xa24   : > { %5059 = vmatprep.subr.bf16.mxu0 %v14557_v58  ;;  %v5247_v58 = vld [vmem:[#allocation15 + $0xd0] sm:$0xff] }
 0xa27   : > { %5060 = vmatpush2.bf16.msra.mxu0 %v14555_v41  ;;  %v5246_v41 = vld [vmem:[#allocation15 + $0xc8] sm:$0xff] }
 0xa28   : > { %5061 = vmatprep.subr.bf16.mxu0 %v14560_v59  ;;  %v5245_v59 = vld [vmem:[#allocation15 + $0xc0] sm:$0xff] }
 0xa2b   : > { %5062 = vmatpush2.bf16.msra.mxu0 %v14558_v26  ;;  %v5244_v26 = vld [vmem:[#allocation15 + $0xb8] sm:$0xff] }
 0xa2c   : > { %5063 = vmatprep.subr.bf16.mxu0 %v14563_v60  ;;  %v5243_v60 = vld [vmem:[#allocation15 + $0xb0] sm:$0xff] }
 0xa2f   : > { %5064 = vmatpush2.bf16.msra.mxu0 %v14561_v61  ;;  %v5242_v61 = vld [vmem:[#allocation15 + $0xa8] sm:$0xff] }
 0xa30   : > { %5065 = vmatprep.subr.bf16.mxu0 %v14566_v63  ;;  %v5241_v63 = vld [vmem:[#allocation15 + $0xa0] sm:$0xff] }
 0xa33   : > { %5066 = vmatpush2.bf16.msra.mxu0 %v14564_v1  ;;  %v5240_v1 = vld [vmem:[#allocation15 + $0x98] sm:$0xff] }
 0xa34   : > { %5067 = vmatprep.subr.bf16.mxu0 %v14569_v57  ;;  %v5239_v57 = vld [vmem:[#allocation15 + $0x90] sm:$0xff] }
 0xa37   : > { %5068 = vmatpush2.bf16.msra.mxu0 %v14567_v2  ;;  %v5238_v2 = vld [vmem:[#allocation15 + $0x88] sm:$0xff] }
 0xa3a   : > { %5070 = vmatmul.mubr.bf16.vlgmr.msra.gmra.mxu0 %v17349_v21 }
 0xab1   : > { %v4823_v5 = vpop.f32.mrf.mxu1 }
 0xab3   : > { %v4825_v7 = vpop.f32.mrf.mxu1 }
 0xab5   : > { %v4827_v9 = vpop.f32.mrf.mxu1 }
 0xab7   : > { %v4829_v15 = vpop.f32.mrf.mxu1 }
 0xaba   : > { %v4620_v3 = vpop.f32.mrf.mxu0 }
 0xabb   : > { %v4824_v16 = vadd.f32 %v4823_v5, %v4620_v3  ;;  %v5237_v3 = vld [vmem:[#allocation15 + $0x80] sm:$0xff] }
 0xabc   : > { %v4622_v4 = vpop.f32.mrf.mxu0 }
 0xabd   : > { %v4826_v12 = vadd.f32 %v4825_v7, %v4622_v4 }
 0xabe   : > { %v4624_v6 = vpop.f32.mrf.mxu0 }
 0xabf   : > { %v4828_v13 = vadd.f32 %v4827_v9, %v4624_v6 }
 0xac0   : > { %v4626_v8 = vpop.f32.mrf.mxu0 }
 0xac1   : > { %v4830_v18 = vadd.f32 %v4829_v15, %v4626_v8 }
 0xafa   : > { %v5071_v10 = vpop.f32.mrf.mxu0 }
 0xafb   : > { %v5080_v24 = vadd.f32 %v5071_v10, %v4824_v16 }
 0xafc   : > { %v5073_v11 = vpop.f32.mrf.mxu0 }
 0xafd   : > { %v5081_v19 = vadd.f32 %v5073_v11, %v4826_v12  ;;  %v5096_v35 = vadd.f32 %v5089_v25, %v5080_v24 }
 0xafe   : > { %v5075_v17 = vpop.f32.mrf.mxu0 }
 0xaff   : > { %v5082_v21 = vadd.f32 %v5075_v17, %v4828_v13  ;;  %v5097_v32 = vadd.f32 %v5093_v22, %v5081_v19  ;;  %v5100_v43 = vmax.f32 %v5096_v35, 0.0  ;;  %v14573_v35 = vld [vmem:[#allocation16 + $0x60] ss:$8 sps:$4 sm:$0xff]  }
 0xb00   : > { %v5077_v29 = vpop.f32.mrf.mxu0 }
 0xb01   : > { %v5083_v30 = vadd.f32 %v5077_v29, %v4830_v18  ;;  %v5098_v31 = vadd.f32 %v5089_v25, %v5082_v21  ;;  %v5101_v40 = vmax.f32 %v5097_v32, 0.0  ;;  %v14572_v32 = vld [vmem:[#allocation16 + $0x74] ss:$8 sps:$4 sm:$0xff]  }
 0xb03   : > { %v5099_v34 = vadd.f32 %v5093_v22, %v5083_v30  ;;  %v5102_v38 = vmax.f32 %v5098_v31, 0.0  ;;  %v5354_v30 = vld [vmem:[%s17808_s26] sm:$0xff] }
 0xb04   : > { %13547 = vmatprep.mubr.msk.f32.mxu0 %vm5356_vm10, %v5354_v30  ;;  %v14570_v31 = vld [vmem:[#allocation16 + $0x70] ss:$8 sps:$4 sm:$0xff]   ;;  %v14626_v30 = vld [vmem:[#allocation16 + $0x154] ss:$8 sps:$4 sm:$0xff]  }
 0xb05   : > { %v5103_v37 = vmax.f32 %v5099_v34, 0.0  ;;  %v14575_v34 = vld [vmem:[#allocation16 + $0x64] ss:$8 sps:$4 sm:$0xff]  }
 0xb07   : > { %5132 = vmatprep.subr.mxu1 %v5103_v37  ;;  %v14581_v37 = vld [vmem:[#allocation16 + $0x54] ss:$8 sps:$4 sm:$0xff]  }
 0xb08   : > { %5133 = vmatpush1.msra.mxu1 %v5102_v38  ;;  %v14579_v38 = vld [vmem:[#allocation16 + $0x50] ss:$8 sps:$4 sm:$0xff]  }
 0xb09   : > { %5134 = vmatprep.subr.mxu1 %v5101_v40  ;;  %v14587_v40 = vld [vmem:[#allocation16 + $0x44] ss:$8 sps:$4 sm:$0xff]  }
 0xb0a   : > { %5135 = vmatpush1.msra.mxu1 %v5100_v43  ;;  %v14585_v43 = vld [vmem:[#allocation16 + $0x40] ss:$8 sps:$4 sm:$0xff]  }
 0xb0b   : > { %12783 = vmatmul.mubr.msk.f32.vlgmr.msra.gmra.mxu1 %vm4238_vm8, %v17331_v20  ;;  %5260 = vmatprep.subr.mxu1 %v16428_v62  ;;  %v5233_v20 = vld [vmem:[#allocation15 + $0x60] sm:$0xff] }
 0xb0c   : > { %5174 = vmatprep.mubr.f32.mxu1 %v16428_v62  ;;  %5261 = vmatpush1.msra.mxu1 %v5236_v46  ;;  %v14593_v46 = vld [vmem:[#allocation16 + $0x34] ss:$8 sps:$4 sm:$0xff]  }
 0xb0d   : > { %5262 = vmatprep.subr.mxu1 %v16428_v62 }
 0xb0e   : > { %5263 = vmatpush1.msra.mxu1 %v5235_v45  ;;  %v14591_v45 = vld [vmem:[#allocation16 + $0x30] ss:$8 sps:$4 sm:$0xff]  }
 0xb0f   : > { %12784 = vmatmul.mubr.msk.f32.gmra.mxu1 %vm4238_vm8, %v17337_v23  ;;  %5264 = vmatprep.subr.mxu1 %v16428_v62  ;;  %v5231_v23 = vld [vmem:[#allocation15 + $0x50] sm:$0xff] }
 0xb10   : > { %5180 = vmatprep.mubr.f32.mxu1 %v16428_v62  ;;  %5265 = vmatpush1.msra.mxu1 %v5234_v47  ;;  %v14599_v47 = vld [vmem:[#allocation16 + $0x24] ss:$8 sps:$4 sm:$0xff]  }
 0xb11   : > { %5266 = vmatprep.subr.mxu1 %v16428_v62 }
 0xb12   : > { %5267 = vmatpush1.msra.mxu1 %v5233_v20  ;;  %v14597_v20 = vld [vmem:[#allocation16 + $0x20] ss:$8 sps:$4 sm:$0xff]  }
 0xb13   : > { %12785 = vmatmul.mubr.msk.f32.gmra.mxu1 %vm4238_vm8, %v17343_v27  ;;  %5268 = vmatprep.subr.mxu1 %v16428_v62  ;;  %v5230_v27 = vld [vmem:[#allocation15 + $0x48] sm:$0xff] }
 0xb14   : > { %5269 = vmatpush1.msra.mxu1 %v5232_v48  ;;  %v14605_v48 = vld [vmem:[#allocation16 + $0x14] ss:$8 sps:$4 sm:$0xff]  }
 0xb15   : > { %5270 = vmatprep.subr.mxu1 %v16428_v62 }
 0xb16   : > { %5271 = vmatpush1.msra.mxu1 %v5231_v23  ;;  %v14603_v23 = vld [vmem:[#allocation16 + $0x10] ss:$8 sps:$4 sm:$0xff]  }
 0xb17   : > { %5272 = vmatprep.subr.mxu1 %v16428_v62 }
 0xb18   : > { %5273 = vmatpush1.msra.mxu1 %v5230_v27 }
 0xb19   : > { %5274 = vmatprep.subr.mxu1 %v16428_v62 }
 0xb1a   : > { %5275 = vmatpush1.msra.mxu1 %v5229_v28 }
 0xb1b   : > { %5276 = vmatprep.subr.mxu1 %v16428_v62 }
 0xb1c   : > { %5277 = vmatpush1.msra.mxu1 %v5228_v49 }
 0xb1d   : > { %5278 = vmatprep.subr.mxu1 %v16428_v62 }
 0xb1e   : > { %5279 = vmatpush1.msra.mxu1 %v5227_v33 }
 0xb1f   : > { %5280 = vmatprep.subr.mxu1 %v16428_v62 }
 0xb20   : > { %5281 = vmatpush1.msra.mxu1 %v5226_v36 }
 0xb21   : > { %5282 = vmatprep.subr.mxu1 %v16428_v62 }
 0xb22   : > { %5283 = vmatpush1.msra.mxu1 %v5225_v50 }
 0xb23   : > { %5284 = vmatprep.subr.mxu1 %v16428_v62 }
 0xb24   : > { %5285 = vmatpush1.msra.mxu1 %v5224_v39 }
 0xb25   : > { %5286 = vmatprep.subr.mxu1 %v16428_v62 }
 0xb26   : > { %5287 = vmatpush1.msra.mxu1 %v5223_v42 }
 0xb27   : > { %5288 = vmatprep.subr.mxu1 %v16428_v62 }
 0xb28   : > { %5289 = vmatpush1.msra.mxu1 %v5222_v51 }
 0xb29   : > { %5290 = vmatprep.subr.mxu1 %v16428_v62 }
 0xb2a   : > { %5291 = vmatpush1.msra.mxu1 %v5221_v44 }
 0xb2b   : > { %5296 = vmatprep.subr.mxu1 %v16428_v62 }
 0xb2c   : > { %5297 = vmatpush2.msra.mxu1 %v5250_v53 }
 0xb2d   : > { %5298 = vmatprep.subr.mxu1 %v16428_v62 }
 0xb2e   : > { %5299 = vmatpush2.msra.mxu1 %v5249_v54 }
 0xb2f   : > { %5300 = vmatprep.subr.mxu1 %v16428_v62 }
 0xb30   : > { %5301 = vmatpush2.msra.mxu1 %v5248_v55 }
 0xb31   : > { %5302 = vmatprep.subr.mxu1 %v16428_v62 }
 0xb32   : > { %5303 = vmatpush2.msra.mxu1 %v5247_v58 }
 0xb33   : > { %5304 = vmatprep.subr.mxu1 %v16428_v62 }
 0xb34   : > { %5305 = vmatpush2.msra.mxu1 %v5246_v41  ;;  %v14578_v41 = vld [vmem:[#allocation16 + $0xf4] ss:$8 sps:$4 sm:$0xff]  }
 0xb35   : > { %5306 = vmatprep.subr.mxu1 %v16428_v62 }
 0xb36   : > { %5307 = vmatpush2.msra.mxu1 %v5245_v59  ;;  %v5355_v59 = vld [vmem:[%s17808_s26 + $0x8] sm:$0x3] }
 0xb37   : > { %5308 = vmatprep.subr.mxu1 %v16428_v62 }
 0xb38   : > { %5309 = vmatpush2.msra.mxu1 %v5244_v26  ;;  %v14576_v26 = vld [vmem:[#allocation16 + $0xf0] ss:$8 sps:$4 sm:$0xff]  }
 0xb39   : > { %5310 = vmatprep.subr.mxu1 %v16428_v62 }
 0xb3a   : > { %5311 = vmatpush2.msra.mxu1 %v5243_v60  ;;  %v14584_v60 = vld [vmem:[#allocation16 + $0xe4] ss:$8 sps:$4 sm:$0xff]  }
 0xb3b   : > { %5312 = vmatprep.subr.mxu1 %v16428_v62 }
 0xb3c   : > { %5313 = vmatpush2.msra.mxu1 %v5242_v61  ;;  %v14582_v61 = vld [vmem:[#allocation16 + $0xe0] ss:$8 sps:$4 sm:$0xff]  }
 0xb3d   : > { %5314 = vmatprep.subr.mxu1 %v16428_v62 }
 0xb3e   : > { %5315 = vmatpush2.msra.mxu1 %v5241_v63  ;;  %v14590_v63 = vld [vmem:[#allocation16 + $0xd4] ss:$8 sps:$4 sm:$0xff]  }
 0xb3f   : > { %5316 = vmatprep.subr.mxu1 %v16428_v62 }
 0xb40   : > { %5317 = vmatpush2.msra.mxu1 %v5240_v1  ;;  %v14588_v1 = vld [vmem:[#allocation16 + $0xd0] ss:$8 sps:$4 sm:$0xff]  }
 0xb41   : > { %5318 = vmatprep.subr.mxu1 %v16428_v62 }
 0xb42   : > { %5319 = vmatpush2.msra.mxu1 %v5239_v57  ;;  %v14596_v57 = vld [vmem:[#allocation16 + $0xc4] ss:$8 sps:$4 sm:$0xff]  }
 0xb43   : > { %5320 = vmatprep.subr.mxu1 %v16428_v62 }
 0xb44   : > { %5321 = vmatpush2.msra.mxu1 %v5238_v2  ;;  %v14594_v2 = vld [vmem:[#allocation16 + $0xc0] ss:$8 sps:$4 sm:$0xff]  }
 0xb45   : > { %5322 = vmatprep.subr.mxu1 %v16428_v62 }
 0xb46   : > { %5323 = vmatpush2.msra.mxu1 %v5237_v3  ;;  %v14602_v3 = vld [vmem:[#allocation16 + $0xb4] ss:$8 sps:$4 sm:$0xff]  }
 0xb47   : > { %5687 = vmatprep.subr.bf16.mxu1 %v14572_v32  ;;  %v14629_v32 = vld [vmem:[#allocation16 + $0x144] ss:$8 sps:$4 sm:$0xff]  }
 0xbcb   : > { %v5170_v4 = vpop.f32.mrf.mxu1 }
 0xbcc   : > { %5193 = vrot.lane.b32.xlu0 %v5170_v4, %s16431_s16 }
 0xbcd   : > { %v5172_v5 = vpop.f32.mrf.mxu1 }
 0xbce   : > { %5195 = vrot.lane.b32.xlu1 %v5172_v5, %s16431_s16 }
 0xbcf   : > { %v5176_v6 = vpop.f32.mrf.mxu1 }
 0xbd0   : > { %5197 = vrot.lane.b32.xlu0 %v5176_v6, %s16431_s16 }
 0xbd1   : > { %v5178_v7 = vpop.f32.mrf.mxu1 }
 0xbd2   : > { %5199 = vrot.lane.b32.xlu1 %v5178_v7, %s16431_s16 }
 0xbd3   : > { %v5182_v8 = vpop.f32.mrf.mxu1 }
 0xbd4   : > { %5201 = vrot.lane.b32.xlu0 %v5182_v8, %s16431_s16 }
 0xbd5   : > { %v5184_v9 = vpop.f32.mrf.mxu1 }
 0xbd6   : > { %5203 = vrot.lane.b32.xlu1 %v5184_v9, %s16431_s16  ;;  %s17812_s16 = sld [smem:[#allocation107_spill]] }
 0xc3e   : > { %v5194_v10 = vpop.permute.xlu0 %5193 }
 0xc40   : > { %v5196_v11 = vpop.permute.xlu1 %5195 }
 0xc41   : > { %v5206_v12 = vsel %vm5205_vm9, %v5194_v10, %v5196_v11  ;;  %v5216_v13 = vmax.f32 %v5172_v5, %v5196_v11  ;;  %v14608_v5 = vld [vmem:[#allocation16 + $0xa4] ss:$8 sps:$4 sm:$0xff]   ;;  %v14612_v10 = vld [vmem:[#allocation16 + $0x90] ss:$8 sps:$4 sm:$0xff]  }
 0xc42   : > { %v5215_v14 = vmax.f32 %v5170_v4, %v5206_v12  ;;  %v5198_v15 = vpop.permute.xlu0 %5197  ;;  %v14600_v4 = vld [vmem:[#allocation16 + $0xb0] ss:$8 sps:$4 sm:$0xff]   ;;  %v14617_v11 = vld [vmem:[#allocation16 + $0x84] ss:$8 sps:$4 sm:$0xff]   ;;  %v14615_v12 = vld [vmem:[#allocation16 + $0x80] ss:$8 sps:$4 sm:$0xff]  }
 0xc43   : > { %12786 = vmatprep.mubr.msk.f32.mxu1 %vm5205_vm9, %v5216_v13  ;;  %v14620_v13 = vld [vmem:[#allocation16 + $0x174] ss:$8 sps:$4 sm:$0xff]  }
 0xc44   : > { %5325 = vmatmul.mubr.f32.vlgmr.msra.gmra.mxu1 %v5215_v14  ;;  %v5200_v16 = vpop.permute.xlu1 %5199 }
 0xc45   : > { %v5207_v17 = vsel %vm5205_vm9, %v5198_v15, %v5200_v16  ;;  %v5218_v18 = vmax.f32 %v5178_v7, %v5200_v16  ;;  %5688 = vmatpush1.bf16.msra.mxu1 %v14570_v31  ;;  %v14611_v7 = vld [vmem:[#allocation16 + $0x4] ss:$8 sps:$4 sm:$0xff]   ;;  %v14624_v31 = vld [vmem:[#allocation16 + $0x150] ss:$8 sps:$4 sm:$0xff]  }
 0xc46   : > { %v5217_v19 = vmax.f32 %v5176_v6, %v5207_v17  ;;  %v5202_v22 = vpop.permute.xlu0 %5201  ;;  %5689 = vmatprep.subr.bf16.mxu1 %v14575_v34  ;;  %v14606_v6 = vld [vmem:[#allocation16 + $0xa0] ss:$8 sps:$4 sm:$0xff]  }
 0xc47   : > { %12787 = vmatprep.mubr.msk.f32.mxu1 %vm5205_vm9, %v5218_v18  ;;  %v14627_v34 = vld [vmem:[#allocation16 + $0x140] ss:$8 sps:$4 sm:$0xff]  }
 0xc48   : > { %5330 = vmatmul.mubr.f32.gmra.mxu1 %v5217_v19  ;;  %v5204_v21 = vpop.permute.xlu1 %5203 }
 0xc49   : > { %v5208_v24 = vsel %vm5205_vm9, %v5202_v22, %v5204_v21  ;;  %v5220_v25 = vmax.f32 %v5184_v9, %v5204_v21  ;;  %5690 = vmatpush1.bf16.msra.mxu1 %v14573_v35  ;;  %v14614_v9 = vld [vmem:[#allocation16 + $0x94] ss:$8 sps:$4 sm:$0xff]   ;;  %v14618_v21 = vld [vmem:[#allocation16 + $0x170] ss:$8 sps:$4 sm:$0xff]  }
 0xc4a   : > { %v5219_v29 = vmax.f32 %v5182_v8, %v5208_v24  ;;  %5691 = vmatprep.subr.bf16.mxu1 %v14581_v37  ;;  %v14609_v8 = vld [vmem:[#allocation16] ss:$8 sps:$4 sm:$0xff]   ;;  %v14632_v35 = vld [vmem:[#allocation16 + $0x134] ss:$8 sps:$4 sm:$0xff]   ;;  %v14630_v37 = vld [vmem:[#allocation16 + $0x130] ss:$8 sps:$4 sm:$0xff]  }
 0xc4b   : > { %12788 = vmatprep.mubr.msk.f32.mxu1 %vm5205_vm9, %v5220_v25  ;;  %v14623_v25 = vld [vmem:[#allocation16 + $0x164] ss:$8 sps:$4 sm:$0xff]  }
 0xc4c   : > { %5335 = vmatmul.mubr.f32.gmra.mxu1 %v5219_v29  ;;  %v14621_v29 = vld [vmem:[#allocation16 + $0x160] ss:$8 sps:$4 sm:$0xff]  }
 0xc4d   : > { %5719 = vmatprep.mubr.bf16.mxu1 %v16427_v0  ;;  %5692 = vmatpush1.bf16.msra.mxu1 %v14579_v38  ;;  %v14635_v38 = vld [vmem:[#allocation16 + $0x124] ss:$8 sps:$4 sm:$0xff]  }
 0xc4e   : > { %5693 = vmatprep.subr.bf16.mxu1 %v14587_v40  ;;  %v14633_v40 = vld [vmem:[#allocation16 + $0x120] ss:$8 sps:$4 sm:$0xff]  }
 0xc51   : > { %5694 = vmatpush1.bf16.msra.mxu1 %v14585_v43  ;;  %v14638_v43 = vld [vmem:[#allocation16 + $0x114] ss:$8 sps:$4 sm:$0xff]  }
 0xc52   : > { %5695 = vmatprep.subr.bf16.mxu1 %v14593_v46  ;;  %v14636_v46 = vld [vmem:[#allocation16 + $0x110] ss:$8 sps:$4 sm:$0xff]  }
 0xc55   : > { %5696 = vmatpush1.bf16.msra.mxu1 %v14591_v45  ;;  %v14641_v45 = vld [vmem:[#allocation16 + $0x104] ss:$8 sps:$4 sm:$0xff]  }
 0xc56   : > { %5697 = vmatprep.subr.bf16.mxu1 %v14599_v47  ;;  %v14639_v47 = vld [vmem:[#allocation16 + $0x100] ss:$8 sps:$4 sm:$0xff]  }
 0xc59   : > { %5698 = vmatpush1.bf16.msra.mxu1 %v14597_v20 }
 0xc5a   : > { %5699 = vmatprep.subr.bf16.mxu1 %v14605_v48  ;;  %v14642_v48 = vld [vmem:[#allocation19 + $0x70] ss:$8 sps:$4 sm:$0xff]  }
 0xc5d   : > { %5700 = vmatpush1.bf16.msra.mxu1 %v14603_v23  ;;  %v14644_v23 = vld [vmem:[#allocation19 + $0x74] ss:$8 sps:$4 sm:$0xff]  }
 0xc5e   : > { %5701 = vmatprep.subr.bf16.mxu1 %v14611_v7  ;;  %v14720_v7 = vld [vmem:[#allocation19 + $0x90] ss:$8 sps:$4 sm:$0xff]  }
 0xc61   : > { %5702 = vmatpush1.bf16.msra.mxu1 %v14609_v8 }
 0xd04   : > { %v5326_v27 = vpop.f32.mrf.mxu1 }
 0xd05   : > { %v5343_v42 = vrot.slane %v5326_v27, 1 }
 0xd06   : > { %v5328_v28 = vpop.f32.mrf.mxu1 }
 0xd07   : > { %v14645_v28 = vld [vmem:[#allocation19 + $0x60] ss:$8 sps:$4 sm:$0xff]  }
 0xd08   : > { %v5331_v49 = vpop.f32.mrf.mxu1 }
 0xd09   : > { %v5344_v36 = vrot.slane %v5331_v49, 1 }
 0xd0a   : > { %v5333_v33 = vpop.f32.mrf.mxu1 }
 0xd0b   : > { %v5345_v55 = vsel %vm2247_vm2, %v5343_v42, %v5344_v36  ;;  %v14648_v33 = vld [vmem:[#allocation19 + $0x50] ss:$8 sps:$4 sm:$0xff]  }
 0xd0c   : > { %v5336_v50 = vpop.f32.mrf.mxu1  ;;  %v5351_v58 = vmax.f32 %v5326_v27, %v5345_v55  ;;  %v14647_v27 = vld [vmem:[#allocation19 + $0x64] ss:$8 sps:$4 sm:$0xff]   ;;  %v14660_v42 = vld [vmem:[#allocation19 + $0x30] ss:$8 sps:$4 sm:$0xff]  }
 0xd0d   : > { %v5346_v39 = vrot.slane %v5336_v50, 1  ;;  %v14680_v55 = vld [vmem:[#allocation19 + $0x4] ss:$8 sps:$4 sm:$0xff]  }
 0xd0e   : > { %v5338_v51 = vpop.f32.mrf.mxu1 }
 0xd0f   : > { %v5353_v44 = vmax.f32 %v5336_v50, %v5346_v39  ;;  %v5347_v53 = vsel %vm2247_vm2, %v5344_v36, %v5346_v39  ;;  %v14656_v36 = vld [vmem:[#allocation19 + $0x44] ss:$8 sps:$4 sm:$0xff]   ;;  %v14654_v50 = vld [vmem:[#allocation19 + $0x40] ss:$8 sps:$4 sm:$0xff]   ;;  %v14662_v39 = vld [vmem:[#allocation19 + $0x34] ss:$8 sps:$4 sm:$0xff]  }
 0xd10   : > { %v5352_v54 = vmax.f32 %v5331_v49, %v5347_v53  ;;  %v14650_v49 = vld [vmem:[#allocation19 + $0x54] ss:$8 sps:$4 sm:$0xff]   ;;  %v14668_v51 = vld [vmem:[#allocation19 + $0x24] ss:$8 sps:$4 sm:$0xff]  }
 0xd11   : > { %13541 = vmatprep.subr.msk.mxu0 %vm3687_vm6, %v5353_v44  ;;  %v14674_v53 = vld [vmem:[#allocation19 + $0x14] ss:$8 sps:$4 sm:$0xff]  }
 0xd12   : > { %13542 = vmatpush3.msk.msra.mxu0 %vm3687_vm6, %v5353_v44  ;;  %v14666_v44 = vld [vmem:[#allocation19 + $0x20] ss:$8 sps:$4 sm:$0xff]  }
 0xd13   : > { %13543 = vmatprep.subr.mxu0 %v5352_v54 }
 0xd14   : > { %13544 = vmatpush3.msra.mxu0 %v5352_v54  ;;  %v14672_v54 = vld [vmem:[#allocation19 + $0x10] ss:$8 sps:$4 sm:$0xff]  }
 0xd15   : > { %13545 = vmatprep.subr.mxu0 %v5351_v58 }
 0xd16   : > { %13546 = vmatpush3.msra.mxu0 %v5351_v58  ;;  %v14678_v58 = vld [vmem:[#allocation19] ss:$8 sps:$4 sm:$0xff]  }
 0xd17   : > { %13548 = vmatmul.mubr.msk.f32.vlgmr.msra.gmra.mxu0 %vm5356_vm10, %v5355_v59  ;;  %5566 = vmatprep.subr.bf16.mxu0 %v14578_v41  ;;  %v14686_v41 = vld [vmem:[#allocation19 + $0xf4] ss:$8 sps:$4 sm:$0xff]   ;;  %v14684_v59 = vld [vmem:[#allocation19 + $0xf0] ss:$8 sps:$4 sm:$0xff]  }
 0xd18   : > { %5567 = vmatpush1.bf16.msra.mxu0 %v14576_v26  ;;  %5598 = vmatprep.mubr.bf16.mxu0 %v16427_v0  ;;  %v14692_v26 = vld [vmem:[#allocation19 + $0xe4] ss:$8 sps:$4 sm:$0xff]  }
 0xd19   : > { %5568 = vmatprep.subr.bf16.mxu0 %v14584_v60  ;;  %v14690_v60 = vld [vmem:[#allocation19 + $0xe0] ss:$8 sps:$4 sm:$0xff]  }
 0xd1c   : > { %5569 = vmatpush1.bf16.msra.mxu0 %v14582_v61  ;;  %v14698_v61 = vld [vmem:[#allocation19 + $0xd4] ss:$8 sps:$4 sm:$0xff]  }
 0xd1d   : > { %5570 = vmatprep.subr.bf16.mxu0 %v14590_v63  ;;  %v14696_v63 = vld [vmem:[#allocation19 + $0xd0] ss:$8 sps:$4 sm:$0xff]  }
 0xd20   : > { %5571 = vmatpush1.bf16.msra.mxu0 %v14588_v1  ;;  %v14704_v1 = vld [vmem:[#allocation19 + $0xc4] ss:$8 sps:$4 sm:$0xff]  }
 0xd21   : > { %5572 = vmatprep.subr.bf16.mxu0 %v14596_v57  ;;  %v14702_v57 = vld [vmem:[#allocation19 + $0xc0] ss:$8 sps:$4 sm:$0xff]  }
 0xd24   : > { %5573 = vmatpush1.bf16.msra.mxu0 %v14594_v2  ;;  %v14710_v2 = vld [vmem:[#allocation19 + $0xb4] ss:$8 sps:$4 sm:$0xff]  }
 0xd25   : > { %5574 = vmatprep.subr.bf16.mxu0 %v14602_v3  ;;  %v14708_v3 = vld [vmem:[#allocation19 + $0xb0] ss:$8 sps:$4 sm:$0xff]  }
 0xd28   : > { %5575 = vmatpush1.bf16.msra.mxu0 %v14600_v4  ;;  %v14716_v4 = vld [vmem:[#allocation19 + $0xa4] ss:$8 sps:$4 sm:$0xff]  }
 0xd29   : > { %5576 = vmatprep.subr.bf16.mxu0 %v14608_v5  ;;  %v14714_v5 = vld [vmem:[#allocation19 + $0xa0] ss:$8 sps:$4 sm:$0xff]  }
 0xd2c   : > { %5577 = vmatpush1.bf16.msra.mxu0 %v14606_v6  ;;  %v14722_v6 = vld [vmem:[#allocation19 + $0x94] ss:$8 sps:$4 sm:$0xff]  }
 0xd2d   : > { %5578 = vmatprep.subr.bf16.mxu0 %v14614_v9 }
 0xd30   : > { %5579 = vmatpush1.bf16.msra.mxu0 %v14612_v10 }
 0xd31   : > { %5580 = vmatprep.subr.bf16.mxu0 %v14617_v11 }
 0xd34   : > { %5581 = vmatpush1.bf16.msra.mxu0 %v14615_v12 }
 0xd35   : > { %5828 = vmatprep.subr.bf16.mxu0 %v14620_v13 }
 0xdd7   : > { %v13549_v14 = vpop.f32.mrf.mxu0 }
 0xdd9   : > { %v5432_v15 = vpop.f32.mrf.mxu0 }
 0xdda   : > { %v5443_v16 = vpack.c.bf16 %v5432_v15, %v5432_v15  ;;  %v5460_v17 = vpack.c.bf16 %v13549_v14, %v5432_v15 }
 0xddc   : > { %v5481_v18 = vshll.u32 %v5460_v17, 16  ;;  %5720 = vmatmul.mubr.bf16.vlgmr.msra.gmra.mxu1 %v5443_v16  ;;  %v5479_v19 = vshrl.u32 %v5460_v17, 16  ;;  %v5746_v20 = vrot.slane %v5460_v17, 1  ;;  %v5871_v16 = vld [vmem:[#allocation18] sm:$0x3] }
 0xddd   : > { %5958 = vmatprep.mubr.f32.mxu1 %v16428_v62 }
 0xdde   : > { %v5483_v22 = vrot.slane %v5481_v18, 1 }
 0xde0   : > { %v5484_v24 = vor.u32 %v5483_v22, %v5479_v19  ;;  %v5876_v19 = vrot.slane %v5871_v16, %v17108_v52 }
 0xde2   : > { %5599 = vmatmul.mubr.bf16.vlgmr.msra.gmra.mxu0 %v5484_v24  ;;  %v5880_v24 = vrot.slane %v5871_v16, %v17110_v56 }
 0xde3   : > { %5829 = vmatpush1.bf16.msra.mxu0 %v14618_v21  ;;  %5860 = vmatprep.mubr.bf16.mxu0 %v16427_v0 }
 0xde4   : > { %5830 = vmatprep.subr.bf16.mxu0 %v14623_v25 }
 0xde7   : > { %5831 = vmatpush1.bf16.msra.mxu0 %v14621_v29 }
 0xde8   : > { %5832 = vmatprep.subr.bf16.mxu0 %v14626_v30 }
 0xdeb   : > { %5833 = vmatpush1.bf16.msra.mxu0 %v14624_v31 }
 0xdec   : > { %5834 = vmatprep.subr.bf16.mxu0 %v14629_v32 }
 0xdef   : > { %5835 = vmatpush1.bf16.msra.mxu0 %v14627_v34 }
 0xdf0   : > { %5836 = vmatprep.subr.bf16.mxu0 %v14632_v35 }
 0xdf3   : > { %5837 = vmatpush1.bf16.msra.mxu0 %v14630_v37  ;;  %v14653_v37 = vld [vmem:[#allocation19 + $0x174] ss:$8 sps:$4 sm:$0xff]  }
 0xdf4   : > { %5838 = vmatprep.subr.bf16.mxu0 %v14635_v38 }
 0xdf7   : > { %5839 = vmatpush1.bf16.msra.mxu0 %v14633_v40  ;;  %v17416_v40 = vld [vmem:[%s17809_s11] sm:$0xff] }
 0xdf8   : > { %5840 = vmatprep.subr.bf16.mxu0 %v14638_v43  ;;  %v14651_v43 = vld [vmem:[#allocation19 + $0x170] ss:$8 sps:$4 sm:$0xff]  }
 0xdfb   : > { %5841 = vmatpush1.bf16.msra.mxu0 %v14636_v46  ;;  %v14659_v46 = vld [vmem:[#allocation19 + $0x164] ss:$8 sps:$4 sm:$0xff]  }
 0xdfc   : > { %5842 = vmatprep.subr.bf16.mxu0 %v14641_v45  ;;  %v17422_v45 = vld [vmem:[%s17809_s11 + $0x8] sm:$0x3] }
 0xdff   : > { %5843 = vmatpush1.bf16.msra.mxu0 %v14639_v47  ;;  %v14657_v47 = vld [vmem:[#allocation19 + $0x160] ss:$8 sps:$4 sm:$0xff]  }
 0xe00   : > { %6417 = vmatprep.subr.bf16.mxu0 %v14644_v23  ;;  %v14671_v23 = vld [vmem:[#allocation19 + $0x144] ss:$8 sps:$4 sm:$0xff]  }
 0xe02   : > { %5861 = vmatmul.mubr.bf16.vlgmr.msra.gmra.mxu0 %v5746_v20  ;;  %v14665_v20 = vld [vmem:[#allocation19 + $0x154] ss:$8 sps:$4 sm:$0xff]  }
 0xe03   : > { %6418 = vmatpush1.bf16.msra.mxu0 %v14642_v48  ;;  %v14663_v48 = vld [vmem:[#allocation19 + $0x150] ss:$8 sps:$4 sm:$0xff]  }
 0xe04   : > { %6419 = vmatprep.subr.bf16.mxu0 %v14647_v27  ;;  %v14669_v27 = vld [vmem:[#allocation19 + $0x140] ss:$8 sps:$4 sm:$0xff]  }
 0xe07   : > { %6420 = vmatpush1.bf16.msra.mxu0 %v14645_v28  ;;  %v14677_v28 = vld [vmem:[#allocation19 + $0x134] ss:$8 sps:$4 sm:$0xff]  }
 0xe08   : > { %6421 = vmatprep.subr.bf16.mxu0 %v14650_v49  ;;  %v14675_v49 = vld [vmem:[#allocation19 + $0x130] ss:$8 sps:$4 sm:$0xff]  }
 0xe0b   : > { %6422 = vmatpush1.bf16.msra.mxu0 %v14648_v33  ;;  %v14683_v33 = vld [vmem:[#allocation19 + $0x124] ss:$8 sps:$4 sm:$0xff]  }
 0xe0c   : > { %6423 = vmatprep.subr.bf16.mxu0 %v14656_v36  ;;  %v14681_v36 = vld [vmem:[#allocation19 + $0x120] ss:$8 sps:$4 sm:$0xff]  }
 0xe0f   : > { %6424 = vmatpush1.bf16.msra.mxu0 %v14654_v50  ;;  %v14689_v50 = vld [vmem:[#allocation19 + $0x114] ss:$8 sps:$4 sm:$0xff]  }
 0xe10   : > { %6425 = vmatprep.subr.bf16.mxu0 %v14662_v39  ;;  %v14687_v39 = vld [vmem:[#allocation19 + $0x110] ss:$8 sps:$4 sm:$0xff]  }
 0xe13   : > { %6426 = vmatpush1.bf16.msra.mxu0 %v14660_v42  ;;  %v14695_v42 = vld [vmem:[#allocation19 + $0x104] ss:$8 sps:$4 sm:$0xff]  }
 0xe14   : > { %6427 = vmatprep.subr.bf16.mxu0 %v14668_v51  ;;  %v14693_v51 = vld [vmem:[#allocation19 + $0x100] ss:$8 sps:$4 sm:$0xff]  }
 0xe17   : > { %6428 = vmatpush1.bf16.msra.mxu0 %v14666_v44  ;;  %v14701_v44 = vld [vmem:[#allocation19 + $0x1f4] ss:$8 sps:$4 sm:$0xff]  }
 0xe18   : > { %6429 = vmatprep.subr.bf16.mxu0 %v14674_v53  ;;  %v14699_v53 = vld [vmem:[#allocation19 + $0x1f0] ss:$8 sps:$4 sm:$0xff]  }
 0xe1b   : > { %6430 = vmatpush1.bf16.msra.mxu0 %v14672_v54  ;;  %v14707_v54 = vld [vmem:[#allocation19 + $0x1e4] ss:$8 sps:$4 sm:$0xff]  }
 0xe1c   : > { %6431 = vmatprep.subr.bf16.mxu0 %v14680_v55  ;;  %v14705_v55 = vld [vmem:[#allocation19 + $0x1e0] ss:$8 sps:$4 sm:$0xff]  }
 0xe1f   : > { %6432 = vmatpush1.bf16.msra.mxu0 %v14678_v58  ;;  %v14713_v58 = vld [vmem:[#allocation19 + $0x1d4] ss:$8 sps:$4 sm:$0xff]  }
 0xe20   : > { %6433 = vmatprep.subr.bf16.mxu0 %v14686_v41  ;;  %v14711_v41 = vld [vmem:[#allocation19 + $0x1d0] ss:$8 sps:$4 sm:$0xff]  }
 0xe23   : > { %6434 = vmatpush2.bf16.msra.mxu0 %v14684_v59  ;;  %v14719_v59 = vld [vmem:[#allocation19 + $0x1c4] ss:$8 sps:$4 sm:$0xff]  }
 0xe24   : > { %6435 = vmatprep.subr.bf16.mxu0 %v14692_v26  ;;  %v14717_v26 = vld [vmem:[#allocation19 + $0x1c0] ss:$8 sps:$4 sm:$0xff]  }
 0xe27   : > { %6436 = vmatpush2.bf16.msra.mxu0 %v14690_v60  ;;  %v14725_v60 = vld [vmem:[#allocation19 + $0x1b4] ss:$8 sps:$4 sm:$0xff]  }
 0xe28   : > { %6437 = vmatprep.subr.bf16.mxu0 %v14698_v61  ;;  %v14723_v61 = vld [vmem:[#allocation19 + $0x1b0] ss:$8 sps:$4 sm:$0xff]  }
 0xe2b   : > { %6438 = vmatpush2.bf16.msra.mxu0 %v14696_v63  ;;  %v14728_v63 = vld [vmem:[#allocation19 + $0x84] ss:$8 sps:$4 sm:$0xff]  }
 0xe2c   : > { %6439 = vmatprep.subr.bf16.mxu0 %v14704_v1  ;;  %v14726_v1 = vld [vmem:[#allocation19 + $0x80] ss:$8 sps:$4 sm:$0xff]  }
 0xe2f   : > { %6440 = vmatpush2.bf16.msra.mxu0 %v14702_v57  ;;  %v14731_v57 = vld [vmem:[#allocation19 + $0x1a4] ss:$8 sps:$4 sm:$0xff]  }
 0xe30   : > { %6441 = vmatprep.subr.bf16.mxu0 %v14710_v2  ;;  %v14729_v2 = vld [vmem:[#allocation19 + $0x1a0] ss:$8 sps:$4 sm:$0xff]  }
 0xe33   : > { %6442 = vmatpush2.bf16.msra.mxu0 %v14708_v3  ;;  %v14734_v3 = vld [vmem:[#allocation19 + $0x194] ss:$8 sps:$4 sm:$0xff]  }
 0xe34   : > { %6443 = vmatprep.subr.bf16.mxu0 %v14716_v4  ;;  %v14732_v4 = vld [vmem:[#allocation19 + $0x190] ss:$8 sps:$4 sm:$0xff]  }
 0xe37   : > { %6444 = vmatpush2.bf16.msra.mxu0 %v14714_v5  ;;  %v14737_v5 = vld [vmem:[#allocation19 + $0x184] ss:$8 sps:$4 sm:$0xff]  }
 0xe38   : > { %6445 = vmatprep.subr.bf16.mxu0 %v14722_v6  ;;  %v14735_v6 = vld [vmem:[#allocation19 + $0x180] ss:$8 sps:$4 sm:$0xff]  }
 0xe3b   : > { %6446 = vmatpush2.bf16.msra.mxu0 %v14720_v7  ;;  %v14740_v7 = vld [vmem:[#allocation19 + $0x274] ss:$8 sps:$4 sm:$0xff]  }
 0xe3c   : > { %6447 = vmatprep.subr.bf16.mxu0 %v14728_v63  ;;  %v14786_v63 = vld [vmem:[#allocation22 + $0x70] ss:$8 sps:$4 sm:$0xff]  }
 0xe3f   : > { %6448 = vmatpush2.bf16.msra.mxu0 %v14726_v1  ;;  %v14788_v1 = vld [vmem:[#allocation22 + $0x74] ss:$8 sps:$4 sm:$0xff]  }
 0xe9c   : > { %v5721_v8 = vpop.f32.mrf.mxu1 }
 0xe9e   : > { %v5723_v9 = vpop.f32.mrf.mxu1 }
 0xea0   : > { %v5725_v10 = vpop.f32.mrf.mxu1 }
 0xea2   : > { %v5600_v11 = vpop.f32.mrf.mxu0  ;;  %v5726_v12 = vpop.f32.mrf.mxu1 }
 0xea3   : > { %v5722_v17 = vadd.f32 %v5721_v8, %v5600_v11 }
 0xea4   : > { %v5602_v13 = vpop.f32.mrf.mxu0 }
 0xea5   : > { %v5724_v22 = vadd.f32 %v5723_v9, %v5602_v13 }
 0xea6   : > { %v5604_v14 = vpop.f32.mrf.mxu0 }
 0xea8   : > { %v5605_v15 = vpop.f32.mrf.mxu0 }
 0xec2   : > { %v5862_v18 = vpop.f32.mrf.mxu0 }
 0xec3   : > { %v5869_v21 = vadd.f32 %v5862_v18, %v5722_v17 }
 0xec4   : > { %v5864_v25 = vpop.f32.mrf.mxu0 }
 0xec5   : > { %v5870_v29 = vadd.f32 %v5864_v25, %v5724_v22  ;;  %v5883_v30 = vadd.f32 %v5876_v19, %v5869_v21  ;;  %v14738_v25 = vld [vmem:[#allocation19 + $0x270] ss:$8 sps:$4 sm:$0xff]  }
 0xec6   : > { %v5866_v31 = vpop.f32.mrf.mxu0 }
 0xec7   : > { %v5884_v32 = vadd.f32 %v5880_v24, %v5870_v29  ;;  %v5885_v38 = vmax.f32 %v5883_v30, 0.0  ;;  %v14743_v30 = vld [vmem:[#allocation19 + $0x264] ss:$8 sps:$4 sm:$0xff]  }
 0xec8   : > { %v5867_v34 = vpop.f32.mrf.mxu0 }
 0xec9   : > { %v5886_v35 = vmax.f32 %v5884_v32, 0.0  ;;  %v14741_v32 = vld [vmem:[#allocation19 + $0x260] ss:$8 sps:$4 sm:$0xff]   ;;  %v14746_v34 = vld [vmem:[#allocation19 + $0x254] ss:$8 sps:$4 sm:$0xff]  }
 0xecb   : > { %5924 = vmatprep.subr.mxu1 %v5886_v35  ;;  %v14744_v35 = vld [vmem:[#allocation19 + $0x250] ss:$8 sps:$4 sm:$0xff]  }
 0xecc   : > { %5925 = vmatpush1.msra.mxu1 %v5885_v38  ;;  %v14747_v38 = vld [vmem:[#allocation19 + $0x240] ss:$8 sps:$4 sm:$0xff]  }
 0xecd   : > { %12840 = vmatmul.mubr.msk.f32.vlgmr.msra.gmra.mxu1 %vm5887_vm11, %v17416_v40  ;;  %6216 = vmatprep.subr.bf16.mxu1 %v14653_v37  ;;  %v14749_v37 = vld [vmem:[#allocation19 + $0x244] ss:$8 sps:$4 sm:$0xff]  }
 0xece   : > { %5964 = vmatprep.mubr.f32.mxu1 %v16428_v62  ;;  %6217 = vmatpush1.bf16.msra.mxu1 %v14651_v43  ;;  %v14752_v43 = vld [vmem:[#allocation19 + $0x234] ss:$8 sps:$4 sm:$0xff]  }
 0xecf   : > { %6218 = vmatprep.subr.bf16.mxu1 %v14659_v46  ;;  %v14750_v46 = vld [vmem:[#allocation19 + $0x230] ss:$8 sps:$4 sm:$0xff]  }
 0xed1   : > { %12841 = vmatmul.mubr.msk.f32.gmra.mxu1 %vm5887_vm11, %v17422_v45 }
 0xed2   : > { %6219 = vmatpush1.bf16.msra.mxu1 %v14657_v47  ;;  %v14755_v47 = vld [vmem:[#allocation19 + $0x224] ss:$8 sps:$4 sm:$0xff]  }
 0xed3   : > { %6220 = vmatprep.subr.bf16.mxu1 %v14665_v20  ;;  %v14753_v20 = vld [vmem:[#allocation19 + $0x220] ss:$8 sps:$4 sm:$0xff]  }
 0xed6   : > { %6221 = vmatpush1.bf16.msra.mxu1 %v14663_v48  ;;  %v14758_v48 = vld [vmem:[#allocation19 + $0x214] ss:$8 sps:$4 sm:$0xff]  }
 0xed7   : > { %6222 = vmatprep.subr.bf16.mxu1 %v14671_v23  ;;  %v14756_v23 = vld [vmem:[#allocation19 + $0x210] ss:$8 sps:$4 sm:$0xff]  }
 0xeda   : > { %6223 = vmatpush1.bf16.msra.mxu1 %v14669_v27  ;;  %v14761_v27 = vld [vmem:[#allocation19 + $0x204] ss:$8 sps:$4 sm:$0xff]  }
 0xedb   : > { %6224 = vmatprep.subr.bf16.mxu1 %v14677_v28  ;;  %v14759_v28 = vld [vmem:[#allocation19 + $0x200] ss:$8 sps:$4 sm:$0xff]  }
 0xede   : > { %6225 = vmatpush1.bf16.msra.mxu1 %v14675_v49  ;;  %v14764_v49 = vld [vmem:[#allocation19 + $0x2f4] ss:$8 sps:$4 sm:$0xff]  }
 0xedf   : > { %6226 = vmatprep.subr.bf16.mxu1 %v14683_v33  ;;  %v14762_v33 = vld [vmem:[#allocation19 + $0x2f0] ss:$8 sps:$4 sm:$0xff]  }
 0xee2   : > { %6227 = vmatpush1.bf16.msra.mxu1 %v14681_v36  ;;  %v14767_v36 = vld [vmem:[#allocation19 + $0x2e4] ss:$8 sps:$4 sm:$0xff]  }
 0xee3   : > { %6228 = vmatprep.subr.bf16.mxu1 %v14689_v50  ;;  %v14765_v50 = vld [vmem:[#allocation19 + $0x2e0] ss:$8 sps:$4 sm:$0xff]  }
 0xee6   : > { %6229 = vmatpush1.bf16.msra.mxu1 %v14687_v39  ;;  %v14770_v39 = vld [vmem:[#allocation19 + $0x2d4] ss:$8 sps:$4 sm:$0xff]  }
 0xee7   : > { %6230 = vmatprep.subr.bf16.mxu1 %v14695_v42  ;;  %v14768_v42 = vld [vmem:[#allocation19 + $0x2d0] ss:$8 sps:$4 sm:$0xff]  }
 0xeea   : > { %6231 = vmatpush1.bf16.msra.mxu1 %v14693_v51  ;;  %v14773_v51 = vld [vmem:[#allocation19 + $0x2c4] ss:$8 sps:$4 sm:$0xff]  }
 0xeeb   : > { %6232 = vmatprep.subr.bf16.mxu1 %v14701_v44  ;;  %v14771_v44 = vld [vmem:[#allocation19 + $0x2c0] ss:$8 sps:$4 sm:$0xff]  }
 0xeee   : > { %6233 = vmatpush2.bf16.msra.mxu1 %v14699_v53  ;;  %v14776_v53 = vld [vmem:[#allocation19 + $0x2b4] ss:$8 sps:$4 sm:$0xff]  }
 0xeef   : > { %6234 = vmatprep.subr.bf16.mxu1 %v14707_v54  ;;  %v14774_v54 = vld [vmem:[#allocation19 + $0x2b0] ss:$8 sps:$4 sm:$0xff]  }
 0xef2   : > { %6235 = vmatpush2.bf16.msra.mxu1 %v14705_v55  ;;  %v14779_v55 = vld [vmem:[#allocation19 + $0x2a4] ss:$8 sps:$4 sm:$0xff]  }
 0xef3   : > { %6236 = vmatprep.subr.bf16.mxu1 %v14713_v58  ;;  %v14777_v58 = vld [vmem:[#allocation19 + $0x2a0] ss:$8 sps:$4 sm:$0xff]  }
 0xef6   : > { %6237 = vmatpush2.bf16.msra.mxu1 %v14711_v41  ;;  %v14782_v41 = vld [vmem:[#allocation19 + $0x294] ss:$8 sps:$4 sm:$0xff]  }
 0xef7   : > { %6238 = vmatprep.subr.bf16.mxu1 %v14719_v59  ;;  %v14780_v59 = vld [vmem:[#allocation19 + $0x290] ss:$8 sps:$4 sm:$0xff]  }
 0xefa   : > { %6239 = vmatpush2.bf16.msra.mxu1 %v14717_v26  ;;  %v14785_v26 = vld [vmem:[#allocation19 + $0x284] ss:$8 sps:$4 sm:$0xff]  }
 0xefb   : > { %6240 = vmatprep.subr.bf16.mxu1 %v14725_v60  ;;  %v14783_v60 = vld [vmem:[#allocation19 + $0x280] ss:$8 sps:$4 sm:$0xff]  }
 0xefe   : > { %6241 = vmatpush2.bf16.msra.mxu1 %v14723_v61 }
 0xeff   : > { %6242 = vmatprep.subr.bf16.mxu1 %v14731_v57  ;;  %v14791_v57 = vld [vmem:[#allocation22 + $0x64] ss:$8 sps:$4 sm:$0xff]  }
 0xf02   : > { %6243 = vmatpush2.bf16.msra.mxu1 %v14729_v2  ;;  %v14789_v2 = vld [vmem:[#allocation22 + $0x60] ss:$8 sps:$4 sm:$0xff]  }
 0xf03   : > { %6244 = vmatprep.subr.bf16.mxu1 %v14734_v3  ;;  %v14794_v3 = vld [vmem:[#allocation22 + $0x54] ss:$8 sps:$4 sm:$0xff]  }
 0xf06   : > { %6245 = vmatpush2.bf16.msra.mxu1 %v14732_v4  ;;  %v14792_v4 = vld [vmem:[#allocation22 + $0x50] ss:$8 sps:$4 sm:$0xff]  }
 0xf07   : > { %6246 = vmatprep.subr.bf16.mxu1 %v14737_v5  ;;  %v14800_v5 = vld [vmem:[#allocation22 + $0x44] ss:$8 sps:$4 sm:$0xff]  }
 0xf0a   : > { %6247 = vmatpush2.bf16.msra.mxu1 %v14735_v6  ;;  %v14798_v6 = vld [vmem:[#allocation22 + $0x40] ss:$8 sps:$4 sm:$0xff]  }
 0xf0b   : > { %6657 = vmatprep.subr.bf16.mxu1 %v14740_v7  ;;  %v14806_v7 = vld [vmem:[#allocation22 + $0x34] ss:$8 sps:$4 sm:$0xff]  }
 0xf8d   : > { %v5960_v8 = vpop.f32.mrf.mxu1 }
 0xf8e   : > { %v5971_v11 = vpack.c.bf16 %v5960_v8, %v5960_v8 }
 0xf8f   : > { %v5962_v9 = vpop.f32.mrf.mxu1 }
 0xf90   : > { %v5972_v10 = vpack.c.bf16 %v5962_v9, %v5962_v9 }
 0xf91   : > { %v5966_v12 = vpop.f32.mrf.mxu1 }
 0xf92   : > { %v17426_v13 = vpack.c.bf16 %v5966_v12, %v5960_v8  ;;  %6449 = vmatprep.mubr.bf16.mxu0 %v5972_v10  ;;  %v14804_v8 = vld [vmem:[#allocation22 + $0x30] ss:$8 sps:$4 sm:$0xff]   ;;  %v14810_v10 = vld [vmem:[#allocation22 + $0x20] ss:$8 sps:$4 sm:$0xff]  }
 0xf93   : > { %v5968_v14 = vpop.f32.mrf.mxu1  ;;  %6450 = vmatmul.mubr.bf16.vlgmr.msra.gmra.mxu0 %v5971_v11  ;;  %v14818_v11 = vld [vmem:[#allocation22 + $0x14] ss:$8 sps:$4 sm:$0xff]   ;;  %v14816_v12 = vld [vmem:[#allocation22 + $0x10] ss:$8 sps:$4 sm:$0xff]  }
 0xf94   : > { %v6043_v15 = vshll.u32 %v17426_v13, 16  ;;  %v6006_v16 = vpack.c.bf16 %v5968_v14, %v5962_v9  ;;  %6780 = vmatprep.mubr.f32.mxu0 %v16428_v62  ;;  %v6041_v21 = vshrl.u32 %v17426_v13, 16  ;;  %v6493_v61 = vrot.slane %v17426_v13, 1  ;;  %v14812_v9 = vld [vmem:[#allocation22 + $0x24] ss:$8 sps:$4 sm:$0xff]  }
 0xf95   : > { %v14824_v13 = vld [vmem:[#allocation22 + $0x4] ss:$8 sps:$4 sm:$0xff]   ;;  %v14822_v14 = vld [vmem:[#allocation22] ss:$8 sps:$4 sm:$0xff]  }
 0xf96   : > { %v6050_v17 = vshll.u32 %v6006_v16, 16  ;;  %v6045_v18 = vrot.slane %v6043_v15, 1  ;;  %v6048_v19 = vshrl.u32 %v6006_v16, 16  ;;  %v6494_v31 = vrot.slane %v6006_v16, 1  ;;  %v14830_v15 = vld [vmem:[#allocation22 + $0xf4] ss:$8 sps:$4 sm:$0xff]  }
 0xf97   : > { %v14828_v16 = vld [vmem:[#allocation22 + $0xf0] ss:$8 sps:$4 sm:$0xff]  }
 0xf98   : > { %v6052_v22 = vrot.slane %v6050_v17, 1  ;;  %v6046_v29 = vor.u32 %v6045_v18, %v6041_v21  ;;  %v14836_v17 = vld [vmem:[#allocation22 + $0xe4] ss:$8 sps:$4 sm:$0xff]   ;;  %v14834_v18 = vld [vmem:[#allocation22 + $0xe0] ss:$8 sps:$4 sm:$0xff]  }
 0xf99   : > { %v14840_v21 = vld [vmem:[#allocation22 + $0xd0] ss:$8 sps:$4 sm:$0xff]  }
 0xf9a   : > { %v6053_v24 = vor.u32 %v6052_v22, %v6048_v19  ;;  %v14842_v19 = vld [vmem:[#allocation22 + $0xd4] ss:$8 sps:$4 sm:$0xff]  }
 0xf9c   : > { %6248 = vmatprep.mubr.bf16.mxu1 %v6053_v24  ;;  %v14848_v24 = vld [vmem:[#allocation22 + $0xc4] ss:$8 sps:$4 sm:$0xff]  }
 0xf9d   : > { %6249 = vmatmul.mubr.bf16.vlgmr.msra.gmra.mxu1 %v6046_v29 }
 0xf9e   : > { %6658 = vmatpush1.bf16.msra.mxu1 %v14738_v25  ;;  %6689 = vmatprep.mubr.bf16.mxu1 %v6494_v31  ;;  %v14854_v31 = vld [vmem:[#allocation22 + $0xb4] ss:$8 sps:$4 sm:$0xff]  }
 0xf9f   : > { %6659 = vmatprep.subr.bf16.mxu1 %v14743_v30  ;;  %v14846_v30 = vld [vmem:[#allocation22 + $0xc0] ss:$8 sps:$4 sm:$0xff]  }
 0xfa2   : > { %6660 = vmatpush1.bf16.msra.mxu1 %v14741_v32 }
 0xfa3   : > { %6661 = vmatprep.subr.bf16.mxu1 %v14746_v34  ;;  %v14852_v34 = vld [vmem:[#allocation22 + $0xb0] ss:$8 sps:$4 sm:$0xff]  }
 0xfa6   : > { %6662 = vmatpush1.bf16.msra.mxu1 %v14744_v35  ;;  %v14860_v35 = vld [vmem:[#allocation22 + $0xa4] ss:$8 sps:$4 sm:$0xff]  }
 0xfa7   : > { %6663 = vmatprep.subr.bf16.mxu1 %v14749_v37 }
 0xfaa   : > { %6664 = vmatpush1.bf16.msra.mxu1 %v14747_v38 }
 0xfab   : > { %6665 = vmatprep.subr.bf16.mxu1 %v14752_v43 }
 0xfae   : > { %6666 = vmatpush1.bf16.msra.mxu1 %v14750_v46  ;;  %v14858_v46 = vld [vmem:[#allocation22 + $0xa0] ss:$8 sps:$4 sm:$0xff]  }
 0xfaf   : > { %6667 = vmatprep.subr.bf16.mxu1 %v14755_v47  ;;  %v14866_v47 = vld [vmem:[#allocation22 + $0x94] ss:$8 sps:$4 sm:$0xff]  }
 0xfb2   : > { %6668 = vmatpush1.bf16.msra.mxu1 %v14753_v20 }
 0xfb3   : > { %6669 = vmatprep.subr.bf16.mxu1 %v14758_v48 }
 0xfb6   : > { %6670 = vmatpush1.bf16.msra.mxu1 %v14756_v23  ;;  %v14864_v23 = vld [vmem:[#allocation22 + $0x90] ss:$8 sps:$4 sm:$0xff]  }
 0xfb7   : > { %6671 = vmatprep.subr.bf16.mxu1 %v14761_v27  ;;  %v6700_v27 = vld [vmem:[#allocation21] sm:$0x3] }
 0xfba   : > { %6672 = vmatpush1.bf16.msra.mxu1 %v14759_v28 }
 0xfbb   : > { %6673 = vmatprep.subr.bf16.mxu1 %v14764_v49  ;;  %v6705_v49 = vrot.slane %v6700_v27, %v17108_v52 }
 0xfbe   : > { %6674 = vmatpush2.bf16.msra.mxu1 %v14762_v33 }
 0xfbf   : > { %6675 = vmatprep.subr.bf16.mxu1 %v14767_v36 }
 0xfc2   : > { %6676 = vmatpush2.bf16.msra.mxu1 %v14765_v50  ;;  %v6709_v50 = vrot.slane %v6700_v27, %v17110_v56 }
 0xfc3   : > { %6677 = vmatprep.subr.bf16.mxu1 %v14770_v39 }
 0xfc6   : > { %6678 = vmatpush2.bf16.msra.mxu1 %v14768_v42 }
 0xfc7   : > { %6679 = vmatprep.subr.bf16.mxu1 %v14773_v51 }
 0xfca   : > { %6680 = vmatpush2.bf16.msra.mxu1 %v14771_v44 }
 0xfcb   : > { %6681 = vmatprep.subr.bf16.mxu1 %v14776_v53 }
 0xfce   : > { %6682 = vmatpush2.bf16.msra.mxu1 %v14774_v54 }
 0xfcf   : > { %6683 = vmatprep.subr.bf16.mxu1 %v14779_v55 }
 0xfd2   : > { %6684 = vmatpush2.bf16.msra.mxu1 %v14777_v58  ;;  %v14797_v58 = vld [vmem:[#allocation22 + $0x174] ss:$8 sps:$4 sm:$0xff]  }
 0xfd3   : > { %6685 = vmatprep.subr.bf16.mxu1 %v14782_v41 }
 0xfd6   : > { %6686 = vmatpush2.bf16.msra.mxu1 %v14780_v59  ;;  %v14795_v59 = vld [vmem:[#allocation22 + $0x170] ss:$8 sps:$4 sm:$0xff]  }
 0xfd7   : > { %6687 = vmatprep.subr.bf16.mxu1 %v14785_v26  ;;  %v14803_v26 = vld [vmem:[#allocation22 + $0x164] ss:$8 sps:$4 sm:$0xff]  }
 0xfda   : > { %6688 = vmatpush2.bf16.msra.mxu1 %v14783_v60  ;;  %v14801_v60 = vld [vmem:[#allocation22 + $0x160] ss:$8 sps:$4 sm:$0xff]  }
 0xfdb   : > { %7239 = vmatprep.subr.bf16.mxu1 %v14788_v1  ;;  %v14815_v1 = vld [vmem:[#allocation22 + $0x144] ss:$8 sps:$4 sm:$0xff]  }
 0xfdd   : > { %6690 = vmatmul.mubr.bf16.vlgmr.msra.gmra.mxu1 %v6493_v61  ;;  %v14809_v61 = vld [vmem:[#allocation22 + $0x154] ss:$8 sps:$4 sm:$0xff]  }
 0xfde   : > { %7240 = vmatpush1.bf16.msra.mxu1 %v14786_v63  ;;  %v14807_v63 = vld [vmem:[#allocation22 + $0x150] ss:$8 sps:$4 sm:$0xff]  }
 0xfdf   : > { %7241 = vmatprep.subr.bf16.mxu1 %v14791_v57  ;;  %v14813_v57 = vld [vmem:[#allocation22 + $0x140] ss:$8 sps:$4 sm:$0xff]  }
 0xfe2   : > { %7242 = vmatpush1.bf16.msra.mxu1 %v14789_v2  ;;  %v14821_v2 = vld [vmem:[#allocation22 + $0x134] ss:$8 sps:$4 sm:$0xff]  }
 0xfe3   : > { %7243 = vmatprep.subr.bf16.mxu1 %v14794_v3  ;;  %v14819_v3 = vld [vmem:[#allocation22 + $0x130] ss:$8 sps:$4 sm:$0xff]  }
 0xfe6   : > { %7244 = vmatpush1.bf16.msra.mxu1 %v14792_v4  ;;  %v14827_v4 = vld [vmem:[#allocation22 + $0x124] ss:$8 sps:$4 sm:$0xff]  }
 0xfe7   : > { %7245 = vmatprep.subr.bf16.mxu1 %v14800_v5  ;;  %v14825_v5 = vld [vmem:[#allocation22 + $0x120] ss:$8 sps:$4 sm:$0xff]  }
 0xfea   : > { %7246 = vmatpush1.bf16.msra.mxu1 %v14798_v6  ;;  %v14833_v6 = vld [vmem:[#allocation22 + $0x114] ss:$8 sps:$4 sm:$0xff]  }
 0xfeb   : > { %7247 = vmatprep.subr.bf16.mxu1 %v14806_v7  ;;  %v14831_v7 = vld [vmem:[#allocation22 + $0x110] ss:$8 sps:$4 sm:$0xff]  }
 0xfee   : > { %7248 = vmatpush1.bf16.msra.mxu1 %v14804_v8  ;;  %v14839_v8 = vld [vmem:[#allocation22 + $0x104] ss:$8 sps:$4 sm:$0xff]  }
 0xfef   : > { %7249 = vmatprep.subr.bf16.mxu1 %v14812_v9  ;;  %v14837_v9 = vld [vmem:[#allocation22 + $0x100] ss:$8 sps:$4 sm:$0xff]  }
 0xff2   : > { %7250 = vmatpush1.bf16.msra.mxu1 %v14810_v10  ;;  %v14845_v10 = vld [vmem:[#allocation22 + $0x1f4] ss:$8 sps:$4 sm:$0xff]  }
 0xff3   : > { %7251 = vmatprep.subr.bf16.mxu1 %v14818_v11  ;;  %v14843_v11 = vld [vmem:[#allocation22 + $0x1f0] ss:$8 sps:$4 sm:$0xff]  }
 0xff6   : > { %7252 = vmatpush1.bf16.msra.mxu1 %v14816_v12  ;;  %v14851_v12 = vld [vmem:[#allocation22 + $0x1e4] ss:$8 sps:$4 sm:$0xff]  }
 0xff7   : > { %7253 = vmatprep.subr.bf16.mxu1 %v14824_v13  ;;  %v14849_v13 = vld [vmem:[#allocation22 + $0x1e0] ss:$8 sps:$4 sm:$0xff]  }
 0xffa   : > { %7254 = vmatpush1.bf16.msra.mxu1 %v14822_v14  ;;  %v14857_v14 = vld [vmem:[#allocation22 + $0x1d4] ss:$8 sps:$4 sm:$0xff]  }
 0xffb   : > { %7255 = vmatprep.subr.bf16.mxu1 %v14830_v15  ;;  %v14855_v15 = vld [vmem:[#allocation22 + $0x1d0] ss:$8 sps:$4 sm:$0xff]  }
 0xffe   : > { %7256 = vmatpush2.bf16.msra.mxu1 %v14828_v16  ;;  %v14863_v16 = vld [vmem:[#allocation22 + $0x1c4] ss:$8 sps:$4 sm:$0xff]  }
 0xfff   : > { %7257 = vmatprep.subr.bf16.mxu1 %v14836_v17  ;;  %v14861_v17 = vld [vmem:[#allocation22 + $0x1c0] ss:$8 sps:$4 sm:$0xff]  }
0x1002   : > { %7258 = vmatpush2.bf16.msra.mxu1 %v14834_v18  ;;  %v14869_v18 = vld [vmem:[#allocation22 + $0x1b4] ss:$8 sps:$4 sm:$0xff]  }
0x1003   : > { %7259 = vmatprep.subr.bf16.mxu1 %v14842_v19  ;;  %v14867_v19 = vld [vmem:[#allocation22 + $0x1b0] ss:$8 sps:$4 sm:$0xff]  }
0x1006   : > { %7260 = vmatpush2.bf16.msra.mxu1 %v14840_v21  ;;  %v14870_v21 = vld [vmem:[#allocation22 + $0x80] ss:$8 sps:$4 sm:$0xff]  }
0x1007   : > { %7261 = vmatprep.subr.bf16.mxu1 %v14848_v24  ;;  %v14875_v24 = vld [vmem:[#allocation22 + $0x1a4] ss:$8 sps:$4 sm:$0xff]  }
0x100a   : > { %7262 = vmatpush2.bf16.msra.mxu1 %v14846_v30  ;;  %v14876_v30 = vld [vmem:[#allocation22 + $0x190] ss:$8 sps:$4 sm:$0xff]  }
0x100b   : > { %7263 = vmatprep.subr.bf16.mxu1 %v14854_v31  ;;  %v14881_v31 = vld [vmem:[#allocation22 + $0x184] ss:$8 sps:$4 sm:$0xff]  }
0x100e   : > { %7264 = vmatpush2.bf16.msra.mxu1 %v14852_v34  ;;  %v14884_v34 = vld [vmem:[#allocation22 + $0x274] ss:$8 sps:$4 sm:$0xff]  }
0x100f   : > { %7265 = vmatprep.subr.bf16.mxu1 %v14860_v35 }
0x1012   : > { %7266 = vmatpush2.bf16.msra.mxu1 %v14858_v46 }
0x1013   : > { %7267 = vmatprep.subr.bf16.mxu1 %v14866_v47 }
0x1016   : > { %7268 = vmatpush2.bf16.msra.mxu1 %v14864_v23 }
0x1053   : > { %v6451_v22 = vpop.f32.mrf.mxu0 }
0x1055   : > { %v6453_v25 = vpop.f32.mrf.mxu0 }
0x1057   : > { %v6455_v29 = vpop.f32.mrf.mxu0 }
0x1058   : > { %v14878_v29 = vld [vmem:[#allocation22 + $0x194] ss:$8 sps:$4 sm:$0xff]  }
0x1059   : > { %v6456_v32 = vpop.f32.mrf.mxu0 }
0x105a   : > { %v14879_v32 = vld [vmem:[#allocation22 + $0x180] ss:$8 sps:$4 sm:$0xff]  }
0x105d   : > { %v6250_v37 = vpop.f32.mrf.mxu1 }
0x105e   : > { %v6452_v38 = vadd.f32 %v6451_v22, %v6250_v37  ;;  %v14872_v22 = vld [vmem:[#allocation22 + $0x84] ss:$8 sps:$4 sm:$0xff]  }
0x105f   : > { %v6252_v43 = vpop.f32.mrf.mxu1  ;;  %7269 = vmatprep.subr.bf16.mxu1 %v14872_v22 }
0x1060   : > { %v6454_v33 = vadd.f32 %v6453_v25, %v6252_v43  ;;  %v14873_v25 = vld [vmem:[#allocation22 + $0x1a0] ss:$8 sps:$4 sm:$0xff]   ;;  %7270 = vmatpush2.bf16.msra.mxu1 %v14870_v21 }
0x1061   : > { %v6254_v20 = vpop.f32.mrf.mxu1 }
0x1063   : > { %v6255_v48 = vpop.f32.mrf.mxu1 }
0x109d   : > { %v6691_v28 = vpop.f32.mrf.mxu1 }
0x109e   : > { %v6698_v36 = vadd.f32 %v6691_v28, %v6452_v38 }
0x109f   : > { %v6693_v39 = vpop.f32.mrf.mxu1 }
0x10a0   : > { %v6699_v42 = vadd.f32 %v6693_v39, %v6454_v33  ;;  %v6712_v51 = vadd.f32 %v6705_v49, %v6698_v36  ;;  %v14882_v39 = vld [vmem:[#allocation22 + $0x270] ss:$8 sps:$4 sm:$0xff]  }
0x10a1   : > { %v6695_v44 = vpop.f32.mrf.mxu1 }
0x10a2   : > { %v6713_v53 = vadd.f32 %v6709_v50, %v6699_v42  ;;  %v6714_v41 = vmax.f32 %v6712_v51, 0.0  ;;  %v14887_v51 = vld [vmem:[#allocation22 + $0x264] ss:$8 sps:$4 sm:$0xff]  }
0x10a3   : > { %v6696_v54 = vpop.f32.mrf.mxu1 }
0x10a4   : > { %v6715_v55 = vmax.f32 %v6713_v53, 0.0  ;;  %v14885_v53 = vld [vmem:[#allocation22 + $0x260] ss:$8 sps:$4 sm:$0xff]   ;;  %v14890_v54 = vld [vmem:[#allocation22 + $0x254] ss:$8 sps:$4 sm:$0xff]  }
0x10a6   : > { %6746 = vmatprep.subr.mxu0 %v6715_v55  ;;  %v14888_v55 = vld [vmem:[#allocation22 + $0x250] ss:$8 sps:$4 sm:$0xff]  }
0x10a7   : > { %6747 = vmatpush1.msra.mxu0 %v6714_v41  ;;  %v14891_v41 = vld [vmem:[#allocation22 + $0x240] ss:$8 sps:$4 sm:$0xff]  }
0x10a8   : > { %12938 = vmatmul.mubr.msk.f32.vlgmr.msra.gmra.mxu0 %vm5887_vm11, %v17416_v40  ;;  %7038 = vmatprep.subr.bf16.mxu0 %v14797_v58  ;;  %v14893_v58 = vld [vmem:[#allocation22 + $0x244] ss:$8 sps:$4 sm:$0xff]  }
0x10a9   : > { %6786 = vmatprep.mubr.f32.mxu0 %v16428_v62  ;;  %7039 = vmatpush1.bf16.msra.mxu0 %v14795_v59  ;;  %v14896_v59 = vld [vmem:[#allocation22 + $0x234] ss:$8 sps:$4 sm:$0xff]  }
0x10aa   : > { %7040 = vmatprep.subr.bf16.mxu0 %v14803_v26  ;;  %v14894_v26 = vld [vmem:[#allocation22 + $0x230] ss:$8 sps:$4 sm:$0xff]  }
0x10ac   : > { %12939 = vmatmul.mubr.msk.f32.gmra.mxu0 %vm5887_vm11, %v17422_v45 }
0x10ad   : > { %7041 = vmatpush1.bf16.msra.mxu0 %v14801_v60  ;;  %v14899_v60 = vld [vmem:[#allocation22 + $0x224] ss:$8 sps:$4 sm:$0xff]  }
0x10ae   : > { %7042 = vmatprep.subr.bf16.mxu0 %v14809_v61  ;;  %v14897_v61 = vld [vmem:[#allocation22 + $0x220] ss:$8 sps:$4 sm:$0xff]  }
0x10b1   : > { %7043 = vmatpush1.bf16.msra.mxu0 %v14807_v63  ;;  %v14902_v63 = vld [vmem:[#allocation22 + $0x214] ss:$8 sps:$4 sm:$0xff]  }
0x10b2   : > { %7044 = vmatprep.subr.bf16.mxu0 %v14815_v1  ;;  %v14900_v1 = vld [vmem:[#allocation22 + $0x210] ss:$8 sps:$4 sm:$0xff]  }
0x10b5   : > { %7045 = vmatpush1.bf16.msra.mxu0 %v14813_v57  ;;  %v14905_v57 = vld [vmem:[#allocation22 + $0x204] ss:$8 sps:$4 sm:$0xff]  }
0x10b6   : > { %7046 = vmatprep.subr.bf16.mxu0 %v14821_v2  ;;  %v14903_v2 = vld [vmem:[#allocation22 + $0x200] ss:$8 sps:$4 sm:$0xff]  }
0x10b9   : > { %7047 = vmatpush1.bf16.msra.mxu0 %v14819_v3  ;;  %v14908_v3 = vld [vmem:[#allocation22 + $0x2f4] ss:$8 sps:$4 sm:$0xff]  }
0x10ba   : > { %7048 = vmatprep.subr.bf16.mxu0 %v14827_v4  ;;  %v14906_v4 = vld [vmem:[#allocation22 + $0x2f0] ss:$8 sps:$4 sm:$0xff]  }
0x10bd   : > { %7049 = vmatpush1.bf16.msra.mxu0 %v14825_v5  ;;  %v14911_v5 = vld [vmem:[#allocation22 + $0x2e4] ss:$8 sps:$4 sm:$0xff]  }
0x10be   : > { %7050 = vmatprep.subr.bf16.mxu0 %v14833_v6  ;;  %v14909_v6 = vld [vmem:[#allocation22 + $0x2e0] ss:$8 sps:$4 sm:$0xff]  }
0x10c1   : > { %7051 = vmatpush1.bf16.msra.mxu0 %v14831_v7  ;;  %v14914_v7 = vld [vmem:[#allocation22 + $0x2d4] ss:$8 sps:$4 sm:$0xff]  }
0x10c2   : > { %7052 = vmatprep.subr.bf16.mxu0 %v14839_v8  ;;  %v14912_v8 = vld [vmem:[#allocation22 + $0x2d0] ss:$8 sps:$4 sm:$0xff]  }
0x10c5   : > { %7053 = vmatpush1.bf16.msra.mxu0 %v14837_v9  ;;  %v14917_v9 = vld [vmem:[#allocation22 + $0x2c4] ss:$8 sps:$4 sm:$0xff]  }
0x10c6   : > { %7054 = vmatprep.subr.bf16.mxu0 %v14845_v10  ;;  %v14915_v10 = vld [vmem:[#allocation22 + $0x2c0] ss:$8 sps:$4 sm:$0xff]  }
0x10c9   : > { %7055 = vmatpush2.bf16.msra.mxu0 %v14843_v11  ;;  %v14920_v11 = vld [vmem:[#allocation22 + $0x2b4] ss:$8 sps:$4 sm:$0xff]  }
0x10ca   : > { %7056 = vmatprep.subr.bf16.mxu0 %v14851_v12  ;;  %v14918_v12 = vld [vmem:[#allocation22 + $0x2b0] ss:$8 sps:$4 sm:$0xff]  }
0x10cd   : > { %7057 = vmatpush2.bf16.msra.mxu0 %v14849_v13  ;;  %v14923_v13 = vld [vmem:[#allocation22 + $0x2a4] ss:$8 sps:$4 sm:$0xff]  }
0x10ce   : > { %7058 = vmatprep.subr.bf16.mxu0 %v14857_v14  ;;  %v14921_v14 = vld [vmem:[#allocation22 + $0x2a0] ss:$8 sps:$4 sm:$0xff]  }
0x10d1   : > { %7059 = vmatpush2.bf16.msra.mxu0 %v14855_v15  ;;  %v14926_v15 = vld [vmem:[#allocation22 + $0x294] ss:$8 sps:$4 sm:$0xff]  }
0x10d2   : > { %7060 = vmatprep.subr.bf16.mxu0 %v14863_v16  ;;  %v14924_v16 = vld [vmem:[#allocation22 + $0x290] ss:$8 sps:$4 sm:$0xff]  }
0x10d5   : > { %7061 = vmatpush2.bf16.msra.mxu0 %v14861_v17  ;;  %v14929_v17 = vld [vmem:[#allocation22 + $0x284] ss:$8 sps:$4 sm:$0xff]  }
0x10d6   : > { %7062 = vmatprep.subr.bf16.mxu0 %v14869_v18  ;;  %v14927_v18 = vld [vmem:[#allocation22 + $0x280] ss:$8 sps:$4 sm:$0xff]  }
0x10d9   : > { %7063 = vmatpush2.bf16.msra.mxu0 %v14867_v19 }
0x10da   : > { %7064 = vmatprep.subr.bf16.mxu0 %v14875_v24 }
0x10dd   : > { %7065 = vmatpush2.bf16.msra.mxu0 %v14873_v25 }
0x10de   : > { %7066 = vmatprep.subr.bf16.mxu0 %v14878_v29 }
0x10e1   : > { %7067 = vmatpush2.bf16.msra.mxu0 %v14876_v30 }
0x10e2   : > { %7068 = vmatprep.subr.bf16.mxu0 %v14881_v31 }
0x10e5   : > { %7069 = vmatpush2.bf16.msra.mxu0 %v14879_v32 }
0x10e6   : > { %7479 = vmatprep.subr.bf16.mxu0 %v14884_v34 }
0x1168   : > { %v6782_v35 = vpop.f32.mrf.mxu0 }
0x1169   : > { %v6793_v43 = vpack.c.bf16 %v6782_v35, %v6782_v35 }
0x116a   : > { %v6784_v37 = vpop.f32.mrf.mxu0 }
0x116b   : > { %v6794_v38 = vpack.c.bf16 %v6784_v37, %v6784_v37 }
0x116c   : > { %v6788_v46 = vpop.f32.mrf.mxu0 }
0x116d   : > { %v17439_v47 = vpack.c.bf16 %v6788_v46, %v6782_v35  ;;  %7271 = vmatprep.mubr.bf16.mxu1 %v6794_v38  ;;  %v7522_v35 = vld [vmem:[#allocation24] sm:$0x3] }
0x116e   : > { %v6790_v20 = vpop.f32.mrf.mxu0  ;;  %7272 = vmatmul.mubr.bf16.vlgmr.msra.gmra.mxu1 %v6793_v43  ;;  %v7527_v38 = vrot.slane %v7522_v35, %v17108_v52 }
0x116f   : > { %v6865_v48 = vshll.u32 %v17439_v47, 16  ;;  %v6828_v23 = vpack.c.bf16 %v6790_v20, %v6784_v37  ;;  %7602 = vmatprep.mubr.f32.mxu1 %v16428_v62  ;;  %v6863_v36 = vshrl.u32 %v17439_v47, 16  ;;  %v7315_v19 = vrot.slane %v17439_v47, 1 }
0x1170   : > { %v7531_v47 = vrot.slane %v7522_v35, %v17110_v56  ;;  %v14944_v35 = vld [vmem:[#allocation28 + $0x154] ss:$8 sps:$4 sm:$0xff]  }
0x1171   : > { %v6872_v27 = vshll.u32 %v6828_v23, 16  ;;  %v6867_v28 = vrot.slane %v6865_v48, 1  ;;  %v6870_v49 = vshrl.u32 %v6828_v23, 16  ;;  %v7316_v44 = vrot.slane %v6828_v23, 1 }
0x1173   : > { %v6874_v33 = vrot.slane %v6872_v27, 1  ;;  %v6868_v42 = vor.u32 %v6867_v28, %v6863_v36 }
0x1175   : > { %v6875_v50 = vor.u32 %v6874_v33, %v6870_v49 }
0x1177   : > { %7070 = vmatprep.mubr.bf16.mxu0 %v6875_v50  ;;  %v7652_v50 = vld [vmem:[#allocation25 + $0x78] sm:$0xff] }
0x1178   : > { %7071 = vmatmul.mubr.bf16.vlgmr.msra.gmra.mxu0 %v6868_v42  ;;  %v7650_v42 = vld [vmem:[#allocation25 + $0x68] sm:$0xff] }
0x1179   : > { %7480 = vmatpush1.bf16.msra.mxu0 %v14882_v39  ;;  %7511 = vmatprep.mubr.bf16.mxu0 %v7316_v44  ;;  %v7651_v39 = vld [vmem:[#allocation25 + $0x70] sm:$0xff] }
0x117a   : > { %7481 = vmatprep.subr.bf16.mxu0 %v14887_v51  ;;  %v7649_v51 = vld [vmem:[#allocation25 + $0x60] sm:$0xff]  ;;  %v7647_v44 = vld [vmem:[#allocation25 + $0x50] sm:$0xff] }
0x117d   : > { %7482 = vmatpush1.bf16.msra.mxu0 %v14885_v53  ;;  %v7645_v53 = vld [vmem:[#allocation25 + $0x40] sm:$0xff] }
0x117e   : > { %7483 = vmatprep.subr.bf16.mxu0 %v14890_v54  ;;  %v7644_v54 = vld [vmem:[#allocation25 + $0x38] sm:$0xff] }
0x1181   : > { %7484 = vmatpush1.bf16.msra.mxu0 %v14888_v55  ;;  %v7643_v55 = vld [vmem:[#allocation25 + $0x30] sm:$0xff] }
0x1182   : > { %7485 = vmatprep.subr.bf16.mxu0 %v14893_v58  ;;  %v7642_v58 = vld [vmem:[#allocation25 + $0x28] sm:$0xff] }
0x1185   : > { %7486 = vmatpush1.bf16.msra.mxu0 %v14891_v41  ;;  %v7641_v41 = vld [vmem:[#allocation25 + $0x20] sm:$0xff] }
0x1186   : > { %7487 = vmatprep.subr.bf16.mxu0 %v14896_v59  ;;  %v7640_v59 = vld [vmem:[#allocation25 + $0x18] sm:$0xff] }
0x1189   : > { %7488 = vmatpush1.bf16.msra.mxu0 %v14894_v26  ;;  %v7639_v26 = vld [vmem:[#allocation25 + $0x10] sm:$0xff] }
0x118a   : > { %7489 = vmatprep.subr.bf16.mxu0 %v14899_v60  ;;  %v7638_v60 = vld [vmem:[#allocation25 + $0x8] sm:$0xff] }
0x118d   : > { %7490 = vmatpush1.bf16.msra.mxu0 %v14897_v61  ;;  %v7637_v61 = vld [vmem:[#allocation25] sm:$0xff] }
0x118e   : > { %7491 = vmatprep.subr.bf16.mxu0 %v14902_v63  ;;  %v7664_v63 = vld [vmem:[#allocation25 + $0xd8] sm:$0xff] }
0x1191   : > { %7492 = vmatpush1.bf16.msra.mxu0 %v14900_v1  ;;  %v7663_v1 = vld [vmem:[#allocation25 + $0xd0] sm:$0xff] }
0x1192   : > { %7493 = vmatprep.subr.bf16.mxu0 %v14905_v57  ;;  %v7662_v57 = vld [vmem:[#allocation25 + $0xc8] sm:$0xff] }
0x1195   : > { %7494 = vmatpush1.bf16.msra.mxu0 %v14903_v2  ;;  %v7661_v2 = vld [vmem:[#allocation25 + $0xc0] sm:$0xff] }
0x1196   : > { %7495 = vmatprep.subr.bf16.mxu0 %v14908_v3  ;;  %v7660_v3 = vld [vmem:[#allocation25 + $0xb8] sm:$0xff] }
0x1199   : > { %7496 = vmatpush2.bf16.msra.mxu0 %v14906_v4  ;;  %v7659_v4 = vld [vmem:[#allocation25 + $0xb0] sm:$0xff] }
0x119a   : > { %7497 = vmatprep.subr.bf16.mxu0 %v14911_v5  ;;  %v7658_v5 = vld [vmem:[#allocation25 + $0xa8] sm:$0xff] }
0x119d   : > { %7498 = vmatpush2.bf16.msra.mxu0 %v14909_v6  ;;  %v7657_v6 = vld [vmem:[#allocation25 + $0xa0] sm:$0xff] }
0x119e   : > { %7499 = vmatprep.subr.bf16.mxu0 %v14914_v7  ;;  %v7656_v7 = vld [vmem:[#allocation25 + $0x98] sm:$0xff] }
0x11a1   : > { %7500 = vmatpush2.bf16.msra.mxu0 %v14912_v8  ;;  %v7655_v8 = vld [vmem:[#allocation25 + $0x90] sm:$0xff] }
0x11a2   : > { %7501 = vmatprep.subr.bf16.mxu0 %v14917_v9  ;;  %v7654_v9 = vld [vmem:[#allocation25 + $0x88] sm:$0xff] }
0x11a5   : > { %7502 = vmatpush2.bf16.msra.mxu0 %v14915_v10  ;;  %v7653_v10 = vld [vmem:[#allocation25 + $0x80] sm:$0xff] }
0x11a6   : > { %7503 = vmatprep.subr.bf16.mxu0 %v14920_v11 }
0x11a9   : > { %7504 = vmatpush2.bf16.msra.mxu0 %v14918_v12 }
0x11aa   : > { %7505 = vmatprep.subr.bf16.mxu0 %v14923_v13 }
0x11ad   : > { %7506 = vmatpush2.bf16.msra.mxu0 %v14921_v14 }
0x11ae   : > { %7507 = vmatprep.subr.bf16.mxu0 %v14926_v15 }
0x11b1   : > { %7508 = vmatpush2.bf16.msra.mxu0 %v14924_v16 }
0x11b2   : > { %7509 = vmatprep.subr.bf16.mxu0 %v14929_v17 }
0x11b5   : > { %7510 = vmatpush2.bf16.msra.mxu0 %v14927_v18 }
0x11b6   : > { %13550 = vmatprep.subr.mxu0 %v16428_v62 }
0x11b8   : > { %7512 = vmatmul.mubr.bf16.vlgmr.msra.gmra.mxu0 %v7315_v19 }
0x11b9   : > { %13554 = vmatprep.mubr.msk.f32.mxu0 %vm16430_vm5, %v16428_v62 }
0x122e   : > { %v7273_v22 = vpop.f32.mrf.mxu1 }
0x1230   : > { %v7275_v21 = vpop.f32.mrf.mxu1 }
0x1232   : > { %v7277_v24 = vpop.f32.mrf.mxu1 }
0x1234   : > { %v7278_v25 = vpop.f32.mrf.mxu1 }
0x1238   : > { %v7072_v29 = vpop.f32.mrf.mxu0 }
0x1239   : > { %v7274_v30 = vadd.f32 %v7273_v22, %v7072_v29 }
0x123a   : > { %v7074_v31 = vpop.f32.mrf.mxu0 }
0x123b   : > { %v7276_v43 = vadd.f32 %v7275_v21, %v7074_v31  ;;  %v14932_v31 = vld [vmem:[#allocation28 + $0x174] ss:$8 sps:$4 sm:$0xff]  }
0x123c   : > { %v7076_v32 = vpop.f32.mrf.mxu0 }
0x123d   : > { %v14938_v32 = vld [vmem:[#allocation28 + $0x164] ss:$8 sps:$4 sm:$0xff]  }
0x123e   : > { %v7077_v34 = vpop.f32.mrf.mxu0 }
0x123f   : > { %v14936_v34 = vld [vmem:[#allocation28 + $0x160] ss:$8 sps:$4 sm:$0xff]  }
0x1278   : > { %v7513_v37 = vpop.f32.mrf.mxu0 }
0x1279   : > { %v7520_v46 = vadd.f32 %v7513_v37, %v7274_v30  ;;  %v14930_v30 = vld [vmem:[#allocation28 + $0x170] ss:$8 sps:$4 sm:$0xff]  }
0x127a   : > { %v7515_v20 = vpop.f32.mrf.mxu0  ;;  %v14942_v37 = vld [vmem:[#allocation28 + $0x150] ss:$8 sps:$4 sm:$0xff]  }
0x127b   : > { %v7521_v48 = vadd.f32 %v7515_v20, %v7276_v43  ;;  %v7534_v23 = vadd.f32 %v7527_v38, %v7520_v46  ;;  %v14950_v38 = vld [vmem:[#allocation28 + $0x144] ss:$8 sps:$4 sm:$0xff]   ;;  %v14948_v43 = vld [vmem:[#allocation28 + $0x140] ss:$8 sps:$4 sm:$0xff]   ;;  %v14956_v46 = vld [vmem:[#allocation28 + $0x134] ss:$8 sps:$4 sm:$0xff]  }
0x127c   : > { %v7517_v27 = vpop.f32.mrf.mxu0  ;;  %v14962_v20 = vld [vmem:[#allocation28 + $0x124] ss:$8 sps:$4 sm:$0xff]  }
0x127d   : > { %v7535_v28 = vadd.f32 %v7531_v47, %v7521_v48  ;;  %v7536_v36 = vmax.f32 %v7534_v23, 0.0  ;;  %v14954_v47 = vld [vmem:[#allocation28 + $0x130] ss:$8 sps:$4 sm:$0xff]   ;;  %v14960_v48 = vld [vmem:[#allocation28 + $0x120] ss:$8 sps:$4 sm:$0xff]  }
0x127e   : > { %v7518_v49 = vpop.f32.mrf.mxu0  ;;  %v14968_v23 = vld [vmem:[#allocation28 + $0x114] ss:$8 sps:$4 sm:$0xff]   ;;  %v14966_v27 = vld [vmem:[#allocation28 + $0x110] ss:$8 sps:$4 sm:$0xff]  }
0x127f   : > { %v7537_v33 = vmax.f32 %v7535_v28, 0.0 }
0x1281   : > { %7568 = vmatprep.subr.mxu1 %v7537_v33 }
0x1282   : > { %7569 = vmatpush1.msra.mxu1 %v7536_v36 }
0x1283   : > { %13036 = vmatmul.mubr.msk.f32.vlgmr.msra.gmra.mxu1 %vm5887_vm11, %v17416_v40  ;;  %7671 = vmatprep.subr.mxu1 %v16428_v62  ;;  %v7648_v40 = vld [vmem:[#allocation25 + $0x58] sm:$0xff] }
0x1284   : > { %7608 = vmatprep.mubr.f32.mxu1 %v16428_v62  ;;  %7672 = vmatpush1.msra.mxu1 %v7652_v50 }
0x1285   : > { %7673 = vmatprep.subr.mxu1 %v16428_v62 }
0x1286   : > { %7674 = vmatpush1.msra.mxu1 %v7651_v39 }
0x1287   : > { %13037 = vmatmul.mubr.msk.f32.gmra.mxu1 %vm5887_vm11, %v17422_v45  ;;  %7675 = vmatprep.subr.mxu1 %v16428_v62  ;;  %v7646_v45 = vld [vmem:[#allocation25 + $0x48] sm:$0xff] }
0x1288   : > { %7676 = vmatpush1.msra.mxu1 %v7650_v42 }
0x1289   : > { %7677 = vmatprep.subr.mxu1 %v16428_v62 }
0x128a   : > { %7678 = vmatpush1.msra.mxu1 %v7649_v51 }
0x128b   : > { %7679 = vmatprep.subr.mxu1 %v16428_v62 }
0x128c   : > { %7680 = vmatpush1.msra.mxu1 %v7648_v40 }
0x128d   : > { %7681 = vmatprep.subr.mxu1 %v16428_v62 }
0x128e   : > { %7682 = vmatpush1.msra.mxu1 %v7647_v44  ;;  %v14935_v44 = vld [vmem:[#allocation28 + $0xf4] ss:$8 sps:$4 sm:$0xff]  }
0x128f   : > { %7683 = vmatprep.subr.mxu1 %v16428_v62 }
0x1290   : > { %7684 = vmatpush1.msra.mxu1 %v7646_v45  ;;  %v7755_v45 = vld [vmem:[#allocation27] sm:$0x3f] }
0x1291   : > { %7685 = vmatprep.subr.mxu1 %v16428_v62 }
0x1292   : > { %7686 = vmatpush1.msra.mxu1 %v7645_v53  ;;  %v14933_v53 = vld [vmem:[#allocation28 + $0xf0] ss:$8 sps:$4 sm:$0xff]  }
0x1293   : > { %7687 = vmatprep.subr.mxu1 %v16428_v62 }
0x1294   : > { %7688 = vmatpush1.msra.mxu1 %v7644_v54  ;;  %v14941_v54 = vld [vmem:[#allocation28 + $0xe4] ss:$8 sps:$4 sm:$0xff]  }
0x1295   : > { %7689 = vmatprep.subr.mxu1 %v16428_v62 }
0x1296   : > { %7690 = vmatpush1.msra.mxu1 %v7643_v55  ;;  %v14939_v55 = vld [vmem:[#allocation28 + $0xe0] ss:$8 sps:$4 sm:$0xff]  }
0x1297   : > { %7691 = vmatprep.subr.mxu1 %v16428_v62 }
0x1298   : > { %7692 = vmatpush1.msra.mxu1 %v7642_v58  ;;  %v14947_v58 = vld [vmem:[#allocation28 + $0xd4] ss:$8 sps:$4 sm:$0xff]  }
0x1299   : > { %7693 = vmatprep.subr.mxu1 %v16428_v62 }
0x129a   : > { %7694 = vmatpush1.msra.mxu1 %v7641_v41  ;;  %v14945_v41 = vld [vmem:[#allocation28 + $0xd0] ss:$8 sps:$4 sm:$0xff]  }
0x129b   : > { %7695 = vmatprep.subr.mxu1 %v16428_v62 }
0x129c   : > { %7696 = vmatpush1.msra.mxu1 %v7640_v59  ;;  %v14953_v59 = vld [vmem:[#allocation28 + $0xc4] ss:$8 sps:$4 sm:$0xff]  }
0x129d   : > { %7697 = vmatprep.subr.mxu1 %v16428_v62 }
0x129e   : > { %7698 = vmatpush1.msra.mxu1 %v7639_v26  ;;  %v14951_v26 = vld [vmem:[#allocation28 + $0xc0] ss:$8 sps:$4 sm:$0xff]  }
0x129f   : > { %7699 = vmatprep.subr.mxu1 %v16428_v62 }
0x12a0   : > { %7700 = vmatpush1.msra.mxu1 %v7638_v60  ;;  %v14959_v60 = vld [vmem:[#allocation28 + $0xb4] ss:$8 sps:$4 sm:$0xff]  }
0x12a1   : > { %7701 = vmatprep.subr.mxu1 %v16428_v62 }
0x12a2   : > { %7702 = vmatpush1.msra.mxu1 %v7637_v61  ;;  %v14957_v61 = vld [vmem:[#allocation28 + $0xb0] ss:$8 sps:$4 sm:$0xff]  }
0x12a3   : > { %7711 = vmatprep.subr.mxu1 %v16428_v62 }
0x12a4   : > { %7712 = vmatpush2.msra.mxu1 %v7664_v63  ;;  %v14965_v63 = vld [vmem:[#allocation28 + $0xa4] ss:$8 sps:$4 sm:$0xff]  }
0x12a5   : > { %7713 = vmatprep.subr.mxu1 %v16428_v62 }
0x12a6   : > { %7714 = vmatpush2.msra.mxu1 %v7663_v1  ;;  %v14963_v1 = vld [vmem:[#allocation28 + $0xa0] ss:$8 sps:$4 sm:$0xff]  }
0x12a7   : > { %7715 = vmatprep.subr.mxu1 %v16428_v62 }
0x12a8   : > { %7716 = vmatpush2.msra.mxu1 %v7662_v57  ;;  %v14971_v57 = vld [vmem:[#allocation28 + $0x94] ss:$8 sps:$4 sm:$0xff]  }
0x12a9   : > { %7717 = vmatprep.subr.mxu1 %v16428_v62 }
0x12aa   : > { %7718 = vmatpush2.msra.mxu1 %v7661_v2  ;;  %v14969_v2 = vld [vmem:[#allocation28 + $0x90] ss:$8 sps:$4 sm:$0xff]  }
0x12ab   : > { %7719 = vmatprep.subr.mxu1 %v16428_v62 }
0x12ac   : > { %7720 = vmatpush2.msra.mxu1 %v7660_v3  ;;  %v14974_v3 = vld [vmem:[#allocation28 + $0x104] ss:$8 sps:$4 sm:$0xff]  }
0x12ad   : > { %7721 = vmatprep.subr.mxu1 %v16428_v62 }
0x12ae   : > { %7722 = vmatpush2.msra.mxu1 %v7659_v4  ;;  %v14972_v4 = vld [vmem:[#allocation28 + $0x100] ss:$8 sps:$4 sm:$0xff]  }
0x12af   : > { %7723 = vmatprep.subr.mxu1 %v16428_v62 }
0x12b0   : > { %7724 = vmatpush2.msra.mxu1 %v7658_v5  ;;  %v14977_v5 = vld [vmem:[#allocation28 + $0x84] ss:$8 sps:$4 sm:$0xff]  }
0x12b1   : > { %7725 = vmatprep.subr.mxu1 %v16428_v62 }
0x12b2   : > { %7726 = vmatpush2.msra.mxu1 %v7657_v6  ;;  %v14975_v6 = vld [vmem:[#allocation28 + $0x80] ss:$8 sps:$4 sm:$0xff]  }
0x12b3   : > { %7727 = vmatprep.subr.mxu1 %v16428_v62 }
0x12b4   : > { %7728 = vmatpush2.msra.mxu1 %v7656_v7  ;;  %v14980_v7 = vld [vmem:[#allocation28 + $0x74] ss:$8 sps:$4 sm:$0xff]  }
0x12b5   : > { %7729 = vmatprep.subr.mxu1 %v16428_v62 }
0x12b6   : > { %7730 = vmatpush2.msra.mxu1 %v7655_v8 }
0x12b7   : > { %7731 = vmatprep.subr.mxu1 %v16428_v62 }
0x12b8   : > { %7732 = vmatpush2.msra.mxu1 %v7654_v9 }
0x12b9   : > { %7733 = vmatprep.subr.mxu1 %v16428_v62 }
0x12ba   : > { %7734 = vmatpush2.msra.mxu1 %v7653_v10 }
0x12bb   : > { %8218 = vmatprep.subr.bf16.mxu1 %v14932_v31  ;;  %v14993_v31 = vld [vmem:[#allocation28 + $0x20] ss:$8 sps:$4 sm:$0xff]  }
0x1343   : > { %v7604_v11 = vpop.f32.mrf.mxu1 }
0x1344   : > { %7619 = vrot.lane.b32.xlu0 %v7604_v11, %s16432_s10 }
0x1345   : > { %v7606_v12 = vpop.f32.mrf.mxu1 }
0x1346   : > { %7621 = vrot.lane.b32.xlu1 %v7606_v12, %s16432_s10 }
0x1347   : > { %v7610_v13 = vpop.f32.mrf.mxu1 }
0x1348   : > { %7623 = vrot.lane.b32.xlu0 %v7610_v13, %s16432_s10 }
0x1349   : > { %v7612_v14 = vpop.f32.mrf.mxu1 }
0x134a   : > { %7625 = vrot.lane.b32.xlu1 %v7612_v14, %s16432_s10  ;;  %s12390_s10 = sshll.u32 %s17816_s28, 3 }
0x13b6   : > { %v7620_v15 = vpop.permute.xlu0 %7619 }
0x13b8   : > { %v7622_v16 = vpop.permute.xlu1 %7621 }
0x13b9   : > { %v7627_v17 = vsel %vm2054_vm1, %v7620_v15, %v7622_v16  ;;  %v7634_v18 = vmax.f32 %v7606_v12, %v7622_v16  ;;  %v14978_v15 = vld [vmem:[#allocation28 + $0x70] ss:$8 sps:$4 sm:$0xff]  }
0x13ba   : > { %v7633_v19 = vmax.f32 %v7604_v11, %v7627_v17  ;;  %v7624_v22 = vpop.permute.xlu0 %7623  ;;  %v14983_v17 = vld [vmem:[#allocation28 + $0x64] ss:$8 sps:$4 sm:$0xff]  }
0x13bb   : > { %13038 = vmatprep.mubr.msk.f32.mxu1 %vm2054_vm1, %v7634_v18  ;;  %v14981_v18 = vld [vmem:[#allocation28 + $0x60] ss:$8 sps:$4 sm:$0xff]  }
0x13bc   : > { %7736 = vmatmul.mubr.f32.vlgmr.msra.gmra.mxu1 %v7633_v19  ;;  %v7626_v21 = vpop.permute.xlu1 %7625  ;;  %v14986_v19 = vld [vmem:[#allocation28 + $0x54] ss:$8 sps:$4 sm:$0xff]  }
0x13bd   : > { %v7628_v24 = vsel %vm2054_vm1, %v7624_v22, %v7626_v21  ;;  %v7636_v25 = vmax.f32 %v7612_v14, %v7626_v21  ;;  %8219 = vmatpush1.bf16.msra.mxu1 %v14930_v30  ;;  %v14984_v22 = vld [vmem:[#allocation28 + $0x50] ss:$8 sps:$4 sm:$0xff]   ;;  %v14989_v21 = vld [vmem:[#allocation28 + $0x44] ss:$8 sps:$4 sm:$0xff]  }
0x13be   : > { %v7635_v29 = vmax.f32 %v7610_v13, %v7628_v24  ;;  %8220 = vmatprep.subr.bf16.mxu1 %v14938_v32  ;;  %v14987_v24 = vld [vmem:[#allocation28 + $0x40] ss:$8 sps:$4 sm:$0xff]   ;;  %v14995_v30 = vld [vmem:[#allocation28 + $0x24] ss:$8 sps:$4 sm:$0xff]   ;;  %v14998_v32 = vld [vmem:[#allocation28 + $0x14] ss:$8 sps:$4 sm:$0xff]  }
0x13bf   : > { %13039 = vmatprep.mubr.msk.f32.mxu1 %vm2054_vm1, %v7636_v25  ;;  %v14992_v25 = vld [vmem:[#allocation28 + $0x34] ss:$8 sps:$4 sm:$0xff]   ;;  %vm10113_vm1 = vcmask 39936  }
0x13c0   : > { %7741 = vmatmul.mubr.f32.gmra.mxu1 %v7635_v29  ;;  %v14990_v29 = vld [vmem:[#allocation28 + $0x30] ss:$8 sps:$4 sm:$0xff]  }
0x13c1   : > { %8250 = vmatprep.mubr.bf16.mxu1 %v16427_v0  ;;  %8221 = vmatpush1.bf16.msra.mxu1 %v14936_v34  ;;  %v15001_v34 = vld [vmem:[#allocation28 + $0x4] ss:$8 sps:$4 sm:$0xff]  }
0x13c2   : > { %8222 = vmatprep.subr.bf16.mxu1 %v14944_v35  ;;  %v14999_v35 = vld [vmem:[#allocation28] ss:$8 sps:$4 sm:$0xff]  }
0x13c5   : > { %8223 = vmatpush1.bf16.msra.mxu1 %v14942_v37  ;;  %v15008_v37 = vld [vmem:[#allocation31 + $0x170] ss:$8 sps:$4 sm:$0xff]  }
0x13c6   : > { %8224 = vmatprep.subr.bf16.mxu1 %v14950_v38  ;;  %v15010_v38 = vld [vmem:[#allocation31 + $0x174] ss:$8 sps:$4 sm:$0xff]  }
0x13c9   : > { %8225 = vmatpush1.bf16.msra.mxu1 %v14948_v43  ;;  %v15014_v43 = vld [vmem:[#allocation31 + $0x160] ss:$8 sps:$4 sm:$0xff]  }
0x13ca   : > { %8226 = vmatprep.subr.bf16.mxu1 %v14956_v46  ;;  %v15016_v46 = vld [vmem:[#allocation31 + $0x164] ss:$8 sps:$4 sm:$0xff]  }
0x13cd   : > { %8227 = vmatpush1.bf16.msra.mxu1 %v14954_v47  ;;  %v15020_v47 = vld [vmem:[#allocation31 + $0x150] ss:$8 sps:$4 sm:$0xff]  }
0x13ce   : > { %8228 = vmatprep.subr.bf16.mxu1 %v14962_v20  ;;  %v15022_v20 = vld [vmem:[#allocation31 + $0x154] ss:$8 sps:$4 sm:$0xff]  }
0x13d1   : > { %8229 = vmatpush1.bf16.msra.mxu1 %v14960_v48  ;;  %v15026_v48 = vld [vmem:[#allocation31 + $0x140] ss:$8 sps:$4 sm:$0xff]  }
0x13d2   : > { %8230 = vmatprep.subr.bf16.mxu1 %v14968_v23  ;;  %v15028_v23 = vld [vmem:[#allocation31 + $0x144] ss:$8 sps:$4 sm:$0xff]  }
0x13d5   : > { %8231 = vmatpush1.bf16.msra.mxu1 %v14966_v27  ;;  %v15032_v27 = vld [vmem:[#allocation31 + $0x130] ss:$8 sps:$4 sm:$0xff]  }
0x13d6   : > { %8232 = vmatprep.subr.bf16.mxu1 %v14974_v3 }
0x13d9   : > { %8233 = vmatpush1.bf16.msra.mxu1 %v14972_v4 }
0x13da   : > { %8602 = vmatprep.subr.bf16.mxu1 %v15010_v38  ;;  %v15031_v38 = vld [vmem:[#allocation31 + $0x24] ss:$8 sps:$4 sm:$0xff]  }
0x147c   : > { %v7737_v28 = vpop.f32.mrf.mxu1 }
0x147d   : > { %v7748_v36 = vrot.slane %v7737_v28, 1 }
0x147e   : > { %v7739_v49 = vpop.f32.mrf.mxu1 }
0x147f   : > { %v15038_v49 = vld [vmem:[#allocation31 + $0x120] ss:$8 sps:$4 sm:$0xff]  }
0x1480   : > { %v7742_v33 = vpop.f32.mrf.mxu1 }
0x1481   : > { %v7749_v50 = vrot.slane %v7742_v33, 1 }
0x1482   : > { %v7744_v39 = vpop.f32.mrf.mxu1 }
0x1483   : > { %v7750_v42 = vsel %vm2247_vm2, %v7748_v36, %v7749_v50  ;;  %v7754_v51 = vmax.f32 %v7742_v33, %v7749_v50  ;;  %v15040_v33 = vld [vmem:[#allocation31 + $0x124] ss:$8 sps:$4 sm:$0xff]   ;;  %v15044_v36 = vld [vmem:[#allocation31 + $0x110] ss:$8 sps:$4 sm:$0xff]   ;;  %v15046_v50 = vld [vmem:[#allocation31 + $0x114] ss:$8 sps:$4 sm:$0xff]  }
0x1484   : > { %v7753_v40 = vmax.f32 %v7737_v28, %v7750_v42  ;;  %v15034_v28 = vld [vmem:[#allocation31 + $0x134] ss:$8 sps:$4 sm:$0xff]   ;;  %v15050_v39 = vld [vmem:[#allocation31 + $0x100] ss:$8 sps:$4 sm:$0xff]   ;;  %v15052_v42 = vld [vmem:[#allocation31 + $0x104] ss:$8 sps:$4 sm:$0xff]  }
0x1485   : > { %13551 = vmatpush3.msk.msra.mxu0 %vm3687_vm6, %v7754_v51  ;;  %v15056_v51 = vld [vmem:[#allocation31 + $0x1f0] ss:$8 sps:$4 sm:$0xff]   ;;  %vm10532_vm2 = vcmask 1041408   ;;  %vm11519_vm6 = vcmask 1042432  }
0x1486   : > { %13552 = vmatprep.subr.mxu0 %v16428_v62 }
0x1487   : > { %13553 = vmatpush3.msra.mxu0 %v7753_v40  ;;  %v15058_v40 = vld [vmem:[#allocation31 + $0x1f4] ss:$8 sps:$4 sm:$0xff]  }
0x1488   : > { %13555 = vmatmul.mubr.msk.f32.vlgmr.msra.gmra.mxu0 %vm7756_vm12, %v7755_v45  ;;  %7956 = vmatprep.subr.bf16.mxu0 %v14935_v44  ;;  %v15062_v44 = vld [vmem:[#allocation31 + $0x1e0] ss:$8 sps:$4 sm:$0xff]   ;;  %v15064_v45 = vld [vmem:[#allocation31 + $0x1e4] ss:$8 sps:$4 sm:$0xff]  }
0x1489   : > { %7957 = vmatpush1.bf16.msra.mxu0 %v14933_v53  ;;  %7988 = vmatprep.mubr.bf16.mxu0 %v16427_v0  ;;  %v15068_v53 = vld [vmem:[#allocation31 + $0x1d0] ss:$8 sps:$4 sm:$0xff]  }
0x148a   : > { %7958 = vmatprep.subr.bf16.mxu0 %v14941_v54  ;;  %v15070_v54 = vld [vmem:[#allocation31 + $0x1d4] ss:$8 sps:$4 sm:$0xff]  }
0x148d   : > { %7959 = vmatpush1.bf16.msra.mxu0 %v14939_v55  ;;  %v15074_v55 = vld [vmem:[#allocation31 + $0x1c0] ss:$8 sps:$4 sm:$0xff]  }
0x148e   : > { %7960 = vmatprep.subr.bf16.mxu0 %v14947_v58  ;;  %v15076_v58 = vld [vmem:[#allocation31 + $0x1c4] ss:$8 sps:$4 sm:$0xff]  }
0x1491   : > { %7961 = vmatpush1.bf16.msra.mxu0 %v14945_v41  ;;  %v15080_v41 = vld [vmem:[#allocation31 + $0x1b0] ss:$8 sps:$4 sm:$0xff]  }
0x1492   : > { %7962 = vmatprep.subr.bf16.mxu0 %v14953_v59  ;;  %v15082_v59 = vld [vmem:[#allocation31 + $0x1b4] ss:$8 sps:$4 sm:$0xff]  }
0x1495   : > { %7963 = vmatpush1.bf16.msra.mxu0 %v14951_v26  ;;  %v15086_v26 = vld [vmem:[#allocation31 + $0x1a0] ss:$8 sps:$4 sm:$0xff]  }
0x1496   : > { %7964 = vmatprep.subr.bf16.mxu0 %v14959_v60  ;;  %v15088_v60 = vld [vmem:[#allocation31 + $0x1a4] ss:$8 sps:$4 sm:$0xff]  }
0x1499   : > { %7965 = vmatpush1.bf16.msra.mxu0 %v14957_v61 }
0x149a   : > { %7966 = vmatprep.subr.bf16.mxu0 %v14965_v63 }
0x149d   : > { %7967 = vmatpush1.bf16.msra.mxu0 %v14963_v1 }
0x149e   : > { %7968 = vmatprep.subr.bf16.mxu0 %v14971_v57 }
0x14a1   : > { %7969 = vmatpush1.bf16.msra.mxu0 %v14969_v2 }
0x14a2   : > { %7970 = vmatprep.subr.bf16.mxu0 %v14977_v5 }
0x14a5   : > { %7971 = vmatpush1.bf16.msra.mxu0 %v14975_v6  ;;  %v8261_v6 = vld [vmem:[#allocation30] sm:$0x3] }
0x14a6   : > { %8077 = vmatprep.subr.bf16.mxu0 %v14980_v7 }
0x1548   : > { %v7829_v8 = vpop.f32.mrf.mxu0 }
0x1549   : > { %v7834_v9 = vpack.c.bf16 %v7829_v8, %v7829_v8 }
0x154a   : > { %v13556_v10 = vpop.f32.mrf.mxu0 }
0x154b   : > { %v7871_v11 = vshll.u32 %v7834_v9, 16  ;;  %v8136_v12 = vrot.slane %v7834_v9, 1  ;;  %v7869_v13 = vshrl.u32 %v7834_v9, 16 }
0x154d   : > { %v7873_v14 = vrot.slane %v7871_v11, 1  ;;  %8251 = vmatmul.mubr.bf16.vlgmr.msra.gmra.mxu1 %v8136_v12 }
0x154e   : > { %8603 = vmatpush1.bf16.msra.mxu1 %v15008_v37  ;;  %v15023_v37 = vld [vmem:[#allocation31 + $0x30] ss:$8 sps:$4 sm:$0xff]  }
0x154f   : > { %v7874_v16 = vor.u32 %v7873_v14, %v7869_v13  ;;  %8604 = vmatprep.subr.bf16.mxu1 %v15016_v46  ;;  %v8270_v13 = vrot.slane %v8261_v6, %v17110_v56  ;;  %v15037_v46 = vld [vmem:[#allocation31 + $0x14] ss:$8 sps:$4 sm:$0xff]  }
0x1551   : > { %7989 = vmatmul.mubr.bf16.vlgmr.msra.gmra.mxu0 %v7874_v16 }
0x1552   : > { %8078 = vmatpush1.bf16.msra.mxu0 %v14978_v15  ;;  %8109 = vmatprep.mubr.bf16.mxu0 %v16427_v0  ;;  %v14996_v0 = vld [vmem:[#allocation28 + $0x10] ss:$8 sps:$4 sm:$0xff]  }
0x1553   : > { %8079 = vmatprep.subr.bf16.mxu0 %v14983_v17  ;;  %8605 = vmatpush1.bf16.msra.mxu1 %v15014_v43  ;;  %v15029_v43 = vld [vmem:[#allocation31 + $0x20] ss:$8 sps:$4 sm:$0xff]  }
0x1554   : > { %8606 = vmatprep.subr.bf16.mxu1 %v15022_v20  ;;  %v15043_v20 = vld [vmem:[#allocation31 + $0x4] ss:$8 sps:$4 sm:$0xff]  }
0x1556   : > { %8080 = vmatpush1.bf16.msra.mxu0 %v14981_v18 }
0x1557   : > { %8081 = vmatprep.subr.bf16.mxu0 %v14986_v19  ;;  %8607 = vmatpush1.bf16.msra.mxu1 %v15020_v47  ;;  %v15035_v47 = vld [vmem:[#allocation31 + $0x10] ss:$8 sps:$4 sm:$0xff]  }
0x1558   : > { %8608 = vmatprep.subr.bf16.mxu1 %v15028_v23  ;;  %v15049_v23 = vld [vmem:[#allocation31 + $0xf4] ss:$8 sps:$4 sm:$0xff]  }
0x155a   : > { %8082 = vmatpush1.bf16.msra.mxu0 %v14984_v22  ;;  %v15004_v22 = vld [vmem:[#allocation31 + $0x74] ss:$8 sps:$4 sm:$0xff]  }
0x155b   : > { %8083 = vmatprep.subr.bf16.mxu0 %v14989_v21  ;;  %8609 = vmatpush1.bf16.msra.mxu1 %v15026_v48  ;;  %v15041_v48 = vld [vmem:[#allocation31] ss:$8 sps:$4 sm:$0xff]  }
0x155c   : > { %8610 = vmatprep.subr.bf16.mxu1 %v15034_v28  ;;  %v15055_v28 = vld [vmem:[#allocation31 + $0xe4] ss:$8 sps:$4 sm:$0xff]  }
0x155e   : > { %8084 = vmatpush1.bf16.msra.mxu0 %v14987_v24  ;;  %v17497_v24 = vld [vmem:[%s17810_s2] sm:$0x3f]  ;;  %s1933_s2 = scalar_lea.vmem %s16682_s17, %s12390_s10 }
0x155f   : > { %8085 = vmatprep.subr.bf16.mxu0 %v14992_v25  ;;  %8611 = vmatpush1.bf16.msra.mxu1 %v15032_v27  ;;  %v15002_v25 = vld [vmem:[#allocation31 + $0x70] ss:$8 sps:$4 sm:$0xff]  }
0x1560   : > { %8612 = vmatprep.subr.bf16.mxu1 %v15040_v33  ;;  %v15047_v27 = vld [vmem:[#allocation31 + $0xf0] ss:$8 sps:$4 sm:$0xff]   ;;  %v15061_v33 = vld [vmem:[#allocation31 + $0xd4] ss:$8 sps:$4 sm:$0xff]  }
0x1562   : > { %8086 = vmatpush1.bf16.msra.mxu0 %v14990_v29  ;;  %v15007_v29 = vld [vmem:[#allocation31 + $0x64] ss:$8 sps:$4 sm:$0xff]  }
0x1563   : > { %8087 = vmatprep.subr.bf16.mxu0 %v14995_v30  ;;  %8613 = vmatpush1.bf16.msra.mxu1 %v15038_v49  ;;  %v15005_v30 = vld [vmem:[#allocation31 + $0x60] ss:$8 sps:$4 sm:$0xff]  }
0x1564   : > { %8614 = vmatprep.subr.bf16.mxu1 %v15046_v50  ;;  %v15053_v49 = vld [vmem:[#allocation31 + $0xe0] ss:$8 sps:$4 sm:$0xff]   ;;  %v15067_v50 = vld [vmem:[#allocation31 + $0xc4] ss:$8 sps:$4 sm:$0xff]  }
0x1566   : > { %8088 = vmatpush1.bf16.msra.mxu0 %v14993_v31  ;;  %v15013_v31 = vld [vmem:[#allocation31 + $0x54] ss:$8 sps:$4 sm:$0xff]  }
0x1567   : > { %8089 = vmatprep.subr.bf16.mxu0 %v14998_v32  ;;  %8615 = vmatpush1.bf16.msra.mxu1 %v15044_v36  ;;  %v15011_v32 = vld [vmem:[#allocation31 + $0x50] ss:$8 sps:$4 sm:$0xff]  }
0x1568   : > { %8616 = vmatprep.subr.bf16.mxu1 %v15052_v42  ;;  %v15059_v36 = vld [vmem:[#allocation31 + $0xd0] ss:$8 sps:$4 sm:$0xff]   ;;  %v15073_v42 = vld [vmem:[#allocation31 + $0xb4] ss:$8 sps:$4 sm:$0xff]  }
0x156a   : > { %8090 = vmatpush1.bf16.msra.mxu0 %v14996_v0  ;;  %v15019_v0 = vld [vmem:[#allocation31 + $0x44] ss:$8 sps:$4 sm:$0xff]  }
0x156b   : > { %8091 = vmatprep.subr.bf16.mxu0 %v15001_v34  ;;  %8617 = vmatpush1.bf16.msra.mxu1 %v15050_v39  ;;  %v15017_v34 = vld [vmem:[#allocation31 + $0x40] ss:$8 sps:$4 sm:$0xff]  }
0x156c   : > { %8618 = vmatprep.subr.bf16.mxu1 %v15058_v40  ;;  %v15065_v39 = vld [vmem:[#allocation31 + $0xc0] ss:$8 sps:$4 sm:$0xff]   ;;  %v15079_v40 = vld [vmem:[#allocation31 + $0xa4] ss:$8 sps:$4 sm:$0xff]  }
0x156e   : > { %8092 = vmatpush1.bf16.msra.mxu0 %v14999_v35  ;;  %v15025_v35 = vld [vmem:[#allocation31 + $0x34] ss:$8 sps:$4 sm:$0xff]  }
0x156f   : > { %8619 = vmatpush2.bf16.msra.mxu1 %v15056_v51  ;;  %v15071_v51 = vld [vmem:[#allocation31 + $0xb0] ss:$8 sps:$4 sm:$0xff]  }
0x1570   : > { %8620 = vmatprep.subr.bf16.mxu1 %v15064_v45  ;;  %v15085_v45 = vld [vmem:[#allocation31 + $0x94] ss:$8 sps:$4 sm:$0xff]  }
0x1571   : > { %8110 = vmatmul.mubr.bf16.vlgmr.msra.gmra.mxu0 %v7834_v9  ;;  %v8266_v9 = vrot.slane %v8261_v6, %v17108_v52 }
0x1572   : > { %8352 = vmatprep.mubr.f32.mxu0 %v16428_v62 }
0x1573   : > { %8621 = vmatpush2.bf16.msra.mxu1 %v15062_v44  ;;  %v15077_v44 = vld [vmem:[#allocation31 + $0xa0] ss:$8 sps:$4 sm:$0xff]  }
0x1574   : > { %8622 = vmatprep.subr.bf16.mxu1 %v15070_v54  ;;  %v15091_v54 = vld [vmem:[#allocation31 + $0x84] ss:$8 sps:$4 sm:$0xff]  }
0x1577   : > { %8623 = vmatpush2.bf16.msra.mxu1 %v15068_v53  ;;  %v15083_v53 = vld [vmem:[#allocation31 + $0x90] ss:$8 sps:$4 sm:$0xff]  }
0x1578   : > { %8624 = vmatprep.subr.bf16.mxu1 %v15076_v58  ;;  %v15094_v58 = vld [vmem:[#allocation31 + $0x194] ss:$8 sps:$4 sm:$0xff]  }
0x157b   : > { %8625 = vmatpush2.bf16.msra.mxu1 %v15074_v55  ;;  %v15089_v55 = vld [vmem:[#allocation31 + $0x80] ss:$8 sps:$4 sm:$0xff]  }
0x157c   : > { %8626 = vmatprep.subr.bf16.mxu1 %v15082_v59  ;;  %v15097_v59 = vld [vmem:[#allocation31 + $0x184] ss:$8 sps:$4 sm:$0xff]  }
0x157f   : > { %8627 = vmatpush2.bf16.msra.mxu1 %v15080_v41  ;;  %v15092_v41 = vld [vmem:[#allocation31 + $0x190] ss:$8 sps:$4 sm:$0xff]  }
0x1580   : > { %8628 = vmatprep.subr.bf16.mxu1 %v15088_v60  ;;  %v15100_v60 = vld [vmem:[#allocation31 + $0x274] ss:$8 sps:$4 sm:$0xff]  }
0x1583   : > { %8629 = vmatpush2.bf16.msra.mxu1 %v15086_v26  ;;  %v15095_v26 = vld [vmem:[#allocation31 + $0x180] ss:$8 sps:$4 sm:$0xff]  }
0x1584   : > { %8630 = vmatprep.subr.bf16.mxu1 %v15094_v58  ;;  %v15175_v58 = vld [vmem:[#allocation34 + $0x24] ss:$8 sps:$4 sm:$0xff]  }
0x1587   : > { %8631 = vmatpush2.bf16.msra.mxu1 %v15092_v41  ;;  %v15173_v41 = vld [vmem:[#allocation34 + $0x20] ss:$8 sps:$4 sm:$0xff]  }
0x1588   : > { %8632 = vmatprep.subr.bf16.mxu1 %v15097_v59  ;;  %v15181_v59 = vld [vmem:[#allocation34 + $0x14] ss:$8 sps:$4 sm:$0xff]  }
0x158b   : > { %8633 = vmatpush2.bf16.msra.mxu1 %v15095_v26  ;;  %v15179_v26 = vld [vmem:[#allocation34 + $0x10] ss:$8 sps:$4 sm:$0xff]  }
0x158c   : > { %9043 = vmatprep.subr.bf16.mxu1 %v15100_v60  ;;  %v15187_v60 = vld [vmem:[#allocation34 + $0x4] ss:$8 sps:$4 sm:$0xff]  }
0x160d   : > { %v8252_v61 = vpop.f32.mrf.mxu1 }
0x160f   : > { %v8254_v63 = vpop.f32.mrf.mxu1 }
0x1611   : > { %v7990_v1 = vpop.f32.mrf.mxu0  ;;  %v8256_v57 = vpop.f32.mrf.mxu1 }
0x1613   : > { %v7992_v2 = vpop.f32.mrf.mxu0  ;;  %v8257_v3 = vpop.f32.mrf.mxu1 }
0x1615   : > { %v7994_v4 = vpop.f32.mrf.mxu0 }
0x1617   : > { %v7995_v5 = vpop.f32.mrf.mxu0 }
0x1631   : > { %v8111_v7 = vpop.f32.mrf.mxu0 }
0x1632   : > { %v8112_v8 = vadd.f32 %v8111_v7, %v7990_v1 }
0x1633   : > { %v8113_v10 = vpop.f32.mrf.mxu0 }
0x1634   : > { %v8259_v11 = vadd.f32 %v8252_v61, %v8112_v8  ;;  %v8114_v12 = vadd.f32 %v8113_v10, %v7992_v2 }
0x1635   : > { %v8115_v14 = vpop.f32.mrf.mxu0 }
0x1636   : > { %v8260_v15 = vadd.f32 %v8254_v63, %v8114_v12  ;;  %v8273_v16 = vadd.f32 %v8266_v9, %v8259_v11  ;;  %v15098_v9 = vld [vmem:[#allocation31 + $0x270] ss:$8 sps:$4 sm:$0xff]   ;;  %v15103_v11 = vld [vmem:[#allocation31 + $0x264] ss:$8 sps:$4 sm:$0xff]   ;;  %v15106_v14 = vld [vmem:[#allocation31 + $0x254] ss:$8 sps:$4 sm:$0xff]  }
0x1637   : > { %v8116_v17 = vpop.f32.mrf.mxu0 }
0x1638   : > { %v8274_v18 = vadd.f32 %v8270_v13, %v8260_v15  ;;  %v8275_v21 = vmax.f32 %v8273_v16, 0.0  ;;  %v15101_v13 = vld [vmem:[#allocation31 + $0x260] ss:$8 sps:$4 sm:$0xff]   ;;  %v15104_v15 = vld [vmem:[#allocation31 + $0x250] ss:$8 sps:$4 sm:$0xff]  }
0x1639   : > { %v15109_v16 = vld [vmem:[#allocation31 + $0x244] ss:$8 sps:$4 sm:$0xff]   ;;  %v15107_v17 = vld [vmem:[#allocation31 + $0x240] ss:$8 sps:$4 sm:$0xff]  }
0x163a   : > { %v8276_v19 = vmax.f32 %v8274_v18, 0.0  ;;  %v15112_v18 = vld [vmem:[#allocation31 + $0x234] ss:$8 sps:$4 sm:$0xff]  }
0x163c   : > { %13090 = vmatprep.subr.msk.mxu0 %vm8281_vm13, %v8276_v19  ;;  %v15110_v19 = vld [vmem:[#allocation31 + $0x230] ss:$8 sps:$4 sm:$0xff]  }
0x163d   : > { %13091 = vmatpush1.msk.msra.mxu0 %vm8281_vm13, %v8275_v21  ;;  %v15113_v21 = vld [vmem:[#allocation31 + $0x220] ss:$8 sps:$4 sm:$0xff]  }
0x163e   : > { %13092 = vmatmul.mubr.msk.f32.vlgmr.msra.gmra.mxu0 %vm8277_vm14, %v17497_v24  ;;  %8803 = vmatprep.subr.bf16.mxu0 %v15004_v22  ;;  %v15115_v22 = vld [vmem:[#allocation31 + $0x224] ss:$8 sps:$4 sm:$0xff]  }
0x163f   : > { %8804 = vmatpush1.bf16.msra.mxu0 %v15002_v25  ;;  %v15118_v25 = vld [vmem:[#allocation31 + $0x214] ss:$8 sps:$4 sm:$0xff]  }
0x1640   : > { %8805 = vmatprep.subr.bf16.mxu0 %v15007_v29  ;;  %v15116_v29 = vld [vmem:[#allocation31 + $0x210] ss:$8 sps:$4 sm:$0xff]  }
0x1643   : > { %8806 = vmatpush1.bf16.msra.mxu0 %v15005_v30  ;;  %v15121_v30 = vld [vmem:[#allocation31 + $0x204] ss:$8 sps:$4 sm:$0xff]  }
0x1644   : > { %8807 = vmatprep.subr.bf16.mxu0 %v15013_v31  ;;  %v15119_v31 = vld [vmem:[#allocation31 + $0x200] ss:$8 sps:$4 sm:$0xff]  }
0x1647   : > { %8808 = vmatpush1.bf16.msra.mxu0 %v15011_v32  ;;  %v15124_v32 = vld [vmem:[#allocation31 + $0x2f4] ss:$8 sps:$4 sm:$0xff]  }
0x1648   : > { %8809 = vmatprep.subr.bf16.mxu0 %v15019_v0  ;;  %v15122_v0 = vld [vmem:[#allocation31 + $0x2f0] ss:$8 sps:$4 sm:$0xff]  }
0x164b   : > { %8810 = vmatpush1.bf16.msra.mxu0 %v15017_v34  ;;  %v15127_v34 = vld [vmem:[#allocation31 + $0x2e4] ss:$8 sps:$4 sm:$0xff]  }
0x164c   : > { %8811 = vmatprep.subr.bf16.mxu0 %v15025_v35  ;;  %v15125_v35 = vld [vmem:[#allocation31 + $0x2e0] ss:$8 sps:$4 sm:$0xff]  }
0x164f   : > { %8812 = vmatpush1.bf16.msra.mxu0 %v15023_v37  ;;  %v15130_v37 = vld [vmem:[#allocation31 + $0x2d4] ss:$8 sps:$4 sm:$0xff]  }
0x1650   : > { %8813 = vmatprep.subr.bf16.mxu0 %v15031_v38  ;;  %v15128_v38 = vld [vmem:[#allocation31 + $0x2d0] ss:$8 sps:$4 sm:$0xff]  }
0x1653   : > { %8814 = vmatpush1.bf16.msra.mxu0 %v15029_v43  ;;  %v15133_v43 = vld [vmem:[#allocation31 + $0x2c4] ss:$8 sps:$4 sm:$0xff]  }
0x1654   : > { %8815 = vmatprep.subr.bf16.mxu0 %v15037_v46  ;;  %v15131_v46 = vld [vmem:[#allocation31 + $0x2c0] ss:$8 sps:$4 sm:$0xff]  }
0x1657   : > { %8816 = vmatpush1.bf16.msra.mxu0 %v15035_v47  ;;  %v15136_v47 = vld [vmem:[#allocation31 + $0x2b4] ss:$8 sps:$4 sm:$0xff]  }
0x1658   : > { %8817 = vmatprep.subr.bf16.mxu0 %v15043_v20  ;;  %v15134_v20 = vld [vmem:[#allocation31 + $0x2b0] ss:$8 sps:$4 sm:$0xff]  }
0x165b   : > { %8818 = vmatpush1.bf16.msra.mxu0 %v15041_v48  ;;  %v15139_v48 = vld [vmem:[#allocation31 + $0x2a4] ss:$8 sps:$4 sm:$0xff]  }
0x165c   : > { %8819 = vmatprep.subr.bf16.mxu0 %v15049_v23  ;;  %v15137_v23 = vld [vmem:[#allocation31 + $0x2a0] ss:$8 sps:$4 sm:$0xff]  }
0x165f   : > { %8820 = vmatpush2.bf16.msra.mxu0 %v15047_v27  ;;  %v15142_v27 = vld [vmem:[#allocation31 + $0x294] ss:$8 sps:$4 sm:$0xff]  }
0x1660   : > { %8821 = vmatprep.subr.bf16.mxu0 %v15055_v28  ;;  %v15140_v28 = vld [vmem:[#allocation31 + $0x290] ss:$8 sps:$4 sm:$0xff]  }
0x1663   : > { %8822 = vmatpush2.bf16.msra.mxu0 %v15053_v49  ;;  %v15145_v49 = vld [vmem:[#allocation31 + $0x284] ss:$8 sps:$4 sm:$0xff]  }
0x1664   : > { %8823 = vmatprep.subr.bf16.mxu0 %v15061_v33  ;;  %v15143_v33 = vld [vmem:[#allocation31 + $0x280] ss:$8 sps:$4 sm:$0xff]  }
0x1667   : > { %8824 = vmatpush2.bf16.msra.mxu0 %v15059_v36 }
0x1668   : > { %8825 = vmatprep.subr.bf16.mxu0 %v15067_v50  ;;  %v15146_v50 = vld [vmem:[#allocation34 + $0x70] ss:$8 sps:$4 sm:$0xff]  }
0x166b   : > { %8826 = vmatpush2.bf16.msra.mxu0 %v15065_v39  ;;  %v15148_v39 = vld [vmem:[#allocation34 + $0x74] ss:$8 sps:$4 sm:$0xff]  }
0x166c   : > { %8827 = vmatprep.subr.bf16.mxu0 %v15073_v42  ;;  %v15151_v42 = vld [vmem:[#allocation34 + $0x64] ss:$8 sps:$4 sm:$0xff]  }
0x166f   : > { %8828 = vmatpush2.bf16.msra.mxu0 %v15071_v51  ;;  %v15149_v51 = vld [vmem:[#allocation34 + $0x60] ss:$8 sps:$4 sm:$0xff]  }
0x1670   : > { %8829 = vmatprep.subr.bf16.mxu0 %v15079_v40  ;;  %v15157_v40 = vld [vmem:[#allocation34 + $0x54] ss:$8 sps:$4 sm:$0xff]  }
0x1673   : > { %8830 = vmatpush2.bf16.msra.mxu0 %v15077_v44  ;;  %v15155_v44 = vld [vmem:[#allocation34 + $0x50] ss:$8 sps:$4 sm:$0xff]  }
0x1674   : > { %8831 = vmatprep.subr.bf16.mxu0 %v15085_v45  ;;  %v15163_v45 = vld [vmem:[#allocation34 + $0x44] ss:$8 sps:$4 sm:$0xff]  }
0x1677   : > { %8832 = vmatpush2.bf16.msra.mxu0 %v15083_v53  ;;  %v15161_v53 = vld [vmem:[#allocation34 + $0x40] ss:$8 sps:$4 sm:$0xff]  }
0x1678   : > { %8833 = vmatprep.subr.bf16.mxu0 %v15091_v54  ;;  %v15169_v54 = vld [vmem:[#allocation34 + $0x34] ss:$8 sps:$4 sm:$0xff]  }
0x167b   : > { %8834 = vmatpush2.bf16.msra.mxu0 %v15089_v55  ;;  %v15167_v55 = vld [vmem:[#allocation34 + $0x30] ss:$8 sps:$4 sm:$0xff]  }
0x16fe   : > { %v8354_v61 = vpop.f32.mrf.mxu0 }
0x16ff   : > { %v17503_v63 = vpack.c.bf16 %v8354_v61, %v8354_v61  ;;  %v15185_v61 = vld [vmem:[#allocation34] ss:$8 sps:$4 sm:$0xff]  }
0x1700   : > { %v8356_v1 = vpop.f32.mrf.mxu0 }
0x1701   : > { %v8429_v57 = vshll.u32 %v17503_v63, 16  ;;  %v8360_v2 = vpack.c.bf16 %v8356_v1, %v8356_v1  ;;  %v8427_v7 = vshrl.u32 %v17503_v63, 16  ;;  %v8879_v36 = vrot.slane %v17503_v63, 1  ;;  %v15191_v1 = vld [vmem:[#allocation34 + $0xf0] ss:$8 sps:$4 sm:$0xff]  }
0x1703   : > { %8835 = vmatprep.mubr.bf16.mxu0 %v8360_v2  ;;  %v8436_v3 = vshll.u32 %v8360_v2, 16  ;;  %v8431_v4 = vrot.slane %v8429_v57, 1  ;;  %v8434_v5 = vshrl.u32 %v8360_v2, 16  ;;  %v8880_v12 = vrot.slane %v8360_v2, 1  ;;  %v15199_v57 = vld [vmem:[#allocation34 + $0xe4] ss:$8 sps:$4 sm:$0xff]  }
0x1704   : > { %8836 = vmatmul.mubr.bf16.vlgmr.msra.gmra.mxu0 %v17503_v63  ;;  %v15193_v63 = vld [vmem:[#allocation34 + $0xf4] ss:$8 sps:$4 sm:$0xff]   ;;  %v15197_v2 = vld [vmem:[#allocation34 + $0xe0] ss:$8 sps:$4 sm:$0xff]  }
0x1705   : > { %v8438_v6 = vrot.slane %v8436_v3, 1  ;;  %9172 = vmatprep.mubr.f32.mxu0 %v16428_v62  ;;  %v8432_v10 = vor.u32 %v8431_v4, %v8427_v7  ;;  %v15205_v3 = vld [vmem:[#allocation34 + $0xd4] ss:$8 sps:$4 sm:$0xff]   ;;  %v15203_v4 = vld [vmem:[#allocation34 + $0xd0] ss:$8 sps:$4 sm:$0xff]  }
0x1706   : > { %v15217_v7 = vld [vmem:[#allocation34 + $0xb4] ss:$8 sps:$4 sm:$0xff]  }
0x1707   : > { %v8439_v8 = vor.u32 %v8438_v6, %v8434_v5  ;;  %v15211_v5 = vld [vmem:[#allocation34 + $0xc4] ss:$8 sps:$4 sm:$0xff]   ;;  %v15209_v6 = vld [vmem:[#allocation34 + $0xc0] ss:$8 sps:$4 sm:$0xff]  }
0x1709   : > { %8634 = vmatprep.mubr.bf16.mxu1 %v8439_v8 }
0x170a   : > { %8635 = vmatmul.mubr.bf16.vlgmr.msra.gmra.mxu1 %v8432_v10  ;;  %v15223_v10 = vld [vmem:[#allocation34 + $0xa4] ss:$8 sps:$4 sm:$0xff]  }
0x170b   : > { %9044 = vmatpush1.bf16.msra.mxu1 %v15098_v9  ;;  %9075 = vmatprep.mubr.bf16.mxu1 %v8880_v12  ;;  %v15215_v9 = vld [vmem:[#allocation34 + $0xb0] ss:$8 sps:$4 sm:$0xff]  }
0x170c   : > { %9045 = vmatprep.subr.bf16.mxu1 %v15103_v11 }
0x170f   : > { %9046 = vmatpush1.bf16.msra.mxu1 %v15101_v13  ;;  %v15221_v13 = vld [vmem:[#allocation34 + $0xa0] ss:$8 sps:$4 sm:$0xff]  }
0x1710   : > { %9047 = vmatprep.subr.bf16.mxu1 %v15106_v14  ;;  %v15229_v14 = vld [vmem:[#allocation34 + $0x94] ss:$8 sps:$4 sm:$0xff]  }
0x1713   : > { %9048 = vmatpush1.bf16.msra.mxu1 %v15104_v15 }
0x1714   : > { %9049 = vmatprep.subr.bf16.mxu1 %v15109_v16 }
0x1717   : > { %9050 = vmatpush1.bf16.msra.mxu1 %v15107_v17 }
0x1718   : > { %9051 = vmatprep.subr.bf16.mxu1 %v15112_v18 }
0x171b   : > { %9052 = vmatpush1.bf16.msra.mxu1 %v15110_v19  ;;  %v15227_v19 = vld [vmem:[#allocation34 + $0x90] ss:$8 sps:$4 sm:$0xff]  }
0x171c   : > { %9053 = vmatprep.subr.bf16.mxu1 %v15115_v22 }
0x171f   : > { %9054 = vmatpush1.bf16.msra.mxu1 %v15113_v21 }
0x1720   : > { %9055 = vmatprep.subr.bf16.mxu1 %v15118_v25  ;;  %v9086_v25 = vld [vmem:[#allocation33] sm:$0x3] }
0x1723   : > { %9056 = vmatpush1.bf16.msra.mxu1 %v15116_v29 }
0x1724   : > { %9057 = vmatprep.subr.bf16.mxu1 %v15121_v30  ;;  %v9091_v30 = vrot.slane %v9086_v25, %v17108_v52 }
0x1727   : > { %9058 = vmatpush1.bf16.msra.mxu1 %v15119_v31 }
0x1728   : > { %9059 = vmatprep.subr.bf16.mxu1 %v15124_v32 }
0x172b   : > { %9060 = vmatpush2.bf16.msra.mxu1 %v15122_v0  ;;  %v9095_v0 = vrot.slane %v9086_v25, %v17110_v56  ;;  %v15242_v25 = vld [vmem:[#allocation34 + $0x270] ss:$8 sps:$4 sm:$0xff]  }
0x172c   : > { %9061 = vmatprep.subr.bf16.mxu1 %v15127_v34 }
0x172f   : > { %9062 = vmatpush2.bf16.msra.mxu1 %v15125_v35 }
0x1730   : > { %9063 = vmatprep.subr.bf16.mxu1 %v15130_v37 }
0x1733   : > { %9064 = vmatpush2.bf16.msra.mxu1 %v15128_v38 }
0x1734   : > { %9065 = vmatprep.subr.bf16.mxu1 %v15133_v43 }
0x1737   : > { %9066 = vmatpush2.bf16.msra.mxu1 %v15131_v46 }
0x1738   : > { %9067 = vmatprep.subr.bf16.mxu1 %v15136_v47 }
0x173b   : > { %9068 = vmatpush2.bf16.msra.mxu1 %v15134_v20  ;;  %v15154_v20 = vld [vmem:[#allocation34 + $0x174] ss:$8 sps:$4 sm:$0xff]  }
0x173c   : > { %9069 = vmatprep.subr.bf16.mxu1 %v15139_v48 }
0x173f   : > { %9070 = vmatpush2.bf16.msra.mxu1 %v15137_v23  ;;  %v15152_v23 = vld [vmem:[#allocation34 + $0x170] ss:$8 sps:$4 sm:$0xff]  }
0x1740   : > { %9071 = vmatprep.subr.bf16.mxu1 %v15142_v27  ;;  %v15160_v27 = vld [vmem:[#allocation34 + $0x164] ss:$8 sps:$4 sm:$0xff]  }
0x1743   : > { %9072 = vmatpush2.bf16.msra.mxu1 %v15140_v28  ;;  %v15158_v28 = vld [vmem:[#allocation34 + $0x160] ss:$8 sps:$4 sm:$0xff]  }
0x1744   : > { %9073 = vmatprep.subr.bf16.mxu1 %v15145_v49  ;;  %v15166_v49 = vld [vmem:[#allocation34 + $0x154] ss:$8 sps:$4 sm:$0xff]  }
0x1747   : > { %9074 = vmatpush2.bf16.msra.mxu1 %v15143_v33  ;;  %v15164_v33 = vld [vmem:[#allocation34 + $0x150] ss:$8 sps:$4 sm:$0xff]  }
0x1748   : > { %9623 = vmatprep.subr.bf16.mxu1 %v15148_v39  ;;  %v15178_v39 = vld [vmem:[#allocation34 + $0x134] ss:$8 sps:$4 sm:$0xff]  }
0x174a   : > { %9076 = vmatmul.mubr.bf16.vlgmr.msra.gmra.mxu1 %v8879_v36  ;;  %v15172_v36 = vld [vmem:[#allocation34 + $0x144] ss:$8 sps:$4 sm:$0xff]  }
0x174b   : > { %9624 = vmatpush1.bf16.msra.mxu1 %v15146_v50  ;;  %v15170_v50 = vld [vmem:[#allocation34 + $0x140] ss:$8 sps:$4 sm:$0xff]  }
0x174c   : > { %9625 = vmatprep.subr.bf16.mxu1 %v15151_v42  ;;  %v15176_v42 = vld [vmem:[#allocation34 + $0x130] ss:$8 sps:$4 sm:$0xff]  }
0x174f   : > { %9626 = vmatpush1.bf16.msra.mxu1 %v15149_v51  ;;  %v15184_v51 = vld [vmem:[#allocation34 + $0x124] ss:$8 sps:$4 sm:$0xff]  }
0x1750   : > { %9627 = vmatprep.subr.bf16.mxu1 %v15157_v40  ;;  %v15182_v40 = vld [vmem:[#allocation34 + $0x120] ss:$8 sps:$4 sm:$0xff]  }
0x1753   : > { %9628 = vmatpush1.bf16.msra.mxu1 %v15155_v44  ;;  %v15190_v44 = vld [vmem:[#allocation34 + $0x114] ss:$8 sps:$4 sm:$0xff]  }
0x1754   : > { %9629 = vmatprep.subr.bf16.mxu1 %v15163_v45  ;;  %v15188_v45 = vld [vmem:[#allocation34 + $0x110] ss:$8 sps:$4 sm:$0xff]  }
0x1757   : > { %9630 = vmatpush1.bf16.msra.mxu1 %v15161_v53  ;;  %v15196_v53 = vld [vmem:[#allocation34 + $0x104] ss:$8 sps:$4 sm:$0xff]  }
0x1758   : > { %9631 = vmatprep.subr.bf16.mxu1 %v15169_v54  ;;  %v15194_v54 = vld [vmem:[#allocation34 + $0x100] ss:$8 sps:$4 sm:$0xff]  }
0x175b   : > { %9632 = vmatpush1.bf16.msra.mxu1 %v15167_v55  ;;  %v15202_v55 = vld [vmem:[#allocation34 + $0x1f4] ss:$8 sps:$4 sm:$0xff]  }
0x175c   : > { %9633 = vmatprep.subr.bf16.mxu1 %v15175_v58  ;;  %v15200_v58 = vld [vmem:[#allocation34 + $0x1f0] ss:$8 sps:$4 sm:$0xff]  }
0x175f   : > { %9634 = vmatpush1.bf16.msra.mxu1 %v15173_v41  ;;  %v15208_v41 = vld [vmem:[#allocation34 + $0x1e4] ss:$8 sps:$4 sm:$0xff]  }
0x1760   : > { %9635 = vmatprep.subr.bf16.mxu1 %v15181_v59  ;;  %v15206_v59 = vld [vmem:[#allocation34 + $0x1e0] ss:$8 sps:$4 sm:$0xff]  }
0x1763   : > { %9636 = vmatpush1.bf16.msra.mxu1 %v15179_v26  ;;  %v15214_v26 = vld [vmem:[#allocation34 + $0x1d4] ss:$8 sps:$4 sm:$0xff]  }
0x1764   : > { %9637 = vmatprep.subr.bf16.mxu1 %v15187_v60  ;;  %v15212_v60 = vld [vmem:[#allocation34 + $0x1d0] ss:$8 sps:$4 sm:$0xff]  }
0x1767   : > { %9638 = vmatpush1.bf16.msra.mxu1 %v15185_v61  ;;  %v15220_v61 = vld [vmem:[#allocation34 + $0x1c4] ss:$8 sps:$4 sm:$0xff]  }
0x1768   : > { %9639 = vmatprep.subr.bf16.mxu1 %v15193_v63  ;;  %v15218_v63 = vld [vmem:[#allocation34 + $0x1c0] ss:$8 sps:$4 sm:$0xff]  }
0x176b   : > { %9640 = vmatpush2.bf16.msra.mxu1 %v15191_v1  ;;  %v15226_v1 = vld [vmem:[#allocation34 + $0x1b4] ss:$8 sps:$4 sm:$0xff]  }
0x176c   : > { %9641 = vmatprep.subr.bf16.mxu1 %v15199_v57  ;;  %v15224_v57 = vld [vmem:[#allocation34 + $0x1b0] ss:$8 sps:$4 sm:$0xff]  }
0x176f   : > { %9642 = vmatpush2.bf16.msra.mxu1 %v15197_v2  ;;  %v15232_v2 = vld [vmem:[#allocation34 + $0x1a4] ss:$8 sps:$4 sm:$0xff]  }
0x1770   : > { %9643 = vmatprep.subr.bf16.mxu1 %v15205_v3  ;;  %v15230_v3 = vld [vmem:[#allocation34 + $0x1a0] ss:$8 sps:$4 sm:$0xff]  }
0x1773   : > { %9644 = vmatpush2.bf16.msra.mxu1 %v15203_v4  ;;  %v15235_v4 = vld [vmem:[#allocation34 + $0x84] ss:$8 sps:$4 sm:$0xff]  }
0x1774   : > { %9645 = vmatprep.subr.bf16.mxu1 %v15211_v5  ;;  %v15233_v5 = vld [vmem:[#allocation34 + $0x80] ss:$8 sps:$4 sm:$0xff]  }
0x1777   : > { %9646 = vmatpush2.bf16.msra.mxu1 %v15209_v6  ;;  %v15238_v6 = vld [vmem:[#allocation34 + $0x194] ss:$8 sps:$4 sm:$0xff]  }
0x1778   : > { %9647 = vmatprep.subr.bf16.mxu1 %v15217_v7  ;;  %v15236_v7 = vld [vmem:[#allocation34 + $0x190] ss:$8 sps:$4 sm:$0xff]  }
0x177b   : > { %9648 = vmatpush2.bf16.msra.mxu1 %v15215_v9  ;;  %v15239_v9 = vld [vmem:[#allocation34 + $0x180] ss:$8 sps:$4 sm:$0xff]  }
0x177c   : > { %9649 = vmatprep.subr.bf16.mxu1 %v15223_v10  ;;  %v15244_v10 = vld [vmem:[#allocation34 + $0x274] ss:$8 sps:$4 sm:$0xff]  }
0x177f   : > { %9650 = vmatpush2.bf16.msra.mxu1 %v15221_v13 }
0x1780   : > { %9651 = vmatprep.subr.bf16.mxu1 %v15229_v14 }
0x1783   : > { %9652 = vmatpush2.bf16.msra.mxu1 %v15227_v19 }
0x1784   : > { %9653 = vmatprep.subr.bf16.mxu1 %v15235_v4 }
0x1787   : > { %9654 = vmatpush2.bf16.msra.mxu1 %v15233_v5  ;;  %v9906_v5 = vld [vmem:[#allocation36] sm:$0x3] }
0x17c4   : > { %v8837_v8 = vpop.f32.mrf.mxu0 }
0x17c6   : > { %v8839_v11 = vpop.f32.mrf.mxu0 }
0x17c8   : > { %v8841_v12 = vpop.f32.mrf.mxu0 }
0x17ca   : > { %v8636_v15 = vpop.f32.mrf.mxu1  ;;  %v8842_v16 = vpop.f32.mrf.mxu0 }
0x17cb   : > { %v8838_v17 = vadd.f32 %v8837_v8, %v8636_v15  ;;  %v15241_v8 = vld [vmem:[#allocation34 + $0x184] ss:$8 sps:$4 sm:$0xff]  }
0x17cc   : > { %v8638_v18 = vpop.f32.mrf.mxu1 }
0x17cd   : > { %v8840_v31 = vadd.f32 %v8839_v11, %v8638_v18 }
0x17ce   : > { %v8640_v22 = vpop.f32.mrf.mxu1 }
0x17d0   : > { %v8641_v21 = vpop.f32.mrf.mxu1 }
0x180a   : > { %v9077_v29 = vpop.f32.mrf.mxu1 }
0x180b   : > { %v9084_v32 = vadd.f32 %v9077_v29, %v8838_v17 }
0x180c   : > { %v9079_v34 = vpop.f32.mrf.mxu1 }
0x180d   : > { %v9085_v35 = vadd.f32 %v9079_v34, %v8840_v31  ;;  %v9098_v37 = vadd.f32 %v9091_v30, %v9084_v32  ;;  %v15247_v30 = vld [vmem:[#allocation34 + $0x264] ss:$8 sps:$4 sm:$0xff]   ;;  %v15245_v32 = vld [vmem:[#allocation34 + $0x260] ss:$8 sps:$4 sm:$0xff]   ;;  %v15248_v34 = vld [vmem:[#allocation34 + $0x250] ss:$8 sps:$4 sm:$0xff]  }
0x180e   : > { %v9081_v38 = vpop.f32.mrf.mxu1 }
0x180f   : > { %v9099_v43 = vadd.f32 %v9095_v0, %v9085_v35  ;;  %v9100_v48 = vmax.f32 %v9098_v37, 0.0  ;;  %v15250_v0 = vld [vmem:[#allocation34 + $0x254] ss:$8 sps:$4 sm:$0xff]   ;;  %v15253_v35 = vld [vmem:[#allocation34 + $0x244] ss:$8 sps:$4 sm:$0xff]  }
0x1810   : > { %v9082_v46 = vpop.f32.mrf.mxu1  ;;  %v15251_v37 = vld [vmem:[#allocation34 + $0x240] ss:$8 sps:$4 sm:$0xff]   ;;  %v15256_v38 = vld [vmem:[#allocation34 + $0x234] ss:$8 sps:$4 sm:$0xff]  }
0x1811   : > { %v9101_v47 = vmax.f32 %v9099_v43, 0.0  ;;  %v15254_v43 = vld [vmem:[#allocation34 + $0x230] ss:$8 sps:$4 sm:$0xff]   ;;  %v15259_v46 = vld [vmem:[#allocation34 + $0x224] ss:$8 sps:$4 sm:$0xff]  }
0x1813   : > { %13189 = vmatprep.subr.msk.mxu0 %vm8281_vm13, %v9101_v47  ;;  %v15257_v47 = vld [vmem:[#allocation34 + $0x220] ss:$8 sps:$4 sm:$0xff]  }
0x1814   : > { %13190 = vmatpush1.msk.msra.mxu0 %vm8281_vm13, %v9100_v48  ;;  %v15260_v48 = vld [vmem:[#allocation34 + $0x210] ss:$8 sps:$4 sm:$0xff]  }
0x1815   : > { %13191 = vmatmul.mubr.msk.f32.vlgmr.msra.gmra.mxu0 %vm8277_vm14, %v17497_v24  ;;  %9422 = vmatprep.subr.bf16.mxu0 %v15154_v20  ;;  %v15262_v20 = vld [vmem:[#allocation34 + $0x214] ss:$8 sps:$4 sm:$0xff]  }
0x1816   : > { %9423 = vmatpush1.bf16.msra.mxu0 %v15152_v23  ;;  %v15265_v23 = vld [vmem:[#allocation34 + $0x204] ss:$8 sps:$4 sm:$0xff]  }
0x1817   : > { %9424 = vmatprep.subr.bf16.mxu0 %v15160_v27  ;;  %v15263_v27 = vld [vmem:[#allocation34 + $0x200] ss:$8 sps:$4 sm:$0xff]  }
0x181a   : > { %9425 = vmatpush1.bf16.msra.mxu0 %v15158_v28  ;;  %v15268_v28 = vld [vmem:[#allocation34 + $0x2f4] ss:$8 sps:$4 sm:$0xff]  }
0x181b   : > { %9426 = vmatprep.subr.bf16.mxu0 %v15166_v49  ;;  %v15266_v49 = vld [vmem:[#allocation34 + $0x2f0] ss:$8 sps:$4 sm:$0xff]  }
0x181e   : > { %9427 = vmatpush1.bf16.msra.mxu0 %v15164_v33  ;;  %v15271_v33 = vld [vmem:[#allocation34 + $0x2e4] ss:$8 sps:$4 sm:$0xff]  }
0x181f   : > { %9428 = vmatprep.subr.bf16.mxu0 %v15172_v36  ;;  %v15269_v36 = vld [vmem:[#allocation34 + $0x2e0] ss:$8 sps:$4 sm:$0xff]  }
0x1822   : > { %9429 = vmatpush1.bf16.msra.mxu0 %v15170_v50  ;;  %v15274_v50 = vld [vmem:[#allocation34 + $0x2d4] ss:$8 sps:$4 sm:$0xff]  }
0x1823   : > { %9430 = vmatprep.subr.bf16.mxu0 %v15178_v39  ;;  %v15272_v39 = vld [vmem:[#allocation34 + $0x2d0] ss:$8 sps:$4 sm:$0xff]  }
0x1826   : > { %9431 = vmatpush1.bf16.msra.mxu0 %v15176_v42  ;;  %v15277_v42 = vld [vmem:[#allocation34 + $0x2c4] ss:$8 sps:$4 sm:$0xff]  }
0x1827   : > { %9432 = vmatprep.subr.bf16.mxu0 %v15184_v51  ;;  %v15275_v51 = vld [vmem:[#allocation34 + $0x2c0] ss:$8 sps:$4 sm:$0xff]  }
0x182a   : > { %9433 = vmatpush1.bf16.msra.mxu0 %v15182_v40  ;;  %v15280_v40 = vld [vmem:[#allocation34 + $0x2b4] ss:$8 sps:$4 sm:$0xff]  }
0x182b   : > { %9434 = vmatprep.subr.bf16.mxu0 %v15190_v44  ;;  %v15278_v44 = vld [vmem:[#allocation34 + $0x2b0] ss:$8 sps:$4 sm:$0xff]  }
0x182e   : > { %9435 = vmatpush1.bf16.msra.mxu0 %v15188_v45  ;;  %v15283_v45 = vld [vmem:[#allocation34 + $0x2a4] ss:$8 sps:$4 sm:$0xff]  }
0x182f   : > { %9436 = vmatprep.subr.bf16.mxu0 %v15196_v53  ;;  %v15281_v53 = vld [vmem:[#allocation34 + $0x2a0] ss:$8 sps:$4 sm:$0xff]  }
0x1832   : > { %9437 = vmatpush1.bf16.msra.mxu0 %v15194_v54  ;;  %v15286_v54 = vld [vmem:[#allocation34 + $0x294] ss:$8 sps:$4 sm:$0xff]  }
0x1833   : > { %9438 = vmatprep.subr.bf16.mxu0 %v15202_v55  ;;  %v15284_v55 = vld [vmem:[#allocation34 + $0x290] ss:$8 sps:$4 sm:$0xff]  }
0x1836   : > { %9439 = vmatpush2.bf16.msra.mxu0 %v15200_v58  ;;  %v15289_v58 = vld [vmem:[#allocation34 + $0x284] ss:$8 sps:$4 sm:$0xff]  }
0x1837   : > { %9440 = vmatprep.subr.bf16.mxu0 %v15208_v41  ;;  %v15287_v41 = vld [vmem:[#allocation34 + $0x280] ss:$8 sps:$4 sm:$0xff]  }
0x183a   : > { %9441 = vmatpush2.bf16.msra.mxu0 %v15206_v59 }
0x183b   : > { %9442 = vmatprep.subr.bf16.mxu0 %v15214_v26 }
0x183e   : > { %9443 = vmatpush2.bf16.msra.mxu0 %v15212_v60 }
0x183f   : > { %9444 = vmatprep.subr.bf16.mxu0 %v15220_v61 }
0x1842   : > { %9445 = vmatpush2.bf16.msra.mxu0 %v15218_v63 }
0x1843   : > { %9446 = vmatprep.subr.bf16.mxu0 %v15226_v1 }
0x1846   : > { %9447 = vmatpush2.bf16.msra.mxu0 %v15224_v57 }
0x1847   : > { %9448 = vmatprep.subr.bf16.mxu0 %v15232_v2 }
0x184a   : > { %9449 = vmatpush2.bf16.msra.mxu0 %v15230_v3 }
0x184b   : > { %9450 = vmatprep.subr.bf16.mxu0 %v15238_v6 }
0x184e   : > { %9451 = vmatpush2.bf16.msra.mxu0 %v15236_v7  ;;  %v9911_v7 = vrot.slane %v9906_v5, %v17108_v52 }
0x184f   : > { %9452 = vmatprep.subr.bf16.mxu0 %v15241_v8 }
0x1852   : > { %9453 = vmatpush2.bf16.msra.mxu0 %v15239_v9 }
0x1853   : > { %9863 = vmatprep.subr.bf16.mxu0 %v15244_v10  ;;  %v9915_v10 = vrot.slane %v9906_v5, %v17110_v56  ;;  %v10024_v56 = vld [vmem:[#allocation37 + $0x68] sm:$0xff]  ;;  %v15301_v5 = vld [vmem:[#allocation40 + $0x50] sm:$0xff]  }
0x18d5   : > { %v9174_v11 = vpop.f32.mrf.mxu0 }
0x18d6   : > { %v17516_v12 = vpack.c.bf16 %v9174_v11, %v9174_v11 }
0x18d7   : > { %v9176_v13 = vpop.f32.mrf.mxu0 }
0x18d8   : > { %v9249_v14 = vshll.u32 %v17516_v12, 16  ;;  %v9180_v15 = vpack.c.bf16 %v9176_v13, %v9176_v13  ;;  %v9247_v22 = vshrl.u32 %v17516_v12, 16  ;;  %v9699_v59 = vrot.slane %v17516_v12, 1 }
0x18da   : > { %9655 = vmatprep.mubr.bf16.mxu1 %v9180_v15  ;;  %v9256_v16 = vshll.u32 %v9180_v15, 16  ;;  %v9251_v17 = vrot.slane %v9249_v14, 1  ;;  %v9254_v18 = vshrl.u32 %v9180_v15, 16  ;;  %v9700_v31 = vrot.slane %v9180_v15, 1 }
0x18db   : > { %9656 = vmatmul.mubr.bf16.vlgmr.msra.gmra.mxu1 %v17516_v12 }
0x18dc   : > { %v9258_v19 = vrot.slane %v9256_v16, 1  ;;  %9992 = vmatprep.mubr.f32.mxu1 %v16428_v62  ;;  %v9252_v29 = vor.u32 %v9251_v17, %v9247_v22  ;;  %v10025_v22 = vld [vmem:[#allocation37 + $0x70] sm:$0xff] }
0x18de   : > { %v9259_v21 = vor.u32 %v9258_v19, %v9254_v18  ;;  %v10026_v19 = vld [vmem:[#allocation37 + $0x78] sm:$0xff] }
0x18e0   : > { %9454 = vmatprep.mubr.bf16.mxu0 %v9259_v21  ;;  %v10023_v21 = vld [vmem:[#allocation37 + $0x60] sm:$0xff] }
0x18e1   : > { %9455 = vmatmul.mubr.bf16.vlgmr.msra.gmra.mxu0 %v9252_v29  ;;  %v10020_v29 = vld [vmem:[#allocation37 + $0x48] sm:$0xff] }
0x18e2   : > { %9864 = vmatpush1.bf16.msra.mxu0 %v15242_v25  ;;  %9895 = vmatprep.mubr.bf16.mxu0 %v9700_v31  ;;  %v10022_v25 = vld [vmem:[#allocation37 + $0x58] sm:$0xff] }
0x18e3   : > { %9865 = vmatprep.subr.bf16.mxu0 %v15247_v30  ;;  %v10019_v30 = vld [vmem:[#allocation37 + $0x40] sm:$0xff]  ;;  %v10018_v31 = vld [vmem:[#allocation37 + $0x38] sm:$0xff] }
0x18e6   : > { %9866 = vmatpush1.bf16.msra.mxu0 %v15245_v32  ;;  %v10017_v32 = vld [vmem:[#allocation37 + $0x30] sm:$0xff] }
0x18e7   : > { %9867 = vmatprep.subr.bf16.mxu0 %v15250_v0  ;;  %v10016_v0 = vld [vmem:[#allocation37 + $0x28] sm:$0xff] }
0x18ea   : > { %9868 = vmatpush1.bf16.msra.mxu0 %v15248_v34  ;;  %v10015_v34 = vld [vmem:[#allocation37 + $0x20] sm:$0xff] }
0x18eb   : > { %9869 = vmatprep.subr.bf16.mxu0 %v15253_v35  ;;  %v10014_v35 = vld [vmem:[#allocation37 + $0x18] sm:$0xff] }
0x18ee   : > { %9870 = vmatpush1.bf16.msra.mxu0 %v15251_v37  ;;  %v10013_v37 = vld [vmem:[#allocation37 + $0x10] sm:$0xff] }
0x18ef   : > { %9871 = vmatprep.subr.bf16.mxu0 %v15256_v38  ;;  %v10012_v38 = vld [vmem:[#allocation37 + $0x8] sm:$0xff] }
0x18f2   : > { %9872 = vmatpush1.bf16.msra.mxu0 %v15254_v43  ;;  %v10011_v43 = vld [vmem:[#allocation37] sm:$0xff] }
0x18f3   : > { %9873 = vmatprep.subr.bf16.mxu0 %v15259_v46  ;;  %v10034_v46 = vld [vmem:[#allocation37 + $0xb8] sm:$0xff] }
0x18f6   : > { %9874 = vmatpush1.bf16.msra.mxu0 %v15257_v47  ;;  %v10033_v47 = vld [vmem:[#allocation37 + $0xb0] sm:$0xff] }
0x18f7   : > { %9875 = vmatprep.subr.bf16.mxu0 %v15262_v20  ;;  %v10032_v20 = vld [vmem:[#allocation37 + $0xa8] sm:$0xff] }
0x18fa   : > { %9876 = vmatpush1.bf16.msra.mxu0 %v15260_v48  ;;  %v10031_v48 = vld [vmem:[#allocation37 + $0xa0] sm:$0xff] }
0x18fb   : > { %9877 = vmatprep.subr.bf16.mxu0 %v15265_v23  ;;  %v10030_v23 = vld [vmem:[#allocation37 + $0x98] sm:$0xff] }
0x18fe   : > { %9878 = vmatpush1.bf16.msra.mxu0 %v15263_v27  ;;  %v10029_v27 = vld [vmem:[#allocation37 + $0x90] sm:$0xff] }
0x18ff   : > { %9879 = vmatprep.subr.bf16.mxu0 %v15268_v28  ;;  %v10028_v28 = vld [vmem:[#allocation37 + $0x88] sm:$0xff] }
0x1902   : > { %9880 = vmatpush2.bf16.msra.mxu0 %v15266_v49  ;;  %v10027_v49 = vld [vmem:[#allocation37 + $0x80] sm:$0xff] }
0x1903   : > { %9881 = vmatprep.subr.bf16.mxu0 %v15271_v33 }
0x1906   : > { %9882 = vmatpush2.bf16.msra.mxu0 %v15269_v36 }
0x1907   : > { %9883 = vmatprep.subr.bf16.mxu0 %v15274_v50 }
0x190a   : > { %9884 = vmatpush2.bf16.msra.mxu0 %v15272_v39 }
0x190b   : > { %9885 = vmatprep.subr.bf16.mxu0 %v15277_v42 }
0x190e   : > { %9886 = vmatpush2.bf16.msra.mxu0 %v15275_v51 }
0x190f   : > { %9887 = vmatprep.subr.bf16.mxu0 %v15280_v40 }
0x1912   : > { %9888 = vmatpush2.bf16.msra.mxu0 %v15278_v44  ;;  %v15290_v44 = vld [vmem:[#allocation40 + $0xb8] sm:$0xff]  }
0x1913   : > { %9889 = vmatprep.subr.bf16.mxu0 %v15283_v45  ;;  %v15292_v45 = vld [vmem:[#allocation40 + $0xb0] sm:$0xff]  }
0x1916   : > { %9890 = vmatpush2.bf16.msra.mxu0 %v15281_v53  ;;  %v15294_v53 = vld [vmem:[#allocation40 + $0xa8] sm:$0xff]  }
0x1917   : > { %9891 = vmatprep.subr.bf16.mxu0 %v15286_v54  ;;  %v15296_v54 = vld [vmem:[#allocation40 + $0xa0] sm:$0xff]  }
0x191a   : > { %9892 = vmatpush2.bf16.msra.mxu0 %v15284_v55  ;;  %v15298_v55 = vld [vmem:[#allocation40 + $0x98] sm:$0xff]  }
0x191b   : > { %9893 = vmatprep.subr.bf16.mxu0 %v15289_v58  ;;  %v15300_v58 = vld [vmem:[#allocation40 + $0x90] sm:$0xff]  }
0x191e   : > { %9894 = vmatpush2.bf16.msra.mxu0 %v15287_v41  ;;  %v15302_v41 = vld [vmem:[#allocation40 + $0x88] sm:$0xff]  }
0x191f   : > { %13557 = vmatprep.subr.mxu0 %v16428_v62 }
0x1921   : > { %9896 = vmatmul.mubr.bf16.vlgmr.msra.gmra.mxu0 %v9699_v59 }
0x1922   : > { %13559 = vmatprep.mubr.msk.f32.mxu0 %vm16430_vm5, %v16428_v62 }
0x199b   : > { %v9657_v26 = vpop.f32.mrf.mxu1 }
0x199d   : > { %v9659_v60 = vpop.f32.mrf.mxu1 }
0x199f   : > { %v9661_v61 = vpop.f32.mrf.mxu1 }
0x19a1   : > { %v9456_v63 = vpop.f32.mrf.mxu0  ;;  %v9662_v1 = vpop.f32.mrf.mxu1 }
0x19a2   : > { %v9658_v57 = vadd.f32 %v9657_v26, %v9456_v63  ;;  %v10112_v63 = vld [vmem:[#allocation39] sm:$0xf] }
0x19a3   : > { %v9458_v2 = vpop.f32.mrf.mxu0  ;;  %v15291_v1 = vld [vmem:[#allocation40 + $0x78] sm:$0xff]  }
0x19a4   : > { %v9660_v8 = vadd.f32 %v9659_v60, %v9458_v2  ;;  %v15295_v2 = vld [vmem:[#allocation40 + $0x68] sm:$0xff]  }
0x19a5   : > { %v9460_v3 = vpop.f32.mrf.mxu0 }
0x19a6   : > { %v15297_v3 = vld [vmem:[#allocation40 + $0x60] sm:$0xff]  }
0x19a7   : > { %v9461_v4 = vpop.f32.mrf.mxu0 }
0x19a8   : > { %v15299_v4 = vld [vmem:[#allocation40 + $0x58] sm:$0xff]  }
0x19e1   : > { %v9897_v6 = vpop.f32.mrf.mxu0 }
0x19e2   : > { %v9904_v9 = vadd.f32 %v9897_v6, %v9658_v57  ;;  %v15293_v57 = vld [vmem:[#allocation40 + $0x70] sm:$0xff]   ;;  %v15303_v6 = vld [vmem:[#allocation40 + $0x48] sm:$0xff]  }
0x19e3   : > { %v9899_v11 = vpop.f32.mrf.mxu0 }
0x19e4   : > { %v9905_v12 = vadd.f32 %v9899_v11, %v9660_v8  ;;  %v9918_v13 = vadd.f32 %v9911_v7, %v9904_v9  ;;  %v15304_v7 = vld [vmem:[#allocation40 + $0x80] sm:$0xff]  }
0x19e5   : > { %v9901_v14 = vpop.f32.mrf.mxu0  ;;  %v15305_v8 = vld [vmem:[#allocation40 + $0x40] sm:$0xff]  }
0x19e6   : > { %v9919_v15 = vadd.f32 %v9915_v10, %v9905_v12  ;;  %v9920_v18 = vmax.f32 %v9918_v13, 0.0 }
0x19e7   : > { %v9902_v16 = vpop.f32.mrf.mxu0 }
0x19e8   : > { %v9921_v17 = vmax.f32 %v9919_v15, 0.0  ;;  %v15306_v16 = vld [vmem:[#allocation40 + $0x38] sm:$0xff]  }
0x19ea   : > { %13288 = vmatprep.subr.msk.mxu1 %vm8281_vm13, %v9921_v17 }
0x19eb   : > { %13289 = vmatpush1.msk.msra.mxu1 %vm8281_vm13, %v9920_v18  ;;  %v15307_v18 = vld [vmem:[#allocation40 + $0x30] sm:$0xff]  }
0x19ec   : > { %13290 = vmatmul.mubr.msk.f32.vlgmr.msra.gmra.mxu1 %vm8277_vm14, %v17497_v24  ;;  %10038 = vmatprep.subr.mxu1 %v16428_v62  ;;  %v10021_v24 = vld [vmem:[#allocation37 + $0x50] sm:$0xff] }
0x19ed   : > { %10039 = vmatpush1.msra.mxu1 %v10026_v19  ;;  %v15308_v19 = vld [vmem:[#allocation40 + $0x28] sm:$0xff]  }
0x19ee   : > { %10040 = vmatprep.subr.mxu1 %v16428_v62 }
0x19ef   : > { %10041 = vmatpush1.msra.mxu1 %v10025_v22  ;;  %v15309_v22 = vld [vmem:[#allocation40 + $0x20] sm:$0xff]  }
0x19f0   : > { %10042 = vmatprep.subr.mxu1 %v16428_v62 }
0x19f1   : > { %10043 = vmatpush1.msra.mxu1 %v10024_v56  ;;  %v15310_v56 = vld [vmem:[#allocation40 + $0x18] sm:$0xff]  }
0x19f2   : > { %10044 = vmatprep.subr.mxu1 %v16428_v62 }
0x19f3   : > { %10045 = vmatpush1.msra.mxu1 %v10023_v21  ;;  %v15311_v21 = vld [vmem:[#allocation40 + $0x10] sm:$0xff]  }
0x19f4   : > { %10046 = vmatprep.subr.mxu1 %v16428_v62 }
0x19f5   : > { %10047 = vmatpush1.msra.mxu1 %v10022_v25  ;;  %v15312_v25 = vld [vmem:[#allocation40 + $0x8] sm:$0xff]  }
0x19f6   : > { %10048 = vmatprep.subr.mxu1 %v16428_v62 }
0x19f7   : > { %10049 = vmatpush1.msra.mxu1 %v10021_v24  ;;  %v15313_v24 = vld [vmem:[#allocation40] sm:$0xff]  }
0x19f8   : > { %10050 = vmatprep.subr.mxu1 %v16428_v62 }
0x19f9   : > { %10051 = vmatpush1.msra.mxu1 %v10020_v29  ;;  %v15316_v29 = vld [vmem:[#allocation43 + $0x78] sm:$0xff]  }
0x19fa   : > { %10052 = vmatprep.subr.mxu1 %v16428_v62 }
0x19fb   : > { %10053 = vmatpush1.msra.mxu1 %v10019_v30  ;;  %v15318_v30 = vld [vmem:[#allocation43 + $0x70] sm:$0xff]  }
0x19fc   : > { %10054 = vmatprep.subr.mxu1 %v16428_v62 }
0x19fd   : > { %10055 = vmatpush1.msra.mxu1 %v10018_v31  ;;  %v15320_v31 = vld [vmem:[#allocation43 + $0x68] sm:$0xff]  }
0x19fe   : > { %10056 = vmatprep.subr.mxu1 %v16428_v62 }
0x19ff   : > { %10057 = vmatpush1.msra.mxu1 %v10017_v32  ;;  %v15322_v32 = vld [vmem:[#allocation43 + $0x60] sm:$0xff]  }
0x1a00   : > { %10058 = vmatprep.subr.mxu1 %v16428_v62 }
0x1a01   : > { %10059 = vmatpush1.msra.mxu1 %v10016_v0  ;;  %v15324_v0 = vld [vmem:[#allocation43 + $0x58] sm:$0xff]  }
0x1a02   : > { %10060 = vmatprep.subr.mxu1 %v16428_v62 }
0x1a03   : > { %10061 = vmatpush1.msra.mxu1 %v10015_v34  ;;  %v15326_v34 = vld [vmem:[#allocation43 + $0x50] sm:$0xff]  }
0x1a04   : > { %10062 = vmatprep.subr.mxu1 %v16428_v62 }
0x1a05   : > { %10063 = vmatpush1.msra.mxu1 %v10014_v35 }
0x1a06   : > { %10064 = vmatprep.subr.mxu1 %v16428_v62 }
0x1a07   : > { %10065 = vmatpush1.msra.mxu1 %v10013_v37 }
0x1a08   : > { %10066 = vmatprep.subr.mxu1 %v16428_v62 }
0x1a09   : > { %10067 = vmatpush1.msra.mxu1 %v10012_v38 }
0x1a0a   : > { %10068 = vmatprep.subr.mxu1 %v16428_v62 }
0x1a0b   : > { %10069 = vmatpush1.msra.mxu1 %v10011_v43 }
0x1a0c   : > { %10086 = vmatprep.subr.mxu1 %v16428_v62 }
0x1a0d   : > { %10087 = vmatpush2.msra.mxu1 %v10034_v46 }
0x1a0e   : > { %10088 = vmatprep.subr.mxu1 %v16428_v62 }
0x1a0f   : > { %10089 = vmatpush2.msra.mxu1 %v10033_v47 }
0x1a10   : > { %10090 = vmatprep.subr.mxu1 %v16428_v62 }
0x1a11   : > { %10091 = vmatpush2.msra.mxu1 %v10032_v20 }
0x1a12   : > { %10092 = vmatprep.subr.mxu1 %v16428_v62 }
0x1a13   : > { %10093 = vmatpush2.msra.mxu1 %v10031_v48 }
0x1a14   : > { %10094 = vmatprep.subr.mxu1 %v16428_v62 }
0x1a15   : > { %10095 = vmatpush2.msra.mxu1 %v10030_v23 }
0x1a16   : > { %10096 = vmatprep.subr.mxu1 %v16428_v62 }
0x1a17   : > { %10097 = vmatpush2.msra.mxu1 %v10029_v27 }
0x1a18   : > { %10098 = vmatprep.subr.mxu1 %v16428_v62 }
0x1a19   : > { %10099 = vmatpush2.msra.mxu1 %v10028_v28  ;;  %v13318_v28 = vld [vmem:[#allocation42] ss:$0 sm:$0xff] }
0x1a1a   : > { %10100 = vmatprep.subr.mxu1 %v16428_v62 }
0x1a1b   : > { %10101 = vmatpush2.msra.mxu1 %v10027_v49 }
0x1a1c   : > { %13602 = vmatprep.subr.bf16.mxu1 %v16428_v62 }
0x1aac   : > { %v9994_v33 = vpop.f32.mrf.mxu1 }
0x1aad   : > { %10001 = vrot.lane.b32.xlu0 %v9994_v33, %s16433_s18 }
0x1aae   : > { %v9996_v36 = vpop.f32.mrf.mxu1 }
0x1aaf   : > { %10003 = vrot.lane.b32.xlu1 %v9996_v36, %s16433_s18 }
0x1b1f   : > { %v10002_v50 = vpop.permute.xlu0 %10001 }
0x1b21   : > { %v10004_v39 = vpop.permute.xlu1 %10003 }
0x1b22   : > { %v10006_v42 = vsel %vm10005_vm15, %v10002_v50, %v10004_v39  ;;  %v10010_v51 = vmax.f32 %v9996_v36, %v10004_v39 }
0x1b23   : > { %v10009_v40 = vmax.f32 %v9994_v33, %v10006_v42 }
0x1b24   : > { %13291 = vmatprep.mubr.msk.f32.mxu1 %vm10005_vm15, %v10010_v51  ;;  %v17603_v51 = vld [vmem:[%s17811_s22] sm:$0xf] }
0x1b25   : > { %10103 = vmatmul.mubr.f32.vlgmr.msra.gmra.mxu1 %v10009_v40  ;;  %v15314_v40 = vld [vmem:[#allocation43 + $0x38] sm:$0xff]  }
0x1b26   : > { %13618 = vmatprep.mubr.msk.bf16.mxu1 %vm16430_vm5, %v16428_v62  ;;  %13603 = vmatpush3.bf16.msra.mxu1 %v15290_v44  ;;  %v15315_v44 = vld [vmem:[#allocation43 + $0x30] sm:$0xff]  }
0x1b27   : > { %13604 = vmatprep.subr.bf16.mxu1 %v16428_v62 }
0x1b2a   : > { %13605 = vmatpush3.bf16.msra.mxu1 %v15292_v45  ;;  %v15317_v45 = vld [vmem:[#allocation43 + $0x28] sm:$0xff]  }
0x1b2b   : > { %13606 = vmatprep.subr.bf16.mxu1 %v16428_v62 }
0x1b2e   : > { %13607 = vmatpush3.bf16.msra.mxu1 %v15294_v53  ;;  %v15319_v53 = vld [vmem:[#allocation43 + $0x20] sm:$0xff]  }
0x1b2f   : > { %13608 = vmatprep.subr.bf16.mxu1 %v16428_v62 }
0x1b32   : > { %13609 = vmatpush3.bf16.msra.mxu1 %v15296_v54  ;;  %v15321_v54 = vld [vmem:[#allocation43 + $0x18] sm:$0xff]  }
0x1b33   : > { %13610 = vmatprep.subr.bf16.mxu1 %v16428_v62 }
0x1b36   : > { %13611 = vmatpush3.bf16.msra.mxu1 %v15298_v55  ;;  %v15323_v55 = vld [vmem:[#allocation43 + $0x10] sm:$0xff]  }
0x1b37   : > { %13612 = vmatprep.subr.bf16.mxu1 %v16428_v62 }
0x1b3a   : > { %13613 = vmatpush3.bf16.msra.mxu1 %v15300_v58  ;;  %v15325_v58 = vld [vmem:[#allocation43 + $0x8] sm:$0xff]  }
0x1b3b   : > { %13614 = vmatprep.subr.bf16.mxu1 %v16428_v62 }
0x1b3e   : > { %13615 = vmatpush3.bf16.msra.mxu1 %v15302_v41  ;;  %v15327_v41 = vld [vmem:[#allocation43] sm:$0xff]  }
0x1b3f   : > { %13616 = vmatprep.subr.bf16.mxu1 %v16428_v62 }
0x1b42   : > { %13617 = vmatpush3.bf16.msra.mxu1 %v15304_v7  ;;  %v15333_v7 = vld [vmem:[#allocation43 + $0xa0] sm:$0xff]  }
0x1b43   : > { %13627 = vmatprep.subr.bf16.mxu1 %v16428_v62 }
0x1be5   : > { %v10104_v59 = vpop.f32.mrf.mxu1 }
0x1be6   : > { %v10109_v26 = vrot.slane %v10104_v59, 1 }
0x1be7   : > { %v10106_v60 = vpop.f32.mrf.mxu1 }
0x1be8   : > { %v10111_v61 = vmax.f32 %v10104_v59, %v10109_v26  ;;  %v15328_v59 = vld [vmem:[#allocation43 + $0x48] sm:$0xff]   ;;  %v15329_v26 = vld [vmem:[#allocation43 + $0x40] sm:$0xff]  }
0x1bea   : > { %13558 = vmatpush3.msk.msra.mxu0 %vm10117_vm0, %v10111_v61 }
0x1beb   : > { %13560 = vmatmul.mubr.msk.f32.vlgmr.msra.gmra.mxu0 %vm10113_vm1, %v10112_v63  ;;  %13562 = vmatprep.subr.bf16.mxu0 %v16428_v62 }
0x1bec   : > { %13563 = vmatpush3.bf16.msra.mxu0 %v15291_v1  ;;  %13578 = vmatprep.mubr.msk.bf16.mxu0 %vm16430_vm5, %v16428_v62 }
0x1bed   : > { %13564 = vmatprep.subr.bf16.mxu0 %v16428_v62 }
0x1bf0   : > { %13565 = vmatpush3.bf16.msra.mxu0 %v15293_v57 }
0x1bf1   : > { %13566 = vmatprep.subr.bf16.mxu0 %v16428_v62 }
0x1bf4   : > { %13567 = vmatpush3.bf16.msra.mxu0 %v15295_v2 }
0x1bf5   : > { %13568 = vmatprep.subr.bf16.mxu0 %v16428_v62 }
0x1bf8   : > { %13569 = vmatpush3.bf16.msra.mxu0 %v15297_v3  ;;  %v15330_v3 = vld [vmem:[#allocation43 + $0xb8] sm:$0xff]  }
0x1bf9   : > { %13570 = vmatprep.subr.bf16.mxu0 %v16428_v62 }
0x1bfc   : > { %13571 = vmatpush3.bf16.msra.mxu0 %v15299_v4 }
0x1bfd   : > { %13572 = vmatprep.subr.bf16.mxu0 %v16428_v62 }
0x1c00   : > { %13573 = vmatpush3.bf16.msra.mxu0 %v15301_v5  ;;  %v15331_v5 = vld [vmem:[#allocation43 + $0xb0] sm:$0xff]  }
0x1c01   : > { %13574 = vmatprep.subr.bf16.mxu0 %v16428_v62 }
0x1c04   : > { %13575 = vmatpush3.bf16.msra.mxu0 %v15303_v6  ;;  %v15332_v6 = vld [vmem:[#allocation43 + $0xa8] sm:$0xff]  }
0x1c05   : > { %13576 = vmatprep.subr.bf16.mxu0 %v16428_v62 }
0x1c08   : > { %13577 = vmatpush3.bf16.msra.mxu0 %v15305_v8  ;;  %v15334_v8 = vld [vmem:[#allocation43 + $0x98] sm:$0xff]  }
0x1c09   : > { %13582 = vmatprep.subr.bf16.mxu0 %v16428_v62 }
0x1cab   : > { %v10187_v9 = vpop.f32.mrf.mxu0 }
0x1cac   : > { %v10192_v10 = vpack.c.bf16 %v10187_v9, %v10187_v9  ;;  %v15335_v9 = vld [vmem:[#allocation43 + $0x90] sm:$0xff]  }
0x1cad   : > { %v13561_v11 = vpop.f32.mrf.mxu0 }
0x1cae   : > { %v10229_v12 = vshll.u32 %v10192_v10, 16  ;;  %v10428_v13 = vrot.slane %v10192_v10, 1  ;;  %v10227_v14 = vshrl.u32 %v10192_v10, 16  ;;  %v15337_v11 = vld [vmem:[#allocation43 + $0x80] sm:$0xff]  }
0x1cb0   : > { %v10231_v15 = vrot.slane %v10229_v12, 1  ;;  %13619 = vmatmul.mubr.bf16.vlgmr.msra.gmra.mxu1 %v10428_v13  ;;  %v15338_v13 = vld [vmem:[#allocation46 + $0x38] sm:$0xff]  }
0x1cb1   : > { %13643 = vmatprep.mubr.msk.bf16.mxu1 %vm16430_vm5, %v16428_v62  ;;  %13628 = vmatpush3.bf16.msra.mxu1 %v15316_v29 }
0x1cb2   : > { %v10232_v17 = vor.u32 %v10231_v15, %v10227_v14  ;;  %13629 = vmatprep.subr.bf16.mxu1 %v16428_v62  ;;  %v15339_v14 = vld [vmem:[#allocation46 + $0x30] sm:$0xff]   ;;  %v15341_v15 = vld [vmem:[#allocation46 + $0x28] sm:$0xff]  }
0x1cb4   : > { %13579 = vmatmul.mubr.bf16.vlgmr.msra.gmra.mxu0 %v10232_v17  ;;  %v15345_v17 = vld [vmem:[#allocation46 + $0x18] sm:$0xff]  }
0x1cb5   : > { %13583 = vmatpush3.bf16.msra.mxu0 %v15306_v16  ;;  %13598 = vmatprep.mubr.msk.bf16.mxu0 %vm16430_vm5, %v16428_v62  ;;  %v15343_v16 = vld [vmem:[#allocation46 + $0x20] sm:$0xff]  }
0x1cb6   : > { %13584 = vmatprep.subr.bf16.mxu0 %v16428_v62  ;;  %13630 = vmatpush3.bf16.msra.mxu1 %v15318_v30 }
0x1cb7   : > { %13631 = vmatprep.subr.bf16.mxu1 %v16428_v62 }
0x1cb9   : > { %13585 = vmatpush3.bf16.msra.mxu0 %v15307_v18  ;;  %v15347_v18 = vld [vmem:[#allocation46 + $0x10] sm:$0xff]  }
0x1cba   : > { %13586 = vmatprep.subr.bf16.mxu0 %v16428_v62  ;;  %13632 = vmatpush3.bf16.msra.mxu1 %v15320_v31 }
0x1cbb   : > { %13633 = vmatprep.subr.bf16.mxu1 %v16428_v62 }
0x1cbd   : > { %13587 = vmatpush3.bf16.msra.mxu0 %v15308_v19  ;;  %v15349_v19 = vld [vmem:[#allocation46 + $0x8] sm:$0xff]  }
0x1cbe   : > { %13588 = vmatprep.subr.bf16.mxu0 %v16428_v62  ;;  %13634 = vmatpush3.bf16.msra.mxu1 %v15322_v32 }
0x1cbf   : > { %13635 = vmatprep.subr.bf16.mxu1 %v16428_v62 }
0x1cc1   : > { %13589 = vmatpush3.bf16.msra.mxu0 %v15309_v22 }
0x1cc2   : > { %13590 = vmatprep.subr.bf16.mxu0 %v16428_v62  ;;  %13636 = vmatpush3.bf16.msra.mxu1 %v15324_v0 }
0x1cc3   : > { %13637 = vmatprep.subr.bf16.mxu1 %v16428_v62 }
0x1cc5   : > { %13591 = vmatpush3.bf16.msra.mxu0 %v15310_v56 }
0x1cc6   : > { %13592 = vmatprep.subr.bf16.mxu0 %v16428_v62  ;;  %13638 = vmatpush3.bf16.msra.mxu1 %v15326_v34  ;;  %v13345_v34 = vld [vmem:[#allocation45] ss:$0 sm:$0xff] }
0x1cc7   : > { %13639 = vmatprep.subr.bf16.mxu1 %v16428_v62 }
0x1cc9   : > { %13593 = vmatpush3.bf16.msra.mxu0 %v15311_v21 }
0x1cca   : > { %13594 = vmatprep.subr.bf16.mxu0 %v16428_v62  ;;  %13640 = vmatpush3.bf16.msra.mxu1 %v15328_v59  ;;  %v15357_v59 = vld [vmem:[#allocation46 + $0xa0] sm:$0xff]  }
0x1ccb   : > { %13641 = vmatprep.subr.bf16.mxu1 %v16428_v62 }
0x1ccd   : > { %13595 = vmatpush3.bf16.msra.mxu0 %v15312_v25 }
0x1cce   : > { %13596 = vmatprep.subr.bf16.mxu0 %v16428_v62  ;;  %13642 = vmatpush3.bf16.msra.mxu1 %v15329_v26  ;;  %v15358_v26 = vld [vmem:[#allocation46 + $0x98] sm:$0xff]  }
0x1ccf   : > { %13667 = vmatprep.subr.bf16.mxu1 %v16428_v62 }
0x1cd1   : > { %13597 = vmatpush3.bf16.msra.mxu0 %v15313_v24 }
0x1cd2   : > { %13622 = vmatprep.subr.mxu0 %v16428_v62 }
0x1cd4   : > { %13599 = vmatmul.mubr.bf16.vlgmr.msra.gmra.mxu0 %v10192_v10  ;;  %v15336_v10 = vld [vmem:[#allocation43 + $0x88] sm:$0xff]  }
0x1cd5   : > { %13624 = vmatprep.mubr.msk.f32.mxu0 %vm16430_vm5, %v16428_v62 }
0x1d70   : > { %v10512_v35 = vpop.f32.mrf.mxu1 }
0x1d72   : > { %v13620_v37 = vpop.f32.mrf.mxu1 }
0x1d74   : > { %v10316_v38 = vpop.f32.mrf.mxu0  ;;  %v10515_v43 = vpop.f32.mrf.mxu1 }
0x1d76   : > { %v13580_v46 = vpop.f32.mrf.mxu0  ;;  %v13621_v47 = vpop.f32.mrf.mxu1 }
0x1d77   : > { %v15340_v47 = vld [vmem:[#allocation46 + $0x78] sm:$0xff]  }
0x1d78   : > { %v10319_v20 = vpop.f32.mrf.mxu0 }
0x1d7a   : > { %v13581_v48 = vpop.f32.mrf.mxu0 }
0x1d7b   : > { %v15342_v48 = vld [vmem:[#allocation46 + $0x70] sm:$0xff]  }
0x1d94   : > { %v10404_v23 = vpop.f32.mrf.mxu0 }
0x1d95   : > { %v10405_v27 = vadd.f32 %v10404_v23, %v10316_v38  ;;  %v15344_v23 = vld [vmem:[#allocation46 + $0x68] sm:$0xff]  }
0x1d96   : > { %v13600_v49 = vpop.f32.mrf.mxu0 }
0x1d97   : > { %v10518_v33 = vadd.f32 %v10512_v35, %v10405_v27  ;;  %v15346_v27 = vld [vmem:[#allocation46 + $0x60] sm:$0xff]   ;;  %v15350_v49 = vld [vmem:[#allocation46 + $0x50] sm:$0xff]  }
0x1d98   : > { %v10407_v36 = vpop.f32.mrf.mxu0 }
0x1d99   : > { %v10526_v50 = vadd.f32 %v13318_v28, %v10518_v33  ;;  %v15348_v28 = vld [vmem:[#allocation46 + $0x58] sm:$0xff]   ;;  %v15351_v33 = vld [vmem:[#allocation46] sm:$0xff]   ;;  %v15352_v36 = vld [vmem:[#allocation46 + $0x48] sm:$0xff]  }
0x1d9a   : > { %v13601_v39 = vpop.f32.mrf.mxu0 }
0x1d9b   : > { %v10527_v42 = vmax.f32 %v10526_v50, 0.0  ;;  %v15353_v50 = vld [vmem:[#allocation46 + $0x40] sm:$0xff]  }
0x1d9d   : > { %13623 = vmatpush3.msk.msra.mxu0 %vm10532_vm2, %v10527_v42 }
0x1d9e   : > { %13625 = vmatmul.mubr.msk.f32.vlgmr.msra.gmra.mxu0 %vm10528_vm4, %v17603_v51  ;;  %13647 = vmatprep.subr.bf16.mxu0 %v16428_v62 }
0x1d9f   : > { %13648 = vmatpush3.bf16.msra.mxu0 %v15314_v40  ;;  %13663 = vmatprep.mubr.msk.bf16.mxu0 %vm16430_vm5, %v16428_v62 }
0x1da0   : > { %13649 = vmatprep.subr.bf16.mxu0 %v16428_v62 }
0x1da3   : > { %13650 = vmatpush3.bf16.msra.mxu0 %v15315_v44 }
0x1da4   : > { %13651 = vmatprep.subr.bf16.mxu0 %v16428_v62 }
0x1da7   : > { %13652 = vmatpush3.bf16.msra.mxu0 %v15317_v45 }
0x1da8   : > { %13653 = vmatprep.subr.bf16.mxu0 %v16428_v62 }
0x1dab   : > { %13654 = vmatpush3.bf16.msra.mxu0 %v15319_v53 }
0x1dac   : > { %13655 = vmatprep.subr.bf16.mxu0 %v16428_v62 }
0x1daf   : > { %13656 = vmatpush3.bf16.msra.mxu0 %v15321_v54  ;;  %v15354_v54 = vld [vmem:[#allocation46 + $0xb8] sm:$0xff]  }
0x1db0   : > { %13657 = vmatprep.subr.bf16.mxu0 %v16428_v62 }
0x1db3   : > { %13658 = vmatpush3.bf16.msra.mxu0 %v15323_v55 }
0x1db4   : > { %13659 = vmatprep.subr.bf16.mxu0 %v16428_v62 }
0x1db7   : > { %13660 = vmatpush3.bf16.msra.mxu0 %v15325_v58  ;;  %v15355_v58 = vld [vmem:[#allocation46 + $0xb0] sm:$0xff]  }
0x1db8   : > { %13661 = vmatprep.subr.bf16.mxu0 %v16428_v62 }
0x1dbb   : > { %13662 = vmatpush3.bf16.msra.mxu0 %v15327_v41  ;;  %v15356_v41 = vld [vmem:[#allocation46 + $0xa8] sm:$0xff]  }
0x1dbc   : > { %13687 = vmatprep.subr.mxu0 %v16428_v62 }
0x1e5e   : > { %v10602_v60 = vpop.f32.mrf.mxu0 }
0x1e5f   : > { %v10606_v61 = vpack.c.bf16 %v10602_v60, %v10602_v60  ;;  %v15359_v60 = vld [vmem:[#allocation46 + $0x90] sm:$0xff]  }
0x1e60   : > { %v13626_v63 = vpop.f32.mrf.mxu0 }
0x1e61   : > { %v10643_v1 = vshll.u32 %v10606_v61, 16  ;;  %13664 = vmatmul.mubr.bf16.vlgmr.msra.gmra.mxu0 %v10606_v61  ;;  %v10641_v57 = vshrl.u32 %v10606_v61, 16  ;;  %v10842_v12 = vrot.slane %v10606_v61, 1  ;;  %v15360_v61 = vld [vmem:[#allocation46 + $0x88] sm:$0xff]   ;;  %v15361_v63 = vld [vmem:[#allocation46 + $0x80] sm:$0xff]  }
0x1e62   : > { %13689 = vmatprep.mubr.msk.f32.mxu0 %vm16430_vm5, %v16428_v62 }
0x1e63   : > { %v10645_v2 = vrot.slane %v10643_v1, 1 }
0x1e65   : > { %v10646_v4 = vor.u32 %v10645_v2, %v10641_v57 }
0x1e67   : > { %13644 = vmatmul.mubr.bf16.vlgmr.msra.gmra.mxu1 %v10646_v4 }
0x1e68   : > { %13668 = vmatpush3.bf16.msra.mxu1 %v15330_v3  ;;  %13683 = vmatprep.mubr.msk.bf16.mxu1 %vm16430_vm5, %v16428_v62 }
0x1e69   : > { %13669 = vmatprep.subr.bf16.mxu1 %v16428_v62 }
0x1e6c   : > { %13670 = vmatpush3.bf16.msra.mxu1 %v15331_v5 }
0x1e6d   : > { %13671 = vmatprep.subr.bf16.mxu1 %v16428_v62 }
0x1e70   : > { %13672 = vmatpush3.bf16.msra.mxu1 %v15332_v6 }
0x1e71   : > { %13673 = vmatprep.subr.bf16.mxu1 %v16428_v62 }
0x1e74   : > { %13674 = vmatpush3.bf16.msra.mxu1 %v15333_v7 }
0x1e75   : > { %13675 = vmatprep.subr.bf16.mxu1 %v16428_v62 }
0x1e78   : > { %13676 = vmatpush3.bf16.msra.mxu1 %v15334_v8 }
0x1e79   : > { %13677 = vmatprep.subr.bf16.mxu1 %v16428_v62 }
0x1e7c   : > { %13678 = vmatpush3.bf16.msra.mxu1 %v15335_v9 }
0x1e7d   : > { %13679 = vmatprep.subr.bf16.mxu1 %v16428_v62 }
0x1e80   : > { %13680 = vmatpush3.bf16.msra.mxu1 %v15336_v10 }
0x1e81   : > { %13681 = vmatprep.subr.bf16.mxu1 %v16428_v62 }
0x1e84   : > { %13682 = vmatpush3.bf16.msra.mxu1 %v15337_v11  ;;  %v13372_v11 = vld [vmem:[#allocation48] ss:$0 sm:$0xff] }
0x1e85   : > { %13712 = vmatprep.subr.bf16.mxu1 %v16428_v62 }
0x1e87   : > { %13684 = vmatmul.mubr.bf16.vlgmr.msra.gmra.mxu1 %v10842_v12 }
0x1e88   : > { %13728 = vmatprep.mubr.msk.bf16.mxu1 %vm16430_vm5, %v16428_v62  ;;  %13713 = vmatpush3.bf16.msra.mxu1 %v15338_v13 }
0x1e89   : > { %13714 = vmatprep.subr.bf16.mxu1 %v16428_v62 }
0x1e8c   : > { %13715 = vmatpush3.bf16.msra.mxu1 %v15339_v14 }
0x1e8d   : > { %13716 = vmatprep.subr.bf16.mxu1 %v16428_v62 }
0x1e90   : > { %13717 = vmatpush3.bf16.msra.mxu1 %v15341_v15 }
0x1e91   : > { %13718 = vmatprep.subr.bf16.mxu1 %v16428_v62 }
0x1e94   : > { %13719 = vmatpush3.bf16.msra.mxu1 %v15343_v16 }
0x1e95   : > { %13720 = vmatprep.subr.bf16.mxu1 %v16428_v62 }
0x1e98   : > { %13721 = vmatpush3.bf16.msra.mxu1 %v15345_v17 }
0x1e99   : > { %13722 = vmatprep.subr.bf16.mxu1 %v16428_v62 }
0x1e9c   : > { %13723 = vmatpush3.bf16.msra.mxu1 %v15347_v18  ;;  %v11436_v18 = vld [vmem:[#allocation49 + $0x38] sm:$0xff] }
0x1e9d   : > { %13724 = vmatprep.subr.bf16.mxu1 %v16428_v62 }
0x1ea0   : > { %13725 = vmatpush3.bf16.msra.mxu1 %v15349_v19  ;;  %v11435_v19 = vld [vmem:[#allocation49 + $0x30] sm:$0xff] }
0x1ea1   : > { %13726 = vmatprep.subr.bf16.mxu1 %v16428_v62 }
0x1ea4   : > { %13727 = vmatpush3.bf16.msra.mxu1 %v15351_v33  ;;  %v11608_v33 = vld [vmem:[%s17812_s16 + $0x30] sm:$0xff] }
0x1ea5   : > { %13752 = vmatprep.subr.mxu1 %v16428_v62 }
0x1f21   : > { %v10818_v22 = vpop.f32.mrf.mxu0 }
0x1f23   : > { %v13665_v56 = vpop.f32.mrf.mxu0 }
0x1f24   : > { %v11433_v56 = vld [vmem:[#allocation49 + $0x20] sm:$0xff] }
0x1f25   : > { %v10821_v21 = vpop.f32.mrf.mxu0 }
0x1f26   : > { %v11432_v21 = vld [vmem:[#allocation49 + $0x18] sm:$0xff] }
0x1f27   : > { %v10730_v25 = vpop.f32.mrf.mxu1  ;;  %v13666_v24 = vpop.f32.mrf.mxu0 }
0x1f28   : > { %v10819_v32 = vadd.f32 %v10818_v22, %v10730_v25  ;;  %v11434_v22 = vld [vmem:[#allocation49 + $0x28] sm:$0xff]  ;;  %v11429_v24 = vld [vmem:[#allocation49] sm:$0xff] }
0x1f29   : > { %v13645_v29 = vpop.f32.mrf.mxu1  ;;  %v11430_v25 = vld [vmem:[#allocation49 + $0x8] sm:$0xff] }
0x1f2b   : > { %v10733_v30 = vpop.f32.mrf.mxu1 }
0x1f2d   : > { %v13646_v31 = vpop.f32.mrf.mxu1 }
0x1f47   : > { %v10926_v0 = vpop.f32.mrf.mxu1 }
0x1f48   : > { %v10932_v35 = vadd.f32 %v10926_v0, %v10819_v32 }
0x1f49   : > { %v13685_v37 = vpop.f32.mrf.mxu1 }
0x1f4a   : > { %v10940_v38 = vadd.f32 %v13345_v34, %v10932_v35 }
0x1f4b   : > { %v10929_v43 = vpop.f32.mrf.mxu1 }
0x1f4c   : > { %v10941_v46 = vmax.f32 %v10940_v38, 0.0  ;;  %v11514_v38 = vld [vmem:[#allocation51] sm:$0x1] }
0x1f4d   : > { %v13686_v20 = vpop.f32.mrf.mxu1  ;;  %v11600_v43 = vld [vmem:[#allocation52 + $0x38] sm:$0xff] }
0x1f4e   : > { %13688 = vmatpush3.msk.msra.mxu0 %vm10532_vm2, %v10941_v46  ;;  %v11599_v46 = vld [vmem:[#allocation52 + $0x30] sm:$0xff]  ;;  %v11597_v20 = vld [vmem:[#allocation52 + $0x20] sm:$0xff] }
0x1f4f   : > { %13690 = vmatmul.mubr.msk.f32.vlgmr.msra.gmra.mxu0 %vm10528_vm4, %v17603_v51  ;;  %13692 = vmatprep.subr.bf16.mxu0 %v16428_v62 }
0x1f50   : > { %13693 = vmatpush3.bf16.msra.mxu0 %v15340_v47  ;;  %13708 = vmatprep.mubr.msk.bf16.mxu0 %vm16430_vm5, %v16428_v62  ;;  %v11598_v47 = vld [vmem:[#allocation52 + $0x28] sm:$0xff] }
0x1f51   : > { %13694 = vmatprep.subr.bf16.mxu0 %v16428_v62 }
0x1f54   : > { %13695 = vmatpush3.bf16.msra.mxu0 %v15342_v48  ;;  %v11596_v48 = vld [vmem:[#allocation52 + $0x18] sm:$0xff] }
0x1f55   : > { %13696 = vmatprep.subr.bf16.mxu0 %v16428_v62 }
0x1f58   : > { %13697 = vmatpush3.bf16.msra.mxu0 %v15344_v23  ;;  %v11595_v23 = vld [vmem:[#allocation52 + $0x10] sm:$0xff] }
0x1f59   : > { %13698 = vmatprep.subr.bf16.mxu0 %v16428_v62 }
0x1f5c   : > { %13699 = vmatpush3.bf16.msra.mxu0 %v15346_v27  ;;  %v11594_v27 = vld [vmem:[#allocation52 + $0x8] sm:$0xff] }
0x1f5d   : > { %13700 = vmatprep.subr.bf16.mxu0 %v16428_v62 }
0x1f60   : > { %13701 = vmatpush3.bf16.msra.mxu0 %v15348_v28  ;;  %v11593_v28 = vld [vmem:[#allocation52] sm:$0xff] }
0x1f61   : > { %13702 = vmatprep.subr.bf16.mxu0 %v16428_v62 }
0x1f64   : > { %13703 = vmatpush3.bf16.msra.mxu0 %v15350_v49  ;;  %v11609_v49 = vld [vmem:[%s17812_s16 + $0x38] sm:$0xff] }
0x1f65   : > { %13704 = vmatprep.subr.bf16.mxu0 %v16428_v62 }
0x1f68   : > { %13705 = vmatpush3.bf16.msra.mxu0 %v15352_v36  ;;  %v11607_v36 = vld [vmem:[%s17812_s16 + $0x28] sm:$0xff] }
0x1f69   : > { %13706 = vmatprep.subr.bf16.mxu0 %v16428_v62 }
0x1f6c   : > { %13707 = vmatpush3.bf16.msra.mxu0 %v15353_v50  ;;  %v11606_v50 = vld [vmem:[%s17812_s16 + $0x20] sm:$0xff] }
0x1f6d   : > { %13732 = vmatprep.subr.bf16.mxu0 %v16428_v62 }
0x200f   : > { %v11011_v39 = vpop.f32.mrf.mxu0 }
0x2010   : > { %v11015_v42 = vpack.c.bf16 %v11011_v39, %v11011_v39  ;;  %v11605_v39 = vld [vmem:[%s17812_s16 + $0x18] sm:$0xff] }
0x2011   : > { %v13691_v40 = vpop.f32.mrf.mxu0 }
0x2012   : > { %v11052_v44 = vshll.u32 %v11015_v42, 16  ;;  %13729 = vmatmul.mubr.bf16.vlgmr.msra.gmra.mxu1 %v11015_v42  ;;  %v11050_v45 = vshrl.u32 %v11015_v42, 16  ;;  %v11251_v1 = vrot.slane %v11015_v42, 1 }
0x2013   : > { %13754 = vmatprep.mubr.msk.f32.mxu1 %vm16430_vm5, %v16428_v62 }
0x2014   : > { %v11054_v53 = vrot.slane %v11052_v44, 1  ;;  %v11604_v44 = vld [vmem:[%s17812_s16 + $0x10] sm:$0xff] }
0x2016   : > { %v11055_v55 = vor.u32 %v11054_v53, %v11050_v45  ;;  %v11603_v45 = vld [vmem:[%s17812_s16 + $0x8] sm:$0xff]  ;;  %v11602_v53 = vld [vmem:[%s17812_s16] sm:$0xff] }
0x2018   : > { %13709 = vmatmul.mubr.bf16.vlgmr.msra.gmra.mxu0 %v11055_v55  ;;  %v11601_v55 = vld [vmem:[#allocation54] sm:$0x1] }
0x2019   : > { %13733 = vmatpush3.bf16.msra.mxu0 %v15354_v54  ;;  %13748 = vmatprep.mubr.msk.bf16.mxu0 %vm16430_vm5, %v16428_v62  ;;  %v11614_v54 = vld [vmem:[%s16672_s29 + $0x18] sm:$0xff] }
0x201a   : > { %13734 = vmatprep.subr.bf16.mxu0 %v16428_v62 }
0x201d   : > { %13735 = vmatpush3.bf16.msra.mxu0 %v15355_v58 }
0x201e   : > { %13736 = vmatprep.subr.bf16.mxu0 %v16428_v62 }
0x2021   : > { %13737 = vmatpush3.bf16.msra.mxu0 %v15356_v41 }
0x2022   : > { %13738 = vmatprep.subr.bf16.mxu0 %v16428_v62 }
0x2025   : > { %13739 = vmatpush3.bf16.msra.mxu0 %v15357_v59 }
0x2026   : > { %13740 = vmatprep.subr.bf16.mxu0 %v16428_v62 }
0x2029   : > { %13741 = vmatpush3.bf16.msra.mxu0 %v15358_v26 }
0x202a   : > { %13742 = vmatprep.subr.bf16.mxu0 %v16428_v62 }
0x202d   : > { %13743 = vmatpush3.bf16.msra.mxu0 %v15359_v60  ;;  %v11613_v60 = vld [vmem:[%s16672_s29 + $0x10] sm:$0xff] }
0x202e   : > { %13744 = vmatprep.subr.bf16.mxu0 %v16428_v62 }
0x2031   : > { %13745 = vmatpush3.bf16.msra.mxu0 %v15360_v61  ;;  %v11612_v61 = vld [vmem:[%s16672_s29 + $0x8] sm:$0xff] }
0x2032   : > { %13746 = vmatprep.subr.bf16.mxu0 %v16428_v62 }
0x2035   : > { %13747 = vmatpush3.bf16.msra.mxu0 %v15361_v63  ;;  %v11611_v63 = vld [vmem:[%s16672_s29] sm:$0xff] }
0x2036   : > { %13776 = vmatprep.subr.mxu0 %v16428_v62 }
0x2038   : > { %13749 = vmatmul.mubr.bf16.vlgmr.msra.gmra.mxu0 %v11251_v1  ;;  %v11610_v1 = vld [vmem:[#allocation55] sm:$0x1] }
0x2039   : > { %13778 = vmatprep.mubr.msk.f32.mxu0 %vm16430_vm5, %v16428_v62 }
0x20d2   : > { %v11227_v57 = vpop.f32.mrf.mxu1 }
0x20d4   : > { %v13730_v2 = vpop.f32.mrf.mxu1 }
0x20d6   : > { %v11230_v3 = vpop.f32.mrf.mxu1 }
0x20d8   : > { %v11139_v4 = vpop.f32.mrf.mxu0  ;;  %v13731_v5 = vpop.f32.mrf.mxu1 }
0x20d9   : > { %v11228_v9 = vadd.f32 %v11227_v57, %v11139_v4  ;;  %v11615_v5 = vld [vmem:[#allocation57] sm:$0x1] }
0x20da   : > { %v13710_v6 = vpop.f32.mrf.mxu0 }
0x20dc   : > { %v11142_v7 = vpop.f32.mrf.mxu0 }
0x20de   : > { %v13711_v8 = vpop.f32.mrf.mxu0 }
0x20f8   : > { %v11335_v10 = vpop.f32.mrf.mxu0 }
0x20f9   : > { %v11341_v12 = vadd.f32 %v11335_v10, %v11228_v9 }
0x20fa   : > { %v13750_v13 = vpop.f32.mrf.mxu0 }
0x20fb   : > { %v11349_v14 = vadd.f32 %v13372_v11, %v11341_v12 }
0x20fc   : > { %v11338_v15 = vpop.f32.mrf.mxu0 }
0x20fd   : > { %v11350_v16 = vmax.f32 %v11349_v14, 0.0 }
0x20fe   : > { %v13751_v17 = vpop.f32.mrf.mxu0 }
0x20ff   : > { %13753 = vmatpush3.msk.msra.mxu1 %vm10532_vm2, %v11350_v16 }
0x2100   : > { %13755 = vmatmul.mubr.msk.f32.vlgmr.msra.gmra.mxu1 %vm10528_vm4, %v17603_v51  ;;  %13757 = vmatprep.subr.mxu1 %v16428_v62  ;;  %v11431_v51 = vld [vmem:[#allocation49 + $0x10] sm:$0xff] }
0x2101   : > { %13773 = vmatprep.mubr.msk.f32.mxu1 %vm16430_vm5, %v16428_v62  ;;  %13758 = vmatpush3.msra.mxu1 %v11436_v18 }
0x2102   : > { %13759 = vmatprep.subr.mxu1 %v16428_v62 }
0x2103   : > { %13760 = vmatpush3.msra.mxu1 %v11435_v19 }
0x2104   : > { %13761 = vmatprep.subr.mxu1 %v16428_v62 }
0x2105   : > { %13762 = vmatpush3.msra.mxu1 %v11434_v22 }
0x2106   : > { %13763 = vmatprep.subr.mxu1 %v16428_v62 }
0x2107   : > { %13764 = vmatpush3.msra.mxu1 %v11433_v56 }
0x2108   : > { %13765 = vmatprep.subr.mxu1 %v16428_v62 }
0x2109   : > { %13766 = vmatpush3.msra.mxu1 %v11432_v21 }
0x210a   : > { %13767 = vmatprep.subr.mxu1 %v16428_v62 }
0x210b   : > { %13768 = vmatpush3.msra.mxu1 %v11431_v51 }
0x210c   : > { %13769 = vmatprep.subr.mxu1 %v16428_v62 }
0x210d   : > { %13770 = vmatpush3.msra.mxu1 %v11430_v25 }
0x210e   : > { %13771 = vmatprep.subr.mxu1 %v16428_v62 }
0x210f   : > { %13772 = vmatpush3.msra.mxu1 %v11429_v24 }
0x2110   : > { %13800 = vmatprep.subr.mxu1 %v16428_v62 }
0x21c0   : > { %v11420_v29 = vpop.f32.mrf.mxu1 }
0x21c1   : > { %11425 = vrot.lane.b32.xlu0 %v11420_v29, %s16433_s18 }
0x21c2   : > { %v13756_v30 = vpop.f32.mrf.mxu1 }
0x2233   : > { %v11426_v31 = vpop.permute.xlu0 %11425 }
0x2234   : > { %v11428_v32 = vmax.f32 %v11420_v29, %v11426_v31 }
0x2236   : > { %13774 = vmatmul.mubr.msk.f32.vlgmr.msra.gmra.mxu1 %vm10005_vm15, %v11428_v32 }
0x2237   : > { %13816 = vmatprep.mubr.msk.f32.mxu1 %vm16430_vm5, %v16428_v62  ;;  %13801 = vmatpush3.msra.mxu1 %v11609_v49 }
0x2238   : > { %13802 = vmatprep.subr.mxu1 %v16428_v62 }
0x2239   : > { %13803 = vmatpush3.msra.mxu1 %v11608_v33 }
0x223a   : > { %13804 = vmatprep.subr.mxu1 %v16428_v62 }
0x223b   : > { %13805 = vmatpush3.msra.mxu1 %v11607_v36 }
0x223c   : > { %13806 = vmatprep.subr.mxu1 %v16428_v62 }
0x223d   : > { %13807 = vmatpush3.msra.mxu1 %v11606_v50 }
0x223e   : > { %13808 = vmatprep.subr.mxu1 %v16428_v62 }
0x223f   : > { %13809 = vmatpush3.msra.mxu1 %v11605_v39 }
0x2240   : > { %13810 = vmatprep.subr.mxu1 %v16428_v62 }
0x2241   : > { %13811 = vmatpush3.msra.mxu1 %v11604_v44 }
0x2242   : > { %13812 = vmatprep.subr.mxu1 %v16428_v62 }
0x2243   : > { %13813 = vmatpush3.msra.mxu1 %v11603_v45 }
0x2244   : > { %13814 = vmatprep.subr.mxu1 %v16428_v62 }
0x2245   : > { %13815 = vmatpush3.msra.mxu1 %v11602_v53 }
0x22f6   : > { %v11506_v0 = vpop.f32.mrf.mxu1 }
0x22f7   : > { %v11511_v34 = vrot.slane %v11506_v0, 1 }
0x22f8   : > { %v13775_v35 = vpop.f32.mrf.mxu1 }
0x22f9   : > { %v11513_v37 = vmax.f32 %v11506_v0, %v11511_v34 }
0x22fb   : > { %13777 = vmatpush3.msk.msra.mxu0 %vm11519_vm6, %v11513_v37 }
0x22fc   : > { %13779 = vmatmul.mubr.msk.f32.vlgmr.msra.gmra.mxu0 %vm11515_vm7, %v11514_v38  ;;  %13781 = vmatprep.subr.mxu0 %v16428_v62 }
0x22fd   : > { %13782 = vmatpush3.msra.mxu0 %v11600_v43  ;;  %13797 = vmatprep.mubr.msk.f32.mxu0 %vm16430_vm5, %v16428_v62 }
0x22fe   : > { %13783 = vmatprep.subr.mxu0 %v16428_v62 }
0x22ff   : > { %13784 = vmatpush3.msra.mxu0 %v11599_v46 }
0x2300   : > { %13785 = vmatprep.subr.mxu0 %v16428_v62 }
0x2301   : > { %13786 = vmatpush3.msra.mxu0 %v11598_v47 }
0x2302   : > { %13787 = vmatprep.subr.mxu0 %v16428_v62 }
0x2303   : > { %13788 = vmatpush3.msra.mxu0 %v11597_v20 }
0x2304   : > { %13789 = vmatprep.subr.mxu0 %v16428_v62 }
0x2305   : > { %13790 = vmatpush3.msra.mxu0 %v11596_v48 }
0x2306   : > { %13791 = vmatprep.subr.mxu0 %v16428_v62 }
0x2307   : > { %13792 = vmatpush3.msra.mxu0 %v11595_v23 }
0x2308   : > { %13793 = vmatprep.subr.mxu0 %v16428_v62 }
0x2309   : > { %13794 = vmatpush3.msra.mxu0 %v11594_v27 }
0x230a   : > { %13795 = vmatprep.subr.mxu0 %v16428_v62 }
0x230b   : > { %13796 = vmatpush3.msra.mxu0 %v11593_v28 }
0x230c   : > { %13819 = vmatprep.subr.mxu0 %v16428_v62 }
0x23bc   : > { %v11589_v42 = vpop.f32.mrf.mxu0 }
0x23bd   : > { %13798 = vmatmul.mubr.msk.f32.vlgmr.msra.gmra.mxu0 %vm10005_vm15, %v11589_v42 }
0x23be   : > { %v13780_v40 = vpop.f32.mrf.mxu0  ;;  %13827 = vmatprep.mubr.msk.f32.mxu0 %vm16430_vm5, %v16428_v62  ;;  %13820 = vmatpush3.msra.mxu0 %v11614_v54  ;;  %vm11837_vm5 = vcmask 73728  }
0x23bf   : > { %13821 = vmatprep.subr.mxu0 %v16428_v62 }
0x23c0   : > { %13822 = vmatpush3.msra.mxu0 %v11613_v60 }
0x23c1   : > { %13823 = vmatprep.subr.mxu0 %v16428_v62 }
0x23c2   : > { %13824 = vmatpush3.msra.mxu0 %v11612_v61 }
0x23c3   : > { %13825 = vmatprep.subr.mxu0 %v16428_v62 }
0x23c4   : > { %13826 = vmatpush3.msra.mxu0 %v11611_v63 }
0x247d   : > { %v11685_v58 = vpop.f32.mrf.mxu0 }
0x247e   : > { %v11686_v41 = vadd.f32 %v11685_v58, %v11601_v55 }
0x247f   : > { %v13799_v59 = vpop.f32.mrf.mxu0 }
0x2480   : > { %v11689_v26 = vmax.f32 %v11686_v41, 0.0 }
0x2482   : > { %13817 = vmatmul.mubr.msk.f32.vlgmr.msra.gmra.mxu1 %vm10005_vm15, %v11689_v26 }
0x2542   : > { %v11759_v57 = vpop.f32.mrf.mxu1 }
0x2543   : > { %v11760_v2 = vadd.f32 %v11759_v57, %v11610_v1 }
0x2544   : > { %v13818_v3 = vpop.f32.mrf.mxu1 }
0x2545   : > { %v11763_v4 = vmax.f32 %v11760_v2, 0.0 }
0x2547   : > { %13828 = vmatmul.mubr.msk.f32.vlgmr.msra.gmra.mxu0 %vm2408_vm3, %v11763_v4  ;;  %vm11853_vm3 = vcmask 80896  }
0x2607   : > { %v11833_v6 = vpop.f32.mrf.mxu0 }
0x2608   : > { %v11834_v7 = vadd.f32 %v11833_v6, %v11615_v5 }
0x2609   : > { %v13829_v8 = vpop.f32.mrf.mxu0 }
0x260a   : > { %v11838_v9 = vsel %vm11837_vm5, %v11834_v7, -inf }
0x260b   : > { %11839 = vmax.xlane.f32.xlu1 %v11838_v9 }
0x2694   : > { %v11840_v62 = vpop.xlane.xlu1 %11839 }
0x2695   : > { %v11841_v10 = vsub.f32 %v11834_v7, %v11840_v62 }
0x2697   : > { %v11842_v11 = vmul.f32 1.442695, %v11841_v10 }
0x2699   : > { %15362 = vpow2.f32 %v11842_v11 }
0x26a6   : > { %v15363_v12 = vpop.eup %15362 }
0x26a7   : > { %v11844_v13 = vsel %vm11837_vm5, %v15363_v12, 0.0 }
0x26a8   : > { %11845 = vadd.xlane.f32.xlu0 %v11844_v13 }
0x2731   : > { %v11846_v14 = vpop.xlane.xlu0 %11845 }
0x2732   : > { %15364 = vrcp.f32 %v11846_v14 }
0x273f   : > { %v15365_v15 = vpop.eup %15364 }
0x2740   : > { %v11848_v16 = vmul.f32 %v15365_v15, %v15363_v12 }
0x2742   : > { %v11852_v17 = vrot.slane %v11848_v16, %v17108_v52 }
0x2744   : > { %11854 = vst.msk [vmem:[%s1933_s2] sm:$0xff] %vm11853_vm3, %v11852_v17 }
0x2745 PF: > { %s126_s0 = sadd.s32 1, %s16336_s0  }
0x2746   : > { %p123_p7 = scmp.ge.s32.totalorder %s126_s0, 4  }
0x2748   :  { %125 = sbr.rel (!%p123_p7) target bundleno = 105 (0x69), region = 465 }
0x274d   :  { %11874 = vsyncpa [#allocation3], 1 }
0x274e   :  { %11876 = vsyncpa [#allocation3 + $0x1], 1 }
0x274f   :  { %11877 = vsyncpa [#allocation5], 1 }
0x2750   :  { %11878 = vsyncpa [#allocation8], 1 }
0x2751   :  { %11879 = vsyncpa [#allocation11], 1 }
0x2752   :  { %11880 = vsyncpa [#allocation14], 1 }
0x2753   :  { %11881 = vsyncpa [#allocation17], 1 }
0x2754   :  { %11882 = vsyncpa [#allocation20], 1 }
0x2755   :  { %11883 = vsyncpa [#allocation23], 1 }
0x2756   :  { %11884 = vsyncpa [#allocation26], 1 }
0x2757   :  { %11885 = vsyncpa [#allocation29], 1 }
0x2758   :  { %11886 = vsyncpa [#allocation32], 1 }
0x2759   :  { %11887 = vsyncpa [#allocation35], 1 }
0x275a   :  { %11888 = vsyncpa [#allocation38], 1 }
0x275b   :  { %11889 = vsyncpa [#allocation41], 1 }
0x275c   :  { %11890 = vsyncpa [#allocation44], 1 }
0x275d   :  { %11891 = vsyncpa [#allocation47], 1 }
0x275e   :  { %11892 = vsyncpa [#allocation50], 1 }
0x275f   :  { %11893 = vsyncpa [#allocation53], 1 }
0x2760   :  { %11894 = vsyncpa [#allocation56], 1 }

</bundles_post_ra>
